<compile_context>
chip_gen: v7x
topology: tpu7x:2x2x1
jax: 0.10.0
libtpu: 0.0.40
codegen_flags: <defaults>
</compile_context>

<pallas_src>
import functools

import jax
import jax.numpy as jnp
from jax.experimental import pallas as pl
from jax.experimental.pallas import tpu as pltpu


# ----------------------------------------------------------------------------
# Kernel
# ----------------------------------------------------------------------------
def _dsconv_kernel(x_ref, wf_ref, b_ref, pd_ref, p2_ref, beta_ref, out_ref,
                   *, k, s, th, wo, mm_dtype):
    """Fused DSConv: (depthwise+pointwise+BN-scale) as per-tap MXU matmuls,
    then bias + AconC epilogue.

    x_ref:   (1, 1, th_in, Wpad, Cin)   zero-padded input rows for this tile
    wf_ref:  (taps, Cin, Cout)          depthwise * pointwise * bn_scale
    b_ref, pd_ref, p2_ref, beta_ref: (1, Cout)
    out_ref: (1, th, wo, Cout)
    """
    cin = x_ref.shape[-1]
    cout = out_ref.shape[-1]
    m = th * wo

    acc = jnp.zeros((m, cout), jnp.float32)
    t = 0
    for kh in range(k):                      # static unroll over k*k taps
        for kw in range(k):
            if s == 1:
                tap = x_ref[0, 0, pl.ds(kh, th), pl.ds(kw, wo), :]
            else:
                # strided slice for stride > 1 (only traced when s > 1)
                tap = x_ref[0, 0, pl.ds(kh, th, s), pl.ds(kw, wo, s), :]
            a = tap.reshape(m, cin)
            w_t = wf_ref[t]                  # (Cin, Cout), static tap index
            if mm_dtype is not None:
                a = a.astype(mm_dtype)
                w_t = w_t.astype(mm_dtype)
            acc = acc + jnp.dot(a, w_t, preferred_element_type=jnp.float32)
            t += 1

    # Bias already carries pointwise (+folded depthwise) bias and the full
    # BatchNorm affine; only AconC remains as elementwise work.
    y = acc + b_ref[...]
    # AconC: dpx = (p1 - p2) * x ; out = dpx * sigmoid(beta * dpx) + p2 * x
    dpx = pd_ref[...] * y
    y = dpx * jax.nn.sigmoid(beta_ref[...] * dpx) + p2_ref[...] * y

    out_ref[0] = y.reshape(th, wo, cout).astype(out_ref.dtype)


# ----------------------------------------------------------------------------
# Wrapper
# ----------------------------------------------------------------------------
def _pick_row_tile(ho):
    for th in (64, 32, 16, 8):
        if th <= ho and ho % th == 0:
            return th
    return ho


def dsconv_forward(x_nchw, params, *, s=1, matmul_dtype=None,
                   out_dtype=jnp.float32):
    """DSConv forward: AconC(BN(pointwise(depthwise(x)))).  x is NCHW."""
    k = params['k']
    pad = k // 2
    x = jnp.transpose(x_nchw, (0, 2, 3, 1))                 # NHWC
    B, H, W, cin = x.shape
    Ho = (H + 2 * pad - k) // s + 1
    Wo = (W + 2 * pad - k) // s + 1
    cout = params['w_fused'].shape[-1]
    taps = k * k

    th = _pick_row_tile(Ho)                                 # output-row tile
    n_t = Ho // th
    th_in = (th - 1) * s + k                                # input rows incl. halo

    xpad = jnp.pad(x, ((0, 0), (pad, pad), (pad, pad), (0, 0)))
    wpad = xpad.shape[2]
    if n_t == 1:
        # Single row-tile: no halo duplication needed, pure reshape.
        x_tiles = xpad[:, None]
    else:
        # Halo-duplicated row tiles ((k - s) extra rows per tile boundary);
        # tiny compared to a k*k im2col inflation.
        x_tiles = jnp.stack(
            [xpad[:, i * th * s: i * th * s + th_in] for i in range(n_t)],
            axis=1)
    # x_tiles: (B, n_t, th_in, Wpad, Cin)

    kern = functools.partial(_dsconv_kernel, k=k, s=s, th=th, wo=Wo,
                             mm_dtype=matmul_dtype)

    def vec_spec():
        return pl.BlockSpec((1, cout), lambda b, t: (0, 0))

    out_nhwc = pl.pallas_call(
        kern,
        out_shape=jax.ShapeDtypeStruct((B, Ho, Wo, cout), out_dtype),
        grid=(B, n_t),
        in_specs=[
            pl.BlockSpec((1, 1, th_in, wpad, cin), lambda b, t: (b, t, 0, 0, 0)),
            pl.BlockSpec((taps, cin, cout), lambda b, t: (0, 0, 0)),
            vec_spec(), vec_spec(), vec_spec(), vec_spec(),
        ],
        out_specs=pl.BlockSpec((1, th, Wo, cout), lambda b, t: (b, t, 0, 0)),
        compiler_params=pltpu.CompilerParams(
            dimension_semantics=("parallel", "parallel")),
    )(x_tiles, params['w_fused'], params['b_eff'],
      params['p_diff'], params['p2'], params['beta'])

    return jnp.transpose(out_nhwc, (0, 3, 1, 2))            # back to NCHW


# ----------------------------------------------------------------------------
# Parameter construction (PyTorch layout) and fusion into the kernel layout
# ----------------------------------------------------------------------------
def make_dsconv_params(key, c1, c2, k, *, dw_bias=False, eps=1e-5):
    """Synthetic parameters in PyTorch tensor layouts."""
    ks = jax.random.split(key, 10)
    w_dw = 0.1 * jax.random.normal(ks[0], (c1, 1, k, k), jnp.float32)   # depthwise Conv2d
    b_dw = (0.1 * jax.random.normal(ks[1], (c1,), jnp.float32)) if dw_bias else None
    w_pw = 0.1 * jax.random.normal(ks[2], (c2, c1, 1, 1), jnp.float32)  # pointwise Conv2d
    b_pw = 0.1 * jax.random.normal(ks[3], (c2,), jnp.float32)           # pointwise bias
    gamma = 1.0 + 0.1 * jax.random.normal(ks[4], (c2,), jnp.float32)
    beta_bn = 0.1 * jax.random.normal(ks[5], (c2,), jnp.float32)
    run_mean = 0.1 * jax.random.normal(ks[6], (c2,), jnp.float32)
    run_var = 1.0 + 0.1 * jax.random.uniform(ks[7], (c2,), jnp.float32)
    p1 = jax.random.normal(ks[8], (1, c2, 1, 1), jnp.float32)
    p2 = jax.random.normal(ks[9], (1, c2, 1, 1), jnp.float32)
    acon_beta = jnp.ones((1, c2, 1, 1), jnp.float32)
    return dict(k=k, w_dw=w_dw, b_dw=b_dw, w_pw=w_pw, b_pw=b_pw,
                gamma=gamma, beta=beta_bn, running_mean=run_mean,
                running_var=run_var, eps=eps,
                p1=p1, p2=p2, acon_beta=acon_beta)


def fuse_dsconv_params(tp):
    """Fold depthwise, 1x1 pointwise and inference-mode BatchNorm into a
    single per-tap weight tensor + bias; precompute AconC (p1 - p2)."""
    k = tp['k']
    c1 = tp['w_dw'].shape[0]
    c2 = tp['w_pw'].shape[0]
    # PyTorch depthwise weight (c1,1,k,k) -> (taps, Cin), tap order kh-major/kw-minor
    w_dw_taps = tp['w_dw'].reshape(c1, k * k).T
    # PyTorch pointwise weight (c2,c1,1,1) -> (Cin, Cout)
    w_pw = tp['w_pw'].reshape(c2, c1).T
    # Inference-mode BatchNorm as per-channel affine.
    inv_std = 1.0 / jnp.sqrt(tp['running_var'] + tp['eps'])
    bn_scale = tp['gamma'] * inv_std
    bn_bias = tp['beta'] - tp['running_mean'] * bn_scale
    # W_fused[t, c, o] = w_dw[t, c] * w_pw[c, o] * bn_scale[o]
    w_fused = jnp.einsum('tc,co,o->tco', w_dw_taps, w_pw, bn_scale)
    b_eff = tp['b_pw']
    if tp['b_dw'] is not None:
        b_eff = b_eff + tp['b_dw'] @ w_pw                   # fold depthwise bias
    b_eff = b_eff * bn_scale + bn_bias                      # fold BN affine
    # TODO(synk): training-mode BatchNorm (batch statistics + running-stat
    # updates) is not reproduced; this is the eval/inference affine path.
    p1 = tp['p1'].reshape(1, c2)
    p2 = tp['p2'].reshape(1, c2)
    return {
        'k': k,
        'w_fused': w_fused,                                  # (taps, Cin, Cout)
        'b_eff': b_eff.reshape(1, c2),
        'p_diff': p1 - p2,
        'p2': p2,
        'beta': tp['acon_beta'].reshape(1, c2),
    }


# ----------------------------------------------------------------------------
# Pure-JAX reference (matches the PyTorch DSConv forward, NCHW)
# ----------------------------------------------------------------------------
def dsconv_reference(x_nchw, tp, *, s=1):
    k = tp['k']
    pad = k // 2
    c1 = tp['w_dw'].shape[0]
    dn = ('NCHW', 'OIHW', 'NCHW')
    y = jax.lax.conv_general_dilated(
        x_nchw, tp['w_dw'], window_strides=(s, s),
        padding=[(pad, pad), (pad, pad)],
        dimension_numbers=dn, feature_group_count=c1)
    if tp['b_dw'] is not None:
        y = y + tp['b_dw'].reshape(1, c1, 1, 1)
    y = jax.lax.conv_general_dilated(
        y, tp['w_pw'], window_strides=(1, 1), padding=[(0, 0), (0, 0)],
        dimension_numbers=dn)
    y = y + tp['b_pw'].reshape(1, -1, 1, 1)
    inv_std = 1.0 / jnp.sqrt(tp['running_var'] + tp['eps'])
    scale = (tp['gamma'] * inv_std).reshape(1, -1, 1, 1)
    y = (y - tp['running_mean'].reshape(1, -1, 1, 1)) * scale \
        + tp['beta'].reshape(1, -1, 1, 1)
    dpx = (tp['p1'] - tp['p2']) * y
    return dpx * jax.nn.sigmoid(tp['acon_beta'] * dpx) + tp['p2'] * y


# ----------------------------------------------------------------------------
if __name__ == "__main__":
    # Keep matmuls in full f32 so the Pallas kernel and the XLA reference agree
    # tightly (does not change the kernel structure).
    jax.config.update("jax_default_matmul_precision", "highest")

    key = jax.random.PRNGKey(0)
    kx, kp1, kp2 = jax.random.split(key, 3)

    B, C1, H, W = 2, 32, 16, 16
    C2 = 64

    x = jax.random.normal(kx, (B, C1, H, W), jnp.float32)   # NCHW, as in PyTorch

    # Case 1: k=3, s=1 (typical DSConv configuration in the surrounding network)
    tp3 = make_dsconv_params(kp1, C1, C2, k=3)
    fp3 = fuse_dsconv_params(tp3)
    out3 = jax.block_until_ready(dsconv_forward(x, fp3, s=1))
    ref3 = jax.block_until_ready(dsconv_reference(x, tp3, s=1))
    assert out3.shape == (B, C2, H, W), out3.shape
    assert out3.dtype == jnp.float32
    err3 = float(jnp.max(jnp.abs(out3 - ref3)))
    assert bool(jnp.allclose(out3, ref3, rtol=2e-2, atol=2e-2)), err3

    # Case 2: k=1, s=1 (the DSConv default)
    tp1 = make_dsconv_params(kp2, C1, C2, k=1)
    fp1 = fuse_dsconv_params(tp1)
    out1 = jax.block_until_ready(dsconv_forward(x, fp1, s=1))
    ref1 = jax.block_until_ready(dsconv_reference(x, tp1, s=1))
    assert out1.shape == (B, C2, H, W), out1.shape
    err1 = float(jnp.max(jnp.abs(out1 - ref1)))
    assert bool(jnp.allclose(out1, ref1, rtol=2e-2, atol=2e-2)), err1

    print("KERNEL_OK")
</pallas_src>

<mosaic_0001>
module attributes {stable_mosaic.version = 11 : i64} {
  func.func @_dsconv_kernel(%arg0: i32, %arg1: i32, %arg2: memref<1x1x18x18x32xf32, #tpu.memory_space<vmem>>, %arg3: memref<9x32x64xf32, #tpu.memory_space<vmem>>, %arg4: memref<1x64xf32, #tpu.memory_space<vmem>>, %arg5: memref<1x64xf32, #tpu.memory_space<vmem>>, %arg6: memref<1x64xf32, #tpu.memory_space<vmem>>, %arg7: memref<1x64xf32, #tpu.memory_space<vmem>>, %arg8: memref<1x16x16x64xf32, #tpu.memory_space<vmem>>) attributes {dimension_semantics = [#tpu.dimension_semantics<parallel>, #tpu.dimension_semantics<parallel>], iteration_bounds = array<i64: 2, 1>, scalar_prefetch = 0 : i64, scratch_operands = 0 : i64, tpu.core_type = #tpu.core_type<tc>, window_params = [{transform_indices = @transform_0, window_bounds = array<i64: 1, 1, 18, 18, 32>}, {pipeline_mode = #tpu.pipeline_mode<synchronous>, transform_indices = @transform_1, window_bounds = array<i64: 9, 32, 64>}, {pipeline_mode = #tpu.pipeline_mode<synchronous>, transform_indices = @transform_2, window_bounds = array<i64: 1, 64>}, {pipeline_mode = #tpu.pipeline_mode<synchronous>, transform_indices = @transform_3, window_bounds = array<i64: 1, 64>}, {pipeline_mode = #tpu.pipeline_mode<synchronous>, transform_indices = @transform_4, window_bounds = array<i64: 1, 64>}, {pipeline_mode = #tpu.pipeline_mode<synchronous>, transform_indices = @transform_5, window_bounds = array<i64: 1, 64>}, {transform_indices = @transform_6, window_bounds = array<i64: 1, 16, 16, 64>}]} {
    %cst = arith.constant 0.000000e+00 : f32
    %0 = vector.broadcast %cst : f32 to vector<256x64xf32>
    %c0 = arith.constant 0 : index
    %c0_0 = arith.constant 0 : index
    %c0_1 = arith.constant 0 : index
    %c0_2 = arith.constant 0 : index
    %c0_3 = arith.constant 0 : index
    %1 = vector.load %arg2[%c0, %c0_0, %c0_1, %c0_2, %c0_3] : memref<1x1x18x18x32xf32, #tpu.memory_space<vmem>>, vector<1x1x16x16x32xf32>
    %2 = vector.shape_cast %1 : vector<1x1x16x16x32xf32> to vector<16x16x32xf32>
    %3 = vector.shape_cast %2 : vector<16x16x32xf32> to vector<256x32xf32>
    %c0_4 = arith.constant 0 : index
    %c0_5 = arith.constant 0 : index
    %c0_6 = arith.constant 0 : index
    %4 = vector.load %arg3[%c0_4, %c0_5, %c0_6] : memref<9x32x64xf32, #tpu.memory_space<vmem>>, vector<1x32x64xf32>
    %5 = vector.shape_cast %4 : vector<1x32x64xf32> to vector<32x64xf32>
    %cst_7 = arith.constant dense<0.000000e+00> : vector<256x64xf32>
    %6 = tpu.matmul %3, %5, %cst_7 {dimension_numbers = #tpu.dot_dimension_numbers<[1], [0], [0], [1], [0, 0, 1, 1], [], []>, precision = #tpu.contract_precision<fp32>} : vector<256x32xf32>, vector<32x64xf32>, vector<256x64xf32> -> vector<256x64xf32>
    %7 = arith.addf %0, %6 : vector<256x64xf32>
    %c0_8 = arith.constant 0 : index
    %c0_9 = arith.constant 0 : index
    %c0_10 = arith.constant 0 : index
    %c1 = arith.constant 1 : index
    %c0_11 = arith.constant 0 : index
    %8 = vector.load %arg2[%c0_8, %c0_9, %c0_10, %c1, %c0_11] : memref<1x1x18x18x32xf32, #tpu.memory_space<vmem>>, vector<1x1x16x16x32xf32>
    %9 = vector.shape_cast %8 : vector<1x1x16x16x32xf32> to vector<16x16x32xf32>
    %10 = vector.shape_cast %9 : vector<16x16x32xf32> to vector<256x32xf32>
    %c1_12 = arith.constant 1 : index
    %c0_13 = arith.constant 0 : index
    %c0_14 = arith.constant 0 : index
    %11 = vector.load %arg3[%c1_12, %c0_13, %c0_14] : memref<9x32x64xf32, #tpu.memory_space<vmem>>, vector<1x32x64xf32>
    %12 = vector.shape_cast %11 : vector<1x32x64xf32> to vector<32x64xf32>
    %cst_15 = arith.constant dense<0.000000e+00> : vector<256x64xf32>
    %13 = tpu.matmul %10, %12, %cst_15 {dimension_numbers = #tpu.dot_dimension_numbers<[1], [0], [0], [1], [0, 0, 1, 1], [], []>, precision = #tpu.contract_precision<fp32>} : vector<256x32xf32>, vector<32x64xf32>, vector<256x64xf32> -> vector<256x64xf32>
    %14 = arith.addf %7, %13 : vector<256x64xf32>
    %c0_16 = arith.constant 0 : index
    %c0_17 = arith.constant 0 : index
    %c0_18 = arith.constant 0 : index
    %c2 = arith.constant 2 : index
    %c0_19 = arith.constant 0 : index
    %15 = vector.load %arg2[%c0_16, %c0_17, %c0_18, %c2, %c0_19] : memref<1x1x18x18x32xf32, #tpu.memory_space<vmem>>, vector<1x1x16x16x32xf32>
    %16 = vector.shape_cast %15 : vector<1x1x16x16x32xf32> to vector<16x16x32xf32>
    %17 = vector.shape_cast %16 : vector<16x16x32xf32> to vector<256x32xf32>
    %c2_20 = arith.constant 2 : index
    %c0_21 = arith.constant 0 : index
    %c0_22 = arith.constant 0 : index
    %18 = vector.load %arg3[%c2_20, %c0_21, %c0_22] : memref<9x32x64xf32, #tpu.memory_space<vmem>>, vector<1x32x64xf32>
    %19 = vector.shape_cast %18 : vector<1x32x64xf32> to vector<32x64xf32>
    %cst_23 = arith.constant dense<0.000000e+00> : vector<256x64xf32>
    %20 = tpu.matmul %17, %19, %cst_23 {dimension_numbers = #tpu.dot_dimension_numbers<[1], [0], [0], [1], [0, 0, 1, 1], [], []>, precision = #tpu.contract_precision<fp32>} : vector<256x32xf32>, vector<32x64xf32>, vector<256x64xf32> -> vector<256x64xf32>
    %21 = arith.addf %14, %20 : vector<256x64xf32>
    %c0_24 = arith.constant 0 : index
    %c0_25 = arith.constant 0 : index
    %c1_26 = arith.constant 1 : index
    %c0_27 = arith.constant 0 : index
    %c0_28 = arith.constant 0 : index
    %22 = vector.load %arg2[%c0_24, %c0_25, %c1_26, %c0_27, %c0_28] : memref<1x1x18x18x32xf32, #tpu.memory_space<vmem>>, vector<1x1x16x16x32xf32>
    %23 = vector.shape_cast %22 : vector<1x1x16x16x32xf32> to vector<16x16x32xf32>
    %24 = vector.shape_cast %23 : vector<16x16x32xf32> to vector<256x32xf32>
    %c3 = arith.constant 3 : index
    %c0_29 = arith.constant 0 : index
    %c0_30 = arith.constant 0 : index
    %25 = vector.load %arg3[%c3, %c0_29, %c0_30] : memref<9x32x64xf32, #tpu.memory_space<vmem>>, vector<1x32x64xf32>
    %26 = vector.shape_cast %25 : vector<1x32x64xf32> to vector<32x64xf32>
    %cst_31 = arith.constant dense<0.000000e+00> : vector<256x64xf32>
    %27 = tpu.matmul %24, %26, %cst_31 {dimension_numbers = #tpu.dot_dimension_numbers<[1], [0], [0], [1], [0, 0, 1, 1], [], []>, precision = #tpu.contract_precision<fp32>} : vector<256x32xf32>, vector<32x64xf32>, vector<256x64xf32> -> vector<256x64xf32>
    %28 = arith.addf %21, %27 : vector<256x64xf32>
    %c0_32 = arith.constant 0 : index
    %c0_33 = arith.constant 0 : index
    %c1_34 = arith.constant 1 : index
    %c1_35 = arith.constant 1 : index
    %c0_36 = arith.constant 0 : index
    %29 = vector.load %arg2[%c0_32, %c0_33, %c1_34, %c1_35, %c0_36] : memref<1x1x18x18x32xf32, #tpu.memory_space<vmem>>, vector<1x1x16x16x32xf32>
    %30 = vector.shape_cast %29 : vector<1x1x16x16x32xf32> to vector<16x16x32xf32>
    %31 = vector.shape_cast %30 : vector<16x16x32xf32> to vector<256x32xf32>
    %c4 = arith.constant 4 : index
    %c0_37 = arith.constant 0 : index
    %c0_38 = arith.constant 0 : index
    %32 = vector.load %arg3[%c4, %c0_37, %c0_38] : memref<9x32x64xf32, #tpu.memory_space<vmem>>, vector<1x32x64xf32>
    %33 = vector.shape_cast %32 : vector<1x32x64xf32> to vector<32x64xf32>
    %cst_39 = arith.constant dense<0.000000e+00> : vector<256x64xf32>
    %34 = tpu.matmul %31, %33, %cst_39 {dimension_numbers = #tpu.dot_dimension_numbers<[1], [0], [0], [1], [0, 0, 1, 1], [], []>, precision = #tpu.contract_precision<fp32>} : vector<256x32xf32>, vector<32x64xf32>, vector<256x64xf32> -> vector<256x64xf32>
    %35 = arith.addf %28, %34 : vector<256x64xf32>
    %c0_40 = arith.constant 0 : index
    %c0_41 = arith.constant 0 : index
    %c1_42 = arith.constant 1 : index
    %c2_43 = arith.constant 2 : index
    %c0_44 = arith.constant 0 : index
    %36 = vector.load %arg2[%c0_40, %c0_41, %c1_42, %c2_43, %c0_44] : memref<1x1x18x18x32xf32, #tpu.memory_space<vmem>>, vector<1x1x16x16x32xf32>
    %37 = vector.shape_cast %36 : vector<1x1x16x16x32xf32> to vector<16x16x32xf32>
    %38 = vector.shape_cast %37 : vector<16x16x32xf32> to vector<256x32xf32>
    %c5 = arith.constant 5 : index
    %c0_45 = arith.constant 0 : index
    %c0_46 = arith.constant 0 : index
    %39 = vector.load %arg3[%c5, %c0_45, %c0_46] : memref<9x32x64xf32, #tpu.memory_space<vmem>>, vector<1x32x64xf32>
    %40 = vector.shape_cast %39 : vector<1x32x64xf32> to vector<32x64xf32>
    %cst_47 = arith.constant dense<0.000000e+00> : vector<256x64xf32>
    %41 = tpu.matmul %38, %40, %cst_47 {dimension_numbers = #tpu.dot_dimension_numbers<[1], [0], [0], [1], [0, 0, 1, 1], [], []>, precision = #tpu.contract_precision<fp32>} : vector<256x32xf32>, vector<32x64xf32>, vector<256x64xf32> -> vector<256x64xf32>
    %42 = arith.addf %35, %41 : vector<256x64xf32>
    %c0_48 = arith.constant 0 : index
    %c0_49 = arith.constant 0 : index
    %c2_50 = arith.constant 2 : index
    %c0_51 = arith.constant 0 : index
    %c0_52 = arith.constant 0 : index
    %43 = vector.load %arg2[%c0_48, %c0_49, %c2_50, %c0_51, %c0_52] : memref<1x1x18x18x32xf32, #tpu.memory_space<vmem>>, vector<1x1x16x16x32xf32>
    %44 = vector.shape_cast %43 : vector<1x1x16x16x32xf32> to vector<16x16x32xf32>
    %45 = vector.shape_cast %44 : vector<16x16x32xf32> to vector<256x32xf32>
    %c6 = arith.constant 6 : index
    %c0_53 = arith.constant 0 : index
    %c0_54 = arith.constant 0 : index
    %46 = vector.load %arg3[%c6, %c0_53, %c0_54] : memref<9x32x64xf32, #tpu.memory_space<vmem>>, vector<1x32x64xf32>
    %47 = vector.shape_cast %46 : vector<1x32x64xf32> to vector<32x64xf32>
    %cst_55 = arith.constant dense<0.000000e+00> : vector<256x64xf32>
    %48 = tpu.matmul %45, %47, %cst_55 {dimension_numbers = #tpu.dot_dimension_numbers<[1], [0], [0], [1], [0, 0, 1, 1], [], []>, precision = #tpu.contract_precision<fp32>} : vector<256x32xf32>, vector<32x64xf32>, vector<256x64xf32> -> vector<256x64xf32>
    %49 = arith.addf %42, %48 : vector<256x64xf32>
    %c0_56 = arith.constant 0 : index
    %c0_57 = arith.constant 0 : index
    %c2_58 = arith.constant 2 : index
    %c1_59 = arith.constant 1 : index
    %c0_60 = arith.constant 0 : index
    %50 = vector.load %arg2[%c0_56, %c0_57, %c2_58, %c1_59, %c0_60] : memref<1x1x18x18x32xf32, #tpu.memory_space<vmem>>, vector<1x1x16x16x32xf32>
    %51 = vector.shape_cast %50 : vector<1x1x16x16x32xf32> to vector<16x16x32xf32>
    %52 = vector.shape_cast %51 : vector<16x16x32xf32> to vector<256x32xf32>
    %c7 = arith.constant 7 : index
    %c0_61 = arith.constant 0 : index
    %c0_62 = arith.constant 0 : index
    %53 = vector.load %arg3[%c7, %c0_61, %c0_62] : memref<9x32x64xf32, #tpu.memory_space<vmem>>, vector<1x32x64xf32>
    %54 = vector.shape_cast %53 : vector<1x32x64xf32> to vector<32x64xf32>
    %cst_63 = arith.constant dense<0.000000e+00> : vector<256x64xf32>
    %55 = tpu.matmul %52, %54, %cst_63 {dimension_numbers = #tpu.dot_dimension_numbers<[1], [0], [0], [1], [0, 0, 1, 1], [], []>, precision = #tpu.contract_precision<fp32>} : vector<256x32xf32>, vector<32x64xf32>, vector<256x64xf32> -> vector<256x64xf32>
    %56 = arith.addf %49, %55 : vector<256x64xf32>
    %c0_64 = arith.constant 0 : index
    %c0_65 = arith.constant 0 : index
    %c2_66 = arith.constant 2 : index
    %c2_67 = arith.constant 2 : index
    %c0_68 = arith.constant 0 : index
    %57 = vector.load %arg2[%c0_64, %c0_65, %c2_66, %c2_67, %c0_68] : memref<1x1x18x18x32xf32, #tpu.memory_space<vmem>>, vector<1x1x16x16x32xf32>
    %58 = vector.shape_cast %57 : vector<1x1x16x16x32xf32> to vector<16x16x32xf32>
    %59 = vector.shape_cast %58 : vector<16x16x32xf32> to vector<256x32xf32>
    %c8 = arith.constant 8 : index
    %c0_69 = arith.constant 0 : index
    %c0_70 = arith.constant 0 : index
    %60 = vector.load %arg3[%c8, %c0_69, %c0_70] : memref<9x32x64xf32, #tpu.memory_space<vmem>>, vector<1x32x64xf32>
    %61 = vector.shape_cast %60 : vector<1x32x64xf32> to vector<32x64xf32>
    %cst_71 = arith.constant dense<0.000000e+00> : vector<256x64xf32>
    %62 = tpu.matmul %59, %61, %cst_71 {dimension_numbers = #tpu.dot_dimension_numbers<[1], [0], [0], [1], [0, 0, 1, 1], [], []>, precision = #tpu.contract_precision<fp32>} : vector<256x32xf32>, vector<32x64xf32>, vector<256x64xf32> -> vector<256x64xf32>
    %63 = arith.addf %56, %62 : vector<256x64xf32>
    %c0_72 = arith.constant 0 : index
    %c0_73 = arith.constant 0 : index
    %64 = vector.load %arg4[%c0_72, %c0_73] : memref<1x64xf32, #tpu.memory_space<vmem>>, vector<1x64xf32>
    %65 = vector.broadcast %64 : vector<1x64xf32> to vector<256x64xf32>
    %66 = arith.addf %63, %65 : vector<256x64xf32>
    %c0_74 = arith.constant 0 : index
    %c0_75 = arith.constant 0 : index
    %67 = vector.load %arg5[%c0_74, %c0_75] : memref<1x64xf32, #tpu.memory_space<vmem>>, vector<1x64xf32>
    %68 = vector.broadcast %67 : vector<1x64xf32> to vector<256x64xf32>
    %69 = arith.mulf %68, %66 : vector<256x64xf32>
    %c0_76 = arith.constant 0 : index
    %c0_77 = arith.constant 0 : index
    %70 = vector.load %arg7[%c0_76, %c0_77] : memref<1x64xf32, #tpu.memory_space<vmem>>, vector<1x64xf32>
    %71 = vector.broadcast %70 : vector<1x64xf32> to vector<256x64xf32>
    %72 = arith.mulf %71, %69 : vector<256x64xf32>
    %73 = arith.negf %72 : vector<256x64xf32>
    %74 = math.exp %73 : vector<256x64xf32>
    %cst_78 = arith.constant 1.000000e+00 : f32
    %75 = vector.broadcast %cst_78 : f32 to vector<256x64xf32>
    %76 = arith.addf %75, %74 : vector<256x64xf32>
    %77 = arith.divf %75, %76 : vector<256x64xf32>
    %78 = arith.mulf %69, %77 : vector<256x64xf32>
    %c0_79 = arith.constant 0 : index
    %c0_80 = arith.constant 0 : index
    %79 = vector.load %arg6[%c0_79, %c0_80] : memref<1x64xf32, #tpu.memory_space<vmem>>, vector<1x64xf32>
    %80 = vector.broadcast %79 : vector<1x64xf32> to vector<256x64xf32>
    %81 = arith.mulf %80, %66 : vector<256x64xf32>
    %82 = arith.addf %78, %81 : vector<256x64xf32>
    %83 = vector.shape_cast %82 : vector<256x64xf32> to vector<16x16x64xf32>
    %c0_81 = arith.constant 0 : index
    %c0_82 = arith.constant 0 : index
    %c0_83 = arith.constant 0 : index
    %c0_84 = arith.constant 0 : index
    %84 = vector.load %arg8[%c0_81, %c0_82, %c0_83, %c0_84] : memref<1x16x16x64xf32, #tpu.memory_space<vmem>>, vector<1x16x16x64xf32>
    %85 = vector.shape_cast %84 : vector<1x16x16x64xf32> to vector<16x16x64xf32>
    %86 = vector.shape_cast %83 : vector<16x16x64xf32> to vector<1x16x16x64xf32>
    tpu.vector_store %arg8[%c0_81, %c0_82, %c0_83, %c0_84], %86 {strides = array<i32>} : memref<1x16x16x64xf32, #tpu.memory_space<vmem>>, vector<1x16x16x64xf32>,
    return
  }
  func.func @transform_0(%arg0: i32, %arg1: i32) -> (i32, i32, i32, i32, i32) {
    %c0_i32 = arith.constant 0 : i32
    %c0_i32_0 = arith.constant 0 : i32
    %c0_i32_1 = arith.constant 0 : i32
    %c0_i32_2 = arith.constant 0 : i32
    return %arg0, %arg1, %c0_i32, %c0_i32_0, %c0_i32_1 : i32, i32, i32, i32, i32
  }
  func.func @transform_1(%arg0: i32, %arg1: i32) -> (i32, i32, i32) {
    %c0_i32 = arith.constant 0 : i32
    %c0_i32_0 = arith.constant 0 : i32
    %c0_i32_1 = arith.constant 0 : i32
    %c0_i32_2 = arith.constant 0 : i32
    return %c0_i32, %c0_i32_0, %c0_i32_1 : i32, i32, i32
  }
  func.func @transform_2(%arg0: i32, %arg1: i32) -> (i32, i32) {
    %c0_i32 = arith.constant 0 : i32
    %c0_i32_0 = arith.constant 0 : i32
    %c0_i32_1 = arith.constant 0 : i32
    return %c0_i32, %c0_i32_0 : i32, i32
  }
  func.func @transform_3(%arg0: i32, %arg1: i32) -> (i32, i32) {
    %c0_i32 = arith.constant 0 : i32
    %c0_i32_0 = arith.constant 0 : i32
    %c0_i32_1 = arith.constant 0 : i32
    return %c0_i32, %c0_i32_0 : i32, i32
  }
  func.func @transform_4(%arg0: i32, %arg1: i32) -> (i32, i32) {
    %c0_i32 = arith.constant 0 : i32
    %c0_i32_0 = arith.constant 0 : i32
    %c0_i32_1 = arith.constant 0 : i32
    return %c0_i32, %c0_i32_0 : i32, i32
  }
  func.func @transform_5(%arg0: i32, %arg1: i32) -> (i32, i32) {
    %c0_i32 = arith.constant 0 : i32
    %c0_i32_0 = arith.constant 0 : i32
    %c0_i32_1 = arith.constant 0 : i32
    return %c0_i32, %c0_i32_0 : i32, i32
  }
  func.func @transform_6(%arg0: i32, %arg1: i32) -> (i32, i32, i32, i32) {
    %c0_i32 = arith.constant 0 : i32
    %c0_i32_0 = arith.constant 0 : i32
    %c0_i32_1 = arith.constant 0 : i32
    return %arg0, %arg1, %c0_i32, %c0_i32_0 : i32, i32, i32, i32
  }
}

</mosaic_0001>

<bundles_post_ra>
// kernel: tpu_custom_call.1
= control target key start
LH: loop header
LB: loop body
LE: loop exit
PB: predicated region body
PF: predicated region fallthrough
CT: control target
= control target key end

     0   :  { %11 = vsyncpa [#allocation3], 0  ;;  %s32228_s0 = inlined_call_operand.vmem [shape: f32[2,1,18,18,32], index: 0, kind: input, shape index: {}]   ;;  %s32229_s1 = inlined_call_operand.vmem [shape: f32[9,32,64], index: 1, kind: input, shape index: {}]   ;;  %s32230_s2 = inlined_call_operand.vmem [shape: f32[1,64], index: 2, kind: input, shape index: {}]   ;;  %s32231_s3 = inlined_call_operand.vmem [shape: f32[1,64], index: 3, kind: input, shape index: {}]   ;;  %s32232_s4 = inlined_call_operand.vmem [shape: f32[1,64], index: 4, kind: input, shape index: {}]   ;;  %s32233_s5 = inlined_call_operand.vmem [shape: f32[1,64], index: 5, kind: input, shape index: {}]   ;;  %s32234_s6 = inlined_call_operand.hbm [shape: f32[2,16,16,64], index: 6, kind: output, shape index: {}]  }
   0x1   :  { %13 = vsyncpa [#allocation3 + $0x1], 0  ;;  %s26281_s21 = smov 0   ;;  %s26283_s22 = smov 0  }
   0x2   :  { %s26285_s23 = smov 0   ;;  %s26287_s24 = smov 0  }
   0x3   :  { %s26289_s25 = smov 0   ;;  %s26291_s26 = smov 0  }
   0x4 LB: > { %s18608_s27 = sadd.s32 4294967295, %s26241_s26   ;;  %s18609_s28 = sadd.s32 4294967294, %s26241_s26   ;;  %s26241_s26 = sphi %s26291_s26, %s19_s26   ;;  %s26237_s25 = sphi %s26289_s25, %s34969_s25   ;;  %s26233_s24 = sphi %s26287_s24, %s34968_s24   ;;  %s26229_s23 = sphi %s26285_s23, %s34967_s23   ;;  %s26225_s22 = sphi %s26283_s22, %s34966_s22   ;;  %s26221_s21 = sphi %s26281_s21, %s34965_s21  }
   0x5   : > { %s31_s29 = sadd.s32 1, %s26237_s25  ;;  %s173_s30 = sadd.s32 1, %s26229_s23 }
   0x6   : > { %p33_p0 = scmp.ge.s32.totalorder %s31_s29, 2  ;;  %p183_p1 = scmp.ne.s32.totalorder %s26229_s23, %s26225_s22 }
   0x7   : > { %p184_p2 = scmp.eq.s32.totalorder %s18608_s27, 1  ;;  %p189_p3 = scmp.ne.s32.totalorder %s26225_s22, %s26221_s21 }
   0x8   : > { %s34971_s29 = smov (%p33_p0, %s31_s29), 0  ;;  %p190_p5 = scmp.eq.s32.totalorder %s18609_s28, 1 }
   0x9   : > { %p26321_p4 = por %p184_p2, %p183_p1  ;;  %s168_s8 = ssub.s32 %s26237_s25, %s34971_s29 }
   0xa   : > { %p18612_p6 = scmp.ge.s32.totalorder %s26241_s26, 1  ;;  %p171_p7 = scmp.eq.s32.totalorder %s168_s8, 0 }
   0xb   : > { %p26328_p8 = por %p190_p5, %p189_p3  ;;  %p235_p9 = scmp.lt.s32.totalorder %s26241_s26, 3 }
   0xc   : > { %s26334_s10 = scalar_select %p171_p7, %s26229_s23, %s173_s30  }
   0xd   : > { %p236_p10 = pnand %p18612_p6, %p235_p9 }
   0xf   : > { %239 = sbr.rel (%p236_p10) target bundleno = 2053 (0x805), region = 44 }
  0x16   : > { %v18691_v0 = vld [vmem:[%s32229_s1 + $0x80] sm:$0xff]  ;;  %v18692_v1 = vld [vmem:[%s32229_s1 + $0x88] sm:$0xff]  ;;  %p269_p11 = scmp.lt.s32.totalorder %s26233_s24, 1  ;;  %v26352_v7 = vld [vmem:[%s32229_s1 + $0x90] sm:$0xff]  ;;  %vm352_vm0 = vcmask 261120   ;;  %vm18476_vm1 = vcmask 523264  }
  0x17   : > { %v18615_v2 = vld [vmem:[%s32229_s1 + $0x20] sm:$0xff]  ;;  %v8282_v3 = vand.u32 4294901760, %v18691_v0  ;;  %v8285_v4 = vand.u32 4294901760, %v18692_v1  ;;  %v18616_v5 = vld [vmem:[%s32229_s1 + $0x28] sm:$0xff]  ;;  %v26357_v8 = vld [vmem:[%s32229_s1 + $0x98] sm:$0xff]  ;;  %v32242_v10 = vand.u32 4294901760, %v26352_v7 }
  0x18   : > { %v450_v6 = vand.u32 4294901760, %v18615_v2  ;;  %v453_v9 = vand.u32 4294901760, %v18616_v5  ;;  %v32241_v11 = vand.u32 4294901760, %v26357_v8  ;;  %v26364_v12 = vld [vmem:[%s32229_s1 + $0x30] sm:$0xff]  ;;  %v26369_v13 = vld [vmem:[%s32229_s1 + $0x38] sm:$0xff]  ;;  %s270_s13 = scalar_select %p269_p11, %s26233_s24, 1 }
  0x19   : > { %v26372_v14 = vpack.c.bf16 %v8285_v4, %v8282_v3  ;;  %v456_v15 = vand.u32 4294901760, %v26364_v12  ;;  %v32243_v16 = vand.u32 4294901760, %v26369_v13  ;;  %v26388_v21 = vsub.f32 %v18691_v0, %v8282_v3  ;;  %s266_s15 = sand.u32 1, %s26225_s22   ;;  %s18880_s19 = sshll.u32 %s26233_s24, 12 }
  0x1a   : > { %v26376_v17 = vsub.f32 %v18615_v2, %v450_v6  ;;  %v26378_v18 = vpack.c.bf16 %v453_v9, %v450_v6  ;;  %v26384_v19 = vpack.c.bf16 %v32241_v11, %v32242_v10  ;;  %s25977_s14 = smul.u32 432, %s270_s13  ;;  %v26386_v20 = vsub.f32 %v18616_v5, %v453_v9  ;;  %s31770_s16 = sshll.u32 %s266_s15, 8 }
  0x1b   : > { %33326 = vst [vmem:[#allocation5_spill] sm:$0xff] %v26372_v14  ;;  %33329 = vst [vmem:[#allocation8_spill] sm:$0xff] %v26388_v21  ;;  %24066 = vmatprep.subr.bf16.mxu0 %v26372_v14  ;;  %v26395_v22 = vpack.c.bf16 %v32243_v16, %v456_v15  ;;  %v26398_v24 = vsub.f32 %v18692_v1, %v8285_v4  ;;  %v32236_v26 = vand.u32 4294901760, %v26388_v21  ;;  %s31809_s18 = scalar_lea.vmem [#allocation2], %s31770_s16  ;;  %s32174_s28 = scalar_lea.hbm %s32234_s6, %s18880_s19 }
  0x1c   : > { %33327 = vst [vmem:[#allocation6_spill] sm:$0xff] %v26384_v19  ;;  %33328 = vst [vmem:[#allocation7_spill] sm:$0xff] %v26386_v20  ;;  %v32240_v23 = vand.u32 4294901760, %v26376_v17  ;;  %24068 = vmatpush3.bf16.msra.mxu0 %v26372_v14  ;;  %23850 = vmatprep.subr.bf16.mxu1 %v26378_v18  ;;  %s26405_s17 = scalar_lea.vmem %s32228_s0, %s25977_s14  ;;  %v32239_v25 = vand.u32 4294901760, %v26386_v20  ;;  %s18526_s20 = sshll.u32 %s31809_s18, 4  ;;  %s32176_s20 = int_to_ptr.vmem [resolvable:$true] %s18526_s20 }
  0x1d   : > { %33330 = vst [vmem:[#allocation9_spill] sm:$0xff] %v26395_v22  ;;  %33331 = vst [vmem:[#allocation10_spill] sm:$0xff] %v26398_v24  ;;  %23852 = vmatpush3.bf16.msra.mxu1 %v26378_v18  ;;  %24070 = vmatprep.subr.bf16.mxu0 %v26384_v19  ;;  %v18659_v27 = vld [vmem:[%s26405_s17 + $0x19] sm:$0xff]  ;;  %v18660_v28 = vld [vmem:[%s26405_s17 + $0x21] sm:$0xff]  ;;  %v32235_v31 = vand.u32 4294901760, %v26398_v24  ;;  %s32182_s24 = scalar_lea.sflag [#allocation3], %s266_s15 }
  0x1e   : > { %v315_v29 = vld [vmem:[%s26405_s17 + $0x1] sm:$0xff]  ;;  %v842_v30 = vsub.f32 %v26376_v17, %v32240_v23  ;;  %23854 = vmatprep.subr.bf16.mxu1 %v26395_v22  ;;  %v8186_v32 = vsel %vm352_vm0, %v18659_v27, 0  ;;  %v8189_v33 = vsel %vm352_vm0, %v18660_v28, 0  ;;  %v849_v35 = vsub.f32 %v26386_v20, %v32239_v25  ;;  %v18661_v36 = vld [vmem:[%s26405_s17 + $0x31] sm:$0xff]  ;;  %v316_v37 = vld [vmem:[%s26405_s17 + $0x9] sm:$0xff]  ;;  %s26163_s30 = scalar_lea.vmem %s32176_s20, 4096 }
  0x1f   : > { %v354_v34 = vsel %vm352_vm0, %v315_v29, 0  ;;  %v26427_v38 = vand.u32 4294901760, %v8186_v32  ;;  %v26429_v39 = vand.u32 4294901760, %v8189_v33  ;;  %v18662_v42 = vld [vmem:[%s26405_s17 + $0x39] sm:$0xff]  ;;  %v18663_v43 = vld [vmem:[%s26405_s17 + $0x49] sm:$0xff]  ;;  %v8192_v45 = vsel %vm352_vm0, %v18661_v36, 0  ;;  %p26164_p12 = scmp.ne.s32.totalorder %s32176_s20, %s26163_s30 }
  0x20   : > { %v26431_v40 = vand.u32 4294901760, %v354_v34  ;;  %v843_v41 = vand.u32 4294901760, %v842_v30  ;;  %24072 = vmatpush3.bf16.msra.mxu0 %v26384_v19  ;;  %v850_v44 = vand.u32 4294901760, %v849_v35  ;;  %v24073_v46 = vpack.c.bf16 %v32235_v31, %v32236_v26  ;;  %v18664_v52 = vld [vmem:[%s26405_s17 + $0x51] sm:$0xff]  ;;  %v18665_v27 = vld [vmem:[%s26405_s17 + $0x61] sm:$0xff]  ;;  %v18666_v28 = vld [vmem:[%s26405_s17 + $0x69] sm:$0xff] }
  0x21   : > { %33332 = vst [vmem:[#allocation11_spill] sm:$0xff] %v26427_v38  ;;  %33333 = vst [vmem:[#allocation12_spill] sm:$0xff] %v26429_v39  ;;  %v357_v47 = vsel %vm352_vm0, %v316_v37, 0  ;;  %v26443_v48 = vsub.f32 %v8186_v32, %v26427_v38  ;;  %23856 = vmatpush3.bf16.msra.mxu1 %v26395_v22  ;;  %v26447_v49 = vsub.f32 %v8189_v33, %v26429_v39  ;;  %v26452_v51 = vand.u32 4294901760, %v8192_v45  ;;  %v18667_v29 = vld [vmem:[%s26405_s17 + $0x79] sm:$0xff]  ;;  %v18672_v26 = vld [vmem:[%s26405_s17 + $0xb1] sm:$0xff]  ;;  %p26165_p13 = pnand %p26164_p12, %p26321_p4 }
  0x22   : > { %v26450_v50 = vsub.f32 %v354_v34, %v26431_v40  ;;  %v23857_v53 = vpack.c.bf16 %v850_v44, %v843_v41  ;;  %24074 = vmatprep.subr.bf16.mxu0 %v24073_v46  ;;  %v26455_v54 = vand.u32 4294901760, %v357_v47  ;;  %v8195_v55 = vsel %vm352_vm0, %v18662_v42, 0  ;;  %v18668_v41 = vld [vmem:[%s26405_s17 + $0x81] sm:$0xff]  ;;  %v18683_v22 = vld [vmem:[%s26405_s17 + $0x139] sm:$0xff]  ;;  %s26243_s8 = smov [#allocation2]  }
  0x23   : > { %33334 = vst [vmem:[#allocation13_spill] sm:$0xff] %v26443_v48  ;;  %33335 = vst [vmem:[#allocation14_spill] sm:$0xff] %v26447_v49  ;;  %v8198_v56 = vsel %vm352_vm0, %v18663_v43, 0  ;;  %v26460_v57 = vand.u32 4294901760, %v26443_v48  ;;  %v26463_v58 = vand.u32 4294901760, %v26447_v49  ;;  %v26467_v60 = vsub.f32 %v8192_v45, %v26452_v51  ;;  %v18673_v16 = vld [vmem:[%s26405_s17 + $0xc1] sm:$0xff]  ;;  %p26166_p0 = pneg %p26165_p13 }
  0x24   : > { %33336 = vst [vmem:[#allocation15_spill] sm:$0xff] %v26452_v51  ;;  %v32238_v59 = vand.u32 4294901760, %v26450_v50  ;;  %23858 = vmatprep.subr.bf16.mxu1 %v23857_v53  ;;  %v26470_v61 = vsub.f32 %v357_v47, %v26455_v54  ;;  %v26472_v62 = vand.u32 4294901760, %v8195_v55  ;;  %v26474_v63 = vand.u32 4294901760, %v8198_v56  ;;  %s26167_s11 = sshll.u32 %s26243_s8, 4  ;;  %s26168_s11 = int_to_ptr.vmem [resolvable:$false] %s26167_s11 }
  0x25   : > { %33337 = vst [vmem:[#allocation16_spill] sm:$0xff] %v26460_v57  ;;  %33338 = vst [vmem:[#allocation17_spill] sm:$0xff] %v26463_v58  ;;  %v8201_v0 = vsel %vm352_vm0, %v18664_v52, 0  ;;  %v8353_v1 = vsub.f32 %v26443_v48, %v26460_v57  ;;  %22345 = vmatprep.mubr.f32.mxu0 %v26460_v57  ;;  %v26484_v3 = vand.u32 4294901760, %v26467_v60  ;;  %v8363_v30 = vsub.f32 %v26447_v49, %v26463_v58  ;;  %v18682_v49 = vld [vmem:[%s26405_s17 + $0x129] sm:$0xff]  ;;  %v18689_v48 = vld [vmem:[%s26405_s17 + $0x181] sm:$0xff]  ;;  %p26170_p1 = scmp.lt.s32.totalorder %s32176_s20, %s26168_s11 }
  0x26   : > { %33339 = vst [vmem:[#allocation18_spill] sm:$0xff] %v26467_v60  ;;  %33340 = vst [vmem:[#allocation19_spill] sm:$0xff] %v26470_v61  ;;  %v521_v2 = vsub.f32 %v26450_v50, %v32238_v59  ;;  %22346 = vmatmul.mubr.f32.vlgmr.msra.gmra.mrb[0].mxu0 %v26463_v58  ;;  %v32237_v4 = vand.u32 4294901760, %v26470_v61  ;;  %v26489_v5 = vsub.f32 %v8195_v55, %v26472_v62  ;;  %v26494_v9 = vand.u32 4294901760, %v8201_v0  ;;  %v18669_v55 = vld [vmem:[%s26405_s17 + $0x91] sm:$0xff]  ;;  %s26169_s12 = scalar_lea.vmem %s26168_s11, 8192 }
  0x27   : > { %33341 = vst [vmem:[#allocation20_spill] sm:$0xff] %v26472_v62  ;;  %33342 = vst [vmem:[#allocation21_spill] sm:$0xff] %v26474_v63  ;;  %v26492_v6 = vsub.f32 %v8198_v56, %v26474_v63  ;;  %22348 = vmatprep.mubr.f32.mxu0 %v26484_v3  ;;  %24076 = vmatpush3.bf16.msra.mxu0 %v24073_v46  ;;  %v561_v33 = vsub.f32 %v26467_v60, %v26484_v3  ;;  %v26517_v42 = vand.u32 4294901760, %v8353_v1  ;;  %p26171_p2 = scmp.lt.s32.totalorder %s26169_s12, %s26163_s30 }
  0x28   : > { %33343 = vst [vmem:[#allocation22_spill] sm:$0xff] %v26484_v3  ;;  %33344 = vst [vmem:[#allocation23_spill] sm:$0xff] %v26489_v5  ;;  %v522_v32 = vand.u32 4294901760, %v521_v2  ;;  %v531_v34 = vsub.f32 %v26470_v61, %v32237_v4  ;;  %v26508_v35 = vand.u32 4294901760, %v26489_v5  ;;  %v26514_v37 = vsub.f32 %v8201_v0, %v26494_v9  ;;  %v18690_v61 = vld [vmem:[%s26405_s17 + $0x189] sm:$0xff] }
  0x29   : > { %33345 = vst [vmem:[#allocation24_spill] sm:$0xff] %v26492_v6  ;;  %33346 = vst [vmem:[#allocation25_spill] sm:$0xff] %v26494_v9  ;;  %v26511_v36 = vand.u32 4294901760, %v26492_v6  ;;  %v8204_v43 = vsel %vm352_vm0, %v18665_v27, 0  ;;  %v8207_v44 = vsel %vm352_vm0, %v18666_v28, 0  ;;  %v8210_v45 = vsel %vm352_vm0, %v18667_v29, 0  ;;  %p26172_p3 = por %p26171_p2, %p26170_p1 }
  0x2a   : > { %33347 = vst [vmem:[#allocation26_spill] sm:$0xff] %v26508_v35  ;;  %33349 = vst [vmem:[#allocation28_spill] sm:$0xff] %v26514_v37  ;;  %20833 = vmatprep.mubr.f32.mxu1 %v522_v32  ;;  %v532_v46 = vand.u32 4294901760, %v531_v34  ;;  %22349 = vmatmul.mubr.f32.gmra.mrb[2].mxu0 %v26508_v35  ;;  %v26524_v47 = vand.u32 4294901760, %v26514_v37  ;;  %v26526_v52 = vand.u32 4294901760, %v8204_v43  ;;  %v26532_v56 = vsub.f32 %v26364_v12, %v456_v15  ;;  %v18671_v32 = vld [vmem:[%s26405_s17 + $0xa9] sm:$0xff] }
  0x2b   : > { %33348 = vst [vmem:[#allocation27_spill] sm:$0xff] %v26511_v36  ;;  %33350 = vst [vmem:[#allocation29_spill] sm:$0xff] %v26517_v42  ;;  %v26534_v0 = vand.u32 4294901760, %v8363_v30  ;;  %22351 = vmatprep.mubr.f32.mxu0 %v26511_v36  ;;  %v26537_v1 = vand.u32 4294901760, %v8207_v44  ;;  %v26539_v2 = vand.u32 4294901760, %v8210_v45  ;;  %v8213_v27 = vsel %vm352_vm0, %v18668_v41, 0  ;;  %p26173_p5 = pnand %p26172_p3, %p26166_p0 }
  0x2c   : > { %33351 = vst [vmem:[#allocation30_spill] sm:$0xff] %v26524_v47  ;;  %33352 = vst [vmem:[#allocation31_spill] sm:$0xff] %v26526_v52  ;;  %20834 = vmatmul.mubr.f32.vlgmr.msra.gmra.mrb[0].mxu1 %v532_v46  ;;  %v26542_v28 = vand.u32 4294901760, %v561_v33  ;;  %v26545_v29 = vsub.f32 %v8204_v43, %v26526_v52  ;;  %v571_v12 = vsub.f32 %v26489_v5, %v26508_v35  ;;  %v26549_v15 = vand.u32 4294901760, %v8213_v27  ;;  %v18670_v30 = vld [vmem:[%s26405_s17 + $0x99] sm:$0xff] }
  0x2d   : > { %33353 = vst [vmem:[#allocation32_spill] sm:$0xff] %v26534_v0  ;;  %33354 = vst [vmem:[#allocation33_spill] sm:$0xff] %v26537_v1  ;;  %23860 = vmatpush3.bf16.msra.mxu1 %v23857_v53  ;;  %20836 = vmatprep.mubr.f32.mxu1 %v26517_v42  ;;  %v26555_v34 = vsub.f32 %v8207_v44, %v26537_v1  ;;  %v581_v33 = vsub.f32 %v26492_v6, %v26511_v36  ;;  %v8216_v43 = vsel %vm352_vm0, %v18669_v55, 0  ;;  %v18681_v6 = vld [vmem:[%s26405_s17 + $0x121] sm:$0xff] }
  0x2e   : > { %33355 = vst [vmem:[#allocation34_spill] sm:$0xff] %v26539_v2  ;;  %33356 = vst [vmem:[#allocation35_spill] sm:$0xff] %v26542_v28  ;;  %v26560_v41 = vsub.f32 %v8210_v45, %v26539_v2  ;;  %22352 = vmatmul.mubr.f32.gmra.mrb[4].mxu0 %v26524_v47  ;;  %v26565_v46 = vand.u32 4294901760, %v26545_v29  ;;  %v591_v53 = vsub.f32 %v26514_v37, %v26524_v47  ;;  %v26572_v44 = vand.u32 4294901760, %v8216_v43  ;;  %v18679_v37 = vld [vmem:[%s26405_s17 + $0x109] sm:$0xff] }
  0x2f   : > { %33357 = vst [vmem:[#allocation36_spill] sm:$0xff] %v26545_v29  ;;  %33358 = vst [vmem:[#allocation37_spill] sm:$0xff] %v26549_v15  ;;  %v26570_v31 = vsub.f32 %v8213_v27, %v26549_v15  ;;  %v26576_v45 = vand.u32 4294901760, %v26555_v34  ;;  %v8219_v4 = vsel %vm352_vm0, %v18670_v30, 0  ;;  %v8222_v59 = vsel %vm352_vm0, %v18671_v32, 0 }
  0x30   : > { %33359 = vst [vmem:[#allocation38_spill] sm:$0xff] %v26555_v34  ;;  %33360 = vst [vmem:[#allocation39_spill] sm:$0xff] %v26560_v41  ;;  %v26579_v55 = vand.u32 4294901760, %v26560_v41  ;;  %20837 = vmatmul.mubr.f32.gmra.mrb[2].mxu1 %v26534_v0  ;;  %22354 = vmatprep.mubr.f32.mxu0 %v26565_v46  ;;  %v26585_v27 = vand.u32 4294901760, %v571_v12  ;;  %v601_v25 = vsub.f32 %v26545_v29, %v26565_v46  ;;  %v26592_v11 = vand.u32 4294901760, %v8219_v4  ;;  %v18674_v0 = vld [vmem:[%s26405_s17 + $0xc9] sm:$0xff] }
  0x31   : > { %33361 = vst [vmem:[#allocation40_spill] sm:$0xff] %v26565_v46  ;;  %33362 = vst [vmem:[#allocation41_spill] sm:$0xff] %v26570_v31  ;;  %v26590_v23 = vsub.f32 %v8216_v43, %v26572_v44  ;;  %20839 = vmatprep.mubr.f32.mxu1 %v26542_v28  ;;  %v26595_v30 = vand.u32 4294901760, %v581_v33  ;;  %v26597_v32 = vand.u32 4294901760, %v8222_v59  ;;  %v8225_v10 = vsel %vm352_vm0, %v18672_v26, 0  ;;  %v18675_v46 = vld [vmem:[%s26405_s17 + $0xd9] sm:$0xff] }
  0x32   : > { %33363 = vst [vmem:[#allocation42_spill] sm:$0xff] %v26572_v44  ;;  %33364 = vst [vmem:[#allocation43_spill] sm:$0xff] %v26576_v45  ;;  %22355 = vmatmul.mubr.f32.gmra.mrb[6].mxu0 %v26576_v45  ;;  %v26603_v12 = vand.u32 4294901760, %v26570_v31  ;;  %v26606_v43 = vsub.f32 %v8219_v4, %v26592_v11  ;;  %v33373_v28 = vand.u32 4294901760, %v26369_v13  ;;  %v26616_v26 = vand.u32 4294901760, %v591_v53 }
  0x33   : > { %33365 = vst [vmem:[#allocation44_spill] sm:$0xff] %v26579_v55  ;;  %33366 = vst [vmem:[#allocation45_spill] sm:$0xff] %v26585_v27  ;;  %22357 = vmatprep.mubr.f32.mxu0 %v26579_v55  ;;  %v26619_v24 = vand.u32 4294901760, %v26590_v23  ;;  %v26622_v21 = vsub.f32 %v8222_v59, %v26597_v32  ;;  %v26624_v4 = vand.u32 4294901760, %v8225_v10  ;;  %v26628_v42 = vand.u32 4294901760, %v601_v25 }
  0x34   : > { %33367 = vst [vmem:[#allocation46_spill] sm:$0xff] %v26590_v23  ;;  %33368 = vst [vmem:[#allocation47_spill] sm:$0xff] %v26592_v11  ;;  %v26613_v33 = vsub.f32 %v26369_v13, %v33373_v28  ;;  %20840 = vmatmul.mubr.f32.gmra.mrb[4].mxu1 %v26585_v27  ;;  %v611_v13 = vsub.f32 %v26555_v34, %v26576_v45  ;;  %v621_v28 = vsub.f32 %v26560_v41, %v26579_v55  ;;  %v18676_v27 = vld [vmem:[%s26405_s17 + $0xe1] sm:$0xff] }
  0x35   : > { %33369 = vst [vmem:[#allocation48_spill] sm:$0xff] %v26595_v30  ;;  %33370 = vst [vmem:[#allocation49_spill] sm:$0xff] %v26597_v32  ;;  %v8228_v53 = vsel %vm352_vm0, %v18673_v16, 0  ;;  %20842 = vmatprep.mubr.f32.mxu1 %v26595_v30  ;;  %v26637_v59 = vand.u32 4294901760, %v26606_v43  ;;  %v631_v47 = vsub.f32 %v26570_v31, %v26603_v12  ;;  %v8231_v25 = vsel %vm352_vm0, %v18674_v0, 0 }
  0x36   : > { %33371 = vst [vmem:[#allocation50_spill] sm:$0xff] %v26603_v12  ;;  %33372 = vst [vmem:[#allocation51_spill] sm:$0xff] %v26606_v43  ;;  %v26641_v36 = vand.u32 4294901760, %v8228_v53  ;;  %22358 = vmatmul.mubr.f32.gmra.mrb[8].mxu0 %v26603_v12  ;;  %v26647_v55 = vsub.f32 %v8225_v10, %v26624_v4  ;;  %v641_v16 = vsub.f32 %v26590_v23, %v26619_v24  ;;  %v26651_v30 = vand.u32 4294901760, %v8231_v25 }
  0x37   : > { %33374 = vst [vmem:[#allocation52_spill] sm:$0xff] %v26616_v26  ;;  %33375 = vst [vmem:[#allocation53_spill] sm:$0xff] %v26619_v24  ;;  %v8234_v45 = vsel %vm352_vm0, %v18675_v46, 0  ;;  %22360 = vmatprep.mubr.f32.mxu0 %v26619_v24  ;;  %v26656_v35 = vand.u32 4294901760, %v26622_v21  ;;  %v26664_v10 = vand.u32 4294901760, %v611_v13  ;;  %v8237_v12 = vsel %vm352_vm0, %v18676_v27, 0 }
  0x38   : > { %33376 = vst [vmem:[#allocation54_spill] sm:$0xff] %v26622_v21  ;;  %33377 = vst [vmem:[#allocation55_spill] sm:$0xff] %v26624_v4  ;;  %v26659_v0 = vsub.f32 %v8228_v53, %v26641_v36  ;;  %v26661_v3 = vand.u32 4294901760, %v8234_v45  ;;  %20843 = vmatmul.mubr.f32.gmra.mrb[6].mxu1 %v26616_v26  ;;  %v33387_v58 = vand.u32 4294901760, %v26532_v56  ;;  %v18677_v24 = vld [vmem:[%s26405_s17 + $0xf1] sm:$0xff]  ;;  %v33388_v57 = vand.u32 4294901760, %v26352_v7 }
  0x39   : > { %33378 = vst [vmem:[#allocation56_spill] sm:$0xff] %v26628_v42  ;;  %33379 = vst [vmem:[#allocation57_spill] sm:$0xff] %v26637_v59  ;;  %20845 = vmatprep.mubr.f32.mxu1 %v26628_v42  ;;  %v26677_v53 = vand.u32 4294901760, %v621_v28  ;;  %v26679_v26 = vand.u32 4294901760, %v631_v47  ;;  %v26682_v13 = vsub.f32 %v8231_v25, %v26651_v30  ;;  %v33393_v27 = vand.u32 4294901760, %v26357_v8  ;;  %v18678_v28 = vld [vmem:[%s26405_s17 + $0xf9] sm:$0xff] }
  0x3a   : > { %33380 = vst [vmem:[#allocation58_spill] sm:$0xff] %v26641_v36  ;;  %33381 = vst [vmem:[#allocation59_spill] sm:$0xff] %v26647_v55  ;;  %v856_v46 = vsub.f32 %v26532_v56, %v33387_v58  ;;  %v26674_v23 = vsub.f32 %v26352_v7, %v33388_v57  ;;  %22361 = vmatmul.mubr.f32.gmra.mrb[10].mxu0 %v26637_v59  ;;  %v26691_v7 = vand.u32 4294901760, %v26647_v55  ;;  %v26693_v57 = vand.u32 4294901760, %v641_v16 }
  0x3b   : > { %33382 = vst [vmem:[#allocation60_spill] sm:$0xff] %v26651_v30  ;;  %33383 = vst [vmem:[#allocation61_spill] sm:$0xff] %v26656_v35  ;;  %v26687_v31 = vsub.f32 %v26357_v8, %v33393_v27  ;;  %v26695_v58 = vand.u32 4294901760, %v8237_v12  ;;  %v32279_v47 = vand.u32 4294901760, %v26613_v33  ;;  %22363 = vmatprep.mubr.f32.mxu0 %v26656_v35  ;;  %v26701_v25 = vand.u32 4294901760, %v26659_v0 }
  0x3c   : > { %33384 = vst [vmem:[#allocation62_spill] sm:$0xff] %v26659_v0  ;;  %33385 = vst [vmem:[#allocation63_spill] sm:$0xff] %v26661_v3  ;;  %v651_v8 = vsub.f32 %v26606_v43, %v26637_v59  ;;  %v26706_v27 = vsub.f32 %v8234_v45, %v26661_v3  ;;  %v8240_v42 = vsel %vm352_vm0, %v18677_v24, 0  ;;  %20846 = vmatmul.mubr.f32.gmra.mrb[8].mxu1 %v26664_v10  ;;  %v857_v16 = vand.u32 4294901760, %v856_v46  ;;  %v18680_v43 = vld [vmem:[%s26405_s17 + $0x111] sm:$0xff] }
  0x3d   : > { %33386 = vst [vmem:[#allocation64_spill] sm:$0xff] %v26664_v10  ;;  %33389 = vst [vmem:[#allocation65_spill] sm:$0xff] %v26674_v23  ;;  %v863_v41 = vsub.f32 %v26613_v33, %v32279_v47  ;;  %v26713_v34 = vand.u32 4294901760, %v8240_v42  ;;  %20848 = vmatprep.mubr.f32.mxu1 %v26677_v53  ;;  %v26719_v45 = vand.u32 4294901760, %v26682_v13  ;;  %v661_v24 = vsub.f32 %v26622_v21, %v26656_v35 }
  0x3e   : > { %33390 = vst [vmem:[#allocation66_spill] sm:$0xff] %v26677_v53  ;;  %33391 = vst [vmem:[#allocation67_spill] sm:$0xff] %v26679_v26  ;;  %v8243_v10 = vsel %vm352_vm0, %v18678_v28, 0  ;;  %22364 = vmatmul.mubr.f32.gmra.mrb[12].mxu0 %v26691_v7  ;;  %v26727_v47 = vsub.f32 %v8237_v12, %v26695_v58  ;;  %v26738_v46 = vand.u32 4294901760, %v26706_v27  ;;  %v33406_v28 = vand.u32 4294901760, %v26674_v23 }
  0x3f   : > { %33392 = vst [vmem:[#allocation68_spill] sm:$0xff] %v26682_v13  ;;  %33394 = vst [vmem:[#allocation69_spill] sm:$0xff] %v26687_v31  ;;  %v864_v29 = vand.u32 4294901760, %v863_v41  ;;  %v26730_v53 = vsub.f32 %v8240_v42, %v26713_v34  ;;  %v26732_v59 = vand.u32 4294901760, %v8243_v10  ;;  %22366 = vmatprep.mubr.f32.mxu0 %v26701_v25  ;;  %v33407_v35 = vand.u32 4294901760, %v26687_v31 }
  0x40   : > { %33395 = vst [vmem:[#allocation70_spill] sm:$0xff] %v26691_v7  ;;  %33396 = vst [vmem:[#allocation71_spill] sm:$0xff] %v26693_v57  ;;  %v8246_v21 = vsel %vm352_vm0, %v18679_v37, 0  ;;  %20849 = vmatmul.mubr.f32.gmra.mrb[10].mxu1 %v26679_v26  ;;  %v26746_v42 = vand.u32 4294901760, %v651_v8  ;;  %v671_v41 = vsub.f32 %v26647_v55, %v26691_v7  ;;  %v26755_v23 = vand.u32 4294901760, %v661_v24 }
  0x41   : > { %33397 = vst [vmem:[#allocation72_spill] sm:$0xff] %v26695_v58  ;;  %33398 = vst [vmem:[#allocation73_spill] sm:$0xff] %v26701_v25  ;;  %v24077_v12 = vpack.c.bf16 %v33407_v35, %v33406_v28  ;;  %v23861_v5 = vpack.c.bf16 %v864_v29, %v857_v16  ;;  %v26750_v60 = vand.u32 4294901760, %v8246_v21  ;;  %20851 = vmatprep.mubr.f32.mxu1 %v26693_v57  ;;  %v8249_v37 = vsel %vm352_vm0, %v18680_v43, 0 }
  0x42   : > { %33399 = vst [vmem:[#allocation74_spill] sm:$0xff] %v26706_v27  ;;  %33400 = vst [vmem:[#allocation75_spill] sm:$0xff] %v26713_v34  ;;  %v681_v35 = vsub.f32 %v26659_v0, %v26701_v25  ;;  %v8252_v8 = vsel %vm352_vm0, %v18681_v6, 0  ;;  %22367 = vmatmul.mubr.f32.gmra.mrb[14].mxu0 %v26719_v45  ;;  %v26763_v29 = vand.u32 4294901760, %v26727_v47  ;;  %v26766_v16 = vand.u32 4294901760, %v26730_v53  ;;  %v18684_v25 = vld [vmem:[%s26405_s17 + $0x141] sm:$0xff] }
  0x43   : > { %33401 = vst [vmem:[#allocation76_spill] sm:$0xff] %v26719_v45  ;;  %33402 = vst [vmem:[#allocation77_spill] sm:$0xff] %v26727_v47  ;;  %24078 = vmatprep.subr.bf16.mxu0 %v24077_v12  ;;  %23862 = vmatprep.subr.bf16.mxu1 %v23861_v5  ;;  %v26769_v24 = vsub.f32 %v8243_v10, %v26732_v59  ;;  %v26771_v28 = vand.u32 4294901760, %v8249_v37  ;;  %v26775_v6 = vsub.f32 %v8246_v21, %v26750_v60  ;;  %v18687_v0 = vld [vmem:[%s26405_s17 + $0x169] sm:$0xff] }
  0x44   : > { %33403 = vst [vmem:[#allocation78_spill] sm:$0xff] %v26730_v53  ;;  %33404 = vst [vmem:[#allocation79_spill] sm:$0xff] %v26732_v59  ;;  %22369 = vmatprep.mubr.f32.mxu0 %v26738_v46  ;;  %23864 = vmatpush3.bf16.msra.mxu1 %v23861_v5  ;;  %v26777_v43 = vand.u32 4294901760, %v8252_v8  ;;  %v8255_v57 = vsel %vm352_vm0, %v18682_v49, 0  ;;  %v8258_v26 = vsel %vm352_vm0, %v18683_v22, 0  ;;  %v26782_v31 = vand.u32 4294901760, %v671_v41 }
  0x45   : > { %33405 = vst [vmem:[#allocation80_spill] sm:$0xff] %v26738_v46  ;;  %33408 = vst [vmem:[#allocation81_spill] sm:$0xff] %v26746_v42  ;;  %20852 = vmatmul.mubr.f32.gmra.mrb[12].mxu1 %v26746_v42  ;;  %v691_v10 = vsub.f32 %v26682_v13, %v26719_v45  ;;  %24080 = vmatpush3.bf16.msra.mxu0 %v24077_v12  ;;  %v26788_v5 = vand.u32 4294901760, %v681_v35  ;;  %v701_v21 = vsub.f32 %v26706_v27, %v26738_v46  ;;  %v18685_v49 = vld [vmem:[%s26405_s17 + $0x151] sm:$0xff]  ;;  %v18686_v27 = vld [vmem:[%s26405_s17 + $0x159] sm:$0xff] }
  0x46   : > { %33409 = vst [vmem:[#allocation82_spill] sm:$0xff] %v26750_v60  ;;  %33410 = vst [vmem:[#allocation83_spill] sm:$0xff] %v26755_v23  ;;  %20854 = vmatprep.mubr.f32.mxu1 %v26755_v23  ;;  %24082 = vmatprep.subr.bf16.mxu0 %v26372_v14  ;;  %v26796_v22 = vand.u32 4294901760, %v26769_v24  ;;  %v26799_v12 = vsub.f32 %v8249_v37, %v26771_v28  ;;  %v26801_v41 = vand.u32 4294901760, %v8255_v57  ;;  %v26803_v35 = vand.u32 4294901760, %v8258_v26 }
  0x47   : > { %33411 = vst [vmem:[#allocation84_spill] sm:$0xff] %v26763_v29  ;;  %33412 = vst [vmem:[#allocation85_spill] sm:$0xff] %v26766_v16  ;;  %22370 = vmatmul.mubr.f32.gmra.mrb[16].mxu0 %v26763_v29  ;;  %v26807_v23 = vand.u32 4294901760, %v26775_v6  ;;  %v26810_v42 = vsub.f32 %v8252_v8, %v26777_v43  ;;  %v8261_v46 = vsel %vm352_vm0, %v18684_v25, 0  ;;  %v26814_v45 = vand.u32 4294901760, %v691_v10 }
  0x48   : > { %33413 = vst [vmem:[#allocation86_spill] sm:$0xff] %v26769_v24  ;;  %33414 = vst [vmem:[#allocation87_spill] sm:$0xff] %v26771_v28  ;;  %22372 = vmatprep.mubr.f32.mxu0 %v26766_v16  ;;  %v711_v37 = vsub.f32 %v26727_v47, %v26763_v29  ;;  %v8264_v7 = vsel %vm352_vm0, %v18685_v49, 0  ;;  %v26821_v13 = vand.u32 4294901760, %v701_v21  ;;  %v721_v8 = vsub.f32 %v26730_v53, %v26766_v16  ;;  %v18688_v53 = vld [vmem:[%s26405_s17 + $0x171] sm:$0xff] }
  0x49   : > { %33415 = vst [vmem:[#allocation88_spill] sm:$0xff] %v26775_v6  ;;  %33416 = vst [vmem:[#allocation89_spill] sm:$0xff] %v26777_v43  ;;  %20855 = vmatmul.mubr.f32.gmra.mrb[14].mxu1 %v26782_v31  ;;  %v26828_v25 = vand.u32 4294901760, %v26799_v12  ;;  %v26831_v10 = vsub.f32 %v8255_v57, %v26801_v41  ;;  %v26834_v49 = vsub.f32 %v8258_v26, %v26803_v35  ;;  %v26840_v21 = vand.u32 4294901760, %v26810_v42 }
  0x4a   : > { %33417 = vst [vmem:[#allocation90_spill] sm:$0xff] %v26782_v31  ;;  %33418 = vst [vmem:[#allocation91_spill] sm:$0xff] %v26788_v5  ;;  %20857 = vmatprep.mubr.f32.mxu1 %v26788_v5  ;;  %v26836_v5 = vand.u32 4294901760, %v8261_v46  ;;  %v26842_v31 = vand.u32 4294901760, %v8264_v7  ;;  %v8267_v16 = vsel %vm352_vm0, %v18686_v27, 0  ;;  %v26846_v29 = vand.u32 4294901760, %v711_v37 }
  0x4b   : > { %33419 = vst [vmem:[#allocation92_spill] sm:$0xff] %v26796_v22  ;;  %33420 = vst [vmem:[#allocation93_spill] sm:$0xff] %v26799_v12  ;;  %22373 = vmatmul.mubr.f32.gmra.mrb[18].mxu0 %v26796_v22  ;;  %v731_v57 = vsub.f32 %v26769_v24, %v26796_v22  ;;  %v8270_v26 = vsel %vm352_vm0, %v18687_v0, 0  ;;  %v26853_v47 = vand.u32 4294901760, %v721_v8  ;;  %v741_v55 = vsub.f32 %v26775_v6, %v26807_v23 }
  0x4c   : > { %33421 = vst [vmem:[#allocation94_spill] sm:$0xff] %v26801_v41  ;;  %33422 = vst [vmem:[#allocation95_spill] sm:$0xff] %v26803_v35  ;;  %22375 = vmatprep.mubr.f32.mxu0 %v26807_v23  ;;  %v26860_v27 = vand.u32 4294901760, %v26831_v10  ;;  %v26863_v37 = vand.u32 4294901760, %v26834_v49  ;;  %v26866_v0 = vsub.f32 %v8261_v46, %v26836_v5  ;;  %v26872_v8 = vsub.f32 %v8264_v7, %v26842_v31 }
  0x4d   : > { %33423 = vst [vmem:[#allocation96_spill] sm:$0xff] %v26807_v23  ;;  %33424 = vst [vmem:[#allocation97_spill] sm:$0xff] %v26810_v42  ;;  %20858 = vmatmul.mubr.f32.gmra.mrb[16].mxu1 %v26814_v45  ;;  %v8273_v23 = vsel %vm352_vm0, %v18688_v53, 0  ;;  %v26879_v22 = vpack.c.bf16 %v26386_v20, %v26376_v17  ;;  %v26882_v6 = vand.u32 4294901760, %v731_v57  ;;  %v751_v46 = vsub.f32 %v26799_v12, %v26828_v25 }
  0x4e   : > { %33425 = vst [vmem:[#allocation98_spill] sm:$0xff] %v26814_v45  ;;  %33426 = vst [vmem:[#allocation99_spill] sm:$0xff] %v26821_v13  ;;  %20860 = vmatprep.mubr.f32.mxu1 %v26821_v13  ;;  %v26868_v45 = vand.u32 4294901760, %v8267_v16  ;;  %v26874_v13 = vand.u32 4294901760, %v8270_v26  ;;  %v8276_v24 = vsel %vm352_vm0, %v18689_v48, 0  ;;  %v26889_v7 = vand.u32 4294901760, %v741_v55 }
  0x4f   : > { %33427 = vst [vmem:[#allocation100_spill] sm:$0xff] %v26828_v25  ;;  %33428 = vst [vmem:[#allocation101_spill] sm:$0xff] %v26831_v10  ;;  %22376 = vmatmul.mubr.f32.gmra.mrb[20].mxu0 %v26828_v25  ;;  %v761_v53 = vsub.f32 %v26810_v42, %v26840_v21  ;;  %23866 = vmatprep.subr.bf16.mxu1 %v26879_v22  ;;  %v26896_v57 = vand.u32 4294901760, %v26866_v0  ;;  %v26901_v25 = vand.u32 4294901760, %v8273_v23  ;;  %v26905_v48 = vand.u32 4294901760, %v26872_v8 }
  0x50   : > { %33429 = vst [vmem:[#allocation102_spill] sm:$0xff] %v26834_v49  ;;  %33430 = vst [vmem:[#allocation103_spill] sm:$0xff] %v26836_v5  ;;  %22378 = vmatprep.mubr.f32.mxu0 %v26840_v21  ;;  %v26908_v55 = vsub.f32 %v8270_v26, %v26874_v13  ;;  %v26914_v42 = vand.u32 4294901760, %v751_v46  ;;  %v781_v20 = vsub.f32 %v26834_v49, %v26863_v37 }
  0x51   : > { %33431 = vst [vmem:[#allocation104_spill] sm:$0xff] %v26840_v21  ;;  %33432 = vst [vmem:[#allocation105_spill] sm:$0xff] %v26842_v31  ;;  %20861 = vmatmul.mubr.f32.gmra.mrb[18].mxu1 %v26846_v29  ;;  %v8279_v21 = vsel %vm352_vm0, %v18690_v61, 0  ;;  %v26919_v12 = vand.u32 4294901760, %v761_v53  ;;  %v26928_v61 = vsub.f32 %v8273_v23, %v26901_v25 }
  0x52   : > { %33433 = vst [vmem:[#allocation106_spill] sm:$0xff] %v26846_v29  ;;  %33434 = vst [vmem:[#allocation107_spill] sm:$0xff] %v26853_v47  ;;  %20863 = vmatprep.mubr.f32.mxu1 %v26853_v47  ;;  %v26899_v29 = vsub.f32 %v8267_v16, %v26868_v45  ;;  %v26910_v47 = vand.u32 4294901760, %v8276_v24  ;;  %v771_v16 = vsub.f32 %v26831_v10, %v26860_v27  ;;  %v26930_v46 = vand.u32 4294901760, %v8279_v21 }
  0x53   : > { %33435 = vst [vmem:[#allocation108_spill] sm:$0xff] %v26860_v27  ;;  %33436 = vst [vmem:[#allocation109_spill] sm:$0xff] %v26863_v37  ;;  %22379 = vmatmul.mubr.f32.gmra.mrb[22].mxu0 %v26860_v27  ;;  %v26945_v23 = vand.u32 4294901760, %v781_v20  ;;  %v801_v27 = vsub.f32 %v26872_v8, %v26905_v48  ;;  %v26951_v49 = vand.u32 4294901760, %v26928_v61 }
  0x54   : > { %33437 = vst [vmem:[#allocation110_spill] sm:$0xff] %v26866_v0  ;;  %33438 = vst [vmem:[#allocation111_spill] sm:$0xff] %v26868_v45  ;;  %22381 = vmatprep.mubr.f32.mxu0 %v26863_v37  ;;  %v26925_v26 = vand.u32 4294901760, %v26899_v29  ;;  %v26937_v53 = vsub.f32 %v8276_v24, %v26910_v47  ;;  %v791_v37 = vsub.f32 %v26866_v0, %v26896_v57 }
  0x55   : > { %33439 = vst [vmem:[#allocation112_spill] sm:$0xff] %v26872_v8  ;;  %33440 = vst [vmem:[#allocation113_spill] sm:$0xff] %v26874_v13  ;;  %20864 = vmatmul.mubr.f32.gmra.mrb[20].mxu1 %v26882_v6  ;;  %v26954_v24 = vsub.f32 %v8279_v21, %v26930_v46 }
  0x56   : > { %33441 = vst [vmem:[#allocation114_spill] sm:$0xff] %v26882_v6  ;;  %33442 = vst [vmem:[#allocation115_spill] sm:$0xff] %v26889_v7  ;;  %20866 = vmatprep.mubr.f32.mxu1 %v26889_v7  ;;  %v26934_v6 = vand.u32 4294901760, %v26908_v55  ;;  %v26940_v7 = vand.u32 4294901760, %v771_v16  ;;  %v32357_v16 = vand.u32 4294901760, %v26937_v53  ;;  %v811_v20 = vsub.f32 %v26899_v29, %v26925_v26 }
  0x57   : > { %33443 = vst [vmem:[#allocation116_spill] sm:$0xff] %v26899_v29  ;;  %33444 = vst [vmem:[#allocation117_spill] sm:$0xff] %v26901_v25  ;;  %22382 = vmatmul.mubr.f32.gmra.mrb[24].mxu0 %v26896_v57  ;;  %v32360_v21 = vand.u32 4294901760, %v26954_v24 }
  0x58   : > { %33445 = vst [vmem:[#allocation118_spill] sm:$0xff] %v26905_v48  ;;  %33446 = vst [vmem:[#allocation119_spill] sm:$0xff] %v26908_v55  ;;  %22384 = vmatprep.mubr.f32.mxu0 %v26905_v48  ;;  %v821_v48 = vsub.f32 %v26908_v55, %v26934_v6 }
  0x59   : > { %33447 = vst [vmem:[#allocation120_spill] sm:$0xff] %v26910_v47  ;;  %33448 = vst [vmem:[#allocation121_spill] sm:$0xff] %v26914_v42  ;;  %20867 = vmatmul.mubr.f32.gmra.mrb[22].mxu1 %v26914_v42  ;;  %v26964_v42 = vand.u32 4294901760, %v801_v27 }
  0x5a   : > { %33449 = vst [vmem:[#allocation122_spill] sm:$0xff] %v26919_v12  ;;  %33450 = vst [vmem:[#allocation123_spill] sm:$0xff] %v26928_v61  ;;  %20869 = vmatprep.mubr.f32.mxu1 %v26919_v12  ;;  %v26959_v12 = vand.u32 4294901760, %v791_v37  ;;  %v26973_v37 = vand.u32 4294901760, %v811_v20  ;;  %v26978_v27 = vand.u32 4294901760, %v821_v48 }
  0x5b   : > { %33451 = vst [vmem:[#allocation124_spill] sm:$0xff] %v26930_v46  ;;  %33452 = vst [vmem:[#allocation125_spill] sm:$0xff] %v26937_v53  ;;  %22385 = vmatmul.mubr.f32.gmra.mrb[26].mxu0 %v26925_v26 }
  0x5c   : > { %33453 = vst [vmem:[#allocation126_spill] sm:$0xff] %v26940_v7  ;;  %33454 = vst [vmem:[#allocation127_spill] sm:$0xff] %v26945_v23  ;;  %22387 = vmatprep.mubr.f32.mxu0 %v26934_v6 }
  0x5d   : > { %33455 = vst [vmem:[#allocation128_spill] sm:$0xff] %v26954_v24  ;;  %20870 = vmatmul.mubr.f32.gmra.mrb[24].mxu1 %v26940_v7  ;;  %33456 = vst [vmem:[#allocation129_spill] sm:$0xff] %v26959_v12  ;;  %v831_v7 = vsub.f32 %v26928_v61, %v26951_v49 }
  0x5e   : > { %20872 = vmatprep.mubr.f32.mxu1 %v26945_v23  ;;  %33457 = vst [vmem:[#allocation130_spill] sm:$0xff] %v26964_v42  ;;  %33458 = vst [vmem:[#allocation131_spill] sm:$0xff] %v26973_v37  ;;  %v26983_v23 = vld [vmem:[%s32229_s1 + $0xa0] sm:$0xff] }
  0x5f   : > { %22388 = vmatmul.mubr.f32.gmra.mrb[28].mxu0 %v26951_v49  ;;  %33459 = vst [vmem:[#allocation132_spill] sm:$0xff] %v26978_v27  ;;  %v26994_v20 = vand.u32 4294901760, %v831_v7  ;;  %v10265_v48 = vand.u32 4294901760, %v26983_v23 }
  0x60   : > { %22390 = vmatprep.mubr.f32.mxu0 %v32357_v16  ;;  %v26988_v16 = vld [vmem:[%s32229_s1 + $0xa8] sm:$0xff] }
  0x61   : > { %20873 = vmatmul.mubr.f32.gmra.mrb[26].mxu1 %v26959_v12  ;;  %33460 = vst [vmem:[#allocation133_spill] sm:$0xff] %v26994_v20  ;;  %v10268_v53 = vand.u32 4294901760, %v26988_v16 }
  0x62   : > { %20875 = vmatprep.mubr.f32.mxu1 %v26964_v42 }
  0x63   : > { %22391 = vmatmul.mubr.f32.gmra.mrb[30].mxu0 %v32360_v21  ;;  %v27008_v7 = vpack.c.bf16 %v10268_v53, %v10265_v48  ;;  %v23869_v21 = vpack.c.bf16 %v26613_v33, %v26532_v56 }
  0x64   : > { %22401 = vmatprep.mubr.f32.mxu0 %v26427_v38 }
  0x65   : > { %20876 = vmatmul.mubr.f32.gmra.mrb[28].mxu1 %v26973_v37 }
  0x66   : > { %20878 = vmatprep.mubr.f32.mxu1 %v26978_v27 }
  0x67   : > { %22402 = vmatmul.mubr.f32.vlgmr.msra.gmra.mrb[0].mxu0 %v26429_v39 }
  0x68   : > { %22404 = vmatprep.mubr.f32.mxu0 %v26452_v51  ;;  %24084 = vmatpush3.bf16.msra.mxu0 %v26372_v14  ;;  %v33469_v14 = vld [vmem:[#allocation7_spill] sm:$0xff] }
  0x69   : > { %20879 = vmatmul.mubr.f32.gmra.mrb[30].mxu1 %v26994_v20  ;;  %24086 = vmatprep.subr.bf16.mxu0 %v26384_v19 }
  0x6a   : > { %20889 = vmatprep.mubr.f32.mxu1 %v26431_v40 }
  0x6b   : > { %22405 = vmatmul.mubr.f32.gmra.mrb[2].mxu0 %v26472_v62 }
  0x6c   : > { %22407 = vmatprep.mubr.f32.mxu0 %v26474_v63  ;;  %24088 = vmatpush3.bf16.msra.mxu0 %v26384_v19 }
  0x6d   : > { %20890 = vmatmul.mubr.f32.vlgmr.msra.gmra.mrb[0].mxu1 %v26455_v54  ;;  %24090 = vmatprep.subr.bf16.mxu0 %v27008_v7 }
  0x6e   : > { %23868 = vmatpush3.bf16.msra.mxu1 %v26879_v22  ;;  %20892 = vmatprep.mubr.f32.mxu1 %v26427_v38  ;;  %v27067_v22 = vsub.f32 %v26983_v23, %v10265_v48  ;;  %v18729_v23 = vld [vmem:[%s32229_s1 + $0xb0] sm:$0xff] }
  0x6f   : > { %22408 = vmatmul.mubr.f32.gmra.mrb[4].mxu0 %v26494_v9  ;;  %23870 = vmatprep.subr.bf16.mxu1 %v23869_v21 }
  0x70   : > { %22410 = vmatprep.mubr.f32.mxu0 %v26526_v52  ;;  %33461 = vst [vmem:[#allocation134_spill] sm:$0xff] %v27067_v22  ;;  %v32370_v20 = vand.u32 4294901760, %v27067_v22 }
  0x71   : > { %20893 = vmatmul.mubr.f32.gmra.mrb[2].mxu1 %v26429_v39 }
  0x72   : > { %20895 = vmatprep.mubr.f32.mxu1 %v26452_v51  ;;  %23872 = vmatpush3.bf16.msra.mxu1 %v23869_v21  ;;  %v27072_v21 = vsub.f32 %v26988_v16, %v10268_v53  ;;  %v18730_v53 = vld [vmem:[%s32229_s1 + $0xb8] sm:$0xff]  ;;  %v10271_v16 = vand.u32 4294901760, %v18729_v23  ;;  %v10657_v27 = vsub.f32 %v27067_v22, %v32370_v20  ;;  %v33468_v20 = vand.u32 4294901760, %v26376_v17 }
  0x73   : > { %22411 = vmatmul.mubr.f32.gmra.mrb[6].mxu0 %v26537_v1  ;;  %23874 = vmatprep.subr.bf16.mxu1 %v26378_v18  ;;  %v10274_v48 = vand.u32 4294901760, %v18730_v53  ;;  %v33474_v17 = vld [vmem:[#allocation24_spill] sm:$0xff] }
  0x74   : > { %22413 = vmatprep.mubr.f32.mxu0 %v26539_v2  ;;  %33462 = vst [vmem:[#allocation135_spill] sm:$0xff] %v27072_v21  ;;  %v33463_v24 = vand.u32 4294901760, %v27072_v21  ;;  %v10658_v12 = vand.u32 4294901760, %v10657_v27  ;;  %v27113_v27 = vpack.c.bf16 %v27072_v21, %v27067_v22 }
  0x75   : > { %20896 = vmatmul.mubr.f32.gmra.mrb[4].mxu1 %v26472_v62  ;;  %v27100_v42 = vpack.c.bf16 %v10274_v48, %v10271_v16 }
  0x76   : > { %20898 = vmatprep.mubr.f32.mxu1 %v26474_v63  ;;  %v10664_v37 = vsub.f32 %v27072_v21, %v33463_v24  ;;  %v33470_v21 = vand.u32 4294901760, %v33469_v14  ;;  %v33475_v14 = vld [vmem:[#allocation28_spill] sm:$0xff] }
  0x77   : > { %22414 = vmatmul.mubr.f32.gmra.mrb[8].mxu0 %v26549_v15  ;;  %33464 = vst [vmem:[#allocation136_spill] sm:$0xff] %v27100_v42 }
  0x78   : > { %22416 = vmatprep.mubr.f32.mxu0 %v26572_v44  ;;  %v10665_v19 = vand.u32 4294901760, %v10664_v37  ;;  %v33465_v37 = vld [vmem:[#allocation19_spill] sm:$0xff]  ;;  %v27128_v22 = vpack.c.bf16 %v33470_v21, %v33468_v20  ;;  %v33476_v20 = vld [vmem:[#allocation36_spill] sm:$0xff]  ;;  %v33477_v21 = vld [vmem:[#allocation38_spill] sm:$0xff] }
  0x79   : > { %20899 = vmatmul.mubr.f32.gmra.mrb[6].mxu1 %v26494_v9 }
  0x7a   : > { %20901 = vmatprep.mubr.f32.mxu1 %v26526_v52  ;;  %v27108_v24 = vpack.c.bf16 %v10665_v19, %v10658_v12  ;;  %v33466_v19 = vld [vmem:[#allocation13_spill] sm:$0xff] }
  0x7b   : > { %22417 = vmatmul.mubr.f32.gmra.mrb[10].mxu0 %v26592_v11  ;;  %v33467_v12 = vld [vmem:[#allocation9_spill] sm:$0xff] }
  0x7c   : > { %22419 = vmatprep.mubr.f32.mxu0 %v26597_v32 }
  0x7d   : > { %20902 = vmatmul.mubr.f32.gmra.mrb[8].mxu1 %v26537_v1 }
  0x7e   : > { %20904 = vmatprep.mubr.f32.mxu1 %v26539_v2 }
  0x7f   : > { %22420 = vmatmul.mubr.f32.gmra.mrb[12].mxu0 %v26624_v4 }
  0x80   : > { %22422 = vmatprep.mubr.f32.mxu0 %v26641_v36 }
  0x81   : > { %20905 = vmatmul.mubr.f32.gmra.mrb[10].mxu1 %v26549_v15 }
  0x82   : > { %20907 = vmatprep.mubr.f32.mxu1 %v26572_v44 }
  0x83   : > { %22423 = vmatmul.mubr.f32.gmra.mrb[14].mxu0 %v26651_v30 }
  0x84   : > { %22425 = vmatprep.mubr.f32.mxu0 %v26661_v3 }
  0x85   : > { %20908 = vmatmul.mubr.f32.gmra.mrb[12].mxu1 %v26592_v11 }
  0x86   : > { %20910 = vmatprep.mubr.f32.mxu1 %v26597_v32 }
  0x87   : > { %22426 = vmatmul.mubr.f32.gmra.mrb[16].mxu0 %v26695_v58 }
  0x88   : > { %22428 = vmatprep.mubr.f32.mxu0 %v26713_v34 }
  0x89   : > { %20911 = vmatmul.mubr.f32.gmra.mrb[14].mxu1 %v26624_v4 }
  0x8a   : > { %20913 = vmatprep.mubr.f32.mxu1 %v26641_v36 }
  0x8b   : > { %22429 = vmatmul.mubr.f32.gmra.mrb[18].mxu0 %v26732_v59 }
  0x8c   : > { %22431 = vmatprep.mubr.f32.mxu0 %v26750_v60 }
  0x8d   : > { %20914 = vmatmul.mubr.f32.gmra.mrb[16].mxu1 %v26651_v30 }
  0x8e   : > { %20916 = vmatprep.mubr.f32.mxu1 %v26661_v3 }
  0x8f   : > { %22432 = vmatmul.mubr.f32.gmra.mrb[20].mxu0 %v26771_v28 }
  0x90   : > { %22434 = vmatprep.mubr.f32.mxu0 %v26777_v43 }
  0x91   : > { %20917 = vmatmul.mubr.f32.gmra.mrb[18].mxu1 %v26695_v58 }
  0x92   : > { %20919 = vmatprep.mubr.f32.mxu1 %v26713_v34 }
  0x93   : > { %22435 = vmatmul.mubr.f32.gmra.mrb[22].mxu0 %v26801_v41 }
  0x94   : > { %22437 = vmatprep.mubr.f32.mxu0 %v26803_v35 }
  0x95   : > { %20920 = vmatmul.mubr.f32.gmra.mrb[20].mxu1 %v26732_v59 }
  0x96   : > { %20922 = vmatprep.mubr.f32.mxu1 %v26750_v60 }
  0x97   : > { %22438 = vmatmul.mubr.f32.gmra.mrb[24].mxu0 %v26836_v5 }
  0x98   : > { %22440 = vmatprep.mubr.f32.mxu0 %v26842_v31 }
  0x99   : > { %20923 = vmatmul.mubr.f32.gmra.mrb[22].mxu1 %v26771_v28 }
  0x9a   : > { %20925 = vmatprep.mubr.f32.mxu1 %v26777_v43 }
  0x9b   : > { %22441 = vmatmul.mubr.f32.gmra.mrb[26].mxu0 %v26868_v45 }
  0x9c   : > { %22443 = vmatprep.mubr.f32.mxu0 %v26874_v13 }
  0x9d   : > { %20926 = vmatmul.mubr.f32.gmra.mrb[24].mxu1 %v26801_v41 }
  0x9e   : > { %20928 = vmatprep.mubr.f32.mxu1 %v26803_v35 }
  0x9f   : > { %22444 = vmatmul.mubr.f32.gmra.mrb[28].mxu0 %v26901_v25 }
  0xa0   : > { %22446 = vmatprep.mubr.f32.mxu0 %v26910_v47 }
  0xa1   : > { %20929 = vmatmul.mubr.f32.gmra.mrb[26].mxu1 %v26836_v5 }
  0xa2   : > { %20931 = vmatprep.mubr.f32.mxu1 %v26842_v31 }
  0xa3   : > { %22447 = vmatmul.mubr.f32.gmra.mrb[30].mxu0 %v26930_v46 }
  0xa4   : > { %22457 = vmatprep.mubr.f32.mxu0 %v26427_v38 }
  0xa5   : > { %20932 = vmatmul.mubr.f32.gmra.mrb[28].mxu1 %v26868_v45 }
  0xa6   : > { %20934 = vmatprep.mubr.f32.mxu1 %v26874_v13 }
  0xa7   : > { %22458 = vmatmul.mubr.f32.vlgmr.msra.gmra.mrb[0].mxu0 %v26429_v39 }
  0xa8   : > { %22460 = vmatprep.mubr.f32.mxu0 %v26452_v51  ;;  %24092 = vmatpush3.bf16.msra.mxu0 %v27008_v7 }
  0xa9   : > { %20935 = vmatmul.mubr.f32.gmra.mrb[30].mxu1 %v26901_v25  ;;  %24094 = vmatprep.subr.bf16.mxu0 %v27100_v42 }
  0xaa   : > { %20945 = vmatprep.mubr.f32.mxu1 %v26450_v50 }
  0xab   : > { %22461 = vmatmul.mubr.f32.gmra.mrb[2].mxu0 %v26472_v62 }
  0xac   : > { %22463 = vmatprep.mubr.f32.mxu0 %v26474_v63  ;;  %24096 = vmatpush3.bf16.msra.mxu0 %v27100_v42  ;;  %v33471_v42 = vld [vmem:[#allocation14_spill] sm:$0xff] }
  0xad   : > { %20946 = vmatmul.mubr.f32.vlgmr.msra.gmra.mrb[0].mxu1 %v33465_v37  ;;  %24098 = vmatprep.subr.bf16.mxu0 %v27108_v24  ;;  %v33472_v63 = vld [vmem:[#allocation18_spill] sm:$0xff] }
  0xae   : > { %23876 = vmatpush3.bf16.msra.mxu1 %v26378_v18  ;;  %20948 = vmatprep.mubr.f32.mxu1 %v33466_v19  ;;  %v33473_v19 = vld [vmem:[#allocation23_spill] sm:$0xff] }
  0xaf   : > { %22464 = vmatmul.mubr.f32.gmra.mrb[4].mxu0 %v26494_v9  ;;  %23878 = vmatprep.subr.bf16.mxu1 %v33467_v12 }
  0xb0   : > { %22466 = vmatprep.mubr.f32.mxu0 %v26526_v52 }
  0xb1   : > { %20949 = vmatmul.mubr.f32.gmra.mrb[2].mxu1 %v33471_v42  ;;  %v33486_v42 = vld [vmem:[#allocation62_spill] sm:$0xff] }
  0xb2   : > { %20951 = vmatprep.mubr.f32.mxu1 %v33472_v63  ;;  %23880 = vmatpush3.bf16.msra.mxu1 %v33467_v12  ;;  %v33478_v63 = vld [vmem:[#allocation39_spill] sm:$0xff] }
  0xb3   : > { %22467 = vmatmul.mubr.f32.gmra.mrb[6].mxu0 %v26537_v1  ;;  %23882 = vmatprep.subr.bf16.mxu1 %v27128_v22 }
  0xb4   : > { %22469 = vmatprep.mubr.f32.mxu0 %v26539_v2 }
  0xb5   : > { %20952 = vmatmul.mubr.f32.gmra.mrb[4].mxu1 %v33473_v19  ;;  %v33480_v19 = vld [vmem:[#allocation46_spill] sm:$0xff] }
  0xb6   : > { %20954 = vmatprep.mubr.f32.mxu1 %v33474_v17  ;;  %v33479_v17 = vld [vmem:[#allocation41_spill] sm:$0xff] }
  0xb7   : > { %22470 = vmatmul.mubr.f32.gmra.mrb[8].mxu0 %v26549_v15 }
  0xb8   : > { %22472 = vmatprep.mubr.f32.mxu0 %v26572_v44 }
  0xb9   : > { %20955 = vmatmul.mubr.f32.gmra.mrb[6].mxu1 %v33475_v14  ;;  %v33482_v14 = vld [vmem:[#allocation54_spill] sm:$0xff] }
  0xba   : > { %20957 = vmatprep.mubr.f32.mxu1 %v33476_v20  ;;  %v33481_v20 = vld [vmem:[#allocation51_spill] sm:$0xff] }
  0xbb   : > { %22473 = vmatmul.mubr.f32.gmra.mrb[10].mxu0 %v26592_v11 }
  0xbc   : > { %22475 = vmatprep.mubr.f32.mxu0 %v26597_v32 }
  0xbd   : > { %20958 = vmatmul.mubr.f32.gmra.mrb[8].mxu1 %v33477_v21  ;;  %v27159_v21 = vsub.f32 %v18730_v53, %v10274_v48  ;;  %v33487_v53 = vld [vmem:[#allocation68_spill] sm:$0xff] }
  0xbe   : > { %20960 = vmatprep.mubr.f32.mxu1 %v33478_v63  ;;  %v27157_v63 = vsub.f32 %v18729_v23, %v10271_v16  ;;  %v18696_v16 = vld [vmem:[%s26405_s17 + $0x22] sm:$0xff]  ;;  %v18697_v48 = vld [vmem:[%s26405_s17 + $0x32] sm:$0xff] }
  0xbf   : > { %22476 = vmatmul.mubr.f32.gmra.mrb[12].mxu0 %v26624_v4  ;;  %33484 = vst [vmem:[#allocation9_spill] sm:$0xff] %v27159_v21 }
  0xc0   : > { %22478 = vmatprep.mubr.f32.mxu0 %v26641_v36  ;;  %33483 = vst [vmem:[#allocation19_spill] sm:$0xff] %v27157_v63  ;;  %v33509_v36 = vand.u32 4294901760, %v27157_v63 }
  0xc1   : > { %20961 = vmatmul.mubr.f32.gmra.mrb[10].mxu1 %v33479_v17  ;;  %v33485_v17 = vld [vmem:[#allocation59_spill] sm:$0xff] }
  0xc2   : > { %20963 = vmatprep.mubr.f32.mxu1 %v33480_v19  ;;  %v18695_v19 = vld [vmem:[%s26405_s17 + $0x1a] sm:$0xff] }
  0xc3   : > { %22479 = vmatmul.mubr.f32.gmra.mrb[14].mxu0 %v26651_v30  ;;  %v10169_v23 = vsel %vm352_vm0, %v18695_v19, 0  ;;  %v18699_v19 = vld [vmem:[%s26405_s17 + $0x4a] sm:$0xff]  ;;  %v18701_v30 = vld [vmem:[%s26405_s17 + $0x62] sm:$0xff] }
  0xc4   : > { %22481 = vmatprep.mubr.f32.mxu0 %v26661_v3 }
  0xc5   : > { %20964 = vmatmul.mubr.f32.gmra.mrb[12].mxu1 %v33481_v20  ;;  %v27166_v20 = vpack.c.bf16 %v27159_v21, %v27157_v63 }
  0xc6   : > { %20966 = vmatprep.mubr.f32.mxu1 %v33482_v14  ;;  %v10172_v14 = vsel %vm352_vm0, %v18696_v16, 0 }
  0xc7   : > { %22482 = vmatmul.mubr.f32.gmra.mrb[16].mxu0 %v26695_v58  ;;  %v27185_v58 = vand.u32 4294901760, %v10172_v14 }
  0xc8   : > { %22484 = vmatprep.mubr.f32.mxu0 %v26713_v34  ;;  %v33490_v34 = vld [vmem:[#allocation77_spill] sm:$0xff] }
  0xc9   : > { %20967 = vmatmul.mubr.f32.gmra.mrb[14].mxu1 %v33485_v17  ;;  %v33488_v17 = vld [vmem:[#allocation74_spill] sm:$0xff]  ;;  %33492 = vst [vmem:[#allocation137_spill] sm:$0xff] %v27185_v58  ;;  %v27200_v3 = vsub.f32 %v10172_v14, %v27185_v58  ;;  %v33501_v14 = vld [vmem:[#allocation93_spill] sm:$0xff] }
  0xca   : > { %20969 = vmatprep.mubr.f32.mxu1 %v33486_v42  ;;  %v27176_v42 = vand.u32 4294901760, %v10169_v23 }
  0xcb   : > { %22485 = vmatmul.mubr.f32.gmra.mrb[18].mxu0 %v26732_v59  ;;  %v10175_v59 = vsel %vm352_vm0, %v18697_v48, 0  ;;  %v18700_v48 = vld [vmem:[%s26405_s17 + $0x52] sm:$0xff]  ;;  %33497 = vst [vmem:[#allocation140_spill] sm:$0xff] %v27200_v3 }
  0xcc   : > { %22487 = vmatprep.mubr.f32.mxu0 %v26750_v60  ;;  %33489 = vst [vmem:[#allocation7_spill] sm:$0xff] %v27176_v42  ;;  %v18698_v60 = vld [vmem:[%s26405_s17 + $0x3a] sm:$0xff] }
  0xcd   : > { %20970 = vmatmul.mubr.f32.gmra.mrb[16].mxu1 %v33487_v53  ;;  %v33491_v53 = vld [vmem:[#allocation78_spill] sm:$0xff]  ;;  %v10178_v16 = vsel %vm352_vm0, %v18698_v60, 0  ;;  %v33503_v60 = vld [vmem:[#allocation97_spill] sm:$0xff] }
  0xce   : > { %20972 = vmatprep.mubr.f32.mxu1 %v33488_v17  ;;  %v27189_v17 = vsub.f32 %v10169_v23, %v27176_v42  ;;  %v10184_v23 = vsel %vm352_vm0, %v18700_v48, 0  ;;  %v10187_v48 = vsel %vm352_vm0, %v18701_v30, 0 }
  0xcf   : > { %22488 = vmatmul.mubr.f32.gmra.mrb[20].mxu0 %v26771_v28  ;;  %v27191_v28 = vand.u32 4294901760, %v10175_v59 }
  0xd0   : > { %22490 = vmatprep.mubr.f32.mxu0 %v26777_v43  ;;  %33493 = vst [vmem:[#allocation138_spill] sm:$0xff] %v27189_v17  ;;  %v33495_v43 = vld [vmem:[#allocation86_spill] sm:$0xff] }
  0xd1   : > { %20973 = vmatmul.mubr.f32.gmra.mrb[18].mxu1 %v33490_v34  ;;  %33494 = vst [vmem:[#allocation139_spill] sm:$0xff] %v27191_v28  ;;  %v10181_v34 = vsel %vm352_vm0, %v18699_v19, 0 }
  0xd2   : > { %20975 = vmatprep.mubr.f32.mxu1 %v33491_v53  ;;  %v33496_v53 = vld [vmem:[#allocation88_spill] sm:$0xff]  ;;  %v27211_v19 = vand.u32 4294901760, %v10181_v34 }
  0xd3   : > { %22491 = vmatmul.mubr.f32.gmra.mrb[22].mxu0 %v26801_v41  ;;  %v27202_v41 = vand.u32 4294901760, %v10178_v16 }
  0xd4   : > { %22493 = vmatprep.mubr.f32.mxu0 %v26803_v35  ;;  %v27209_v35 = vsub.f32 %v10175_v59, %v27191_v28  ;;  %33500 = vst [vmem:[#allocation143_spill] sm:$0xff] %v27211_v19  ;;  %v27233_v32 = vsub.f32 %v10181_v34, %v27211_v19  ;;  %v27237_v59 = vand.u32 4294901760, %v10187_v48  ;;  %v10671_v34 = vsub.f32 %v27157_v63, %v33509_v36  ;;  %v18706_v63 = vld [vmem:[%s26405_s17 + $0x9a] sm:$0xff] }
  0xd5   : > { %20976 = vmatmul.mubr.f32.gmra.mrb[20].mxu1 %v33495_v43  ;;  %33498 = vst [vmem:[#allocation141_spill] sm:$0xff] %v27202_v41  ;;  %v27216_v43 = vand.u32 4294901760, %v10184_v23  ;;  %v27224_v4 = vsub.f32 %v10178_v16, %v27202_v41 }
  0xd6   : > { %20978 = vmatprep.mubr.f32.mxu1 %v33496_v53  ;;  %33499 = vst [vmem:[#allocation142_spill] sm:$0xff] %v27209_v35  ;;  %v18702_v53 = vld [vmem:[%s26405_s17 + $0x6a] sm:$0xff]  ;;  %33506 = vst [vmem:[#allocation146_spill] sm:$0xff] %v27233_v32  ;;  %v33514_v15 = vand.u32 4294901760, %v27209_v35 }
  0xd7   : > { %22494 = vmatmul.mubr.f32.gmra.mrb[24].mxu0 %v26836_v5  ;;  %33502 = vst [vmem:[#allocation144_spill] sm:$0xff] %v27216_v43  ;;  %33504 = vst [vmem:[#allocation145_spill] sm:$0xff] %v27224_v4  ;;  %v10190_v5 = vsel %vm352_vm0, %v18702_v53, 0  ;;  %v27241_v16 = vsub.f32 %v10184_v23, %v27216_v43  ;;  %v33510_v53 = vand.u32 4294901760, %v27159_v21  ;;  %v33513_v23 = vand.u32 4294901760, %v27200_v3 }
  0xd8   : > { %22496 = vmatprep.mubr.f32.mxu0 %v26842_v31  ;;  %v18703_v31 = vld [vmem:[%s26405_s17 + $0x7a] sm:$0xff]  ;;  %33507 = vst [vmem:[#allocation147_spill] sm:$0xff] %v27237_v59  ;;  %v27254_v11 = vand.u32 4294901760, %v10190_v5  ;;  %v10356_v36 = vsub.f32 %v27209_v35, %v33514_v15 }
  0xd9   : > { %20979 = vmatmul.mubr.f32.gmra.mrb[22].mxu1 %v33501_v14  ;;  %v33505_v14 = vand.u32 4294901760, %v27189_v17  ;;  %33508 = vst [vmem:[#allocation148_spill] sm:$0xff] %v27241_v16  ;;  %v10346_v44 = vsub.f32 %v27200_v3, %v33513_v23 }
  0xda   : > { %20981 = vmatprep.mubr.f32.mxu1 %v33503_v60  ;;  %v10193_v60 = vsel %vm352_vm0, %v18703_v31, 0  ;;  %33512 = vst [vmem:[#allocation149_spill] sm:$0xff] %v27254_v11 }
  0xdb   : > { %22497 = vmatmul.mubr.f32.gmra.mrb[26].mxu0 %v26868_v45  ;;  %v10336_v30 = vsub.f32 %v27189_v17, %v33505_v14  ;;  %v18704_v45 = vld [vmem:[%s26405_s17 + $0x82] sm:$0xff]  ;;  %v18705_v14 = vld [vmem:[%s26405_s17 + $0x92] sm:$0xff] }
  0xdc   : > { %22499 = vmatprep.mubr.f32.mxu0 %v26874_v13  ;;  %v10678_v13 = vsub.f32 %v27159_v21, %v33510_v53  ;;  %v33511_v17 = vld [vmem:[#allocation102_spill] sm:$0xff]  ;;  %v10199_v21 = vsel %vm352_vm0, %v18705_v14, 0  ;;  %v10347_v14 = vand.u32 4294901760, %v10346_v44  ;;  %v33523_v44 = vand.u32 4294901760, %v27241_v16 }
  0xdd   : > { %20982 = vmatmul.mubr.f32.gmra.mrb[24].mxu1 %v26831_v10  ;;  %v10337_v31 = vand.u32 4294901760, %v10336_v30  ;;  %v27266_v10 = vsub.f32 %v10187_v48, %v27237_v59  ;;  %v10196_v30 = vsel %vm352_vm0, %v18704_v45, 0  ;;  %v33517_v48 = vand.u32 4294901760, %v27224_v4  ;;  %v18707_v45 = vld [vmem:[%s26405_s17 + $0xaa] sm:$0xff] }
  0xde   : > { %20984 = vmatprep.mubr.f32.mxu1 %v33511_v17  ;;  %v27268_v17 = vand.u32 4294901760, %v10193_v60  ;;  %v10679_v15 = vand.u32 4294901760, %v10678_v13  ;;  %v27286_v23 = vand.u32 4294901760, %v10199_v21  ;;  %v10202_v13 = vsel %vm352_vm0, %v18706_v63, 0 }
  0xdf   : > { %22500 = vmatmul.mubr.f32.gmra.mrb[28].mxu0 %v26901_v25  ;;  %33515 = vst [vmem:[#allocation150_spill] sm:$0xff] %v27266_v10  ;;  %v10672_v25 = vand.u32 4294901760, %v10671_v34  ;;  %v10366_v53 = vsub.f32 %v27224_v4, %v33517_v48  ;;  %v10357_v34 = vand.u32 4294901760, %v10356_v36  ;;  %v18708_v4 = vld [vmem:[%s26405_s17 + $0xb2] sm:$0xff]  ;;  %v10386_v3 = vsub.f32 %v27241_v16, %v33523_v44  ;;  %v18710_v36 = vld [vmem:[%s26405_s17 + $0xca] sm:$0xff] }
  0xe0   : > { %22502 = vmatprep.mubr.f32.mxu0 %v26910_v47  ;;  %33516 = vst [vmem:[#allocation151_spill] sm:$0xff] %v27268_v17  ;;  %v27280_v47 = vsub.f32 %v10190_v5, %v27254_v11  ;;  %33520 = vst [vmem:[#allocation154_spill] sm:$0xff] %v27286_v23  ;;  %v27294_v5 = vsub.f32 %v10193_v60, %v27268_v17  ;;  %v10205_v63 = vsel %vm352_vm0, %v18707_v45, 0  ;;  %v27305_v48 = vand.u32 4294901760, %v10202_v13 }
  0xe1   : > { %20985 = vmatmul.mubr.f32.gmra.mrb[26].mxu1 %v26866_v0  ;;  %v27284_v0 = vand.u32 4294901760, %v10196_v30  ;;  %v10208_v44 = vsel %vm352_vm0, %v18708_v4, 0  ;;  %v33529_v4 = vand.u32 4294901760, %v26450_v50  ;;  %v10214_v50 = vsel %vm352_vm0, %v18710_v36, 0 }
  0xe2   : > { %20987 = vmatprep.mubr.f32.mxu1 %v26872_v8  ;;  %33518 = vst [vmem:[#allocation152_spill] sm:$0xff] %v27280_v47  ;;  %v33521_v8 = vand.u32 4294901760, %v27233_v32  ;;  %33522 = vst [vmem:[#allocation155_spill] sm:$0xff] %v27294_v5 }
  0xe3   : > { %22503 = vmatmul.mubr.f32.gmra.mrb[30].mxu0 %v26930_v46  ;;  %33519 = vst [vmem:[#allocation153_spill] sm:$0xff] %v27284_v0  ;;  %v18709_v46 = vld [vmem:[%s26405_s17 + $0xc2] sm:$0xff]  ;;  %33524 = vst [vmem:[#allocation156_spill] sm:$0xff] %v27305_v48  ;;  %v27308_v60 = vsub.f32 %v10196_v30, %v27284_v0  ;;  %v27320_v30 = vand.u32 4294901760, %v10205_v63 }
  0xe4   : > { %22513 = vmatprep.mubr.f32.mxu0 %v10337_v31  ;;  %v10376_v35 = vsub.f32 %v27233_v32, %v33521_v8  ;;  %v24101_v31 = vpack.c.bf16 %v10679_v15, %v10672_v25  ;;  %v10367_v8 = vand.u32 4294901760, %v10366_v53  ;;  %v10211_v45 = vsel %vm352_vm0, %v18709_v46, 0 }
  0xe5   : > { %20988 = vmatmul.mubr.f32.gmra.mrb[28].mxu1 %v26899_v29  ;;  %33525 = vst [vmem:[#allocation157_spill] sm:$0xff] %v27308_v60  ;;  %v27311_v29 = vsub.f32 %v10199_v21, %v27286_v23  ;;  %v33527_v53 = vand.u32 4294901760, %v27266_v10  ;;  %33528 = vst [vmem:[#allocation159_spill] sm:$0xff] %v27320_v30  ;;  %v10387_v21 = vand.u32 4294901760, %v10386_v3  ;;  %v33530_v46 = vand.u32 4294901760, %v27280_v47 }
  0xe6   : > { %20990 = vmatprep.mubr.f32.mxu1 %v26908_v55  ;;  %v10377_v25 = vand.u32 4294901760, %v10376_v35  ;;  %v32443_v3 = vand.u32 4294901760, %v27308_v60 }
  0xe7   : > { %22514 = vmatmul.mubr.f32.vlgmr.msra.gmra.mrb[0].mxu0 %v10347_v14  ;;  %33526 = vst [vmem:[#allocation158_spill] sm:$0xff] %v27311_v29  ;;  %v10396_v15 = vsub.f32 %v27266_v10, %v33527_v53  ;;  %v10406_v35 = vsub.f32 %v27280_v47, %v33530_v46  ;;  %v27334_v53 = vand.u32 4294901760, %v10211_v45  ;;  %v18711_v14 = vld [vmem:[%s26405_s17 + $0xda] sm:$0xff]  ;;  %v33535_v46 = vand.u32 4294901760, %v26613_v33 }
  0xe8   : > { %22516 = vmatprep.mubr.f32.mxu0 %v10357_v34  ;;  %24100 = vmatpush3.bf16.msra.mxu0 %v27108_v24  ;;  %v27330_v24 = vsub.f32 %v10202_v13, %v27305_v48  ;;  %v27332_v34 = vand.u32 4294901760, %v10208_v44  ;;  %v33536_v47 = vand.u32 4294901760, %v27294_v5  ;;  %v10217_v36 = vsel %vm352_vm0, %v18711_v14, 0  ;;  %v33539_v33 = vld [vmem:[#allocation16_spill] sm:$0xff] }
  0xe9   : > { %20991 = vmatmul.mubr.f32.gmra.mrb[30].mxu1 %v26928_v61  ;;  %24102 = vmatprep.subr.bf16.mxu0 %v24101_v31  ;;  %33533 = vst [vmem:[#allocation162_spill] sm:$0xff] %v27334_v53  ;;  %v10397_v13 = vand.u32 4294901760, %v10396_v15  ;;  %v33538_v61 = vand.u32 4294901760, %v33465_v37  ;;  %v27364_v37 = vand.u32 4294901760, %v10214_v50  ;;  %v33543_v15 = vand.u32 4294901760, %v27311_v29 }
  0xea   : > { %21001 = vmatprep.mubr.f32.mxu1 %v33529_v4  ;;  %33531 = vst [vmem:[#allocation160_spill] sm:$0xff] %v27330_v24  ;;  %33532 = vst [vmem:[#allocation161_spill] sm:$0xff] %v27332_v34  ;;  %v33534_v4 = vand.u32 4294901760, %v26532_v56  ;;  %v10416_v10 = vsub.f32 %v27294_v5, %v33536_v47  ;;  %v18712_v56 = vld [vmem:[%s26405_s17 + $0xe2] sm:$0xff]  ;;  %v27359_v47 = vsub.f32 %v10208_v44, %v27332_v34 }
  0xeb   : > { %22517 = vmatmul.mubr.f32.gmra.mrb[2].mxu0 %v10367_v8  ;;  %v27348_v8 = vsub.f32 %v10205_v63, %v27320_v30  ;;  %v27362_v63 = vsub.f32 %v10211_v45, %v27334_v53  ;;  %33542 = vst [vmem:[#allocation165_spill] sm:$0xff] %v27364_v37  ;;  %v10436_v14 = vsub.f32 %v27311_v29, %v33543_v15 }
  0xec   : > { %v23885_v55 = vpack.c.bf16 %v33535_v46, %v33534_v4  ;;  %22519 = vmatprep.mubr.f32.mxu0 %v10377_v25  ;;  %24104 = vmatpush3.bf16.msra.mxu0 %v24101_v31  ;;  %v32446_v25 = vand.u32 4294901760, %v27330_v24  ;;  %33540 = vst [vmem:[#allocation16_spill] sm:$0xff] %v27359_v47  ;;  %v10407_v31 = vand.u32 4294901760, %v10406_v35  ;;  %v10417_v44 = vand.u32 4294901760, %v10416_v10 }
  0xed   : > { %33537 = vst [vmem:[#allocation163_spill] sm:$0xff] %v27348_v8  ;;  %21002 = vmatmul.mubr.f32.vlgmr.msra.gmra.mrb[0].mxu1 %v33538_v61  ;;  %24106 = vmatprep.subr.bf16.mxu0 %v27113_v27  ;;  %33541 = vst [vmem:[#allocation164_spill] sm:$0xff] %v27362_v63  ;;  %v18713_v61 = vld [vmem:[%s26405_s17 + $0xf2] sm:$0xff]  ;;  %v27374_v4 = vand.u32 4294901760, %v10217_v36  ;;  %v10220_v46 = vsel %vm352_vm0, %v18712_v56, 0  ;;  %v27387_v45 = vsub.f32 %v10214_v50, %v27364_v37  ;;  %v18715_v56 = vld [vmem:[%s26405_s17 + $0x10a] sm:$0xff] }
  0xee   : > { %23884 = vmatpush3.bf16.msra.mxu1 %v27128_v22  ;;  %21004 = vmatprep.mubr.f32.mxu1 %v33539_v33  ;;  %v10426_v22 = vsub.f32 %v27308_v60, %v32443_v3  ;;  %v10223_v35 = vsel %vm352_vm0, %v18713_v61, 0  ;;  %v18714_v33 = vld [vmem:[%s26405_s17 + $0xfa] sm:$0xff]  ;;  %v33546_v3 = vld [vmem:[#allocation22_spill] sm:$0xff]  ;;  %v10446_v15 = vsub.f32 %v27330_v24, %v32446_v25  ;;  %v27390_v29 = vand.u32 4294901760, %v10220_v46  ;;  %v18716_v50 = vld [vmem:[%s26405_s17 + $0x112] sm:$0xff] }
  0xef   : > { %22520 = vmatmul.mubr.f32.gmra.mrb[4].mxu0 %v10387_v21  ;;  %23886 = vmatprep.subr.bf16.mxu1 %v23885_v55  ;;  %33544 = vst [vmem:[#allocation166_spill] sm:$0xff] %v27374_v4  ;;  %v33545_v21 = vld [vmem:[#allocation17_spill] sm:$0xff]  ;;  %v27397_v10 = vsub.f32 %v10217_v36, %v27374_v4  ;;  %v33553_v24 = vld [vmem:[#allocation27_spill] sm:$0xff]  ;;  %v33554_v60 = vand.u32 4294901760, %v27359_v47 }
  0xf0   : > { %22522 = vmatprep.mubr.f32.mxu0 %v10397_v13  ;;  %33547 = vst [vmem:[#allocation17_spill] sm:$0xff] %v27387_v45  ;;  %v10427_v61 = vand.u32 4294901760, %v10426_v22  ;;  %33548 = vst [vmem:[#allocation22_spill] sm:$0xff] %v27390_v29  ;;  %v27399_v13 = vand.u32 4294901760, %v10223_v35  ;;  %v33552_v22 = vld [vmem:[#allocation26_spill] sm:$0xff] }
  0xf1   : > { %21005 = vmatmul.mubr.f32.gmra.mrb[2].mxu1 %v33545_v21  ;;  %v10437_v21 = vand.u32 4294901760, %v10436_v14  ;;  %33550 = vst [vmem:[#allocation167_spill] sm:$0xff] %v27397_v10  ;;  %v10229_v14 = vsel %vm352_vm0, %v18715_v56, 0  ;;  %v10466_v36 = vsub.f32 %v27359_v47, %v33554_v60  ;;  %v18720_v60 = vld [vmem:[%s26405_s17 + $0x142] sm:$0xff] }
  0xf2   : > { %21007 = vmatprep.mubr.f32.mxu1 %v33546_v3  ;;  %23888 = vmatpush3.bf16.msra.mxu1 %v23885_v55  ;;  %v33549_v3 = vand.u32 4294901760, %v27348_v8  ;;  %33551 = vst [vmem:[#allocation168_spill] sm:$0xff] %v27399_v13  ;;  %v10226_v55 = vsel %vm352_vm0, %v18714_v33, 0  ;;  %v27423_v47 = vsub.f32 %v10223_v35, %v27399_v13  ;;  %v18718_v33 = vld [vmem:[%s26405_s17 + $0x12a] sm:$0xff]  ;;  %v33569_v13 = vld [vmem:[#allocation44_spill] sm:$0xff] }
  0xf3   : > { %22523 = vmatmul.mubr.f32.gmra.mrb[6].mxu0 %v10407_v31  ;;  %23890 = vmatprep.subr.bf16.mxu1 %v26378_v18  ;;  %v18717_v31 = vld [vmem:[%s26405_s17 + $0x122] sm:$0xff]  ;;  %v27417_v56 = vand.u32 4294901760, %v10226_v55  ;;  %v10467_v16 = vand.u32 4294901760, %v10466_v36  ;;  %v33566_v36 = vand.u32 4294901760, %v27397_v10 }
  0xf4   : > { %22525 = vmatprep.mubr.f32.mxu0 %v10417_v44  ;;  %v10456_v25 = vsub.f32 %v27348_v8, %v33549_v3  ;;  %v10447_v44 = vand.u32 4294901760, %v10446_v15  ;;  %v33555_v3 = vand.u32 4294901760, %v27362_v63  ;;  %v10235_v15 = vsel %vm352_vm0, %v18717_v31, 0  ;;  %33558 = vst [vmem:[#allocation169_spill] sm:$0xff] %v27423_v47 }
  0xf5   : > { %21008 = vmatmul.mubr.f32.gmra.mrb[4].mxu1 %v33552_v22  ;;  %v27415_v22 = vsub.f32 %v10220_v46, %v27390_v29  ;;  %33557 = vst [vmem:[#allocation27_spill] sm:$0xff] %v27417_v56  ;;  %v18719_v46 = vld [vmem:[%s26405_s17 + $0x13a] sm:$0xff]  ;;  %v27436_v31 = vand.u32 4294901760, %v10235_v15  ;;  %v10496_v32 = vsub.f32 %v27397_v10, %v33566_v36  ;;  %v18721_v36 = vld [vmem:[%s26405_s17 + $0x152] sm:$0xff]  ;;  %v33575_v10 = vand.u32 4294901760, %v27423_v47 }
  0xf6   : > { %21010 = vmatprep.mubr.f32.mxu1 %v33553_v24  ;;  %v10476_v8 = vsub.f32 %v27362_v63, %v33555_v3  ;;  %v10232_v24 = vsel %vm352_vm0, %v18716_v50, 0  ;;  %v10457_v5 = vand.u32 4294901760, %v10456_v25  ;;  %v27425_v3 = vand.u32 4294901760, %v10229_v14  ;;  %v33561_v63 = vld [vmem:[#allocation40_spill] sm:$0xff] }
  0xf7   : > { %22526 = vmatmul.mubr.f32.gmra.mrb[8].mxu0 %v10427_v61  ;;  %33556 = vst [vmem:[#allocation26_spill] sm:$0xff] %v27415_v22  ;;  %v33560_v61 = vld [vmem:[#allocation30_spill] sm:$0xff]  ;;  %v33562_v50 = vand.u32 4294901760, %v27387_v45  ;;  %v27434_v25 = vand.u32 4294901760, %v10232_v24  ;;  %33564 = vst [vmem:[#allocation40_spill] sm:$0xff] %v27436_v31 }
  0xf8   : > { %22528 = vmatprep.mubr.f32.mxu0 %v10437_v21  ;;  %33559 = vst [vmem:[#allocation170_spill] sm:$0xff] %v27425_v3  ;;  %v10477_v35 = vand.u32 4294901760, %v10476_v8  ;;  %v33568_v8 = vld [vmem:[#allocation43_spill] sm:$0xff] }
  0xf9   : > { %21011 = vmatmul.mubr.f32.gmra.mrb[6].mxu1 %v33560_v61  ;;  %v10486_v21 = vsub.f32 %v27387_v45, %v33562_v50  ;;  %33563 = vst [vmem:[#allocation30_spill] sm:$0xff] %v27434_v25  ;;  %v27440_v61 = vsub.f32 %v10226_v55, %v27417_v56  ;;  %v27448_v45 = vsub.f32 %v10229_v14, %v27425_v3  ;;  %v33573_v50 = vand.u32 4294901760, %v27415_v22  ;;  %v18722_v3 = vld [vmem:[%s26405_s17 + $0x15a] sm:$0xff] }
  0xfa   : > { %21013 = vmatprep.mubr.f32.mxu1 %v33561_v63  ;;  %v10238_v63 = vsel %vm352_vm0, %v18718_v33, 0  ;;  %v27455_v55 = vsub.f32 %v10232_v24, %v27434_v25  ;;  %v10497_v24 = vand.u32 4294901760, %v10496_v32  ;;  %v10247_v25 = vsel %vm352_vm0, %v18721_v36, 0 }
  0xfb   : > { %22529 = vmatmul.mubr.f32.gmra.mrb[10].mxu0 %v10447_v44  ;;  %33565 = vst [vmem:[#allocation171_spill] sm:$0xff] %v27440_v61  ;;  %33567 = vst [vmem:[#allocation172_spill] sm:$0xff] %v27448_v45  ;;  %v10241_v44 = vsel %vm352_vm0, %v18719_v46, 0  ;;  %v27460_v33 = vand.u32 4294901760, %v10238_v63  ;;  %v10487_v14 = vand.u32 4294901760, %v10486_v21  ;;  %v10506_v46 = vsub.f32 %v27415_v22, %v33573_v50  ;;  %v33576_v21 = vld [vmem:[#allocation50_spill] sm:$0xff] }
  0xfc   : > { %22531 = vmatprep.mubr.f32.mxu0 %v10457_v5  ;;  %33570 = vst [vmem:[#allocation43_spill] sm:$0xff] %v27455_v55  ;;  %v27458_v5 = vsub.f32 %v10235_v15, %v27436_v31  ;;  %v10516_v15 = vsub.f32 %v27423_v47, %v33575_v10  ;;  %v33577_v50 = vld [vmem:[#allocation53_spill] sm:$0xff]  ;;  %v18723_v10 = vld [vmem:[%s26405_s17 + $0x16a] sm:$0xff]  ;;  %v33582_v32 = vand.u32 4294901760, %v27448_v45  ;;  %v27495_v47 = vand.u32 4294901760, %v10247_v25 }
  0xfd   : > { %21014 = vmatmul.mubr.f32.gmra.mrb[8].mxu1 %v33568_v8  ;;  %33572 = vst [vmem:[#allocation173_spill] sm:$0xff] %v27460_v33  ;;  %v10507_v31 = vand.u32 4294901760, %v10506_v46  ;;  %v33584_v46 = vld [vmem:[#allocation57_spill] sm:$0xff]  ;;  %v10253_v22 = vsel %vm352_vm0, %v18723_v10, 0 }
  0xfe   : > { %21016 = vmatprep.mubr.f32.mxu1 %v33569_v13  ;;  %33571 = vst [vmem:[#allocation44_spill] sm:$0xff] %v27458_v5  ;;  %v27467_v13 = vand.u32 4294901760, %v10241_v44  ;;  %v10517_v8 = vand.u32 4294901760, %v10516_v15  ;;  %33583 = vst [vmem:[#allocation176_spill] sm:$0xff] %v27495_v47  ;;  %v33587_v15 = vand.u32 4294901760, %v27458_v5 }
  0xff   : > { %22532 = vmatmul.mubr.f32.gmra.mrb[12].mxu0 %v10467_v16  ;;  %v10244_v16 = vsel %vm352_vm0, %v18720_v60, 0  ;;  %v33579_v60 = vand.u32 4294901760, %v27440_v61 }
 0x100   : > { %33574 = vst [vmem:[#allocation174_spill] sm:$0xff] %v27467_v13  ;;  %22534 = vmatprep.mubr.f32.mxu0 %v10477_v35  ;;  %v27481_v35 = vsub.f32 %v10238_v63, %v27460_v33  ;;  %v27488_v36 = vsub.f32 %v10241_v44, %v27467_v13  ;;  %v10536_v63 = vsub.f32 %v27448_v45, %v33582_v32  ;;  %v33586_v44 = vand.u32 4294901760, %v27455_v55  ;;  %v18725_v13 = vld [vmem:[%s26405_s17 + $0x182] sm:$0xff] }
 0x101   : > { %21017 = vmatmul.mubr.f32.gmra.mrb[10].mxu1 %v33576_v21  ;;  %v10526_v21 = vsub.f32 %v27440_v61, %v33579_v60  ;;  %v18724_v60 = vld [vmem:[%s26405_s17 + $0x172] sm:$0xff]  ;;  %v33585_v61 = vld [vmem:[#allocation61_spill] sm:$0xff]  ;;  %v10556_v32 = vsub.f32 %v27458_v5, %v33587_v15  ;;  %v33591_v45 = vld [vmem:[#allocation70_spill] sm:$0xff] }
 0x102   : > { %21019 = vmatprep.mubr.f32.mxu1 %v33577_v50  ;;  %33578 = vst [vmem:[#allocation50_spill] sm:$0xff] %v27481_v35  ;;  %33580 = vst [vmem:[#allocation53_spill] sm:$0xff] %v27488_v36  ;;  %v27490_v50 = vand.u32 4294901760, %v10244_v16  ;;  %v10537_v33 = vand.u32 4294901760, %v10536_v63  ;;  %v10256_v15 = vsel %vm352_vm0, %v18724_v60, 0 }
 0x103   : > { %22535 = vmatmul.mubr.f32.gmra.mrb[14].mxu0 %v10487_v14  ;;  %v10250_v14 = vsel %vm352_vm0, %v18722_v3, 0  ;;  %v10527_v3 = vand.u32 4294901760, %v10526_v21  ;;  %v18726_v21 = vld [vmem:[%s26405_s17 + $0x18a] sm:$0xff]  ;;  %v10557_v5 = vand.u32 4294901760, %v10556_v32 }
 0x104   : > { %33581 = vst [vmem:[#allocation175_spill] sm:$0xff] %v27490_v50  ;;  %22537 = vmatprep.mubr.f32.mxu0 %v10497_v24  ;;  %v10546_v24 = vsub.f32 %v27455_v55, %v33586_v44  ;;  %v27512_v10 = vsub.f32 %v10244_v16, %v27490_v50  ;;  %v27517_v44 = vsub.f32 %v10247_v25, %v27495_v47  ;;  %v27519_v55 = vand.u32 4294901760, %v10253_v22 }
 0x105   : > { %21020 = vmatmul.mubr.f32.gmra.mrb[12].mxu1 %v33584_v46  ;;  %v33592_v46 = vld [vmem:[#allocation73_spill] sm:$0xff]  ;;  %v33593_v50 = vand.u32 4294901760, %v27481_v35  ;;  %v33594_v25 = vand.u32 4294901760, %v27488_v36 }
 0x106   : > { %21022 = vmatprep.mubr.f32.mxu1 %v33585_v61  ;;  %33588 = vst [vmem:[#allocation57_spill] sm:$0xff] %v27512_v10  ;;  %v27514_v61 = vand.u32 4294901760, %v10250_v14  ;;  %33590 = vst [vmem:[#allocation177_spill] sm:$0xff] %v27519_v55  ;;  %v10547_v16 = vand.u32 4294901760, %v10546_v24  ;;  %v27540_v32 = vsub.f32 %v10253_v22, %v27519_v55 }
 0x107   : > { %22538 = vmatmul.mubr.f32.gmra.mrb[16].mxu0 %v10507_v31  ;;  %v10259_v31 = vsel %vm352_vm0, %v18725_v13, 0  ;;  %v10576_v63 = vsub.f32 %v27488_v36, %v33594_v25  ;;  %v27536_v13 = vand.u32 4294901760, %v10256_v15  ;;  %v33599_v25 = vld [vmem:[#allocation80_spill] sm:$0xff] }
 0x108   : > { %33589 = vst [vmem:[#allocation61_spill] sm:$0xff] %v27514_v61  ;;  %22540 = vmatprep.mubr.f32.mxu0 %v10517_v8  ;;  %v10566_v8 = vsub.f32 %v27481_v35, %v33593_v50  ;;  %33596 = vst [vmem:[#allocation73_spill] sm:$0xff] %v27540_v32  ;;  %v10262_v50 = vsel %vm352_vm0, %v18726_v21, 0  ;;  %v33602_v21 = vand.u32 4294901760, %v27517_v44 }
 0x109   : > { %21023 = vmatmul.mubr.f32.gmra.mrb[14].mxu1 %v33591_v45  ;;  %v27534_v45 = vsub.f32 %v10250_v14, %v27514_v61  ;;  %33595 = vst [vmem:[#allocation70_spill] sm:$0xff] %v27536_v13  ;;  %v33600_v14 = vand.u32 4294901760, %v27512_v10  ;;  %v27552_v24 = vsub.f32 %v10256_v15, %v27536_v13  ;;  %v27554_v22 = vand.u32 4294901760, %v10262_v50 }
 0x10a   : > { %21025 = vmatprep.mubr.f32.mxu1 %v33592_v46  ;;  %v27542_v46 = vand.u32 4294901760, %v10259_v31  ;;  %v10567_v60 = vand.u32 4294901760, %v10566_v8  ;;  %v10577_v35 = vand.u32 4294901760, %v10576_v63  ;;  %v32500_v8 = vand.u32 4294901760, %v27540_v32 }
 0x10b   : > { %22541 = vmatmul.mubr.f32.gmra.mrb[18].mxu0 %v10527_v3  ;;  %v33598_v3 = vld [vmem:[#allocation76_spill] sm:$0xff]  ;;  %v10586_v36 = vsub.f32 %v27512_v10, %v33600_v14  ;;  %v33604_v14 = vld [vmem:[#allocation85_spill] sm:$0xff]  ;;  %v32505_v63 = vand.u32 4294901760, %v27552_v24  ;;  %v27570_v10 = vsub.f32 %v10262_v50, %v27554_v22 }
 0x10c   : > { %22543 = vmatprep.mubr.f32.mxu0 %v10537_v33  ;;  %33597 = vst [vmem:[#allocation178_spill] sm:$0xff] %v27542_v46  ;;  %v32499_v33 = vand.u32 4294901760, %v27534_v45  ;;  %33601 = vst [vmem:[#allocation76_spill] sm:$0xff] %v27554_v22 }
 0x10d   : > { %21026 = vmatmul.mubr.f32.gmra.mrb[16].mxu1 %v33598_v3  ;;  %v10596_v3 = vsub.f32 %v27517_v44, %v33602_v21  ;;  %v10587_v15 = vand.u32 4294901760, %v10586_v36  ;;  %33605 = vst [vmem:[#allocation80_spill] sm:$0xff] %v27570_v10  ;;  %v33607_v36 = vld [vmem:[#allocation96_spill] sm:$0xff]  ;;  %v32503_v50 = vand.u32 4294901760, %v27570_v10 }
 0x10e   : > { %21028 = vmatprep.mubr.f32.mxu1 %v33599_v25  ;;  %v33603_v25 = vld [vmem:[#allocation84_spill] sm:$0xff] }
 0x10f   : > { %22544 = vmatmul.mubr.f32.gmra.mrb[20].mxu0 %v10547_v16  ;;  %v27561_v16 = vsub.f32 %v10259_v31, %v27542_v46  ;;  %v10597_v21 = vand.u32 4294901760, %v10596_v3  ;;  %v10616_v31 = vsub.f32 %v27540_v32, %v32500_v8  ;;  %v33608_v8 = vld [vmem:[#allocation100_spill] sm:$0xff] }
 0x110   : > { %22546 = vmatprep.mubr.f32.mxu0 %v10557_v5  ;;  %v10606_v5 = vsub.f32 %v27534_v45, %v32499_v33  ;;  %v10626_v33 = vsub.f32 %v27552_v24, %v32505_v63  ;;  %v33609_v32 = vld [vmem:[#allocation104_spill] sm:$0xff]  ;;  %v33631_v63 = vld [vmem:[#allocation79_spill] sm:$0xff] }
 0x111   : > { %21029 = vmatmul.mubr.f32.gmra.mrb[18].mxu1 %v33603_v25  ;;  %v32504_v25 = vand.u32 4294901760, %v27561_v16 }
 0x112   : > { %21031 = vmatprep.mubr.f32.mxu1 %v33604_v14  ;;  %v33606_v14 = vld [vmem:[#allocation92_spill] sm:$0xff] }
 0x113   : > { %22547 = vmatmul.mubr.f32.gmra.mrb[22].mxu0 %v10567_v60  ;;  %v10607_v60 = vand.u32 4294901760, %v10606_v5  ;;  %v10636_v3 = vsub.f32 %v27561_v16, %v32504_v25  ;;  %v33630_v25 = vld [vmem:[#allocation174_spill] sm:$0xff] }
 0x114   : > { %22549 = vmatprep.mubr.f32.mxu0 %v10577_v35  ;;  %v10617_v35 = vand.u32 4294901760, %v10616_v31 }
 0x115   : > { %21032 = vmatmul.mubr.f32.gmra.mrb[20].mxu1 %v33606_v14  ;;  %v10627_v14 = vand.u32 4294901760, %v10626_v33  ;;  %v10637_v5 = vand.u32 4294901760, %v10636_v3  ;;  %v33618_v33 = vld [vmem:[#allocation49_spill] sm:$0xff]  ;;  %v33621_v3 = vld [vmem:[#allocation58_spill] sm:$0xff] }
 0x116   : > { %21034 = vmatprep.mubr.f32.mxu1 %v33607_v36  ;;  %v33610_v36 = vld [vmem:[#allocation108_spill] sm:$0xff] }
 0x117   : > { %22550 = vmatmul.mubr.f32.gmra.mrb[24].mxu0 %v10587_v15  ;;  %v10646_v15 = vsub.f32 %v27570_v10, %v32503_v50  ;;  %v33629_v50 = vld [vmem:[#allocation173_spill] sm:$0xff] }
 0x118   : > { %22552 = vmatprep.mubr.f32.mxu0 %v10597_v21  ;;  %v33611_v21 = vld [vmem:[#allocation109_spill] sm:$0xff] }
 0x119   : > { %21035 = vmatmul.mubr.f32.gmra.mrb[22].mxu1 %v33608_v8  ;;  %v10647_v31 = vand.u32 4294901760, %v10646_v15  ;;  %v33612_v8 = vld [vmem:[#allocation118_spill] sm:$0xff]  ;;  %v33623_v15 = vld [vmem:[#allocation60_spill] sm:$0xff] }
 0x11a   : > { %21037 = vmatprep.mubr.f32.mxu1 %v33609_v32  ;;  %v27603_v32 = vld [vmem:[%s32229_s1] sm:$0xff] }
 0x11b   : > { %22553 = vmatmul.mubr.f32.gmra.mrb[26].mxu0 %v10607_v60  ;;  %v33619_v60 = vld [vmem:[#allocation168_spill] sm:$0xff] }
 0x11c   : > { %22555 = vmatprep.mubr.f32.mxu0 %v10617_v35  ;;  %v33620_v35 = vld [vmem:[#allocation55_spill] sm:$0xff] }
 0x11d   : > { %21038 = vmatmul.mubr.f32.gmra.mrb[24].mxu1 %v33610_v36  ;;  %v33625_v36 = vld [vmem:[#allocation30_spill] sm:$0xff] }
 0x11e   : > { %21040 = vmatprep.mubr.f32.mxu1 %v33611_v21  ;;  %v33626_v21 = vld [vmem:[#allocation40_spill] sm:$0xff] }
 0x11f   : > { %22556 = vmatmul.mubr.f32.gmra.mrb[28].mxu0 %v10627_v14  ;;  %v33622_v14 = vld [vmem:[#allocation170_spill] sm:$0xff] }
 0x120   : > { %22558 = vmatprep.mubr.f32.mxu0 %v10637_v5  ;;  %v33624_v5 = vld [vmem:[#allocation63_spill] sm:$0xff] }
 0x121   : > { %21041 = vmatmul.mubr.f32.gmra.mrb[26].mxu1 %v26896_v57  ;;  %v27608_v57 = vld [vmem:[%s32229_s1 + $0x8] sm:$0xff] }
 0x122   : > { %21043 = vmatprep.mubr.f32.mxu1 %v33612_v8  ;;  %v33628_v8 = vld [vmem:[#allocation75_spill] sm:$0xff] }
 0x123   : > { %22559 = vmatmul.mubr.f32.gmra.mrb[30].mxu0 %v10647_v31  ;;  %v33627_v31 = vld [vmem:[#allocation72_spill] sm:$0xff] }
 0x124   : > { %22569 = vmatprep.mubr.f32.mxu0 %v27176_v42 }
 0x125   : > { %21044 = vmatmul.mubr.f32.gmra.mrb[28].mxu1 %v26925_v26  ;;  %v2367_v26 = vand.u32 4294901760, %v27608_v57 }
 0x126   : > { %21046 = vmatprep.mubr.f32.mxu1 %v26934_v6  ;;  %v2364_v6 = vand.u32 4294901760, %v27603_v32 }
 0x127   : > { %22570 = vmatmul.mubr.f32.vlgmr.msra.gmra.mrb[0].mxu0 %v27185_v58 }
 0x128   : > { %22572 = vmatprep.mubr.f32.mxu0 %v27191_v28  ;;  %24108 = vmatpush3.bf16.msra.mxu0 %v27113_v27  ;;  %v33615_v27 = vld [vmem:[#allocation37_spill] sm:$0xff]  ;;  %v33657_v28 = vld [vmem:[#allocation146_spill] sm:$0xff] }
 0x129   : > { %21047 = vmatmul.mubr.f32.gmra.mrb[30].mxu1 %v26951_v49  ;;  %24110 = vmatprep.subr.bf16.mxu0 %v27166_v20  ;;  %v27624_v49 = vpack.c.bf16 %v2367_v26, %v2364_v6 }
 0x12a   : > { %21057 = vmatprep.mubr.f32.mxu1 %v26431_v40 }
 0x12b   : > { %22573 = vmatmul.mubr.f32.gmra.mrb[2].mxu0 %v27202_v41  ;;  %33613 = vst [vmem:[#allocation84_spill] sm:$0xff] %v27624_v49 }
 0x12c   : > { %22575 = vmatprep.mubr.f32.mxu0 %v27211_v19  ;;  %24112 = vmatpush3.bf16.msra.mxu0 %v27166_v20  ;;  %v33617_v20 = vld [vmem:[#allocation47_spill] sm:$0xff] }
 0x12d   : > { %21058 = vmatmul.mubr.f32.vlgmr.msra.gmra.mrb[0].mxu1 %v26455_v54  ;;  %24114 = vmatprep.subr.bf16.mxu0 %v27008_v7 }
 0x12e   : > { %23892 = vmatpush3.bf16.msra.mxu1 %v26378_v18  ;;  %21060 = vmatprep.mubr.f32.mxu1 %v26427_v38  ;;  %v33614_v18 = vld [vmem:[#allocation21_spill] sm:$0xff] }
 0x12f   : > { %22576 = vmatmul.mubr.f32.gmra.mrb[4].mxu0 %v27216_v43  ;;  %23894 = vmatprep.subr.bf16.mxu1 %v33467_v12 }
 0x130   : > { %22578 = vmatprep.mubr.f32.mxu0 %v27237_v59 }
 0x131   : > { %21061 = vmatmul.mubr.f32.gmra.mrb[2].mxu1 %v26429_v39 }
 0x132   : > { %21063 = vmatprep.mubr.f32.mxu1 %v26452_v51  ;;  %23896 = vmatpush3.bf16.msra.mxu1 %v33467_v12  ;;  %v33616_v12 = vld [vmem:[#allocation42_spill] sm:$0xff] }
 0x133   : > { %22579 = vmatmul.mubr.f32.gmra.mrb[6].mxu0 %v27254_v11  ;;  %23898 = vmatprep.subr.bf16.mxu1 %v27624_v49 }
 0x134   : > { %22581 = vmatprep.mubr.f32.mxu0 %v27268_v17  ;;  %v33653_v17 = vld [vmem:[#allocation135_spill] sm:$0xff] }
 0x135   : > { %21064 = vmatmul.mubr.f32.gmra.mrb[4].mxu1 %v26472_v62  ;;  %v33654_v11 = vand.u32 4294901760, %v33653_v17  ;;  %v33661_v17 = vld [vmem:[#allocation155_spill] sm:$0xff] }
 0x136   : > { %21066 = vmatprep.mubr.f32.mxu1 %v33614_v18 }
 0x137   : > { %22582 = vmatmul.mubr.f32.gmra.mrb[8].mxu0 %v27284_v0 }
 0x138   : > { %22584 = vmatprep.mubr.f32.mxu0 %v27286_v23  ;;  %v33651_v23 = vld [vmem:[#allocation134_spill] sm:$0xff] }
 0x139   : > { %21067 = vmatmul.mubr.f32.gmra.mrb[6].mxu1 %v26494_v9  ;;  %v33652_v0 = vand.u32 4294901760, %v33651_v23  ;;  %v33664_v23 = vld [vmem:[#allocation160_spill] sm:$0xff] }
 0x13a   : > { %21069 = vmatprep.mubr.f32.mxu1 %v26526_v52 }
 0x13b   : > { %22585 = vmatmul.mubr.f32.gmra.mrb[10].mxu0 %v27305_v48  ;;  %v33650_v48 = vld [vmem:[#allocation136_spill] sm:$0xff]  ;;  %v27712_v59 = vpack.c.bf16 %v33654_v11, %v33652_v0  ;;  %v33659_v0 = vld [vmem:[#allocation150_spill] sm:$0xff] }
 0x13c   : > { %22587 = vmatprep.mubr.f32.mxu0 %v27320_v30  ;;  %v33649_v30 = vld [vmem:[#allocation117_spill] sm:$0xff]  ;;  %v33658_v11 = vld [vmem:[#allocation148_spill] sm:$0xff] }
 0x13d   : > { %21070 = vmatmul.mubr.f32.gmra.mrb[8].mxu1 %v26537_v1 }
 0x13e   : > { %21072 = vmatprep.mubr.f32.mxu1 %v26539_v2 }
 0x13f   : > { %22588 = vmatmul.mubr.f32.gmra.mrb[12].mxu0 %v27332_v34  ;;  %v33648_v34 = vld [vmem:[#allocation142_spill] sm:$0xff] }
 0x140   : > { %22590 = vmatprep.mubr.f32.mxu0 %v27334_v53 }
 0x141   : > { %21073 = vmatmul.mubr.f32.gmra.mrb[10].mxu1 %v33615_v27 }
 0x142   : > { %21075 = vmatprep.mubr.f32.mxu1 %v33616_v12 }
 0x143   : > { %22591 = vmatmul.mubr.f32.gmra.mrb[14].mxu0 %v27364_v37 }
 0x144   : > { %22593 = vmatprep.mubr.f32.mxu0 %v27374_v4  ;;  %v33642_v4 = vld [vmem:[#allocation138_spill] sm:$0xff] }
 0x145   : > { %21076 = vmatmul.mubr.f32.gmra.mrb[12].mxu1 %v33617_v20 }
 0x146   : > { %21078 = vmatprep.mubr.f32.mxu1 %v33618_v33 }
 0x147   : > { %22594 = vmatmul.mubr.f32.gmra.mrb[16].mxu0 %v27390_v29  ;;  %v33641_v29 = vld [vmem:[#allocation105_spill] sm:$0xff] }
 0x148   : > { %22596 = vmatprep.mubr.f32.mxu0 %v33619_v60  ;;  %v33634_v60 = vld [vmem:[#allocation87_spill] sm:$0xff] }
 0x149   : > { %21079 = vmatmul.mubr.f32.gmra.mrb[14].mxu1 %v33620_v35 }
 0x14a   : > { %21081 = vmatprep.mubr.f32.mxu1 %v33621_v3 }
 0x14b   : > { %22597 = vmatmul.mubr.f32.gmra.mrb[18].mxu0 %v27417_v56  ;;  %v33632_v56 = vld [vmem:[#allocation82_spill] sm:$0xff] }
 0x14c   : > { %22599 = vmatprep.mubr.f32.mxu0 %v33622_v14  ;;  %v33633_v14 = vld [vmem:[#allocation175_spill] sm:$0xff] }
 0x14d   : > { %21082 = vmatmul.mubr.f32.gmra.mrb[16].mxu1 %v33623_v15 }
 0x14e   : > { %21084 = vmatprep.mubr.f32.mxu1 %v33624_v5 }
 0x14f   : > { %22600 = vmatmul.mubr.f32.gmra.mrb[20].mxu0 %v33625_v36  ;;  %v33635_v36 = vld [vmem:[#allocation89_spill] sm:$0xff] }
 0x150   : > { %22602 = vmatprep.mubr.f32.mxu0 %v33626_v21  ;;  %v33636_v21 = vld [vmem:[#allocation94_spill] sm:$0xff] }
 0x151   : > { %21085 = vmatmul.mubr.f32.gmra.mrb[18].mxu1 %v33627_v31 }
 0x152   : > { %21087 = vmatprep.mubr.f32.mxu1 %v33628_v8 }
 0x153   : > { %22603 = vmatmul.mubr.f32.gmra.mrb[22].mxu0 %v33629_v50  ;;  %v33637_v50 = vld [vmem:[#allocation95_spill] sm:$0xff] }
 0x154   : > { %22605 = vmatprep.mubr.f32.mxu0 %v33630_v25  ;;  %v27677_v25 = vsub.f32 %v27603_v32, %v2364_v6  ;;  %v313_v32 = vld [vmem:[%s32229_s1 + $0x10] sm:$0xff] }
 0x155   : > { %21088 = vmatmul.mubr.f32.gmra.mrb[20].mxu1 %v33631_v63  ;;  %v33643_v6 = vld [vmem:[#allocation111_spill] sm:$0xff] }
 0x156   : > { %21090 = vmatprep.mubr.f32.mxu1 %v33632_v56  ;;  %33638 = vst [vmem:[#allocation85_spill] sm:$0xff] %v27677_v25 }
 0x157   : > { %22606 = vmatmul.mubr.f32.gmra.mrb[24].mxu0 %v33633_v14  ;;  %v27680_v14 = vsub.f32 %v27608_v57, %v2367_v26  ;;  %v314_v57 = vld [vmem:[%s32229_s1 + $0x18] sm:$0xff]  ;;  %v33644_v26 = vld [vmem:[#allocation113_spill] sm:$0xff] }
 0x158   : > { %22608 = vmatprep.mubr.f32.mxu0 %v27495_v47  ;;  %v33640_v47 = vld [vmem:[#allocation103_spill] sm:$0xff] }
 0x159   : > { %21091 = vmatmul.mubr.f32.gmra.mrb[22].mxu1 %v33634_v60  ;;  %33639 = vst [vmem:[#allocation92_spill] sm:$0xff] %v27680_v14  ;;  %v33647_v37 = vand.u32 4294901760, %v27680_v14 }
 0x15a   : > { %21093 = vmatprep.mubr.f32.mxu1 %v33635_v36 }
 0x15b   : > { %22609 = vmatmul.mubr.f32.gmra.mrb[26].mxu0 %v27514_v61  ;;  %v33646_v61 = vand.u32 4294901760, %v27677_v25  ;;  %v2763_v53 = vsub.f32 %v27680_v14, %v33647_v37  ;;  %v33655_v37 = vld [vmem:[#allocation145_spill] sm:$0xff] }
 0x15c   : > { %22611 = vmatprep.mubr.f32.mxu0 %v27519_v55  ;;  %v2373_v55 = vand.u32 4294901760, %v314_v57 }
 0x15d   : > { %21094 = vmatmul.mubr.f32.gmra.mrb[24].mxu1 %v33636_v21  ;;  %v2764_v41 = vand.u32 4294901760, %v2763_v53  ;;  %v33665_v53 = vld [vmem:[#allocation163_spill] sm:$0xff] }
 0x15e   : > { %21096 = vmatprep.mubr.f32.mxu1 %v33637_v50 }
 0x15f   : > { %22612 = vmatmul.mubr.f32.gmra.mrb[28].mxu0 %v27536_v13  ;;  %v2756_v13 = vsub.f32 %v27677_v25, %v33646_v61  ;;  %v27717_v61 = vpack.c.bf16 %v27680_v14, %v27677_v25 }
 0x160   : > { %22614 = vmatprep.mubr.f32.mxu0 %v27542_v46  ;;  %v33645_v46 = vld [vmem:[#allocation140_spill] sm:$0xff] }
 0x161   : > { %21097 = vmatmul.mubr.f32.gmra.mrb[26].mxu1 %v33640_v47  ;;  %v2757_v19 = vand.u32 4294901760, %v2756_v13  ;;  %v33666_v13 = vld [vmem:[#allocation16_spill] sm:$0xff] }
 0x162   : > { %21099 = vmatprep.mubr.f32.mxu1 %v33641_v29 }
 0x163   : > { %22615 = vmatmul.mubr.f32.gmra.mrb[30].mxu0 %v27554_v22  ;;  %v2370_v22 = vand.u32 4294901760, %v313_v32 }
 0x164   : > { %22625 = vmatprep.mubr.f32.mxu0 %v33642_v4 }
 0x165   : > { %21100 = vmatmul.mubr.f32.gmra.mrb[28].mxu1 %v33643_v6  ;;  %v27720_v43 = vpack.c.bf16 %v2373_v55, %v2370_v22 }
 0x166   : > { %21102 = vmatprep.mubr.f32.mxu1 %v33644_v26 }
 0x167   : > { %22626 = vmatmul.mubr.f32.vlgmr.msra.gmra.mrb[0].mxu0 %v33645_v46  ;;  %33656 = vst [vmem:[#allocation96_spill] sm:$0xff] %v27720_v43 }
 0x168   : > { %22628 = vmatprep.mubr.f32.mxu0 %v33648_v34  ;;  %24116 = vmatpush3.bf16.msra.mxu0 %v27008_v7 }
 0x169   : > { %21103 = vmatmul.mubr.f32.gmra.mrb[30].mxu1 %v33649_v30  ;;  %24118 = vmatprep.subr.bf16.mxu0 %v33650_v48 }
 0x16a   : > { %21113 = vmatprep.mubr.f32.mxu1 %v26431_v40  ;;  %v27730_v40 = vpack.c.bf16 %v2764_v41, %v2757_v19  ;;  %v33662_v41 = vld [vmem:[#allocation157_spill] sm:$0xff]  ;;  %v33663_v19 = vld [vmem:[#allocation158_spill] sm:$0xff] }
 0x16b   : > { %22629 = vmatmul.mubr.f32.gmra.mrb[2].mxu0 %v33655_v37 }
 0x16c   : > { %22631 = vmatprep.mubr.f32.mxu0 %v33657_v28  ;;  %24120 = vmatpush3.bf16.msra.mxu0 %v33650_v48 }
 0x16d   : > { %21114 = vmatmul.mubr.f32.vlgmr.msra.gmra.mrb[0].mxu1 %v26455_v54  ;;  %24122 = vmatprep.subr.bf16.mxu0 %v27712_v59  ;;  %v33660_v54 = vld [vmem:[#allocation152_spill] sm:$0xff] }
 0x16e   : > { %23900 = vmatpush3.bf16.msra.mxu1 %v27624_v49  ;;  %21116 = vmatprep.mubr.f32.mxu1 %v26427_v38  ;;  %v33682_v38 = vld [vmem:[#allocation57_spill] sm:$0xff] }
 0x16f   : > { %22632 = vmatmul.mubr.f32.gmra.mrb[4].mxu0 %v33658_v11  ;;  %23902 = vmatprep.subr.bf16.mxu1 %v27720_v43 }
 0x170   : > { %22634 = vmatprep.mubr.f32.mxu0 %v33659_v0 }
 0x171   : > { %21117 = vmatmul.mubr.f32.gmra.mrb[2].mxu1 %v26429_v39 }
 0x172   : > { %21119 = vmatprep.mubr.f32.mxu1 %v26452_v51  ;;  %23904 = vmatpush3.bf16.msra.mxu1 %v27720_v43  ;;  %v27761_v51 = vsub.f32 %v314_v57, %v2373_v55  ;;  %v279_v55 = vld [vmem:[%s26405_s17] sm:$0xff] }
 0x173   : > { %22635 = vmatmul.mubr.f32.gmra.mrb[6].mxu0 %v33660_v54  ;;  %23906 = vmatprep.subr.bf16.mxu1 %v27730_v40  ;;  %v2268_v57 = vsel %vm352_vm0, %v279_v55, 0  ;;  %v283_v55 = vld [vmem:[%s26405_s17 + $0x30] sm:$0xff]  ;;  %v33686_v43 = vld [vmem:[#allocation73_spill] sm:$0xff] }
 0x174   : > { %22637 = vmatprep.mubr.f32.mxu0 %v33661_v17  ;;  %33673 = vst [vmem:[#allocation104_spill] sm:$0xff] %v27761_v51 }
 0x175   : > { %21120 = vmatmul.mubr.f32.gmra.mrb[4].mxu1 %v26472_v62  ;;  %v33667_v62 = vld [vmem:[#allocation164_spill] sm:$0xff] }
 0x176   : > { %21122 = vmatprep.mubr.f32.mxu1 %v33614_v18  ;;  %v33668_v18 = vld [vmem:[#allocation17_spill] sm:$0xff] }
 0x177   : > { %22638 = vmatmul.mubr.f32.gmra.mrb[8].mxu0 %v33662_v41 }
 0x178   : > { %22640 = vmatprep.mubr.f32.mxu0 %v33663_v19 }
 0x179   : > { %21123 = vmatmul.mubr.f32.gmra.mrb[6].mxu1 %v26494_v9  ;;  %v33669_v9 = vld [vmem:[#allocation167_spill] sm:$0xff] }
 0x17a   : > { %21125 = vmatprep.mubr.f32.mxu1 %v26526_v52  ;;  %v27759_v52 = vsub.f32 %v313_v32, %v2370_v22  ;;  %v33677_v22 = vld [vmem:[#allocation43_spill] sm:$0xff]  ;;  %v33678_v32 = vld [vmem:[#allocation44_spill] sm:$0xff] }
 0x17b   : > { %22641 = vmatmul.mubr.f32.gmra.mrb[10].mxu0 %v33664_v23 }
 0x17c   : > { %22643 = vmatprep.mubr.f32.mxu0 %v33665_v53  ;;  %33672 = vst [vmem:[#allocation100_spill] sm:$0xff] %v27759_v52  ;;  %v33695_v58 = vand.u32 4294901760, %v27759_v52 }
 0x17d   : > { %21126 = vmatmul.mubr.f32.gmra.mrb[8].mxu1 %v26537_v1  ;;  %v33670_v1 = vld [vmem:[#allocation26_spill] sm:$0xff] }
 0x17e   : > { %21128 = vmatprep.mubr.f32.mxu1 %v26539_v2  ;;  %v33671_v2 = vld [vmem:[#allocation169_spill] sm:$0xff] }
 0x17f   : > { %22644 = vmatmul.mubr.f32.gmra.mrb[12].mxu0 %v33666_v13 }
 0x180   : > { %22646 = vmatprep.mubr.f32.mxu0 %v33667_v62 }
 0x181   : > { %21129 = vmatmul.mubr.f32.gmra.mrb[10].mxu1 %v33615_v27  ;;  %v281_v27 = vld [vmem:[%s26405_s17 + $0x18] sm:$0xff] }
 0x182   : > { %21131 = vmatprep.mubr.f32.mxu1 %v33616_v12  ;;  %v27767_v12 = vpack.c.bf16 %v27761_v51, %v27759_v52 }
 0x183   : > { %22647 = vmatmul.mubr.f32.gmra.mrb[14].mxu0 %v33668_v18 }
 0x184   : > { %22649 = vmatprep.mubr.f32.mxu0 %v33669_v9  ;;  %33674 = vst [vmem:[#allocation108_spill] sm:$0xff] %v27767_v12 }
 0x185   : > { %21132 = vmatmul.mubr.f32.gmra.mrb[12].mxu1 %v33617_v20  ;;  %v33675_v20 = vld [vmem:[#allocation171_spill] sm:$0xff] }
 0x186   : > { %21134 = vmatprep.mubr.f32.mxu1 %v33618_v33  ;;  %v33676_v33 = vld [vmem:[#allocation172_spill] sm:$0xff] }
 0x187   : > { %22650 = vmatmul.mubr.f32.gmra.mrb[16].mxu0 %v33670_v1 }
 0x188   : > { %22652 = vmatprep.mubr.f32.mxu0 %v33671_v2 }
 0x189   : > { %21135 = vmatmul.mubr.f32.gmra.mrb[14].mxu1 %v33620_v35  ;;  %v33679_v35 = vld [vmem:[#allocation50_spill] sm:$0xff] }
 0x18a   : > { %21137 = vmatprep.mubr.f32.mxu1 %v33621_v3  ;;  %v280_v3 = vld [vmem:[%s26405_s17 + $0x8] sm:$0xff] }
 0x18b   : > { %22653 = vmatmul.mubr.f32.gmra.mrb[18].mxu0 %v33675_v20  ;;  %v2271_v39 = vsel %vm352_vm0, %v280_v3, 0 }
 0x18c   : > { %22655 = vmatprep.mubr.f32.mxu0 %v33676_v33  ;;  %v27793_v14 = vand.u32 4294901760, %v2271_v39 }
 0x18d   : > { %21138 = vmatmul.mubr.f32.gmra.mrb[16].mxu1 %v33623_v15  ;;  %v33680_v15 = vld [vmem:[#allocation53_spill] sm:$0xff] }
 0x18e   : > { %21140 = vmatprep.mubr.f32.mxu1 %v33624_v5  ;;  %v27784_v5 = vand.u32 4294901760, %v2268_v57  ;;  %33683 = vst [vmem:[#allocation118_spill] sm:$0xff] %v27793_v14  ;;  %v27808_v49 = vsub.f32 %v2271_v39, %v27793_v14 }
 0x18f   : > { %22656 = vmatmul.mubr.f32.gmra.mrb[20].mxu0 %v33677_v22 }
 0x190   : > { %22658 = vmatprep.mubr.f32.mxu0 %v33678_v32  ;;  %33681 = vst [vmem:[#allocation109_spill] sm:$0xff] %v27784_v5  ;;  %33687 = vst [vmem:[#allocation142_spill] sm:$0xff] %v27808_v49 }
 0x191   : > { %21141 = vmatmul.mubr.f32.gmra.mrb[18].mxu1 %v33627_v31  ;;  %v2274_v31 = vsel %vm352_vm0, %v281_v27, 0  ;;  %v2280_v27 = vsel %vm352_vm0, %v283_v55, 0 }
 0x192   : > { %21143 = vmatprep.mubr.f32.mxu1 %v33628_v8  ;;  %v282_v8 = vld [vmem:[%s26405_s17 + $0x20] sm:$0xff]  ;;  %v27799_v25 = vand.u32 4294901760, %v2274_v31  ;;  %v27818_v55 = vand.u32 4294901760, %v2280_v27 }
 0x193   : > { %22659 = vmatmul.mubr.f32.gmra.mrb[22].mxu0 %v33679_v35  ;;  %v2277_v3 = vsel %vm352_vm0, %v282_v8, 0 }
 0x194   : > { %22661 = vmatprep.mubr.f32.mxu0 %v33680_v15  ;;  %33685 = vst [vmem:[#allocation140_spill] sm:$0xff] %v27799_v25  ;;  %33690 = vst [vmem:[#allocation145_spill] sm:$0xff] %v27818_v55 }
 0x195   : > { %21144 = vmatmul.mubr.f32.gmra.mrb[20].mxu1 %v33631_v63  ;;  %v27797_v63 = vsub.f32 %v2268_v57, %v27784_v5  ;;  %v285_v57 = vld [vmem:[%s26405_s17 + $0x48] sm:$0xff]  ;;  %v286_v5 = vld [vmem:[%s26405_s17 + $0x50] sm:$0xff] }
 0x196   : > { %21146 = vmatprep.mubr.f32.mxu1 %v33632_v56  ;;  %v284_v56 = vld [vmem:[%s26405_s17 + $0x38] sm:$0xff]  ;;  %v2286_v39 = vsel %vm352_vm0, %v285_v57, 0  ;;  %v2289_v48 = vsel %vm352_vm0, %v286_v5, 0  ;;  %v33697_v5 = vand.u32 4294901760, %v33642_v4 }
 0x197   : > { %22662 = vmatmul.mubr.f32.gmra.mrb[24].mxu0 %v33682_v38  ;;  %33684 = vst [vmem:[#allocation138_spill] sm:$0xff] %v27797_v63  ;;  %v2283_v12 = vsel %vm352_vm0, %v284_v56, 0  ;;  %v33692_v57 = vand.u32 4294901760, %v27797_v63  ;;  %v27866_v42 = vand.u32 4294901760, %v2289_v48 }
 0x198   : > { %22664 = vmatprep.mubr.f32.mxu0 %v27517_v44  ;;  %v27832_v56 = vand.u32 4294901760, %v2283_v12 }
 0x199   : > { %21147 = vmatmul.mubr.f32.gmra.mrb[22].mxu1 %v33634_v60  ;;  %v27810_v60 = vand.u32 4294901760, %v2277_v3  ;;  %v2435_v14 = vsub.f32 %v27797_v63, %v33692_v57  ;;  %v2770_v57 = vsub.f32 %v27759_v52, %v33695_v58  ;;  %33699 = vst [vmem:[#allocation152_spill] sm:$0xff] %v27866_v42 }
 0x19a   : > { %21149 = vmatprep.mubr.f32.mxu1 %v33635_v36  ;;  %v27816_v36 = vsub.f32 %v2274_v31, %v27799_v25  ;;  %33691 = vst [vmem:[#allocation146_spill] sm:$0xff] %v27832_v56  ;;  %v33696_v25 = vand.u32 4294901760, %v27761_v51 }
 0x19b   : > { %22665 = vmatmul.mubr.f32.gmra.mrb[26].mxu0 %v27534_v45  ;;  %33688 = vst [vmem:[#allocation134_spill] sm:$0xff] %v27810_v60  ;;  %v27830_v8 = vsub.f32 %v2277_v3, %v27810_v60  ;;  %v27845_v3 = vand.u32 4294901760, %v2286_v39  ;;  %v289_v60 = vld [vmem:[%s26405_s17 + $0x78] sm:$0xff]  ;;  %v2436_v58 = vand.u32 4294901760, %v2435_v14 }
 0x19c   : > { %22667 = vmatprep.mubr.f32.mxu0 %v33686_v43  ;;  %33689 = vst [vmem:[#allocation135_spill] sm:$0xff] %v27816_v36 }
 0x19d   : > { %21150 = vmatmul.mubr.f32.gmra.mrb[24].mxu1 %v33636_v21  ;;  %v27841_v21 = vsub.f32 %v2280_v27, %v27818_v55  ;;  %33694 = vst [vmem:[#allocation150_spill] sm:$0xff] %v27845_v3  ;;  %v2777_v27 = vsub.f32 %v27761_v51, %v33696_v25  ;;  %v27864_v55 = vsub.f32 %v2283_v12, %v27832_v56  ;;  %v33700_v25 = vand.u32 4294901760, %v27816_v36  ;;  %v33702_v51 = vld [vmem:[#allocation19_spill] sm:$0xff] }
 0x19e   : > { %21152 = vmatprep.mubr.f32.mxu1 %v33637_v50  ;;  %v287_v50 = vld [vmem:[%s26405_s17 + $0x60] sm:$0xff]  ;;  %v33703_v52 = vand.u32 4294901760, %v33702_v51  ;;  %v27881_v12 = vsub.f32 %v2286_v39, %v27845_v3  ;;  %v33707_v56 = vand.u32 4294901760, %v33645_v46  ;;  %v2771_v51 = vand.u32 4294901760, %v2770_v57  ;;  %v291_v46 = vld [vmem:[%s26405_s17 + $0x90] sm:$0xff] }
 0x19f   : > { %22668 = vmatmul.mubr.f32.gmra.mrb[28].mxu0 %v27552_v24  ;;  %33693 = vst [vmem:[#allocation148_spill] sm:$0xff] %v27841_v21  ;;  %v2292_v31 = vsel %vm352_vm0, %v287_v50, 0  ;;  %v2455_v4 = vsub.f32 %v27816_v36, %v33700_v25  ;;  %v2298_v25 = vsel %vm352_vm0, %v289_v60, 0  ;;  %v290_v36 = vld [vmem:[%s26405_s17 + $0x80] sm:$0xff]  ;;  %v27900_v60 = vsub.f32 %v2289_v48, %v27866_v42 }
 0x1a0   : > { %22670 = vmatprep.mubr.f32.mxu0 %v27561_v16 }
 0x1a1   : > { %21153 = vmatmul.mubr.f32.gmra.mrb[26].mxu1 %v33640_v47  ;;  %v288_v47 = vld [vmem:[%s26405_s17 + $0x68] sm:$0xff]  ;;  %v2456_v57 = vand.u32 4294901760, %v2455_v4 }
 0x1a2   : > { %21155 = vmatprep.mubr.f32.mxu1 %v33641_v29  ;;  %v33698_v29 = vand.u32 4294901760, %v27808_v49  ;;  %v2295_v14 = vsel %vm352_vm0, %v288_v47, 0  ;;  %v27897_v47 = vand.u32 4294901760, %v27864_v55 }
 0x1a3   : > { %22671 = vmatmul.mubr.f32.gmra.mrb[30].mxu0 %v27570_v10  ;;  %v2778_v10 = vand.u32 4294901760, %v2777_v27 }
 0x1a4   : > { %22681 = vmatprep.mubr.f32.mxu0 %v33697_v5  ;;  %v2445_v63 = vsub.f32 %v27808_v49, %v33698_v29  ;;  %v27873_v5 = vand.u32 4294901760, %v27841_v21  ;;  %v33704_v29 = vld [vmem:[#allocation9_spill] sm:$0xff]  ;;  %33710 = vst [vmem:[#allocation158_spill] sm:$0xff] %v27897_v47 }
 0x1a5   : > { %21156 = vmatmul.mubr.f32.gmra.mrb[28].mxu1 %v33643_v6  ;;  %v33705_v49 = vand.u32 4294901760, %v33704_v29  ;;  %v27883_v6 = vand.u32 4294901760, %v2292_v31  ;;  %v33708_v29 = vand.u32 4294901760, %v33648_v34  ;;  %v27904_v34 = vand.u32 4294901760, %v2295_v14 }
 0x1a6   : > { %33701 = vst [vmem:[#allocation155_spill] sm:$0xff] %v27873_v5  ;;  %21158 = vmatprep.mubr.f32.mxu1 %v33644_v26  ;;  %v2446_v39 = vand.u32 4294901760, %v2445_v63  ;;  %v2475_v27 = vsub.f32 %v27841_v21, %v27873_v5  ;;  %v293_v63 = vld [vmem:[%s26405_s17 + $0xa8] sm:$0xff]  ;;  %v2304_v26 = vsel %vm352_vm0, %v291_v46, 0  ;;  %v2485_v5 = vsub.f32 %v27864_v55, %v27897_v47 }
 0x1a7   : > { %v24125_v50 = vpack.c.bf16 %v33705_v49, %v33703_v52  ;;  %33706 = vst [vmem:[#allocation157_spill] sm:$0xff] %v27883_v6  ;;  %22682 = vmatmul.mubr.f32.vlgmr.msra.gmra.mrb[0].mxu0 %v33707_v56  ;;  %v33709_v52 = vand.u32 4294901760, %v27830_v8  ;;  %33711 = vst [vmem:[#allocation160_spill] sm:$0xff] %v27904_v34  ;;  %v27906_v56 = vand.u32 4294901760, %v2298_v25  ;;  %v27915_v48 = vsub.f32 %v2292_v31, %v27883_v6 }
 0x1a8   : > { %22684 = vmatprep.mubr.f32.mxu0 %v33708_v29  ;;  %24124 = vmatpush3.bf16.msra.mxu0 %v27712_v59  ;;  %v2301_v59 = vsel %vm352_vm0, %v290_v36, 0  ;;  %v27912_v29 = vand.u32 4294901760, %v27881_v12  ;;  %v23909_v36 = vpack.c.bf16 %v2778_v10, %v2771_v51  ;;  %v27927_v21 = vand.u32 4294901760, %v27900_v60 }
 0x1a9   : > { %v2465_v49 = vsub.f32 %v27830_v8, %v33709_v52  ;;  %21159 = vmatmul.mubr.f32.gmra.mrb[30].mxu1 %v33649_v30  ;;  %33712 = vst [vmem:[#allocation163_spill] sm:$0xff] %v27906_v56  ;;  %24126 = vmatprep.subr.bf16.mxu0 %v24125_v50  ;;  %v292_v52 = vld [vmem:[%s26405_s17 + $0x98] sm:$0xff]  ;;  %v33714_v30 = vand.u32 4294901760, %v33655_v37  ;;  %v27929_v31 = vand.u32 4294901760, %v2301_v59  ;;  %v27935_v10 = vsub.f32 %v2298_v25, %v27906_v56 }
 0x1aa   : > { %21169 = vmatprep.mubr.f32.mxu1 %v2436_v58  ;;  %33713 = vst [vmem:[#allocation16_spill] sm:$0xff] %v27912_v29  ;;  %v33715_v58 = vand.u32 4294901760, %v33657_v28  ;;  %33716 = vst [vmem:[#allocation164_spill] sm:$0xff] %v27927_v21  ;;  %v2307_v28 = vsel %vm352_vm0, %v292_v52, 0  ;;  %v2310_v37 = vsel %vm352_vm0, %v293_v63, 0  ;;  %v27941_v51 = vand.u32 4294901760, %v2475_v27 }
 0x1ab   : > { %22685 = vmatmul.mubr.f32.gmra.mrb[2].mxu0 %v33714_v30  ;;  %v2466_v4 = vand.u32 4294901760, %v2465_v49  ;;  %33717 = vst [vmem:[#allocation17_spill] sm:$0xff] %v27929_v31  ;;  %v27932_v30 = vsub.f32 %v2295_v14, %v27904_v34  ;;  %33719 = vst [vmem:[#allocation26_spill] sm:$0xff] %v27935_v10  ;;  %v27946_v14 = vand.u32 4294901760, %v27915_v48  ;;  %v27948_v25 = vand.u32 4294901760, %v2304_v26  ;;  %v294_v49 = vld [vmem:[%s26405_s17 + $0xb0] sm:$0xff] }
 0x1ac   : > { %22687 = vmatprep.mubr.f32.mxu0 %v33715_v58  ;;  %24128 = vmatpush3.bf16.msra.mxu0 %v24125_v50  ;;  %33720 = vst [vmem:[#allocation169_spill] sm:$0xff] %v27941_v51  ;;  %v2495_v50 = vsub.f32 %v27881_v12, %v27912_v29  ;;  %v33723_v46 = vand.u32 4294901760, %v33658_v11  ;;  %v27960_v27 = vand.u32 4294901760, %v2307_v28  ;;  %v27962_v52 = vand.u32 4294901760, %v2310_v37  ;;  %v295_v63 = vld [vmem:[%s26405_s17 + $0xc0] sm:$0xff]  ;;  %v296_v29 = vld [vmem:[%s26405_s17 + $0xc8] sm:$0xff] }
 0x1ad   : > { %21170 = vmatmul.mubr.f32.vlgmr.msra.gmra.mrb[0].mxu1 %v2446_v39  ;;  %33718 = vst [vmem:[#allocation167_spill] sm:$0xff] %v27932_v30  ;;  %24130 = vmatprep.subr.bf16.mxu0 %v27008_v7  ;;  %33721 = vst [vmem:[#allocation171_spill] sm:$0xff] %v27946_v14  ;;  %v33724_v39 = vand.u32 4294901760, %v33659_v0  ;;  %v2505_v11 = vsub.f32 %v27900_v60, %v27927_v21  ;;  %v27968_v58 = vand.u32 4294901760, %v27932_v30  ;;  %v27971_v0 = vand.u32 4294901760, %v27935_v10 }
 0x1ae   : > { %23908 = vmatpush3.bf16.msra.mxu1 %v27730_v40  ;;  %21172 = vmatprep.mubr.f32.mxu1 %v2456_v57  ;;  %33722 = vst [vmem:[#allocation172_spill] sm:$0xff] %v27948_v25  ;;  %v27955_v40 = vand.u32 4294901760, %v2485_v5  ;;  %v27958_v57 = vsub.f32 %v2301_v59, %v27929_v31  ;;  %33727 = vst [vmem:[#allocation50_spill] sm:$0xff] %v27960_v27  ;;  %v2313_v5 = vsel %vm352_vm0, %v294_v49, 0  ;;  %v27975_v59 = vand.u32 4294901760, %v2495_v50 }
 0x1af   : > { %22688 = vmatmul.mubr.f32.gmra.mrb[4].mxu0 %v33723_v46  ;;  %23910 = vmatprep.subr.bf16.mxu1 %v23909_v36  ;;  %33728 = vst [vmem:[#allocation53_spill] sm:$0xff] %v27962_v52  ;;  %33729 = vst [vmem:[#allocation57_spill] sm:$0xff] %v27968_v58  ;;  %v2515_v46 = vsub.f32 %v27915_v48, %v27946_v14  ;;  %v2316_v21 = vsel %vm352_vm0, %v295_v63, 0  ;;  %v33733_v49 = vand.u32 4294901760, %v33661_v17  ;;  %v28002_v63 = vand.u32 4294901760, %v2505_v11 }
 0x1b0   : > { %22690 = vmatprep.mubr.f32.mxu0 %v33724_v39  ;;  %33725 = vst [vmem:[#allocation43_spill] sm:$0xff] %v27955_v40  ;;  %33726 = vst [vmem:[#allocation44_spill] sm:$0xff] %v27958_v57  ;;  %v33732_v39 = vand.u32 4294901760, %v33660_v54  ;;  %v27990_v50 = vand.u32 4294901760, %v27958_v57  ;;  %v27993_v14 = vsub.f32 %v2307_v28, %v27960_v27  ;;  %v27998_v54 = vand.u32 4294901760, %v2313_v5 }
 0x1b1   : > { %21173 = vmatmul.mubr.f32.gmra.mrb[2].mxu1 %v2466_v4  ;;  %33730 = vst [vmem:[#allocation73_spill] sm:$0xff] %v27971_v0  ;;  %33731 = vst [vmem:[#allocation19_spill] sm:$0xff] %v27975_v59  ;;  %v27980_v4 = vsub.f32 %v2304_v26, %v27948_v25  ;;  %v27996_v26 = vsub.f32 %v2310_v37, %v27962_v52  ;;  %v2525_v17 = vsub.f32 %v27932_v30, %v27968_v58  ;;  %v298_v58 = vld [vmem:[%s26405_s17 + $0xe0] sm:$0xff] }
 0x1b2   : > { %21175 = vmatprep.mubr.f32.mxu1 %v27941_v51  ;;  %23912 = vmatpush3.bf16.msra.mxu1 %v23909_v36  ;;  %33734 = vst [vmem:[#allocation9_spill] sm:$0xff] %v27990_v50  ;;  %33735 = vst [vmem:[#allocation179_spill] sm:$0xff] %v27993_v14  ;;  %v297_v36 = vld [vmem:[%s26405_s17 + $0xd8] sm:$0xff]  ;;  %v28009_v28 = vand.u32 4294901760, %v2515_v46  ;;  %v2319_v47 = vsel %vm352_vm0, %v296_v29, 0  ;;  %v33742_v11 = vand.u32 4294901760, %v33662_v41  ;;  %v2545_v46 = vsub.f32 %v27958_v57, %v27990_v50 }
 0x1b3   : > { %22691 = vmatmul.mubr.f32.gmra.mrb[6].mxu0 %v33732_v39  ;;  %23914 = vmatprep.subr.bf16.mxu1 %v27717_v61  ;;  %33736 = vst [vmem:[#allocation180_spill] sm:$0xff] %v27996_v26  ;;  %33737 = vst [vmem:[#allocation181_spill] sm:$0xff] %v27998_v54  ;;  %v2535_v39 = vsub.f32 %v27935_v10, %v27971_v0  ;;  %v28012_v37 = vand.u32 4294901760, %v27980_v4  ;;  %v33743_v51 = vand.u32 4294901760, %v33663_v19  ;;  %v28026_v0 = vand.u32 4294901760, %v27993_v14  ;;  %v299_v29 = vld [vmem:[%s26405_s17 + $0xf0] sm:$0xff] }
 0x1b4   : > { %22693 = vmatprep.mubr.f32.mxu0 %v33733_v49  ;;  %33738 = vst [vmem:[#allocation182_spill] sm:$0xff] %v28002_v63  ;;  %33739 = vst [vmem:[#allocation183_spill] sm:$0xff] %v28009_v28  ;;  %v28014_v49 = vand.u32 4294901760, %v2316_v21  ;;  %v28032_v41 = vsub.f32 %v2313_v5, %v27998_v54  ;;  %v2325_v5 = vsel %vm352_vm0, %v298_v58, 0  ;;  %v300_v10 = vld [vmem:[%s26405_s17 + $0xf8] sm:$0xff]  ;;  %v33753_v30 = vand.u32 4294901760, %v33665_v53 }
 0x1b5   : > { %21176 = vmatmul.mubr.f32.gmra.mrb[4].mxu1 %v27955_v40  ;;  %33740 = vst [vmem:[#allocation184_spill] sm:$0xff] %v28012_v37  ;;  %v2322_v40 = vsel %vm352_vm0, %v297_v36, 0  ;;  %33744 = vst [vmem:[#allocation186_spill] sm:$0xff] %v28026_v0  ;;  %v28036_v36 = vand.u32 4294901760, %v2525_v17  ;;  %v28038_v19 = vand.u32 4294901760, %v2535_v39  ;;  %v33752_v17 = vand.u32 4294901760, %v33664_v23 }
 0x1b6   : > { %21178 = vmatprep.mubr.f32.mxu1 %v27975_v59  ;;  %33741 = vst [vmem:[#allocation185_spill] sm:$0xff] %v28014_v49  ;;  %v28029_v59 = vand.u32 4294901760, %v27996_v26  ;;  %33746 = vst [vmem:[#allocation188_spill] sm:$0xff] %v28032_v41  ;;  %v28046_v50 = vsub.f32 %v2316_v21, %v28014_v49  ;;  %v28048_v57 = vand.u32 4294901760, %v2322_v40  ;;  %v2328_v39 = vsel %vm352_vm0, %v299_v29, 0 }
 0x1b7   : > { %22694 = vmatmul.mubr.f32.gmra.mrb[8].mxu0 %v33742_v11  ;;  %33747 = vst [vmem:[#allocation189_spill] sm:$0xff] %v28036_v36  ;;  %33748 = vst [vmem:[#allocation190_spill] sm:$0xff] %v28038_v19  ;;  %v2555_v11 = vsub.f32 %v27980_v4, %v28012_v37  ;;  %v2565_v21 = vsub.f32 %v27993_v14, %v28026_v0  ;;  %v28065_v37 = vand.u32 4294901760, %v28032_v41  ;;  %v28071_v53 = vand.u32 4294901760, %v2325_v5 }
 0x1b8   : > { %22696 = vmatprep.mubr.f32.mxu0 %v33743_v51  ;;  %33745 = vst [vmem:[#allocation187_spill] sm:$0xff] %v28029_v59  ;;  %v28040_v51 = vand.u32 4294901760, %v2319_v47  ;;  %33750 = vst [vmem:[#allocation192_spill] sm:$0xff] %v28046_v50  ;;  %v2575_v58 = vsub.f32 %v27996_v26, %v28029_v59  ;;  %v28082_v59 = vsub.f32 %v2322_v40, %v28048_v57  ;;  %v28084_v0 = vand.u32 4294901760, %v2328_v39  ;;  %v303_v26 = vld [vmem:[%s26405_s17 + $0x120] sm:$0xff] }
 0x1b9   : > { %21179 = vmatmul.mubr.f32.gmra.mrb[6].mxu1 %v28002_v63  ;;  %33751 = vst [vmem:[#allocation193_spill] sm:$0xff] %v28048_v57  ;;  %v301_v63 = vld [vmem:[%s26405_s17 + $0x108] sm:$0xff]  ;;  %33755 = vst [vmem:[#allocation195_spill] sm:$0xff] %v28065_v37  ;;  %v28076_v29 = vand.u32 4294901760, %v2555_v11  ;;  %v2585_v11 = vsub.f32 %v28032_v41, %v28065_v37  ;;  %v33773_v41 = vand.u32 4294901760, %v33669_v9 }
 0x1ba   : > { %33749 = vst [vmem:[#allocation191_spill] sm:$0xff] %v28040_v51  ;;  %21181 = vmatprep.mubr.f32.mxu1 %v28009_v28  ;;  %v28058_v28 = vand.u32 4294901760, %v2545_v46  ;;  %v28069_v23 = vsub.f32 %v2319_v47, %v28040_v51  ;;  %33757 = vst [vmem:[#allocation197_spill] sm:$0xff] %v28071_v53  ;;  %v2334_v46 = vsel %vm352_vm0, %v301_v63, 0  ;;  %v302_v47 = vld [vmem:[%s26405_s17 + $0x110] sm:$0xff]  ;;  %v28092_v63 = vand.u32 4294901760, %v2565_v21 }
 0x1bb   : > { %22697 = vmatmul.mubr.f32.gmra.mrb[10].mxu0 %v33752_v17  ;;  %33758 = vst [vmem:[#allocation198_spill] sm:$0xff] %v28076_v29  ;;  %v28079_v17 = vand.u32 4294901760, %v28046_v50  ;;  %33760 = vst [vmem:[#allocation200_spill] sm:$0xff] %v28082_v59  ;;  %v28098_v40 = vand.u32 4294901760, %v2334_v46  ;;  %v28101_v14 = vand.u32 4294901760, %v2575_v58  ;;  %v28117_v37 = vsub.f32 %v2328_v39, %v28084_v0  ;;  %v305_v39 = vld [vmem:[%s26405_s17 + $0x138] sm:$0xff] }
 0x1bc   : > { %22699 = vmatprep.mubr.f32.mxu0 %v33753_v30  ;;  %33754 = vst [vmem:[#allocation194_spill] sm:$0xff] %v28058_v28  ;;  %33756 = vst [vmem:[#allocation196_spill] sm:$0xff] %v28069_v23  ;;  %v2331_v30 = vsel %vm352_vm0, %v300_v10, 0  ;;  %v33763_v10 = vand.u32 4294901760, %v33667_v62  ;;  %v28107_v62 = vsub.f32 %v2325_v5, %v28071_v53  ;;  %v2340_v58 = vsel %vm352_vm0, %v303_v26, 0  ;;  %v304_v5 = vld [vmem:[%s26405_s17 + $0x128] sm:$0xff] }
 0x1bd   : > { %21182 = vmatmul.mubr.f32.gmra.mrb[8].mxu1 %v28036_v36  ;;  %33759 = vst [vmem:[#allocation199_spill] sm:$0xff] %v28079_v17  ;;  %33761 = vst [vmem:[#allocation201_spill] sm:$0xff] %v28084_v0  ;;  %v33762_v36 = vand.u32 4294901760, %v33666_v13  ;;  %v28104_v13 = vand.u32 4294901760, %v28069_v23  ;;  %v2595_v21 = vsub.f32 %v28046_v50, %v28079_v17  ;;  %v28129_v17 = vsub.f32 %v2334_v46, %v28098_v40 }
 0x1be   : > { %21184 = vmatprep.mubr.f32.mxu1 %v28038_v19  ;;  %33764 = vst [vmem:[#allocation202_spill] sm:$0xff] %v28092_v63  ;;  %v28096_v19 = vand.u32 4294901760, %v2331_v30  ;;  %33766 = vst [vmem:[#allocation204_spill] sm:$0xff] %v28098_v40  ;;  %v28135_v26 = vand.u32 4294901760, %v2585_v11  ;;  %v28140_v9 = vand.u32 4294901760, %v28107_v62  ;;  %v28150_v46 = vand.u32 4294901760, %v28117_v37 }
 0x1bf   : > { %22700 = vmatmul.mubr.f32.gmra.mrb[12].mxu0 %v33762_v36  ;;  %33767 = vst [vmem:[#allocation205_spill] sm:$0xff] %v28101_v14  ;;  %33768 = vst [vmem:[#allocation206_spill] sm:$0xff] %v28104_v13  ;;  %v2337_v36 = vsel %vm352_vm0, %v302_v47, 0  ;;  %v2343_v11 = vsel %vm352_vm0, %v304_v5, 0  ;;  %v33783_v50 = vand.u32 4294901760, %v33671_v2  ;;  %v307_v5 = vld [vmem:[%s26405_s17 + $0x150] sm:$0xff] }
 0x1c0   : > { %22702 = vmatprep.mubr.f32.mxu0 %v33763_v10  ;;  %33765 = vst [vmem:[#allocation203_spill] sm:$0xff] %v28096_v19  ;;  %33769 = vst [vmem:[#allocation207_spill] sm:$0xff] %v28107_v62  ;;  %v28114_v10 = vand.u32 4294901760, %v28082_v59  ;;  %v28126_v47 = vsub.f32 %v2331_v30, %v28096_v19  ;;  %v2625_v2 = vsub.f32 %v28107_v62, %v28140_v9  ;;  %v33792_v62 = vand.u32 4294901760, %v33676_v33 }
 0x1c1   : > { %21185 = vmatmul.mubr.f32.gmra.mrb[10].mxu1 %v28058_v28  ;;  %33771 = vst [vmem:[#allocation209_spill] sm:$0xff] %v28117_v37  ;;  %v33772_v28 = vand.u32 4294901760, %v33668_v18  ;;  %33775 = vst [vmem:[#allocation211_spill] sm:$0xff] %v28129_v17  ;;  %v2605_v18 = vsub.f32 %v28069_v23, %v28104_v13  ;;  %v2346_v13 = vsel %vm352_vm0, %v305_v39, 0  ;;  %v306_v23 = vld [vmem:[%s26405_s17 + $0x140] sm:$0xff] }
 0x1c2   : > { %21187 = vmatprep.mubr.f32.mxu1 %v28076_v29  ;;  %33770 = vst [vmem:[#allocation208_spill] sm:$0xff] %v28114_v10  ;;  %33774 = vst [vmem:[#allocation210_spill] sm:$0xff] %v28126_v47  ;;  %v28131_v29 = vand.u32 4294901760, %v2337_v36  ;;  %v2615_v30 = vsub.f32 %v28082_v59, %v28114_v10  ;;  %v28163_v10 = vand.u32 4294901760, %v28129_v17  ;;  %v28184_v59 = vand.u32 4294901760, %v2346_v13 }
 0x1c3   : > { %22703 = vmatmul.mubr.f32.gmra.mrb[14].mxu0 %v33772_v28  ;;  %33777 = vst [vmem:[#allocation213_spill] sm:$0xff] %v28135_v26  ;;  %33778 = vst [vmem:[#allocation214_spill] sm:$0xff] %v28140_v9  ;;  %v28142_v28 = vand.u32 4294901760, %v2340_v58  ;;  %v2352_v9 = vsel %vm352_vm0, %v307_v5, 0 }
 0x1c4   : > { %22705 = vmatprep.mubr.f32.mxu0 %v33773_v41  ;;  %33776 = vst [vmem:[#allocation212_spill] sm:$0xff] %v28131_v29  ;;  %v28145_v41 = vand.u32 4294901760, %v2595_v21  ;;  %33781 = vst [vmem:[#allocation217_spill] sm:$0xff] %v28150_v46  ;;  %v28160_v21 = vand.u32 4294901760, %v28126_v47  ;;  %v28180_v39 = vand.u32 4294901760, %v2615_v30 }
 0x1c5   : > { %21188 = vmatmul.mubr.f32.gmra.mrb[12].mxu1 %v28092_v63  ;;  %33779 = vst [vmem:[#allocation215_spill] sm:$0xff] %v28142_v28  ;;  %v33782_v63 = vand.u32 4294901760, %v33670_v1  ;;  %33785 = vst [vmem:[#allocation219_spill] sm:$0xff] %v28163_v10  ;;  %v28170_v1 = vand.u32 4294901760, %v2605_v18  ;;  %v2349_v18 = vsel %vm352_vm0, %v306_v23, 0  ;;  %v309_v23 = vld [vmem:[%s26405_s17 + $0x168] sm:$0xff] }
 0x1c6   : > { %21190 = vmatprep.mubr.f32.mxu1 %v28101_v14  ;;  %33780 = vst [vmem:[#allocation216_spill] sm:$0xff] %v28145_v41  ;;  %33784 = vst [vmem:[#allocation218_spill] sm:$0xff] %v28160_v21  ;;  %v28166_v14 = vsub.f32 %v2337_v36, %v28131_v29  ;;  %v2635_v36 = vsub.f32 %v28117_v37, %v28150_v46  ;;  %v2645_v30 = vsub.f32 %v28126_v47, %v28160_v21 }
 0x1c7   : > { %22706 = vmatmul.mubr.f32.gmra.mrb[16].mxu0 %v33782_v63  ;;  %33786 = vst [vmem:[#allocation220_spill] sm:$0xff] %v28170_v1  ;;  %v28177_v63 = vand.u32 4294901760, %v2343_v11  ;;  %33789 = vst [vmem:[#allocation223_spill] sm:$0xff] %v28180_v39  ;;  %v2655_v46 = vsub.f32 %v28129_v17, %v28163_v10  ;;  %v28216_v10 = vsub.f32 %v2346_v13, %v28184_v59  ;;  %v28218_v21 = vand.u32 4294901760, %v2352_v9 }
 0x1c8   : > { %22708 = vmatprep.mubr.f32.mxu0 %v33783_v50  ;;  %v28175_v50 = vsub.f32 %v2340_v58, %v28142_v28  ;;  %33790 = vst [vmem:[#allocation224_spill] sm:$0xff] %v28184_v59  ;;  %v308_v58 = vld [vmem:[%s26405_s17 + $0x158] sm:$0xff]  ;;  %v28213_v5 = vand.u32 4294901760, %v2635_v36  ;;  %v2358_v17 = vsel %vm352_vm0, %v309_v23, 0  ;;  %v33802_v47 = vand.u32 4294901760, %v33678_v32 }
 0x1c9   : > { %21191 = vmatmul.mubr.f32.gmra.mrb[14].mxu1 %v28135_v26  ;;  %33788 = vst [vmem:[#allocation222_spill] sm:$0xff] %v28177_v63  ;;  %v33791_v26 = vand.u32 4294901760, %v33675_v20  ;;  %v28202_v20 = vand.u32 4294901760, %v2625_v2  ;;  %v28208_v33 = vsub.f32 %v2343_v11, %v28177_v63  ;;  %33799 = vst [vmem:[#allocation231_spill] sm:$0xff] %v28216_v10  ;;  %v2355_v2 = vsel %vm352_vm0, %v308_v58, 0  ;;  %v310_v11 = vld [vmem:[%s26405_s17 + $0x170] sm:$0xff] }
 0x1ca   : > { %33787 = vst [vmem:[#allocation221_spill] sm:$0xff] %v28175_v50  ;;  %21193 = vmatprep.mubr.f32.mxu1 %v28145_v41  ;;  %v28198_v41 = vand.u32 4294901760, %v28166_v14  ;;  %33798 = vst [vmem:[#allocation230_spill] sm:$0xff] %v28213_v5  ;;  %v28227_v37 = vand.u32 4294901760, %v2645_v30  ;;  %v28229_v36 = vand.u32 4294901760, %v2655_v46  ;;  %v28242_v32 = vand.u32 4294901760, %v2355_v2 }
 0x1cb   : > { %22709 = vmatmul.mubr.f32.gmra.mrb[18].mxu0 %v33791_v26  ;;  %33794 = vst [vmem:[#allocation226_spill] sm:$0xff] %v28202_v20  ;;  %v28205_v26 = vand.u32 4294901760, %v28175_v50  ;;  %33796 = vst [vmem:[#allocation228_spill] sm:$0xff] %v28208_v33  ;;  %v28249_v46 = vsub.f32 %v2352_v9, %v28218_v21  ;;  %v28251_v30 = vand.u32 4294901760, %v2358_v17  ;;  %v2361_v23 = vsel %vm352_vm0, %v310_v11, 0 }
 0x1cc   : > { %22711 = vmatprep.mubr.f32.mxu0 %v33792_v62  ;;  %33793 = vst [vmem:[#allocation225_spill] sm:$0xff] %v28198_v41  ;;  %v28210_v62 = vand.u32 4294901760, %v2349_v18  ;;  %33800 = vst [vmem:[#allocation232_spill] sm:$0xff] %v28218_v21  ;;  %v2665_v13 = vsub.f32 %v28166_v14, %v28198_v41  ;;  %v28269_v11 = vand.u32 4294901760, %v2361_v23 }
 0x1cd   : > { %21194 = vmatmul.mubr.f32.gmra.mrb[16].mxu1 %v28170_v1  ;;  %33795 = vst [vmem:[#allocation227_spill] sm:$0xff] %v28205_v26  ;;  %v33801_v1 = vand.u32 4294901760, %v33677_v22  ;;  %33803 = vst [vmem:[#allocation233_spill] sm:$0xff] %v28227_v37  ;;  %v2675_v58 = vsub.f32 %v28175_v50, %v28205_v26  ;;  %v28237_v22 = vand.u32 4294901760, %v28208_v33  ;;  %v33811_v26 = vand.u32 4294901760, %v33679_v35 }
 0x1ce   : > { %33797 = vst [vmem:[#allocation229_spill] sm:$0xff] %v28210_v62  ;;  %21196 = vmatprep.mubr.f32.mxu1 %v28180_v39  ;;  %33804 = vst [vmem:[#allocation234_spill] sm:$0xff] %v28229_v36  ;;  %v28258_v41 = vand.u32 4294901760, %v2665_v13  ;;  %v28280_v13 = vsub.f32 %v2358_v17, %v28251_v30  ;;  %v33885_v39 = vld [vmem:[#allocation76_spill] sm:$0xff] }
 0x1cf   : > { %22712 = vmatmul.mubr.f32.gmra.mrb[20].mxu0 %v33801_v1  ;;  %33805 = vst [vmem:[#allocation235_spill] sm:$0xff] %v28237_v22  ;;  %v28240_v1 = vsub.f32 %v2349_v18, %v28210_v62  ;;  %33807 = vst [vmem:[#allocation237_spill] sm:$0xff] %v28242_v32  ;;  %v33812_v18 = vand.u32 4294901760, %v33680_v15  ;;  %v28272_v35 = vand.u32 4294901760, %v2675_v58 }
 0x1d0   : > { %22714 = vmatprep.mubr.f32.mxu0 %v33802_v47  ;;  %v28246_v47 = vand.u32 4294901760, %v28216_v10  ;;  %33809 = vst [vmem:[#allocation239_spill] sm:$0xff] %v28249_v46  ;;  %33810 = vst [vmem:[#allocation240_spill] sm:$0xff] %v28251_v30  ;;  %v28303_v17 = vand.u32 4294901760, %v28280_v13 }
 0x1d1   : > { %21197 = vmatmul.mubr.f32.gmra.mrb[18].mxu1 %v28202_v20  ;;  %33806 = vst [vmem:[#allocation236_spill] sm:$0xff] %v28240_v1  ;;  %33813 = vst [vmem:[#allocation241_spill] sm:$0xff] %v28258_v41  ;;  %v28264_v9 = vand.u32 4294901760, %v28240_v1  ;;  %v28267_v20 = vsub.f32 %v2355_v2, %v28242_v32  ;;  %v33821_v2 = vand.u32 4294901760, %v27517_v44 }
 0x1d2   : > { %21199 = vmatprep.mubr.f32.mxu1 %v28213_v5  ;;  %33808 = vst [vmem:[#allocation238_spill] sm:$0xff] %v28246_v47  ;;  %v2685_v5 = vsub.f32 %v28208_v33, %v28237_v22  ;;  %33816 = vst [vmem:[#allocation244_spill] sm:$0xff] %v28269_v11  ;;  %v2695_v15 = vsub.f32 %v28216_v10, %v28246_v47 }
 0x1d3   : > { %22715 = vmatmul.mubr.f32.gmra.mrb[22].mxu0 %v33811_v26  ;;  %33814 = vst [vmem:[#allocation242_spill] sm:$0xff] %v28264_v9  ;;  %33815 = vst [vmem:[#allocation243_spill] sm:$0xff] %v28267_v20  ;;  %v28277_v26 = vand.u32 4294901760, %v28249_v46  ;;  %v2705_v58 = vsub.f32 %v28240_v1, %v28264_v9  ;;  %v28292_v47 = vand.u32 4294901760, %v28267_v20  ;;  %v33841_v9 = vld [vmem:[#allocation139_spill] sm:$0xff] }
 0x1d4   : > { %22717 = vmatprep.mubr.f32.mxu0 %v33812_v18  ;;  %33817 = vst [vmem:[#allocation245_spill] sm:$0xff] %v28272_v35  ;;  %33819 = vst [vmem:[#allocation247_spill] sm:$0xff] %v28280_v13  ;;  %v33820_v18 = vand.u32 4294901760, %v33682_v38  ;;  %v28287_v22 = vand.u32 4294901760, %v2685_v5  ;;  %v28298_v38 = vand.u32 4294901760, %v2695_v15  ;;  %v33827_v5 = vand.u32 4294901760, %v27534_v45 }
 0x1d5   : > { %21200 = vmatmul.mubr.f32.gmra.mrb[20].mxu1 %v28227_v37  ;;  %33818 = vst [vmem:[#allocation246_spill] sm:$0xff] %v28277_v26  ;;  %33823 = vst [vmem:[#allocation249_spill] sm:$0xff] %v28292_v47  ;;  %v2715_v44 = vsub.f32 %v28249_v46, %v28277_v26  ;;  %v2725_v15 = vsub.f32 %v28267_v20, %v28292_v47  ;;  %v2735_v45 = vsub.f32 %v28280_v13, %v28303_v17  ;;  %v33840_v47 = vld [vmem:[#allocation137_spill] sm:$0xff] }
 0x1d6   : > { %21202 = vmatprep.mubr.f32.mxu1 %v28229_v36  ;;  %33822 = vst [vmem:[#allocation248_spill] sm:$0xff] %v28287_v22  ;;  %v28295_v36 = vsub.f32 %v2361_v23, %v28269_v11  ;;  %33825 = vst [vmem:[#allocation251_spill] sm:$0xff] %v28298_v38  ;;  %v28310_v23 = vand.u32 4294901760, %v2705_v58 }
 0x1d7   : > { %22718 = vmatmul.mubr.f32.gmra.mrb[24].mxu0 %v33820_v18  ;;  %33826 = vst [vmem:[#allocation252_spill] sm:$0xff] %v28303_v17  ;;  %v33828_v18 = vand.u32 4294901760, %v33686_v43  ;;  %v28318_v26 = vand.u32 4294901760, %v2715_v44  ;;  %v33832_v43 = vand.u32 4294901760, %v27552_v24  ;;  %v28327_v58 = vand.u32 4294901760, %v2725_v15  ;;  %v28337_v17 = vld [vmem:[%s32229_s1 + $0xc0] sm:$0xff] }
 0x1d8   : > { %22720 = vmatprep.mubr.f32.mxu0 %v33821_v2  ;;  %33824 = vst [vmem:[#allocation250_spill] sm:$0xff] %v28295_v36  ;;  %33829 = vst [vmem:[#allocation253_spill] sm:$0xff] %v28310_v23  ;;  %v28315_v2 = vand.u32 4294901760, %v28295_v36  ;;  %v28332_v44 = vand.u32 4294901760, %v2735_v45  ;;  %v28342_v24 = vld [vmem:[%s32229_s1 + $0xc8] sm:$0xff]  ;;  %v32721_v45 = vand.u32 4294901760, %v28337_v17 }
 0x1d9   : > { %21203 = vmatmul.mubr.f32.gmra.mrb[22].mxu1 %v28258_v41  ;;  %33831 = vst [vmem:[#allocation255_spill] sm:$0xff] %v28318_v26  ;;  %33834 = vst [vmem:[#allocation256_spill] sm:$0xff] %v28327_v58 }
 0x1da   : > { %21205 = vmatprep.mubr.f32.mxu1 %v28272_v35  ;;  %33830 = vst [vmem:[#allocation254_spill] sm:$0xff] %v28315_v2  ;;  %33835 = vst [vmem:[#allocation257_spill] sm:$0xff] %v28332_v44 }
 0x1db   : > { %22721 = vmatmul.mubr.f32.gmra.mrb[26].mxu0 %v33827_v5  ;;  %v33833_v5 = vand.u32 4294901760, %v27561_v16  ;;  %v33836_v16 = vld [vmem:[#allocation80_spill] sm:$0xff] }
 0x1dc   : > { %22723 = vmatprep.mubr.f32.mxu0 %v33828_v18  ;;  %v2745_v18 = vsub.f32 %v28295_v36, %v28315_v2  ;;  %v33837_v15 = vand.u32 4294901760, %v33836_v16  ;;  %v32720_v2 = vand.u32 4294901760, %v28342_v24  ;;  %v33842_v16 = vld [vmem:[#allocation136_spill] sm:$0xff] }
 0x1dd   : > { %21206 = vmatmul.mubr.f32.gmra.mrb[24].mxu1 %v28287_v22  ;;  %v33859_v22 = vld [vmem:[#allocation154_spill] sm:$0xff] }
 0x1de   : > { %21208 = vmatprep.mubr.f32.mxu1 %v28298_v38  ;;  %v33856_v38 = vld [vmem:[#allocation151_spill] sm:$0xff] }
 0x1df   : > { %22724 = vmatmul.mubr.f32.gmra.mrb[28].mxu0 %v33832_v43  ;;  %v33838_v43 = vld [vmem:[#allocation7_spill] sm:$0xff] }
 0x1e0   : > { %22726 = vmatprep.mubr.f32.mxu0 %v33833_v5  ;;  %v28348_v5 = vand.u32 4294901760, %v2745_v18  ;;  %v28362_v18 = vpack.c.bf16 %v32720_v2, %v32721_v45  ;;  %v33850_v2 = vld [vmem:[#allocation108_spill] sm:$0xff]  ;;  %v33851_v45 = vld [vmem:[#allocation147_spill] sm:$0xff] }
 0x1e1   : > { %21209 = vmatmul.mubr.f32.gmra.mrb[26].mxu1 %v28310_v23  ;;  %v33853_v23 = vld [vmem:[#allocation145_spill] sm:$0xff] }
 0x1e2   : > { %21211 = vmatprep.mubr.f32.mxu1 %v28318_v26  ;;  %33839 = vst [vmem:[#allocation80_spill] sm:$0xff] %v28348_v5  ;;  %33843 = vst [vmem:[#allocation7_spill] sm:$0xff] %v28362_v18  ;;  %v33847_v26 = vld [vmem:[#allocation118_spill] sm:$0xff] }
 0x1e3   : > { %22727 = vmatmul.mubr.f32.gmra.mrb[30].mxu0 %v33837_v15  ;;  %v33844_v15 = vld [vmem:[#allocation109_spill] sm:$0xff] }
 0x1e4   : > { %22737 = vmatprep.mubr.f32.mxu0 %v33838_v43 }
 0x1e5   : > { %21212 = vmatmul.mubr.f32.gmra.mrb[28].mxu1 %v28327_v58  ;;  %v33845_v58 = vld [vmem:[#allocation141_spill] sm:$0xff] }
 0x1e6   : > { %21214 = vmatprep.mubr.f32.mxu1 %v28332_v44  ;;  %v33846_v44 = vld [vmem:[#allocation143_spill] sm:$0xff] }
 0x1e7   : > { %22738 = vmatmul.mubr.f32.vlgmr.msra.gmra.mrb[0].mxu0 %v33840_v47 }
 0x1e8   : > { %22740 = vmatprep.mubr.f32.mxu0 %v33841_v9  ;;  %24132 = vmatpush3.bf16.msra.mxu0 %v27008_v7  ;;  %v33848_v7 = vld [vmem:[#allocation140_spill] sm:$0xff] }
 0x1e9   : > { %21215 = vmatmul.mubr.f32.gmra.mrb[30].mxu1 %v28348_v5  ;;  %24134 = vmatprep.subr.bf16.mxu0 %v33842_v16  ;;  %v33849_v5 = vld [vmem:[#allocation144_spill] sm:$0xff] }
 0x1ea   : > { %21225 = vmatprep.mubr.f32.mxu1 %v33844_v15  ;;  %v33852_v15 = vld [vmem:[#allocation134_spill] sm:$0xff] }
 0x1eb   : > { %22741 = vmatmul.mubr.f32.gmra.mrb[2].mxu0 %v33845_v58 }
 0x1ec   : > { %22743 = vmatprep.mubr.f32.mxu0 %v33846_v44  ;;  %24136 = vmatpush3.bf16.msra.mxu0 %v33842_v16  ;;  %v33854_v16 = vld [vmem:[#allocation149_spill] sm:$0xff] }
 0x1ed   : > { %21226 = vmatmul.mubr.f32.vlgmr.msra.gmra.mrb[0].mxu1 %v33847_v26  ;;  %24138 = vmatprep.subr.bf16.mxu0 %v28362_v18  ;;  %v33855_v26 = vld [vmem:[#allocation84_spill] sm:$0xff] }
 0x1ee   : > { %23916 = vmatpush3.bf16.msra.mxu1 %v27717_v61  ;;  %21228 = vmatprep.mubr.f32.mxu1 %v33848_v7  ;;  %v33857_v61 = vld [vmem:[#allocation146_spill] sm:$0xff]  ;;  %v33858_v7 = vld [vmem:[#allocation153_spill] sm:$0xff] }
 0x1ef   : > { %22744 = vmatmul.mubr.f32.gmra.mrb[4].mxu0 %v33849_v5  ;;  %23918 = vmatprep.subr.bf16.mxu1 %v33850_v2 }
 0x1f0   : > { %22746 = vmatprep.mubr.f32.mxu0 %v33851_v45 }
 0x1f1   : > { %21229 = vmatmul.mubr.f32.gmra.mrb[2].mxu1 %v33852_v15  ;;  %v33860_v15 = vld [vmem:[#allocation156_spill] sm:$0xff] }
 0x1f2   : > { %21231 = vmatprep.mubr.f32.mxu1 %v33853_v23  ;;  %23920 = vmatpush3.bf16.msra.mxu1 %v33850_v2  ;;  %v33861_v2 = vld [vmem:[#allocation159_spill] sm:$0xff]  ;;  %v33862_v23 = vld [vmem:[#allocation161_spill] sm:$0xff] }
 0x1f3   : > { %22747 = vmatmul.mubr.f32.gmra.mrb[6].mxu0 %v33854_v16  ;;  %23922 = vmatprep.subr.bf16.mxu1 %v33855_v26 }
 0x1f4   : > { %22749 = vmatprep.mubr.f32.mxu0 %v33856_v38 }
 0x1f5   : > { %21232 = vmatmul.mubr.f32.gmra.mrb[4].mxu1 %v33857_v61  ;;  %v33863_v61 = vld [vmem:[#allocation162_spill] sm:$0xff] }
 0x1f6   : > { %21234 = vmatprep.mubr.f32.mxu1 %v27845_v3  ;;  %v33864_v3 = vld [vmem:[#allocation165_spill] sm:$0xff] }
 0x1f7   : > { %22750 = vmatmul.mubr.f32.gmra.mrb[8].mxu0 %v33858_v7 }
 0x1f8   : > { %22752 = vmatprep.mubr.f32.mxu0 %v33859_v22 }
 0x1f9   : > { %21235 = vmatmul.mubr.f32.gmra.mrb[6].mxu1 %v27866_v42  ;;  %v33865_v42 = vld [vmem:[#allocation166_spill] sm:$0xff] }
 0x1fa   : > { %21237 = vmatprep.mubr.f32.mxu1 %v27883_v6  ;;  %v33866_v6 = vld [vmem:[#allocation22_spill] sm:$0xff] }
 0x1fb   : > { %22753 = vmatmul.mubr.f32.gmra.mrb[10].mxu0 %v33860_v15 }
 0x1fc   : > { %22755 = vmatprep.mubr.f32.mxu0 %v33861_v2 }
 0x1fd   : > { %21238 = vmatmul.mubr.f32.gmra.mrb[8].mxu1 %v27904_v34  ;;  %v33867_v34 = vld [vmem:[#allocation168_spill] sm:$0xff] }
 0x1fe   : > { %21240 = vmatprep.mubr.f32.mxu1 %v27906_v56  ;;  %v33868_v56 = vld [vmem:[#allocation27_spill] sm:$0xff] }
 0x1ff   : > { %22756 = vmatmul.mubr.f32.gmra.mrb[12].mxu0 %v33862_v23 }
 0x200   : > { %22758 = vmatprep.mubr.f32.mxu0 %v33863_v61 }
 0x201   : > { %21241 = vmatmul.mubr.f32.gmra.mrb[10].mxu1 %v27929_v31  ;;  %v33869_v31 = vld [vmem:[#allocation170_spill] sm:$0xff] }
 0x202   : > { %21243 = vmatprep.mubr.f32.mxu1 %v27948_v25  ;;  %v33870_v25 = vld [vmem:[#allocation30_spill] sm:$0xff] }
 0x203   : > { %22759 = vmatmul.mubr.f32.gmra.mrb[14].mxu0 %v33864_v3 }
 0x204   : > { %22761 = vmatprep.mubr.f32.mxu0 %v33865_v42 }
 0x205   : > { %21244 = vmatmul.mubr.f32.gmra.mrb[12].mxu1 %v27960_v27  ;;  %v33871_v27 = vld [vmem:[#allocation40_spill] sm:$0xff] }
 0x206   : > { %21246 = vmatprep.mubr.f32.mxu1 %v27962_v52  ;;  %v33872_v52 = vld [vmem:[#allocation173_spill] sm:$0xff] }
 0x207   : > { %22762 = vmatmul.mubr.f32.gmra.mrb[16].mxu0 %v33866_v6 }
 0x208   : > { %22764 = vmatprep.mubr.f32.mxu0 %v33867_v34 }
 0x209   : > { %21247 = vmatmul.mubr.f32.gmra.mrb[14].mxu1 %v27998_v54  ;;  %v33873_v54 = vld [vmem:[#allocation174_spill] sm:$0xff] }
 0x20a   : > { %21249 = vmatprep.mubr.f32.mxu1 %v28014_v49  ;;  %v33874_v49 = vld [vmem:[#allocation175_spill] sm:$0xff] }
 0x20b   : > { %22765 = vmatmul.mubr.f32.gmra.mrb[18].mxu0 %v33868_v56 }
 0x20c   : > { %22767 = vmatprep.mubr.f32.mxu0 %v33869_v31 }
 0x20d   : > { %21250 = vmatmul.mubr.f32.gmra.mrb[16].mxu1 %v28040_v51  ;;  %v33875_v51 = vld [vmem:[#allocation176_spill] sm:$0xff] }
 0x20e   : > { %21252 = vmatprep.mubr.f32.mxu1 %v28048_v57  ;;  %v33876_v57 = vand.u32 4294901760, %v28337_v17 }
 0x20f   : > { %22768 = vmatmul.mubr.f32.gmra.mrb[20].mxu0 %v33870_v25 }
 0x210   : > { %22770 = vmatprep.mubr.f32.mxu0 %v33871_v27 }
 0x211   : > { %21253 = vmatmul.mubr.f32.gmra.mrb[18].mxu1 %v28071_v53  ;;  %v28421_v53 = vsub.f32 %v28337_v17, %v33876_v57  ;;  %v18765_v57 = vld [vmem:[%s32229_s1 + $0xd0] sm:$0xff]  ;;  %v33881_v17 = vld [vmem:[#allocation70_spill] sm:$0xff] }
 0x212   : > { %21255 = vmatprep.mubr.f32.mxu1 %v28084_v0  ;;  %v33877_v0 = vand.u32 4294901760, %v28342_v24 }
 0x213   : > { %22771 = vmatmul.mubr.f32.gmra.mrb[22].mxu0 %v33872_v52  ;;  %v33883_v41 = vand.u32 4294901760, %v28421_v53 }
 0x214   : > { %22773 = vmatprep.mubr.f32.mxu0 %v33873_v54  ;;  %v28426_v35 = vsub.f32 %v28342_v24, %v33877_v0  ;;  %v18766_v0 = vld [vmem:[%s32229_s1 + $0xd8] sm:$0xff]  ;;  %v33882_v24 = vld [vmem:[#allocation178_spill] sm:$0xff] }
 0x215   : > { %21256 = vmatmul.mubr.f32.gmra.mrb[20].mxu1 %v28096_v19  ;;  %v33879_v19 = vld [vmem:[#allocation61_spill] sm:$0xff] }
 0x216   : > { %21258 = vmatprep.mubr.f32.mxu1 %v28098_v40  ;;  %33878 = vst [vmem:[#allocation137_spill] sm:$0xff] %v28426_v35  ;;  %v33880_v40 = vld [vmem:[#allocation177_spill] sm:$0xff] }
 0x217   : > { %22774 = vmatmul.mubr.f32.gmra.mrb[24].mxu0 %v33874_v49 }
 0x218   : > { %22776 = vmatprep.mubr.f32.mxu0 %v33875_v51 }
 0x219   : > { %21259 = vmatmul.mubr.f32.gmra.mrb[22].mxu1 %v28131_v29  ;;  %v12258_v29 = vand.u32 4294901760, %v18766_v0 }
 0x21a   : > { %21261 = vmatprep.mubr.f32.mxu1 %v28142_v28  ;;  %v33884_v28 = vand.u32 4294901760, %v28426_v35 }
 0x21b   : > { %22777 = vmatmul.mubr.f32.gmra.mrb[26].mxu0 %v33879_v19 }
 0x21c   : > { %22779 = vmatprep.mubr.f32.mxu0 %v33880_v40  ;;  %v12648_v37 = vsub.f32 %v28426_v35, %v33884_v28 }
 0x21d   : > { %21262 = vmatmul.mubr.f32.gmra.mrb[24].mxu1 %v28177_v63  ;;  %v12255_v63 = vand.u32 4294901760, %v18765_v57 }
 0x21e   : > { %21264 = vmatprep.mubr.f32.mxu1 %v28184_v59  ;;  %v12641_v59 = vsub.f32 %v28421_v53, %v33883_v41  ;;  %v12649_v13 = vand.u32 4294901760, %v12648_v37  ;;  %v33886_v41 = vld [vmem:[#allocation138_spill] sm:$0xff] }
 0x21f   : > { %22780 = vmatmul.mubr.f32.gmra.mrb[28].mxu0 %v33881_v17  ;;  %v28454_v36 = vpack.c.bf16 %v12258_v29, %v12255_v63  ;;  %v33887_v37 = vld [vmem:[#allocation142_spill] sm:$0xff] }
 0x220   : > { %22782 = vmatprep.mubr.f32.mxu0 %v33882_v24 }
 0x221   : > { %21265 = vmatmul.mubr.f32.gmra.mrb[26].mxu1 %v28210_v62  ;;  %v12642_v62 = vand.u32 4294901760, %v12641_v59  ;;  %v28467_v59 = vpack.c.bf16 %v28426_v35, %v28421_v53 }
 0x222   : > { %21267 = vmatprep.mubr.f32.mxu1 %v28218_v21 }
 0x223   : > { %22783 = vmatmul.mubr.f32.gmra.mrb[30].mxu0 %v33885_v39  ;;  %v28462_v28 = vpack.c.bf16 %v12649_v13, %v12642_v62  ;;  %v33888_v62 = vld [vmem:[#allocation135_spill] sm:$0xff] }
 0x224   : > { %22793 = vmatprep.mubr.f32.mxu0 %v33838_v43  ;;  %v33892_v43 = vld [vmem:[#allocation92_spill] sm:$0xff] }
 0x225   : > { %21268 = vmatmul.mubr.f32.gmra.mrb[28].mxu1 %v28242_v32 }
 0x226   : > { %21270 = vmatprep.mubr.f32.mxu1 %v28251_v30 }
 0x227   : > { %22794 = vmatmul.mubr.f32.vlgmr.msra.gmra.mrb[0].mxu0 %v33840_v47  ;;  %v33889_v47 = vld [vmem:[#allocation96_spill] sm:$0xff] }
 0x228   : > { %22796 = vmatprep.mubr.f32.mxu0 %v33841_v9  ;;  %24140 = vmatpush3.bf16.msra.mxu0 %v28362_v18  ;;  %v33890_v9 = vld [vmem:[#allocation85_spill] sm:$0xff] }
 0x229   : > { %21271 = vmatmul.mubr.f32.gmra.mrb[30].mxu1 %v28269_v11  ;;  %24142 = vmatprep.subr.bf16.mxu0 %v28454_v36  ;;  %v33891_v13 = vand.u32 4294901760, %v33890_v9 }
 0x22a   : > { %21281 = vmatprep.mubr.f32.mxu1 %v33886_v41 }
 0x22b   : > { %22797 = vmatmul.mubr.f32.gmra.mrb[2].mxu0 %v33845_v58  ;;  %v33893_v58 = vand.u32 4294901760, %v33892_v43 }
 0x22c   : > { %22799 = vmatprep.mubr.f32.mxu0 %v33846_v44  ;;  %24144 = vmatpush3.bf16.msra.mxu0 %v28454_v36  ;;  %v33894_v44 = vld [vmem:[#allocation148_spill] sm:$0xff] }
 0x22d   : > { %21282 = vmatmul.mubr.f32.vlgmr.msra.gmra.mrb[0].mxu1 %v33887_v37  ;;  %24146 = vmatprep.subr.bf16.mxu0 %v28462_v28  ;;  %v28482_v35 = vpack.c.bf16 %v33893_v58, %v33891_v13  ;;  %v33919_v13 = vld [vmem:[#allocation104_spill] sm:$0xff] }
 0x22e   : > { %23924 = vmatpush3.bf16.msra.mxu1 %v33855_v26  ;;  %21284 = vmatprep.mubr.f32.mxu1 %v33888_v62  ;;  %v33920_v43 = vand.u32 4294901760, %v33919_v13  ;;  %v33939_v13 = vld [vmem:[#allocation73_spill] sm:$0xff] }
 0x22f   : > { %22800 = vmatmul.mubr.f32.gmra.mrb[4].mxu0 %v33849_v5  ;;  %23926 = vmatprep.subr.bf16.mxu1 %v33889_v47  ;;  %v33895_v5 = vld [vmem:[#allocation167_spill] sm:$0xff] }
 0x230   : > { %22802 = vmatprep.mubr.f32.mxu0 %v33851_v45  ;;  %v33896_v45 = vld [vmem:[#allocation26_spill] sm:$0xff] }
 0x231   : > { %21285 = vmatmul.mubr.f32.gmra.mrb[2].mxu1 %v27830_v8 }
 0x232   : > { %21287 = vmatprep.mubr.f32.mxu1 %v33894_v44  ;;  %23928 = vmatpush3.bf16.msra.mxu1 %v33889_v47 }
 0x233   : > { %22803 = vmatmul.mubr.f32.gmra.mrb[6].mxu0 %v33854_v16  ;;  %23930 = vmatprep.subr.bf16.mxu1 %v28482_v35  ;;  %v33902_v16 = vld [vmem:[#allocation188_spill] sm:$0xff] }
 0x234   : > { %22805 = vmatprep.mubr.f32.mxu0 %v33856_v38  ;;  %v33897_v38 = vld [vmem:[#allocation44_spill] sm:$0xff] }
 0x235   : > { %21288 = vmatmul.mubr.f32.gmra.mrb[4].mxu1 %v27864_v55 }
 0x236   : > { %21290 = vmatprep.mubr.f32.mxu1 %v27881_v12 }
 0x237   : > { %22806 = vmatmul.mubr.f32.gmra.mrb[8].mxu0 %v33858_v7  ;;  %v28511_v7 = vsub.f32 %v18765_v57, %v12255_v63  ;;  %v33908_v63 = vld [vmem:[#allocation210_spill] sm:$0xff]  ;;  %v33913_v57 = vld [vmem:[#allocation19_spill] sm:$0xff] }
 0x238   : > { %22808 = vmatprep.mubr.f32.mxu0 %v33859_v22  ;;  %v33898_v22 = vld [vmem:[#allocation179_spill] sm:$0xff] }
 0x239   : > { %21291 = vmatmul.mubr.f32.gmra.mrb[6].mxu1 %v27900_v60  ;;  %33900 = vst [vmem:[#allocation139_spill] sm:$0xff] %v28511_v7 }
 0x23a   : > { %21293 = vmatprep.mubr.f32.mxu1 %v27915_v48 }
 0x23b   : > { %22809 = vmatmul.mubr.f32.gmra.mrb[10].mxu0 %v33860_v15  ;;  %v33899_v15 = vld [vmem:[#allocation180_spill] sm:$0xff] }
 0x23c   : > { %22811 = vmatprep.mubr.f32.mxu0 %v33861_v2  ;;  %v33912_v2 = vld [vmem:[#allocation43_spill] sm:$0xff] }
 0x23d   : > { %21294 = vmatmul.mubr.f32.gmra.mrb[8].mxu1 %v33895_v5 }
 0x23e   : > { %21296 = vmatprep.mubr.f32.mxu1 %v33896_v45 }
 0x23f   : > { %22812 = vmatmul.mubr.f32.gmra.mrb[12].mxu0 %v33862_v23  ;;  %v28513_v23 = vsub.f32 %v18766_v0, %v12258_v29  ;;  %v33907_v29 = vld [vmem:[#allocation209_spill] sm:$0xff]  ;;  %v33914_v0 = vld [vmem:[#allocation250_spill] sm:$0xff] }
 0x240   : > { %22814 = vmatprep.mubr.f32.mxu0 %v33863_v61  ;;  %v33903_v61 = vld [vmem:[#allocation192_spill] sm:$0xff] }
 0x241   : > { %21297 = vmatmul.mubr.f32.gmra.mrb[10].mxu1 %v33897_v38  ;;  %33901 = vst [vmem:[#allocation136_spill] sm:$0xff] %v28513_v23 }
 0x242   : > { %21299 = vmatprep.mubr.f32.mxu1 %v27980_v4 }
 0x243   : > { %22815 = vmatmul.mubr.f32.gmra.mrb[14].mxu0 %v33864_v3  ;;  %v28519_v3 = vpack.c.bf16 %v28513_v23, %v28511_v7 }
 0x244   : > { %22817 = vmatprep.mubr.f32.mxu0 %v33865_v42  ;;  %v33904_v42 = vld [vmem:[#allocation196_spill] sm:$0xff] }
 0x245   : > { %21300 = vmatmul.mubr.f32.gmra.mrb[12].mxu1 %v33898_v22 }
 0x246   : > { %21302 = vmatprep.mubr.f32.mxu1 %v33899_v15 }
 0x247   : > { %22818 = vmatmul.mubr.f32.gmra.mrb[16].mxu0 %v33866_v6  ;;  %v33905_v6 = vld [vmem:[#allocation200_spill] sm:$0xff] }
 0x248   : > { %22820 = vmatprep.mubr.f32.mxu0 %v33867_v34  ;;  %v33906_v34 = vld [vmem:[#allocation207_spill] sm:$0xff] }
 0x249   : > { %21303 = vmatmul.mubr.f32.gmra.mrb[14].mxu1 %v33902_v16 }
 0x24a   : > { %21305 = vmatprep.mubr.f32.mxu1 %v33903_v61 }
 0x24b   : > { %22821 = vmatmul.mubr.f32.gmra.mrb[18].mxu0 %v33868_v56  ;;  %v33909_v56 = vld [vmem:[#allocation211_spill] sm:$0xff] }
 0x24c   : > { %22823 = vmatprep.mubr.f32.mxu0 %v33869_v31  ;;  %v32779_v31 = vand.u32 4294901760, %v28511_v7 }
 0x24d   : > { %21306 = vmatmul.mubr.f32.gmra.mrb[16].mxu1 %v33904_v42 }
 0x24e   : > { %21308 = vmatprep.mubr.f32.mxu1 %v33905_v6 }
 0x24f   : > { %22824 = vmatmul.mubr.f32.gmra.mrb[20].mxu0 %v33870_v25  ;;  %v32778_v25 = vand.u32 4294901760, %v28513_v23 }
 0x250   : > { %22826 = vmatprep.mubr.f32.mxu0 %v33871_v27  ;;  %v12655_v27 = vsub.f32 %v28511_v7, %v32779_v31  ;;  %v33952_v31 = vld [vmem:[#allocation199_spill] sm:$0xff]  ;;  %v33997_v7 = vld [vmem:[#allocation50_spill] sm:$0xff] }
 0x251   : > { %21309 = vmatmul.mubr.f32.gmra.mrb[18].mxu1 %v33906_v34 }
 0x252   : > { %21311 = vmatprep.mubr.f32.mxu1 %v33907_v29 }
 0x253   : > { %22827 = vmatmul.mubr.f32.gmra.mrb[22].mxu0 %v33872_v52  ;;  %v12662_v52 = vsub.f32 %v28513_v23, %v32778_v25  ;;  %v33951_v25 = vld [vmem:[#allocation195_spill] sm:$0xff]  ;;  %v33994_v23 = vld [vmem:[#allocation134_spill] sm:$0xff] }
 0x254   : > { %22829 = vmatprep.mubr.f32.mxu0 %v33873_v54  ;;  %v12656_v54 = vand.u32 4294901760, %v12655_v27  ;;  %v33921_v27 = vld [vmem:[#allocation183_spill] sm:$0xff] }
 0x255   : > { %21312 = vmatmul.mubr.f32.gmra.mrb[20].mxu1 %v33908_v63 }
 0x256   : > { %21314 = vmatprep.mubr.f32.mxu1 %v33909_v56 }
 0x257   : > { %22830 = vmatmul.mubr.f32.gmra.mrb[24].mxu0 %v33874_v49  ;;  %v12663_v49 = vand.u32 4294901760, %v12662_v52  ;;  %v33922_v52 = vand.u32 4294901760, %v33887_v37  ;;  %v33928_v37 = vld [vmem:[#allocation194_spill] sm:$0xff] }
 0x258   : > { %22832 = vmatprep.mubr.f32.mxu0 %v33875_v51 }
 0x259   : > { %21315 = vmatmul.mubr.f32.gmra.mrb[22].mxu1 %v28166_v14  ;;  %v24149_v51 = vpack.c.bf16 %v12663_v49, %v12656_v54  ;;  %v33925_v54 = vld [vmem:[#allocation190_spill] sm:$0xff]  ;;  %v33926_v49 = vand.u32 4294901760, %v27830_v8  ;;  %v33934_v8 = vld [vmem:[#allocation164_spill] sm:$0xff] }
 0x25a   : > { %21317 = vmatprep.mubr.f32.mxu1 %v28175_v50  ;;  %v34011_v50 = vld [vmem:[#allocation229_spill] sm:$0xff] }
 0x25b   : > { %22833 = vmatmul.mubr.f32.gmra.mrb[26].mxu0 %v33879_v19  ;;  %v33910_v19 = vld [vmem:[#allocation169_spill] sm:$0xff] }
 0x25c   : > { %22835 = vmatprep.mubr.f32.mxu0 %v33880_v40  ;;  %v33911_v40 = vld [vmem:[#allocation247_spill] sm:$0xff] }
 0x25d   : > { %21318 = vmatmul.mubr.f32.gmra.mrb[24].mxu1 %v28208_v33  ;;  %v34010_v33 = vld [vmem:[#allocation224_spill] sm:$0xff] }
 0x25e   : > { %21320 = vmatprep.mubr.f32.mxu1 %v28216_v10  ;;  %v34009_v10 = vld [vmem:[#allocation222_spill] sm:$0xff] }
 0x25f   : > { %22836 = vmatmul.mubr.f32.gmra.mrb[28].mxu0 %v33881_v17  ;;  %v33915_v17 = vand.u32 4294901760, %v33886_v41  ;;  %v33924_v41 = vld [vmem:[#allocation189_spill] sm:$0xff] }
 0x260   : > { %22838 = vmatprep.mubr.f32.mxu0 %v33882_v24  ;;  %v33917_v24 = vld [vmem:[#allocation100_spill] sm:$0xff] }
 0x261   : > { %21321 = vmatmul.mubr.f32.gmra.mrb[26].mxu1 %v28240_v1  ;;  %v33918_v9 = vand.u32 4294901760, %v33917_v24  ;;  %v33937_v24 = vld [vmem:[#allocation216_spill] sm:$0xff]  ;;  %v34008_v1 = vld [vmem:[#allocation215_spill] sm:$0xff] }
 0x262   : > { %21323 = vmatprep.mubr.f32.mxu1 %v28249_v46  ;;  %v34007_v46 = vld [vmem:[#allocation212_spill] sm:$0xff] }
 0x263   : > { %22839 = vmatmul.mubr.f32.gmra.mrb[30].mxu0 %v33885_v39  ;;  %v33916_v39 = vld [vmem:[#allocation182_spill] sm:$0xff]  ;;  %v23933_v58 = vpack.c.bf16 %v33920_v43, %v33918_v9  ;;  %v33938_v9 = vld [vmem:[#allocation57_spill] sm:$0xff]  ;;  %v33940_v43 = vld [vmem:[#allocation220_spill] sm:$0xff] }
 0x264   : > { %22849 = vmatprep.mubr.f32.mxu0 %v33910_v19  ;;  %v33927_v19 = vld [vmem:[#allocation155_spill] sm:$0xff] }
 0x265   : > { %21324 = vmatmul.mubr.f32.gmra.mrb[28].mxu1 %v28267_v20  ;;  %v34006_v20 = vld [vmem:[#allocation204_spill] sm:$0xff] }
 0x266   : > { %21326 = vmatprep.mubr.f32.mxu1 %v33911_v40  ;;  %v34005_v40 = vld [vmem:[#allocation203_spill] sm:$0xff] }
 0x267   : > { %22850 = vmatmul.mubr.f32.vlgmr.msra.gmra.mrb[0].mxu0 %v33912_v2  ;;  %v33932_v2 = vld [vmem:[#allocation202_spill] sm:$0xff] }
 0x268   : > { %22852 = vmatprep.mubr.f32.mxu0 %v33913_v57  ;;  %24148 = vmatpush3.bf16.msra.mxu0 %v28462_v28  ;;  %v33923_v28 = vand.u32 4294901760, %v33888_v62  ;;  %v33931_v62 = vld [vmem:[#allocation16_spill] sm:$0xff]  ;;  %v33933_v57 = vld [vmem:[#allocation205_spill] sm:$0xff] }
 0x269   : > { %21327 = vmatmul.mubr.f32.gmra.mrb[30].mxu1 %v33914_v0  ;;  %24150 = vmatprep.subr.bf16.mxu0 %v24149_v51  ;;  %v34004_v0 = vld [vmem:[#allocation201_spill] sm:$0xff] }
 0x26a   : > { %21337 = vmatprep.mubr.f32.mxu1 %v33915_v17  ;;  %v33935_v17 = vld [vmem:[#allocation171_spill] sm:$0xff] }
 0x26b   : > { %22853 = vmatmul.mubr.f32.gmra.mrb[2].mxu0 %v33916_v39  ;;  %v33936_v39 = vld [vmem:[#allocation213_spill] sm:$0xff] }
 0x26c   : > { %22855 = vmatprep.mubr.f32.mxu0 %v33921_v27  ;;  %24152 = vmatpush3.bf16.msra.mxu0 %v24149_v51  ;;  %v33929_v51 = vld [vmem:[#allocation198_spill] sm:$0xff]  ;;  %v33942_v27 = vld [vmem:[#allocation9_spill] sm:$0xff] }
 0x26d   : > { %21338 = vmatmul.mubr.f32.vlgmr.msra.gmra.mrb[0].mxu1 %v33922_v52  ;;  %24154 = vmatprep.subr.bf16.mxu0 %v28467_v59  ;;  %v33943_v52 = vld [vmem:[#allocation184_spill] sm:$0xff] }
 0x26e   : > { %23932 = vmatpush3.bf16.msra.mxu1 %v28482_v35  ;;  %21340 = vmatprep.mubr.f32.mxu1 %v33923_v28  ;;  %v33930_v35 = vld [vmem:[#allocation158_spill] sm:$0xff]  ;;  %v18759_v28 = vld [vmem:[%s26405_s17 + $0x180] sm:$0xff] }
 0x26f   : > { %22856 = vmatmul.mubr.f32.gmra.mrb[4].mxu0 %v33924_v41  ;;  %23934 = vmatprep.subr.bf16.mxu1 %v23933_v58  ;;  %v33944_v41 = vld [vmem:[#allocation226_spill] sm:$0xff] }
 0x270   : > { %22858 = vmatprep.mubr.f32.mxu0 %v33925_v54  ;;  %v33945_v54 = vld [vmem:[#allocation230_spill] sm:$0xff] }
 0x271   : > { %21341 = vmatmul.mubr.f32.gmra.mrb[2].mxu1 %v33926_v49  ;;  %v33946_v49 = vld [vmem:[#allocation186_spill] sm:$0xff] }
 0x272   : > { %21343 = vmatprep.mubr.f32.mxu1 %v33927_v19  ;;  %23936 = vmatpush3.bf16.msra.mxu1 %v23933_v58  ;;  %v33941_v58 = vld [vmem:[#allocation223_spill] sm:$0xff]  ;;  %v33998_v19 = vld [vmem:[#allocation53_spill] sm:$0xff] }
 0x273   : > { %22859 = vmatmul.mubr.f32.gmra.mrb[6].mxu0 %v33928_v37  ;;  %23938 = vmatprep.subr.bf16.mxu1 %v33855_v26  ;;  %v12237_v37 = vsel %vm352_vm0, %v18759_v28, 0  ;;  %v33953_v28 = vld [vmem:[#allocation241_spill] sm:$0xff] }
 0x274   : > { %22861 = vmatprep.mubr.f32.mxu0 %v33929_v51  ;;  %v18760_v51 = vld [vmem:[%s26405_s17 + $0x188] sm:$0xff] }
 0x275   : > { %21344 = vmatmul.mubr.f32.gmra.mrb[4].mxu1 %v33930_v35  ;;  %v33977_v35 = vld [vmem:[#allocation235_spill] sm:$0xff] }
 0x276   : > { %21346 = vmatprep.mubr.f32.mxu1 %v33931_v62 }
 0x277   : > { %22862 = vmatmul.mubr.f32.gmra.mrb[8].mxu0 %v33932_v2  ;;  %v33947_v2 = vld [vmem:[#allocation187_spill] sm:$0xff] }
 0x278   : > { %22864 = vmatprep.mubr.f32.mxu0 %v33933_v57  ;;  %v18761_v57 = vld [vmem:[%s26405_s17 + $0x198] sm:$0xff] }
 0x279   : > { %21347 = vmatmul.mubr.f32.gmra.mrb[6].mxu1 %v33934_v8  ;;  %v33974_v8 = vld [vmem:[#allocation225_spill] sm:$0xff] }
 0x27a   : > { %21349 = vmatprep.mubr.f32.mxu1 %v33935_v17  ;;  %v33973_v17 = vld [vmem:[#allocation257_spill] sm:$0xff] }
 0x27b   : > { %22865 = vmatmul.mubr.f32.gmra.mrb[10].mxu0 %v33936_v39  ;;  %v33948_v39 = vld [vmem:[#allocation233_spill] sm:$0xff] }
 0x27c   : > { %22867 = vmatprep.mubr.f32.mxu0 %v33937_v24  ;;  %v33949_v24 = vld [vmem:[#allocation234_spill] sm:$0xff] }
 0x27d   : > { %21350 = vmatmul.mubr.f32.gmra.mrb[8].mxu1 %v33938_v9  ;;  %v33970_v9 = vld [vmem:[#allocation218_spill] sm:$0xff] }
 0x27e   : > { %21352 = vmatprep.mubr.f32.mxu1 %v33939_v13  ;;  %v33965_v13 = vld [vmem:[#allocation214_spill] sm:$0xff] }
 0x27f   : > { %22868 = vmatmul.mubr.f32.gmra.mrb[12].mxu0 %v33940_v43  ;;  %v28607_v43 = vand.u32 4294901760, %v12237_v37 }
 0x280   : > { %22870 = vmatprep.mubr.f32.mxu0 %v33941_v58  ;;  %v12240_v58 = vsel %vm352_vm0, %v18760_v51, 0 }
 0x281   : > { %21353 = vmatmul.mubr.f32.gmra.mrb[10].mxu1 %v33942_v27  ;;  %33950 = vst [vmem:[#allocation141_spill] sm:$0xff] %v28607_v43  ;;  %v33963_v27 = vld [vmem:[#allocation251_spill] sm:$0xff] }
 0x282   : > { %21355 = vmatprep.mubr.f32.mxu1 %v33943_v52  ;;  %v33958_v52 = vld [vmem:[#allocation206_spill] sm:$0xff] }
 0x283   : > { %22871 = vmatmul.mubr.f32.gmra.mrb[14].mxu0 %v33944_v41  ;;  %v12243_v41 = vsel %vm352_vm0, %v18761_v57, 0  ;;  %v33960_v57 = vld [vmem:[#allocation248_spill] sm:$0xff] }
 0x284   : > { %22873 = vmatprep.mubr.f32.mxu0 %v33945_v54  ;;  %v18762_v54 = vld [vmem:[%s26405_s17 + $0x1a0] sm:$0xff] }
 0x285   : > { %21356 = vmatmul.mubr.f32.gmra.mrb[12].mxu1 %v33946_v49  ;;  %v28615_v49 = vand.u32 4294901760, %v12240_v58  ;;  %v12246_v51 = vsel %vm352_vm0, %v18762_v54, 0  ;;  %v33966_v54 = vld [vmem:[#allocation217_spill] sm:$0xff] }
 0x286   : > { %21358 = vmatprep.mubr.f32.mxu1 %v33947_v2  ;;  %v33955_v2 = vld [vmem:[#allocation245_spill] sm:$0xff] }
 0x287   : > { %22874 = vmatmul.mubr.f32.gmra.mrb[16].mxu0 %v33948_v39  ;;  %33954 = vst [vmem:[#allocation143_spill] sm:$0xff] %v28615_v49  ;;  %v28619_v39 = vsub.f32 %v12237_v37, %v28607_v43 }
 0x288   : > { %22876 = vmatprep.mubr.f32.mxu0 %v33949_v24  ;;  %v28621_v24 = vand.u32 4294901760, %v12243_v41 }
 0x289   : > { %21359 = vmatmul.mubr.f32.gmra.mrb[14].mxu1 %v33951_v25  ;;  %33956 = vst [vmem:[#allocation144_spill] sm:$0xff] %v28619_v39  ;;  %v33959_v25 = vld [vmem:[#allocation208_spill] sm:$0xff]  ;;  %v32780_v37 = vand.u32 4294901760, %v28619_v39 }
 0x28a   : > { %21361 = vmatprep.mubr.f32.mxu1 %v33952_v31  ;;  %33957 = vst [vmem:[#allocation108_spill] sm:$0xff] %v28621_v24  ;;  %v28628_v31 = vsub.f32 %v12240_v58, %v28615_v49 }
 0x28b   : > { %22877 = vmatmul.mubr.f32.gmra.mrb[18].mxu0 %v33953_v28  ;;  %v28630_v28 = vand.u32 4294901760, %v12246_v51 }
 0x28c   : > { %22879 = vmatprep.mubr.f32.mxu0 %v33955_v2  ;;  %33961 = vst [vmem:[#allocation147_spill] sm:$0xff] %v28628_v31  ;;  %v28635_v2 = vsub.f32 %v12243_v41, %v28621_v24 }
 0x28d   : > { %21362 = vmatmul.mubr.f32.gmra.mrb[16].mxu1 %v33958_v52  ;;  %33962 = vst [vmem:[#allocation149_spill] sm:$0xff] %v28630_v28  ;;  %v33967_v52 = vld [vmem:[#allocation253_spill] sm:$0xff]  ;;  %v28642_v58 = vsub.f32 %v12246_v51, %v28630_v28 }
 0x28e   : > { %21364 = vmatprep.mubr.f32.mxu1 %v33959_v25  ;;  %33964 = vst [vmem:[#allocation84_spill] sm:$0xff] %v28635_v2  ;;  %v33969_v25 = vld [vmem:[#allocation255_spill] sm:$0xff]  ;;  %v32782_v41 = vand.u32 4294901760, %v28635_v2 }
 0x28f   : > { %22880 = vmatmul.mubr.f32.gmra.mrb[20].mxu0 %v33960_v57  ;;  %v32781_v57 = vand.u32 4294901760, %v28628_v31  ;;  %33968 = vst [vmem:[#allocation151_spill] sm:$0xff] %v28642_v58  ;;  %v32783_v51 = vand.u32 4294901760, %v28642_v58 }
 0x290   : > { %22882 = vmatprep.mubr.f32.mxu0 %v33963_v27  ;;  %v12600_v27 = vsub.f32 %v28619_v39, %v32780_v37  ;;  %v12620_v37 = vsub.f32 %v28635_v2, %v32782_v41  ;;  %v33979_v41 = vld [vmem:[#allocation242_spill] sm:$0xff]  ;;  %v34001_v2 = vld [vmem:[#allocation191_spill] sm:$0xff]  ;;  %v34003_v39 = vld [vmem:[#allocation197_spill] sm:$0xff] }
 0x291   : > { %21365 = vmatmul.mubr.f32.gmra.mrb[18].mxu1 %v33965_v13  ;;  %v33971_v13 = vld [vmem:[#allocation219_spill] sm:$0xff] }
 0x292   : > { %21367 = vmatprep.mubr.f32.mxu1 %v33966_v54  ;;  %v33972_v54 = vld [vmem:[#allocation256_spill] sm:$0xff]  ;;  %v12621_v62 = vand.u32 4294901760, %v12620_v37  ;;  %v33985_v37 = vld [vmem:[#allocation150_spill] sm:$0xff] }
 0x293   : > { %22883 = vmatmul.mubr.f32.gmra.mrb[22].mxu0 %v33967_v52  ;;  %v12610_v52 = vsub.f32 %v28628_v31, %v32781_v57  ;;  %v12630_v57 = vsub.f32 %v28642_v58, %v32783_v51  ;;  %v33988_v51 = vld [vmem:[#allocation152_spill] sm:$0xff]  ;;  %v33999_v58 = vld [vmem:[#allocation181_spill] sm:$0xff] }
 0x294   : > { %22885 = vmatprep.mubr.f32.mxu0 %v33969_v25  ;;  %v12601_v25 = vand.u32 4294901760, %v12600_v27  ;;  %v34002_v31 = vld [vmem:[#allocation193_spill] sm:$0xff] }
 0x295   : > { %21368 = vmatmul.mubr.f32.gmra.mrb[20].mxu1 %v33970_v9  ;;  %v33975_v9 = vld [vmem:[#allocation227_spill] sm:$0xff]  ;;  %v12631_v27 = vand.u32 4294901760, %v12630_v57  ;;  %v28684_v57 = vld [vmem:[%s32229_s1 + $0x48] sm:$0xff] }
 0x296   : > { %21370 = vmatprep.mubr.f32.mxu1 %v33971_v13  ;;  %v33976_v13 = vld [vmem:[#allocation80_spill] sm:$0xff] }
 0x297   : > { %22886 = vmatmul.mubr.f32.gmra.mrb[24].mxu0 %v33972_v54  ;;  %v12611_v54 = vand.u32 4294901760, %v12610_v52  ;;  %v33982_v52 = vld [vmem:[#allocation249_spill] sm:$0xff] }
 0x298   : > { %22888 = vmatprep.mubr.f32.mxu0 %v33973_v17  ;;  %v33978_v17 = vld [vmem:[#allocation238_spill] sm:$0xff] }
 0x299   : > { %21371 = vmatmul.mubr.f32.gmra.mrb[22].mxu1 %v33974_v8  ;;  %v33980_v8 = vld [vmem:[#allocation246_spill] sm:$0xff] }
 0x29a   : > { %21373 = vmatprep.mubr.f32.mxu1 %v33975_v9  ;;  %v33983_v9 = vld [vmem:[#allocation252_spill] sm:$0xff] }
 0x29b   : > { %22889 = vmatmul.mubr.f32.gmra.mrb[26].mxu0 %v33976_v13  ;;  %v33981_v13 = vld [vmem:[#allocation145_spill] sm:$0xff] }
 0x29c   : > { %22891 = vmatprep.mubr.f32.mxu0 %v12601_v25  ;;  %v33984_v25 = vld [vmem:[#allocation146_spill] sm:$0xff] }
 0x29d   : > { %21374 = vmatmul.mubr.f32.gmra.mrb[24].mxu1 %v33977_v35  ;;  %v33993_v35 = vld [vmem:[#allocation163_spill] sm:$0xff] }
 0x29e   : > { %21376 = vmatprep.mubr.f32.mxu1 %v33978_v17 }
 0x29f   : > { %22892 = vmatmul.mubr.f32.gmra.mrb[28].mxu0 %v12611_v54  ;;  %v33986_v54 = vld [vmem:[#allocation254_spill] sm:$0xff] }
 0x2a0   : > { %22894 = vmatprep.mubr.f32.mxu0 %v12621_v62  ;;  %v28679_v62 = vld [vmem:[%s32229_s1 + $0x40] sm:$0xff] }
 0x2a1   : > { %21377 = vmatmul.mubr.f32.gmra.mrb[26].mxu1 %v33979_v41  ;;  %v33992_v41 = vld [vmem:[#allocation160_spill] sm:$0xff] }
 0x2a2   : > { %21379 = vmatprep.mubr.f32.mxu1 %v33980_v8  ;;  %v33990_v8 = vld [vmem:[#allocation118_spill] sm:$0xff] }
 0x2a3   : > { %22895 = vmatmul.mubr.f32.gmra.mrb[30].mxu0 %v12631_v27  ;;  %v33987_v27 = vld [vmem:[#allocation109_spill] sm:$0xff] }
 0x2a4   : > { %22905 = vmatprep.mubr.f32.mxu0 %v33981_v13 }
 0x2a5   : > { %21380 = vmatmul.mubr.f32.gmra.mrb[28].mxu1 %v33982_v52  ;;  %v33989_v52 = vld [vmem:[#allocation157_spill] sm:$0xff] }
 0x2a6   : > { %21382 = vmatprep.mubr.f32.mxu1 %v33983_v9  ;;  %v4318_v9 = vand.u32 4294901760, %v28684_v57 }
 0x2a7   : > { %22906 = vmatmul.mubr.f32.vlgmr.msra.gmra.mrb[0].mxu0 %v33984_v25 }
 0x2a8   : > { %22908 = vmatprep.mubr.f32.mxu0 %v33985_v37  ;;  %24156 = vmatpush3.bf16.msra.mxu0 %v28467_v59  ;;  %v4315_v59 = vand.u32 4294901760, %v28679_v62 }
 0x2a9   : > { %21383 = vmatmul.mubr.f32.gmra.mrb[30].mxu1 %v33986_v54  ;;  %24158 = vmatprep.subr.bf16.mxu0 %v28519_v3  ;;  %v33991_v54 = vld [vmem:[#allocation140_spill] sm:$0xff] }
 0x2aa   : > { %21393 = vmatprep.mubr.f32.mxu1 %v33987_v27  ;;  %v28700_v17 = vpack.c.bf16 %v4318_v9, %v4315_v59 }
 0x2ab   : > { %22909 = vmatmul.mubr.f32.gmra.mrb[2].mxu0 %v33988_v51 }
 0x2ac   : > { %22911 = vmatprep.mubr.f32.mxu0 %v33989_v52  ;;  %24160 = vmatpush3.bf16.msra.mxu0 %v28519_v3  ;;  %v33995_v3 = vld [vmem:[#allocation17_spill] sm:$0xff] }
 0x2ad   : > { %21394 = vmatmul.mubr.f32.vlgmr.msra.gmra.mrb[0].mxu1 %v33990_v8  ;;  %24162 = vmatprep.subr.bf16.mxu0 %v28362_v18 }
 0x2ae   : > { %23940 = vmatpush3.bf16.msra.mxu1 %v33855_v26  ;;  %21396 = vmatprep.mubr.f32.mxu1 %v33991_v54  ;;  %v33996_v26 = vld [vmem:[#allocation172_spill] sm:$0xff] }
 0x2af   : > { %22912 = vmatmul.mubr.f32.gmra.mrb[4].mxu0 %v33992_v41  ;;  %23942 = vmatprep.subr.bf16.mxu1 %v33889_v47 }
 0x2b0   : > { %22914 = vmatprep.mubr.f32.mxu0 %v33993_v35 }
 0x2b1   : > { %21397 = vmatmul.mubr.f32.gmra.mrb[2].mxu1 %v33994_v23 }
 0x2b2   : > { %21399 = vmatprep.mubr.f32.mxu1 %v33981_v13  ;;  %23944 = vmatpush3.bf16.msra.mxu1 %v33889_v47  ;;  %v34000_v47 = vld [vmem:[#allocation185_spill] sm:$0xff] }
 0x2b3   : > { %22915 = vmatmul.mubr.f32.gmra.mrb[6].mxu0 %v33995_v3  ;;  %23946 = vmatprep.subr.bf16.mxu1 %v28700_v17 }
 0x2b4   : > { %22917 = vmatprep.mubr.f32.mxu0 %v33996_v26 }
 0x2b5   : > { %21400 = vmatmul.mubr.f32.gmra.mrb[4].mxu1 %v33984_v25 }
 0x2b6   : > { %21402 = vmatprep.mubr.f32.mxu1 %v33985_v37 }
 0x2b7   : > { %22918 = vmatmul.mubr.f32.gmra.mrb[8].mxu0 %v33997_v7 }
 0x2b8   : > { %22920 = vmatprep.mubr.f32.mxu0 %v33998_v19 }
 0x2b9   : > { %21403 = vmatmul.mubr.f32.gmra.mrb[6].mxu1 %v33988_v51 }
 0x2ba   : > { %21405 = vmatprep.mubr.f32.mxu1 %v33989_v52 }
 0x2bb   : > { %22921 = vmatmul.mubr.f32.gmra.mrb[10].mxu0 %v33999_v58 }
 0x2bc   : > { %22923 = vmatprep.mubr.f32.mxu0 %v34000_v47 }
 0x2bd   : > { %21406 = vmatmul.mubr.f32.gmra.mrb[8].mxu1 %v33992_v41 }
 0x2be   : > { %21408 = vmatprep.mubr.f32.mxu1 %v33993_v35 }
 0x2bf   : > { %22924 = vmatmul.mubr.f32.gmra.mrb[12].mxu0 %v34001_v2 }
 0x2c0   : > { %22926 = vmatprep.mubr.f32.mxu0 %v34002_v31 }
 0x2c1   : > { %21409 = vmatmul.mubr.f32.gmra.mrb[10].mxu1 %v33995_v3 }
 0x2c2   : > { %21411 = vmatprep.mubr.f32.mxu1 %v33996_v26 }
 0x2c3   : > { %22927 = vmatmul.mubr.f32.gmra.mrb[14].mxu0 %v34003_v39 }
 0x2c4   : > { %22929 = vmatprep.mubr.f32.mxu0 %v34004_v0 }
 0x2c5   : > { %21412 = vmatmul.mubr.f32.gmra.mrb[12].mxu1 %v33997_v7 }
 0x2c6   : > { %21414 = vmatprep.mubr.f32.mxu1 %v33998_v19 }
 0x2c7   : > { %22930 = vmatmul.mubr.f32.gmra.mrb[16].mxu0 %v34005_v40 }
 0x2c8   : > { %22932 = vmatprep.mubr.f32.mxu0 %v34006_v20 }
 0x2c9   : > { %21415 = vmatmul.mubr.f32.gmra.mrb[14].mxu1 %v33999_v58 }
 0x2ca   : > { %21417 = vmatprep.mubr.f32.mxu1 %v34000_v47 }
 0x2cb   : > { %22933 = vmatmul.mubr.f32.gmra.mrb[18].mxu0 %v34007_v46 }
 0x2cc   : > { %22935 = vmatprep.mubr.f32.mxu0 %v34008_v1 }
 0x2cd   : > { %21418 = vmatmul.mubr.f32.gmra.mrb[16].mxu1 %v34001_v2 }
 0x2ce   : > { %21420 = vmatprep.mubr.f32.mxu1 %v34002_v31 }
 0x2cf   : > { %22936 = vmatmul.mubr.f32.gmra.mrb[20].mxu0 %v34009_v10 }
 0x2d0   : > { %22938 = vmatprep.mubr.f32.mxu0 %v34010_v33 }
 0x2d1   : > { %21421 = vmatmul.mubr.f32.gmra.mrb[18].mxu1 %v34003_v39 }
 0x2d2   : > { %21423 = vmatprep.mubr.f32.mxu1 %v34004_v0 }
 0x2d3   : > { %22939 = vmatmul.mubr.f32.gmra.mrb[22].mxu0 %v34011_v50 }
 0x2d4   : > { %22941 = vmatprep.mubr.f32.mxu0 %v28218_v21 }
 0x2d5   : > { %21424 = vmatmul.mubr.f32.gmra.mrb[20].mxu1 %v34005_v40  ;;  %v28756_v40 = vsub.f32 %v28684_v57, %v4318_v9  ;;  %v18622_v9 = vld [vmem:[%s32229_s1 + $0x58] sm:$0xff] }
 0x2d6   : > { %21426 = vmatprep.mubr.f32.mxu1 %v34006_v20  ;;  %v28753_v20 = vsub.f32 %v28679_v62, %v4315_v59  ;;  %v18621_v62 = vld [vmem:[%s32229_s1 + $0x50] sm:$0xff]  ;;  %v4324_v59 = vand.u32 4294901760, %v18622_v9 }
 0x2d7   : > { %22942 = vmatmul.mubr.f32.gmra.mrb[24].mxu0 %v28242_v32  ;;  %34013 = vst [vmem:[#allocation154_spill] sm:$0xff] %v28756_v40  ;;  %v4321_v57 = vand.u32 4294901760, %v18621_v62 }
 0x2d8   : > { %22944 = vmatprep.mubr.f32.mxu0 %v28251_v30  ;;  %34012 = vst [vmem:[#allocation153_spill] sm:$0xff] %v28753_v20 }
 0x2d9   : > { %21427 = vmatmul.mubr.f32.gmra.mrb[22].mxu1 %v34007_v46 }
 0x2da   : > { %21429 = vmatprep.mubr.f32.mxu1 %v34008_v1 }
 0x2db   : > { %22945 = vmatmul.mubr.f32.gmra.mrb[26].mxu0 %v28269_v11 }
 0x2dc   : > { %22947 = vmatprep.mubr.f32.mxu0 %v28607_v43  ;;  %v32813_v43 = vand.u32 4294901760, %v28753_v20 }
 0x2dd   : > { %21430 = vmatmul.mubr.f32.gmra.mrb[24].mxu1 %v34009_v10 }
 0x2de   : > { %21432 = vmatprep.mubr.f32.mxu1 %v34010_v33  ;;  %v32814_v33 = vand.u32 4294901760, %v28756_v40 }
 0x2df   : > { %22948 = vmatmul.mubr.f32.gmra.mrb[28].mxu0 %v28615_v49 }
 0x2e0   : > { %22950 = vmatprep.mubr.f32.mxu0 %v28621_v24  ;;  %v34015_v24 = vld [vmem:[#allocation137_spill] sm:$0xff] }
 0x2e1   : > { %21433 = vmatmul.mubr.f32.gmra.mrb[26].mxu1 %v34011_v50  ;;  %v34016_v49 = vand.u32 4294901760, %v34015_v24 }
 0x2e2   : > { %21435 = vmatprep.mubr.f32.mxu1 %v28218_v21 }
 0x2e3   : > { %22951 = vmatmul.mubr.f32.gmra.mrb[30].mxu0 %v28630_v28  ;;  %v4714_v28 = vsub.f32 %v28756_v40, %v32814_v33 }
 0x2e4   : > { %22961 = vmatprep.mubr.f32.mxu0 %v33894_v44  ;;  %v4707_v44 = vsub.f32 %v28753_v20, %v32813_v43  ;;  %v28793_v43 = vpack.c.bf16 %v28756_v40, %v28753_v20  ;;  %v4190_v40 = vld [vmem:[%s26405_s17 + $0x6a] sm:$0xff]  ;;  %v4191_v20 = vld [vmem:[%s26405_s17 + $0x7a] sm:$0xff] }
 0x2e5   : > { %21436 = vmatmul.mubr.f32.gmra.mrb[28].mxu1 %v28242_v32 }
 0x2e6   : > { %21438 = vmatprep.mubr.f32.mxu1 %v28251_v30  ;;  %v4708_v33 = vand.u32 4294901760, %v4707_v44 }
 0x2e7   : > { %22962 = vmatmul.mubr.f32.vlgmr.msra.gmra.mrb[0].mxu0 %v27864_v55  ;;  %v34014_v55 = vand.u32 4294901760, %v28421_v53 }
 0x2e8   : > { %22964 = vmatprep.mubr.f32.mxu0 %v27881_v12  ;;  %24164 = vmatpush3.bf16.msra.mxu0 %v28362_v18  ;;  %v28796_v12 = vpack.c.bf16 %v4324_v59, %v4321_v57  ;;  %v4715_v18 = vand.u32 4294901760, %v4714_v28 }
 0x2e9   : > { %21439 = vmatmul.mubr.f32.gmra.mrb[30].mxu1 %v28269_v11  ;;  %24166 = vmatprep.subr.bf16.mxu0 %v28454_v36  ;;  %v28788_v30 = vpack.c.bf16 %v34016_v49, %v34014_v55  ;;  %v4187_v55 = vld [vmem:[%s26405_s17 + $0x4a] sm:$0xff] }
 0x2ea   : > { %21449 = vmatprep.mubr.f32.mxu1 %v33987_v27  ;;  %34017 = vst [vmem:[#allocation156_spill] sm:$0xff] %v28796_v12 }
 0x2eb   : > { %22965 = vmatmul.mubr.f32.gmra.mrb[2].mxu0 %v27900_v60  ;;  %v28806_v60 = vpack.c.bf16 %v4715_v18, %v4708_v33  ;;  %v34020_v33 = vld [vmem:[#allocation221_spill] sm:$0xff]  ;;  %v34021_v18 = vld [vmem:[#allocation228_spill] sm:$0xff] }
 0x2ec   : > { %22967 = vmatprep.mubr.f32.mxu0 %v27915_v48  ;;  %24168 = vmatpush3.bf16.msra.mxu0 %v28454_v36  ;;  %v28835_v48 = vsub.f32 %v18621_v62, %v4321_v57  ;;  %v4186_v62 = vld [vmem:[%s26405_s17 + $0x3a] sm:$0xff] }
 0x2ed   : > { %21450 = vmatmul.mubr.f32.vlgmr.msra.gmra.mrb[0].mxu1 %v33990_v8  ;;  %24170 = vmatprep.subr.bf16.mxu0 %v28788_v30  ;;  %v34029_v8 = vld [vmem:[#allocation247_spill] sm:$0xff]  ;;  %v34034_v57 = vld [vmem:[#allocation144_spill] sm:$0xff] }
 0x2ee   : > { %23948 = vmatpush3.bf16.msra.mxu1 %v28700_v17  ;;  %21452 = vmatprep.mubr.f32.mxu1 %v33991_v54  ;;  %34018 = vst [vmem:[#allocation159_spill] sm:$0xff] %v28835_v48 }
 0x2ef   : > { %22968 = vmatmul.mubr.f32.gmra.mrb[4].mxu0 %v33895_v5  ;;  %23950 = vmatprep.subr.bf16.mxu1 %v28796_v12  ;;  %v4181_v5 = vld [vmem:[%s26405_s17 + $0x2] sm:$0xff] }
 0x2f0   : > { %22970 = vmatprep.mubr.f32.mxu0 %v33896_v45  ;;  %v34022_v45 = vld [vmem:[#allocation231_spill] sm:$0xff] }
 0x2f1   : > { %21453 = vmatmul.mubr.f32.gmra.mrb[2].mxu1 %v33994_v23  ;;  %v34024_v23 = vld [vmem:[#allocation239_spill] sm:$0xff] }
 0x2f2   : > { %21455 = vmatprep.mubr.f32.mxu1 %v33981_v13  ;;  %23952 = vmatpush3.bf16.msra.mxu1 %v28796_v12  ;;  %v34047_v12 = vand.u32 4294901760, %v28835_v48 }
 0x2f3   : > { %22971 = vmatmul.mubr.f32.gmra.mrb[6].mxu0 %v33897_v38  ;;  %23954 = vmatprep.subr.bf16.mxu1 %v28806_v60  ;;  %v4219_v38 = vsel %vm352_vm0, %v4181_v5, 0 }
 0x2f4   : > { %22973 = vmatprep.mubr.f32.mxu0 %v27980_v4  ;;  %v28837_v4 = vsub.f32 %v18622_v9, %v4324_v59  ;;  %v34033_v9 = vld [vmem:[#allocation250_spill] sm:$0xff] }
 0x2f5   : > { %21456 = vmatmul.mubr.f32.gmra.mrb[4].mxu1 %v33984_v25 }
 0x2f6   : > { %21458 = vmatprep.mubr.f32.mxu1 %v33985_v37  ;;  %34019 = vst [vmem:[#allocation161_spill] sm:$0xff] %v28837_v4  ;;  %v28843_v53 = vpack.c.bf16 %v28837_v4, %v28835_v48 }
 0x2f7   : > { %22974 = vmatmul.mubr.f32.gmra.mrb[8].mxu0 %v33898_v22  ;;  %v34023_v22 = vld [vmem:[#allocation236_spill] sm:$0xff] }
 0x2f8   : > { %22976 = vmatprep.mubr.f32.mxu0 %v33899_v15  ;;  %v4183_v15 = vld [vmem:[%s26405_s17 + $0x1a] sm:$0xff] }
 0x2f9   : > { %21459 = vmatmul.mubr.f32.gmra.mrb[6].mxu1 %v33988_v51 }
 0x2fa   : > { %21461 = vmatprep.mubr.f32.mxu1 %v33989_v52 }
 0x2fb   : > { %22977 = vmatmul.mubr.f32.gmra.mrb[10].mxu0 %v33902_v16  ;;  %v34025_v16 = vld [vmem:[#allocation203_spill] sm:$0xff] }
 0x2fc   : > { %22979 = vmatprep.mubr.f32.mxu0 %v33903_v61  ;;  %v28860_v61 = vand.u32 4294901760, %v4219_v38 }
 0x2fd   : > { %21462 = vmatmul.mubr.f32.gmra.mrb[8].mxu1 %v33992_v41 }
 0x2fe   : > { %21464 = vmatprep.mubr.f32.mxu1 %v33993_v35  ;;  %34026 = vst [vmem:[#allocation162_spill] sm:$0xff] %v28860_v61  ;;  %v28873_v24 = vsub.f32 %v4219_v38, %v28860_v61  ;;  %v34039_v38 = vld [vmem:[#allocation224_spill] sm:$0xff] }
 0x2ff   : > { %22980 = vmatmul.mubr.f32.gmra.mrb[12].mxu0 %v33904_v42 }
 0x300   : > { %22982 = vmatprep.mubr.f32.mxu0 %v33905_v6  ;;  %v34027_v6 = vld [vmem:[#allocation204_spill] sm:$0xff]  ;;  %34031 = vst [vmem:[#allocation166_spill] sm:$0xff] %v28873_v24 }
 0x301   : > { %21465 = vmatmul.mubr.f32.gmra.mrb[10].mxu1 %v33995_v3 }
 0x302   : > { %21467 = vmatprep.mubr.f32.mxu1 %v33996_v26 }
 0x303   : > { %22983 = vmatmul.mubr.f32.gmra.mrb[14].mxu0 %v33906_v34  ;;  %v4225_v34 = vsel %vm352_vm0, %v4183_v15, 0  ;;  %v4237_v15 = vsel %vm352_vm0, %v4187_v55, 0 }
 0x304   : > { %22985 = vmatprep.mubr.f32.mxu0 %v33907_v29  ;;  %v4184_v29 = vld [vmem:[%s26405_s17 + $0x22] sm:$0xff]  ;;  %v28875_v28 = vand.u32 4294901760, %v4225_v34 }
 0x305   : > { %21468 = vmatmul.mubr.f32.gmra.mrb[12].mxu1 %v33997_v7  ;;  %v4228_v54 = vsel %vm352_vm0, %v4184_v29, 0  ;;  %v34041_v29 = vld [vmem:[#allocation84_spill] sm:$0xff] }
 0x306   : > { %21470 = vmatprep.mubr.f32.mxu1 %v33998_v19  ;;  %34032 = vst [vmem:[#allocation22_spill] sm:$0xff] %v28875_v28  ;;  %v28886_v44 = vand.u32 4294901760, %v4228_v54 }
 0x307   : > { %22986 = vmatmul.mubr.f32.gmra.mrb[16].mxu0 %v33908_v63  ;;  %v34028_v63 = vld [vmem:[#allocation243_spill] sm:$0xff] }
 0x308   : > { %22988 = vmatprep.mubr.f32.mxu0 %v33909_v56  ;;  %v4185_v56 = vld [vmem:[%s26405_s17 + $0x32] sm:$0xff]  ;;  %34036 = vst [vmem:[#allocation27_spill] sm:$0xff] %v28886_v44 }
 0x309   : > { %21471 = vmatmul.mubr.f32.gmra.mrb[14].mxu1 %v33999_v58  ;;  %v4231_v27 = vsel %vm352_vm0, %v4185_v56, 0 }
 0x30a   : > { %21473 = vmatprep.mubr.f32.mxu1 %v34000_v47  ;;  %v28894_v5 = vand.u32 4294901760, %v4231_v27 }
 0x30b   : > { %22989 = vmatmul.mubr.f32.gmra.mrb[18].mxu0 %v28166_v14  ;;  %v4182_v14 = vld [vmem:[%s26405_s17 + $0xa] sm:$0xff] }
 0x30c   : > { %22991 = vmatprep.mubr.f32.mxu0 %v34020_v33  ;;  %v4222_v42 = vsel %vm352_vm0, %v4182_v14, 0  ;;  %v32821_v33 = vand.u32 4294901760, %v28873_v24  ;;  %34038 = vst [vmem:[#allocation30_spill] sm:$0xff] %v28894_v5  ;;  %v4188_v14 = vld [vmem:[%s26405_s17 + $0x52] sm:$0xff]  ;;  %v28917_v55 = vsub.f32 %v4231_v27, %v28894_v5 }
 0x30d   : > { %21474 = vmatmul.mubr.f32.gmra.mrb[16].mxu1 %v34001_v2  ;;  %v28869_v49 = vand.u32 4294901760, %v4222_v42 }
 0x30e   : > { %21476 = vmatprep.mubr.f32.mxu1 %v34002_v31  ;;  %34044 = vst [vmem:[#allocation174_spill] sm:$0xff] %v28917_v55 }
 0x30f   : > { %22992 = vmatmul.mubr.f32.gmra.mrb[20].mxu0 %v34021_v18  ;;  %34030 = vst [vmem:[#allocation165_spill] sm:$0xff] %v28869_v49  ;;  %v28884_v59 = vsub.f32 %v4222_v42, %v28869_v49  ;;  %v28892_v18 = vsub.f32 %v4225_v34, %v28875_v28  ;;  %v4240_v42 = vsel %vm352_vm0, %v4188_v14, 0  ;;  %v34046_v34 = vld [vmem:[#allocation151_spill] sm:$0xff] }
 0x310   : > { %22994 = vmatprep.mubr.f32.mxu0 %v34022_v45  ;;  %v4234_v45 = vsel %vm352_vm0, %v4186_v62, 0  ;;  %v4386_v62 = vsub.f32 %v28873_v24, %v32821_v33  ;;  %v4721_v33 = vsub.f32 %v28835_v48, %v34047_v12  ;;  %v34049_v24 = vld [vmem:[#allocation155_spill] sm:$0xff] }
 0x311   : > { %21477 = vmatmul.mubr.f32.gmra.mrb[18].mxu1 %v34003_v39  ;;  %34035 = vst [vmem:[#allocation168_spill] sm:$0xff] %v28884_v59  ;;  %34037 = vst [vmem:[#allocation170_spill] sm:$0xff] %v28892_v18  ;;  %v28908_v56 = vand.u32 4294901760, %v4234_v45  ;;  %v34050_v14 = vand.u32 4294901760, %v28884_v59  ;;  %v34053_v48 = vand.u32 4294901760, %v28892_v18  ;;  %v34119_v39 = vld [vmem:[#allocation217_spill] sm:$0xff] }
 0x312   : > { %21479 = vmatprep.mubr.f32.mxu1 %v34004_v0  ;;  %v4387_v12 = vand.u32 4294901760, %v4386_v62  ;;  %v4246_v62 = vsel %vm352_vm0, %v4190_v40, 0 }
 0x313   : > { %22995 = vmatmul.mubr.f32.gmra.mrb[22].mxu0 %v34023_v22  ;;  %v34040_v22 = vld [vmem:[#allocation147_spill] sm:$0xff]  ;;  %34043 = vst [vmem:[#allocation173_spill] sm:$0xff] %v28908_v56 }
 0x314   : > { %22997 = vmatprep.mubr.f32.mxu0 %v34024_v23 }
 0x315   : > { %21480 = vmatmul.mubr.f32.gmra.mrb[20].mxu1 %v34025_v16 }
 0x316   : > { %21482 = vmatprep.mubr.f32.mxu1 %v34027_v6  ;;  %v34062_v6 = vld [vmem:[#allocation16_spill] sm:$0xff] }
 0x317   : > { %22998 = vmatmul.mubr.f32.gmra.mrb[24].mxu0 %v34028_v63  ;;  %v28906_v63 = vsub.f32 %v4228_v54, %v28886_v44  ;;  %v28921_v54 = vand.u32 4294901760, %v4237_v15 }
 0x318   : > { %23000 = vmatprep.mubr.f32.mxu0 %v34029_v8  ;;  %v4189_v8 = vld [vmem:[%s26405_s17 + $0x62] sm:$0xff] }
 0x319   : > { %21483 = vmatmul.mubr.f32.gmra.mrb[22].mxu1 %v34007_v46  ;;  %34042 = vst [vmem:[#allocation40_spill] sm:$0xff] %v28906_v63  ;;  %34045 = vst [vmem:[#allocation175_spill] sm:$0xff] %v28921_v54  ;;  %v4243_v23 = vsel %vm352_vm0, %v4189_v8, 0  ;;  %v28939_v8 = vsub.f32 %v4234_v45, %v28908_v56  ;;  %v28954_v45 = vsub.f32 %v4237_v15, %v28921_v54 }
 0x31a   : > { %21485 = vmatprep.mubr.f32.mxu1 %v34008_v1  ;;  %v34056_v1 = vld [vmem:[#allocation136_spill] sm:$0xff]  ;;  %v28956_v46 = vand.u32 4294901760, %v4243_v23 }
 0x31b   : > { %23001 = vmatmul.mubr.f32.gmra.mrb[26].mxu0 %v34033_v9  ;;  %v34048_v9 = vand.u32 4294901760, %v28837_v4  ;;  %34051 = vst [vmem:[#allocation176_spill] sm:$0xff] %v28939_v8  ;;  %34059 = vst [vmem:[#allocation177_spill] sm:$0xff] %v28954_v45 }
 0x31c   : > { %23003 = vmatprep.mubr.f32.mxu0 %v34034_v57  ;;  %34060 = vst [vmem:[#allocation70_spill] sm:$0xff] %v28956_v46  ;;  %v28983_v15 = vsub.f32 %v4243_v23, %v28956_v46 }
 0x31d   : > { %21486 = vmatmul.mubr.f32.gmra.mrb[24].mxu1 %v34009_v10  ;;  %v4728_v27 = vsub.f32 %v28837_v4, %v34048_v9  ;;  %v4406_v9 = vsub.f32 %v28892_v18, %v34053_v48  ;;  %v34054_v4 = vld [vmem:[#allocation139_spill] sm:$0xff]  ;;  %v4192_v48 = vld [vmem:[%s26405_s17 + $0x82] sm:$0xff] }
 0x31e   : > { %21488 = vmatprep.mubr.f32.mxu1 %v34039_v38  ;;  %v28941_v38 = vand.u32 4294901760, %v4240_v42  ;;  %v34055_v10 = vand.u32 4294901760, %v34054_v4  ;;  %v34061_v18 = vld [vmem:[#allocation158_spill] sm:$0xff]  ;;  %34068 = vst [vmem:[#allocation142_spill] sm:$0xff] %v28983_v15 }
 0x31f   : > { %23004 = vmatmul.mubr.f32.gmra.mrb[28].mxu0 %v34040_v22  ;;  %v4729_v4 = vand.u32 4294901760, %v4728_v27  ;;  %v4407_v27 = vand.u32 4294901760, %v4406_v9  ;;  %v34071_v9 = vand.u32 4294901760, %v28939_v8 }
 0x320   : > { %23006 = vmatprep.mubr.f32.mxu0 %v34041_v29  ;;  %34052 = vst [vmem:[#allocation61_spill] sm:$0xff] %v28941_v38  ;;  %v28969_v40 = vsub.f32 %v4240_v42, %v28941_v38 }
 0x321   : > { %21489 = vmatmul.mubr.f32.gmra.mrb[26].mxu1 %v34011_v50  ;;  %v4436_v0 = vsub.f32 %v28939_v8, %v34071_v9  ;;  %v34078_v9 = vld [vmem:[#allocation57_spill] sm:$0xff] }
 0x322   : > { %21491 = vmatprep.mubr.f32.mxu1 %v28218_v21  ;;  %v4396_v21 = vsub.f32 %v28884_v59, %v34050_v14  ;;  %v34057_v14 = vand.u32 4294901760, %v34056_v1  ;;  %v34058_v59 = vld [vmem:[#allocation240_spill] sm:$0xff]  ;;  %34064 = vst [vmem:[#allocation178_spill] sm:$0xff] %v28969_v40 }
 0x323   : > { %23007 = vmatmul.mubr.f32.gmra.mrb[30].mxu0 %v34046_v34 }
 0x324   : > { %23017 = vmatprep.mubr.f32.mxu0 %v34049_v24  ;;  %v24173_v50 = vpack.c.bf16 %v34057_v14, %v34055_v10  ;;  %v4722_v24 = vand.u32 4294901760, %v4721_v33  ;;  %v34063_v10 = vand.u32 4294901760, %v28906_v63  ;;  %v4397_v33 = vand.u32 4294901760, %v4396_v21  ;;  %v4195_v21 = vld [vmem:[%s26405_s17 + $0xaa] sm:$0xff] }
 0x325   : > { %21492 = vmatmul.mubr.f32.gmra.mrb[28].mxu1 %v28242_v32  ;;  %v4249_v32 = vsel %vm352_vm0, %v4191_v20, 0  ;;  %v4193_v20 = vld [vmem:[%s26405_s17 + $0x92] sm:$0xff]  ;;  %v34067_v14 = vand.u32 4294901760, %v28917_v55 }
 0x326   : > { %21494 = vmatprep.mubr.f32.mxu1 %v34058_v59  ;;  %v4416_v1 = vsub.f32 %v28906_v63, %v34063_v10  ;;  %v4194_v63 = vld [vmem:[%s26405_s17 + $0x9a] sm:$0xff]  ;;  %v4255_v59 = vsel %vm352_vm0, %v4193_v20, 0  ;;  %v23957_v16 = vpack.c.bf16 %v4729_v4, %v4722_v24  ;;  %v4261_v4 = vsel %vm352_vm0, %v4195_v21, 0 }
 0x327   : > { %23018 = vmatmul.mubr.f32.vlgmr.msra.gmra.mrb[0].mxu0 %v34061_v18  ;;  %v28973_v18 = vand.u32 4294901760, %v4246_v62  ;;  %v4426_v10 = vsub.f32 %v28917_v55, %v34067_v14  ;;  %v4258_v24 = vsel %vm352_vm0, %v4194_v63, 0  ;;  %v34079_v63 = vld [vmem:[#allocation73_spill] sm:$0xff]  ;;  %v4437_v21 = vand.u32 4294901760, %v4436_v0 }
 0x328   : > { %23020 = vmatprep.mubr.f32.mxu0 %v34062_v6  ;;  %24172 = vmatpush3.bf16.msra.mxu0 %v28788_v30  ;;  %v28975_v6 = vand.u32 4294901760, %v4249_v32  ;;  %v4252_v30 = vsel %vm352_vm0, %v4192_v48, 0  ;;  %v34070_v48 = vld [vmem:[#allocation171_spill] sm:$0xff] }
 0x329   : > { %21495 = vmatmul.mubr.f32.gmra.mrb[30].mxu1 %v28269_v11  ;;  %34065 = vst [vmem:[#allocation76_spill] sm:$0xff] %v28973_v18  ;;  %24174 = vmatprep.subr.bf16.mxu0 %v24173_v50  ;;  %v34069_v11 = vld [vmem:[#allocation164_spill] sm:$0xff]  ;;  %v28994_v42 = vand.u32 4294901760, %v4252_v30  ;;  %v28997_v23 = vsub.f32 %v4246_v62, %v28973_v18  ;;  %v4427_v20 = vand.u32 4294901760, %v4426_v10  ;;  %v4197_v10 = vld [vmem:[%s26405_s17 + $0xc2] sm:$0xff] }
 0x32a   : > { %34066 = vst [vmem:[#allocation138_spill] sm:$0xff] %v28975_v6  ;;  %21505 = vmatprep.mubr.f32.mxu1 %v4387_v12  ;;  %v4417_v12 = vand.u32 4294901760, %v4416_v1  ;;  %v34075_v1 = vld [vmem:[#allocation7_spill] sm:$0xff] }
 0x32b   : > { %23021 = vmatmul.mubr.f32.gmra.mrb[2].mxu0 %v34069_v11  ;;  %34072 = vst [vmem:[#allocation135_spill] sm:$0xff] %v28994_v42  ;;  %34073 = vst [vmem:[#allocation96_spill] sm:$0xff] %v28997_v23  ;;  %v29000_v11 = vsub.f32 %v4249_v32, %v28975_v6  ;;  %v4196_v32 = vld [vmem:[%s26405_s17 + $0xb2] sm:$0xff]  ;;  %v29016_v14 = vsub.f32 %v4252_v30, %v28994_v42 }
 0x32c   : > { %23023 = vmatprep.mubr.f32.mxu0 %v34070_v48  ;;  %24176 = vmatpush3.bf16.msra.mxu0 %v24173_v50  ;;  %v34076_v50 = vand.u32 4294901760, %v28954_v45  ;;  %v29010_v48 = vand.u32 4294901760, %v4255_v59  ;;  %v4264_v0 = vsel %vm352_vm0, %v4196_v32, 0 }
 0x32d   : > { %21506 = vmatmul.mubr.f32.vlgmr.msra.gmra.mrb[0].mxu1 %v4397_v33  ;;  %34074 = vst [vmem:[#allocation85_spill] sm:$0xff] %v29000_v11  ;;  %24178 = vmatprep.subr.bf16.mxu0 %v34075_v1  ;;  %34080 = vst [vmem:[#allocation148_spill] sm:$0xff] %v29016_v14 }
 0x32e   : > { %23956 = vmatpush3.bf16.msra.mxu1 %v28806_v60  ;;  %21508 = vmatprep.mubr.f32.mxu1 %v4407_v27  ;;  %v4446_v33 = vsub.f32 %v28954_v45, %v34076_v50  ;;  %34077 = vst [vmem:[#allocation92_spill] sm:$0xff] %v29010_v48  ;;  %v29018_v60 = vand.u32 4294901760, %v4258_v24  ;;  %v29020_v27 = vand.u32 4294901760, %v4261_v4  ;;  %v34083_v50 = vand.u32 4294901760, %v28969_v40  ;;  %v34087_v45 = vld [vmem:[#allocation184_spill] sm:$0xff] }
 0x32f   : > { %23024 = vmatmul.mubr.f32.gmra.mrb[4].mxu0 %v34078_v9  ;;  %23958 = vmatprep.subr.bf16.mxu1 %v23957_v16  ;;  %v29033_v55 = vsub.f32 %v4255_v59, %v29010_v48  ;;  %v4198_v9 = vld [vmem:[%s26405_s17 + $0xca] sm:$0xff]  ;;  %v29047_v59 = vand.u32 4294901760, %v4264_v0 }
 0x330   : > { %23026 = vmatprep.mubr.f32.mxu0 %v34079_v63  ;;  %34081 = vst [vmem:[#allocation167_spill] sm:$0xff] %v29018_v60  ;;  %34082 = vst [vmem:[#allocation26_spill] sm:$0xff] %v29020_v27  ;;  %v4456_v62 = vsub.f32 %v28969_v40, %v34083_v50  ;;  %v4447_v30 = vand.u32 4294901760, %v4446_v33  ;;  %v34084_v63 = vand.u32 4294901760, %v28983_v15  ;;  %v4267_v50 = vsel %vm352_vm0, %v4197_v10, 0 }
 0x331   : > { %21509 = vmatmul.mubr.f32.gmra.mrb[2].mxu1 %v4417_v12  ;;  %34085 = vst [vmem:[#allocation44_spill] sm:$0xff] %v29033_v55  ;;  %v34086_v12 = vld [vmem:[#allocation9_spill] sm:$0xff]  ;;  %v29042_v33 = vsub.f32 %v4258_v24, %v29018_v60  ;;  %v29045_v32 = vsub.f32 %v4261_v4, %v29020_v27  ;;  %34090 = vst [vmem:[#allocation188_spill] sm:$0xff] %v29047_v59  ;;  %v34091_v10 = vand.u32 4294901760, %v28997_v23  ;;  %v29057_v4 = vand.u32 4294901760, %v4267_v50  ;;  %v34094_v27 = vld [vmem:[#allocation186_spill] sm:$0xff] }
 0x332   : > { %21511 = vmatprep.mubr.f32.mxu1 %v4427_v20  ;;  %v4466_v8 = vsub.f32 %v28983_v15, %v34084_v63  ;;  %23960 = vmatpush3.bf16.msra.mxu1 %v23957_v16  ;;  %v4199_v16 = vld [vmem:[%s26405_s17 + $0xda] sm:$0xff]  ;;  %v4457_v63 = vand.u32 4294901760, %v4456_v62  ;;  %v4270_v40 = vsel %vm352_vm0, %v4198_v9, 0  ;;  %v34095_v60 = vld [vmem:[#allocation187_spill] sm:$0xff]  ;;  %v29070_v15 = vsub.f32 %v4264_v0, %v29047_v59 }
 0x333   : > { %23027 = vmatmul.mubr.f32.gmra.mrb[6].mxu0 %v34086_v12  ;;  %23962 = vmatprep.subr.bf16.mxu1 %v28793_v43  ;;  %34088 = vst [vmem:[#allocation179_spill] sm:$0xff] %v29042_v33  ;;  %34089 = vst [vmem:[#allocation180_spill] sm:$0xff] %v29045_v32  ;;  %v4476_v12 = vsub.f32 %v28997_v23, %v34091_v10  ;;  %v4273_v62 = vsel %vm352_vm0, %v4199_v16, 0  ;;  %v34096_v10 = vand.u32 4294901760, %v29016_v14  ;;  %v4201_v9 = vld [vmem:[%s26405_s17 + $0xf2] sm:$0xff]  ;;  %v4202_v0 = vld [vmem:[%s26405_s17 + $0xfa] sm:$0xff] }
 0x334   : > { %23029 = vmatprep.mubr.f32.mxu0 %v34087_v45  ;;  %v34092_v45 = vand.u32 4294901760, %v29000_v11  ;;  %v4467_v24 = vand.u32 4294901760, %v4466_v8  ;;  %34093 = vst [vmem:[#allocation192_spill] sm:$0xff] %v29057_v4  ;;  %34097 = vst [vmem:[#allocation196_spill] sm:$0xff] %v29070_v15  ;;  %v29081_v8 = vand.u32 4294901760, %v4273_v62  ;;  %v34102_v59 = vld [vmem:[#allocation195_spill] sm:$0xff] }
 0x335   : > { %21512 = vmatmul.mubr.f32.gmra.mrb[4].mxu1 %v4437_v21  ;;  %v4200_v21 = vld [vmem:[%s26405_s17 + $0xe2] sm:$0xff] }
 0x336   : > { %v4486_v20 = vsub.f32 %v29000_v11, %v34092_v45  ;;  %21514 = vmatprep.mubr.f32.mxu1 %v4447_v30  ;;  %v4496_v30 = vsub.f32 %v29016_v14, %v34096_v10  ;;  %v29073_v11 = vand.u32 4294901760, %v4270_v40  ;;  %v29079_v10 = vsub.f32 %v4267_v50, %v29057_v4  ;;  %34101 = vst [vmem:[#allocation209_spill] sm:$0xff] %v29081_v8  ;;  %v4203_v14 = vld [vmem:[%s26405_s17 + $0x10a] sm:$0xff] }
 0x337   : > { %23030 = vmatmul.mubr.f32.gmra.mrb[8].mxu0 %v34094_v27  ;;  %v4477_v27 = vand.u32 4294901760, %v4476_v12  ;;  %v4276_v45 = vsel %vm352_vm0, %v4200_v21, 0  ;;  %v4204_v21 = vld [vmem:[%s26405_s17 + $0x112] sm:$0xff] }
 0x338   : > { %23032 = vmatprep.mubr.f32.mxu0 %v34095_v60  ;;  %v4487_v16 = vand.u32 4294901760, %v4486_v20  ;;  %34098 = vst [vmem:[#allocation200_spill] sm:$0xff] %v29073_v11  ;;  %v34099_v60 = vand.u32 4294901760, %v29033_v55  ;;  %34100 = vst [vmem:[#allocation207_spill] sm:$0xff] %v29079_v10  ;;  %v4279_v20 = vsel %vm352_vm0, %v4201_v9, 0  ;;  %v4497_v12 = vand.u32 4294901760, %v4496_v30 }
 0x339   : > { %21515 = vmatmul.mubr.f32.gmra.mrb[6].mxu1 %v4457_v63  ;;  %v34103_v63 = vld [vmem:[#allocation199_spill] sm:$0xff]  ;;  %v29099_v9 = vand.u32 4294901760, %v4276_v45  ;;  %v4285_v30 = vsel %vm352_vm0, %v4203_v14, 0 }
 0x33a   : > { %21517 = vmatprep.mubr.f32.mxu1 %v4467_v24  ;;  %v4506_v23 = vsub.f32 %v29033_v55, %v34099_v60  ;;  %v34104_v24 = vand.u32 4294901760, %v29042_v33  ;;  %v34105_v60 = vand.u32 4294901760, %v29045_v32 }
 0x33b   : > { %23033 = vmatmul.mubr.f32.gmra.mrb[10].mxu0 %v34102_v59  ;;  %v29097_v59 = vsub.f32 %v4270_v40, %v29073_v11  ;;  %34107 = vst [vmem:[#allocation211_spill] sm:$0xff] %v29099_v9  ;;  %v4205_v40 = vld [vmem:[%s26405_s17 + $0x122] sm:$0xff] }
 0x33c   : > { %23035 = vmatprep.mubr.f32.mxu0 %v34103_v63  ;;  %v4516_v50 = vsub.f32 %v29042_v33, %v34104_v24  ;;  %v4526_v55 = vsub.f32 %v29045_v32, %v34105_v60  ;;  %v4282_v63 = vsel %vm352_vm0, %v4202_v0, 0  ;;  %v4507_v4 = vand.u32 4294901760, %v4506_v23  ;;  %v34111_v32 = vld [vmem:[#allocation208_spill] sm:$0xff]  ;;  %v4206_v24 = vld [vmem:[%s26405_s17 + $0x12a] sm:$0xff] }
 0x33d   : > { %21518 = vmatmul.mubr.f32.gmra.mrb[8].mxu1 %v4477_v27  ;;  %34106 = vst [vmem:[#allocation210_spill] sm:$0xff] %v29097_v59  ;;  %v29105_v33 = vsub.f32 %v4273_v62, %v29081_v8  ;;  %v29107_v60 = vand.u32 4294901760, %v4279_v20  ;;  %v34110_v27 = vld [vmem:[#allocation206_spill] sm:$0xff]  ;;  %v34112_v0 = vand.u32 4294901760, %v29070_v15  ;;  %v29116_v23 = vand.u32 4294901760, %v4282_v63 }
 0x33e   : > { %21520 = vmatprep.mubr.f32.mxu1 %v4487_v16  ;;  %v4517_v11 = vand.u32 4294901760, %v4516_v50  ;;  %v29118_v16 = vand.u32 4294901760, %v4285_v30  ;;  %v4527_v62 = vand.u32 4294901760, %v4526_v55  ;;  %v34116_v50 = vand.u32 4294901760, %v29079_v10  ;;  %v34118_v55 = vld [vmem:[#allocation214_spill] sm:$0xff] }
 0x33f   : > { %34108 = vst [vmem:[#allocation169_spill] sm:$0xff] %v29105_v33  ;;  %34109 = vst [vmem:[#allocation43_spill] sm:$0xff] %v29107_v60  ;;  %23036 = vmatmul.mubr.f32.gmra.mrb[12].mxu0 %v34110_v27  ;;  %v4536_v14 = vsub.f32 %v29070_v15, %v34112_v0  ;;  %v29122_v27 = vsub.f32 %v4276_v45, %v29099_v9  ;;  %v29130_v15 = vsub.f32 %v4279_v20, %v29107_v60  ;;  %v4208_v60 = vld [vmem:[%s26405_s17 + $0x142] sm:$0xff] }
 0x340   : > { %23038 = vmatprep.mubr.f32.mxu0 %v34111_v32  ;;  %34113 = vst [vmem:[#allocation19_spill] sm:$0xff] %v29116_v23  ;;  %34114 = vst [vmem:[#allocation182_spill] sm:$0xff] %v29118_v16  ;;  %v4288_v32 = vsel %vm352_vm0, %v4204_v21, 0  ;;  %v4546_v8 = vsub.f32 %v29079_v10, %v34116_v50  ;;  %v29137_v45 = vsub.f32 %v4282_v63, %v29116_v23  ;;  %v4207_v50 = vld [vmem:[%s26405_s17 + $0x13a] sm:$0xff]  ;;  %v34123_v0 = vand.u32 4294901760, %v29097_v59 }
 0x341   : > { %21521 = vmatmul.mubr.f32.gmra.mrb[10].mxu1 %v4497_v12  ;;  %34115 = vst [vmem:[#allocation100_spill] sm:$0xff] %v29122_v27  ;;  %34117 = vst [vmem:[#allocation104_spill] sm:$0xff] %v29130_v15  ;;  %v4291_v12 = vsel %vm352_vm0, %v4205_v40, 0  ;;  %v29142_v21 = vand.u32 4294901760, %v4288_v32  ;;  %v4537_v20 = vand.u32 4294901760, %v4536_v14  ;;  %v34125_v10 = vand.u32 4294901760, %v29105_v33 }
 0x342   : > { %21523 = vmatprep.mubr.f32.mxu1 %v4507_v4  ;;  %34120 = vst [vmem:[#allocation183_spill] sm:$0xff] %v29137_v45  ;;  %v29140_v4 = vsub.f32 %v4285_v30, %v29118_v16  ;;  %v4556_v40 = vsub.f32 %v29097_v59, %v34123_v0  ;;  %v4547_v63 = vand.u32 4294901760, %v4546_v8  ;;  %v34126_v14 = vld [vmem:[#allocation218_spill] sm:$0xff]  ;;  %v4297_v23 = vsel %vm352_vm0, %v4207_v50, 0  ;;  %v34127_v0 = vld [vmem:[#allocation219_spill] sm:$0xff] }
 0x343   : > { %23039 = vmatmul.mubr.f32.gmra.mrb[14].mxu0 %v34118_v55  ;;  %34122 = vst [vmem:[#allocation190_spill] sm:$0xff] %v29142_v21  ;;  %v4566_v30 = vsub.f32 %v29105_v33, %v34125_v10  ;;  %v4209_v10 = vld [vmem:[%s26405_s17 + $0x152] sm:$0xff]  ;;  %v34132_v8 = vand.u32 4294901760, %v29130_v15  ;;  %v29177_v33 = vand.u32 4294901760, %v4297_v23 }
 0x344   : > { %23041 = vmatprep.mubr.f32.mxu0 %v34119_v39  ;;  %34121 = vst [vmem:[#allocation189_spill] sm:$0xff] %v29140_v4  ;;  %v29149_v39 = vand.u32 4294901760, %v4291_v12  ;;  %v4557_v16 = vand.u32 4294901760, %v4556_v40  ;;  %v34134_v40 = vld [vmem:[#allocation225_spill] sm:$0xff]  ;;  %v4303_v59 = vsel %vm352_vm0, %v4209_v10, 0 }
 0x345   : > { %21524 = vmatmul.mubr.f32.gmra.mrb[12].mxu1 %v4517_v11  ;;  %v4294_v11 = vsel %vm352_vm0, %v4206_v24, 0  ;;  %v34129_v24 = vand.u32 4294901760, %v29122_v27  ;;  %v4567_v55 = vand.u32 4294901760, %v4566_v30  ;;  %34133 = vst [vmem:[#allocation213_spill] sm:$0xff] %v29177_v33  ;;  %v34137_v30 = vand.u32 4294901760, %v29140_v4 }
 0x346   : > { %34124 = vst [vmem:[#allocation194_spill] sm:$0xff] %v29149_v39  ;;  %21526 = vmatprep.mubr.f32.mxu1 %v4527_v62  ;;  %v29163_v62 = vsub.f32 %v4288_v32, %v29142_v21  ;;  %v29170_v50 = vsub.f32 %v4291_v12, %v29149_v39  ;;  %v4586_v32 = vsub.f32 %v29130_v15, %v34132_v8  ;;  %v34136_v12 = vand.u32 4294901760, %v29137_v45  ;;  %v4211_v39 = vld [vmem:[%s26405_s17 + $0x16a] sm:$0xff] }
 0x347   : > { %23042 = vmatmul.mubr.f32.gmra.mrb[16].mxu0 %v34126_v14  ;;  %v4576_v14 = vsub.f32 %v29122_v27, %v34129_v24  ;;  %v4210_v24 = vld [vmem:[%s26405_s17 + $0x15a] sm:$0xff]  ;;  %v34135_v27 = vld [vmem:[#allocation227_spill] sm:$0xff]  ;;  %v4606_v8 = vsub.f32 %v29140_v4, %v34137_v30 }
 0x348   : > { %23044 = vmatprep.mubr.f32.mxu0 %v34127_v0  ;;  %34128 = vst [vmem:[#allocation198_spill] sm:$0xff] %v29163_v62  ;;  %34130 = vst [vmem:[#allocation202_spill] sm:$0xff] %v29170_v50  ;;  %v29172_v0 = vand.u32 4294901760, %v4294_v11  ;;  %v4587_v21 = vand.u32 4294901760, %v4586_v32  ;;  %v4306_v30 = vsel %vm352_vm0, %v4210_v24, 0  ;;  %v34141_v15 = vld [vmem:[#allocation235_spill] sm:$0xff] }
 0x349   : > { %21527 = vmatmul.mubr.f32.gmra.mrb[14].mxu1 %v4537_v20  ;;  %v4300_v20 = vsel %vm352_vm0, %v4208_v60, 0  ;;  %v4577_v60 = vand.u32 4294901760, %v4576_v14  ;;  %v4212_v14 = vld [vmem:[%s26405_s17 + $0x172] sm:$0xff]  ;;  %v4607_v4 = vand.u32 4294901760, %v4606_v8 }
 0x34a   : > { %34131 = vst [vmem:[#allocation205_spill] sm:$0xff] %v29172_v0  ;;  %21529 = vmatprep.mubr.f32.mxu1 %v4547_v63  ;;  %v4596_v63 = vsub.f32 %v29137_v45, %v34136_v12  ;;  %v29194_v10 = vsub.f32 %v4294_v11, %v29172_v0  ;;  %v29199_v12 = vsub.f32 %v4297_v23, %v29177_v33  ;;  %v29201_v45 = vand.u32 4294901760, %v4303_v59 }
 0x34b   : > { %23045 = vmatmul.mubr.f32.gmra.mrb[18].mxu0 %v34134_v40  ;;  %v34142_v40 = vld [vmem:[#allocation238_spill] sm:$0xff]  ;;  %v34143_v0 = vand.u32 4294901760, %v29163_v62  ;;  %v34144_v23 = vand.u32 4294901760, %v29170_v50 }
 0x34c   : > { %23047 = vmatprep.mubr.f32.mxu0 %v34135_v27  ;;  %34138 = vst [vmem:[#allocation216_spill] sm:$0xff] %v29194_v10  ;;  %v29196_v27 = vand.u32 4294901760, %v4300_v20  ;;  %34140 = vst [vmem:[#allocation223_spill] sm:$0xff] %v29201_v45  ;;  %v4597_v11 = vand.u32 4294901760, %v4596_v63  ;;  %v29222_v8 = vsub.f32 %v4303_v59, %v29201_v45 }
 0x34d   : > { %21530 = vmatmul.mubr.f32.gmra.mrb[16].mxu1 %v4557_v16  ;;  %v4309_v16 = vsel %vm352_vm0, %v4211_v39, 0  ;;  %v4626_v32 = vsub.f32 %v29170_v50, %v34144_v23  ;;  %v29218_v39 = vand.u32 4294901760, %v4306_v30  ;;  %v34148_v23 = vld [vmem:[#allocation246_spill] sm:$0xff] }
 0x34e   : > { %34139 = vst [vmem:[#allocation220_spill] sm:$0xff] %v29196_v27  ;;  %21532 = vmatprep.mubr.f32.mxu1 %v4567_v55  ;;  %v4616_v55 = vsub.f32 %v29163_v62, %v34143_v0  ;;  %v4312_v0 = vsel %vm352_vm0, %v4212_v14, 0  ;;  %v34151_v14 = vand.u32 4294901760, %v29199_v12 }
 0x34f   : > { %23048 = vmatmul.mubr.f32.gmra.mrb[20].mxu0 %v34141_v15  ;;  %v29216_v15 = vsub.f32 %v4300_v20, %v29196_v27  ;;  %34145 = vst [vmem:[#allocation226_spill] sm:$0xff] %v29218_v39  ;;  %v34149_v20 = vand.u32 4294901760, %v29194_v10  ;;  %v29234_v63 = vsub.f32 %v4306_v30, %v29218_v39  ;;  %v29236_v59 = vand.u32 4294901760, %v4312_v0 }
 0x350   : > { %23050 = vmatprep.mubr.f32.mxu0 %v34142_v40  ;;  %v29224_v40 = vand.u32 4294901760, %v4309_v16  ;;  %v4617_v24 = vand.u32 4294901760, %v4616_v55  ;;  %v4627_v62 = vand.u32 4294901760, %v4626_v32  ;;  %v32912_v55 = vand.u32 4294901760, %v29222_v8 }
 0x351   : > { %21533 = vmatmul.mubr.f32.gmra.mrb[18].mxu1 %v4577_v60  ;;  %v34147_v60 = vld [vmem:[#allocation242_spill] sm:$0xff]  ;;  %v4636_v50 = vsub.f32 %v29194_v10, %v34149_v20  ;;  %34150 = vst [vmem:[#allocation233_spill] sm:$0xff] %v29236_v59  ;;  %v34153_v20 = vld [vmem:[#allocation252_spill] sm:$0xff]  ;;  %v32916_v32 = vand.u32 4294901760, %v29234_v63  ;;  %v29252_v10 = vsub.f32 %v4312_v0, %v29236_v59 }
 0x352   : > { %21535 = vmatprep.mubr.f32.mxu1 %v4587_v21  ;;  %34146 = vst [vmem:[#allocation230_spill] sm:$0xff] %v29224_v40  ;;  %v32913_v21 = vand.u32 4294901760, %v29216_v15 }
 0x353   : > { %23051 = vmatmul.mubr.f32.gmra.mrb[22].mxu0 %v34147_v60  ;;  %v4646_v60 = vsub.f32 %v29199_v12, %v34151_v14  ;;  %v4637_v30 = vand.u32 4294901760, %v4636_v50  ;;  %v34155_v50 = vand.u32 4294901760, %v34034_v57  ;;  %v4676_v0 = vsub.f32 %v29234_v63, %v32916_v32  ;;  %v34176_v32 = vld [vmem:[#allocation232_spill] sm:$0xff] }
 0x354   : > { %23053 = vmatprep.mubr.f32.mxu0 %v34148_v23  ;;  %v34152_v23 = vld [vmem:[#allocation249_spill] sm:$0xff]  ;;  %v34157_v57 = vand.u32 4294901760, %v34041_v29  ;;  %v34158_v29 = vand.u32 4294901760, %v34046_v34 }
 0x355   : > { %21536 = vmatmul.mubr.f32.gmra.mrb[20].mxu1 %v4597_v11  ;;  %v29243_v11 = vsub.f32 %v4309_v16, %v29224_v40  ;;  %v4647_v14 = vand.u32 4294901760, %v4646_v60  ;;  %v4666_v16 = vsub.f32 %v29222_v8, %v32912_v55 }
 0x356   : > { %21538 = vmatprep.mubr.f32.mxu1 %v4607_v4  ;;  %v4656_v4 = vsub.f32 %v29216_v15, %v32913_v21  ;;  %v34156_v21 = vand.u32 4294901760, %v34040_v22  ;;  %v29283_v22 = vld [vmem:[%s32229_s1 + $0xe8] sm:$0xff] }
 0x357   : > { %23054 = vmatmul.mubr.f32.gmra.mrb[24].mxu0 %v34152_v23  ;;  %v32915_v23 = vand.u32 4294901760, %v29243_v11  ;;  %v4667_v60 = vand.u32 4294901760, %v4666_v16 }
 0x358   : > { %23056 = vmatprep.mubr.f32.mxu0 %v34153_v20  ;;  %v34154_v20 = vld [vmem:[#allocation254_spill] sm:$0xff] }
 0x359   : > { %21539 = vmatmul.mubr.f32.gmra.mrb[22].mxu1 %v4617_v24  ;;  %v4657_v24 = vand.u32 4294901760, %v4656_v4  ;;  %v4686_v55 = vsub.f32 %v29243_v11, %v32915_v23  ;;  %v34175_v23 = vld [vmem:[#allocation229_spill] sm:$0xff] }
 0x35a   : > { %21541 = vmatprep.mubr.f32.mxu1 %v4627_v62  ;;  %v32914_v62 = vand.u32 4294901760, %v29252_v10 }
 0x35b   : > { %23057 = vmatmul.mubr.f32.gmra.mrb[26].mxu0 %v34154_v20  ;;  %v4687_v20 = vand.u32 4294901760, %v4686_v55  ;;  %v32917_v55 = vand.u32 4294901760, %v29283_v22 }
 0x35c   : > { %23059 = vmatprep.mubr.f32.mxu0 %v34155_v50  ;;  %v4696_v4 = vsub.f32 %v29252_v10, %v32914_v62  ;;  %v34164_v50 = vld [vmem:[#allocation203_spill] sm:$0xff] }
 0x35d   : > { %21542 = vmatmul.mubr.f32.gmra.mrb[24].mxu1 %v4637_v30  ;;  %v4677_v30 = vand.u32 4294901760, %v4676_v0  ;;  %v34166_v0 = vld [vmem:[#allocation188_spill] sm:$0xff]  ;;  %v34174_v62 = vld [vmem:[#allocation43_spill] sm:$0xff] }
 0x35e   : > { %21544 = vmatprep.mubr.f32.mxu1 %v4647_v14  ;;  %v29278_v14 = vld [vmem:[%s32229_s1 + $0xe0] sm:$0xff] }
 0x35f   : > { %23060 = vmatmul.mubr.f32.gmra.mrb[28].mxu0 %v34156_v21  ;;  %v4697_v21 = vand.u32 4294901760, %v4696_v4  ;;  %v32918_v16 = vand.u32 4294901760, %v29278_v14  ;;  %v34170_v4 = vld [vmem:[#allocation200_spill] sm:$0xff] }
 0x360   : > { %23062 = vmatprep.mubr.f32.mxu0 %v34157_v57  ;;  %v34168_v57 = vld [vmem:[#allocation212_spill] sm:$0xff] }
 0x361   : > { %21545 = vmatmul.mubr.f32.gmra.mrb[26].mxu1 %v4657_v24  ;;  %v29298_v34 = vpack.c.bf16 %v32917_v55, %v32918_v16  ;;  %v34165_v24 = vld [vmem:[#allocation204_spill] sm:$0xff]  ;;  %v34177_v55 = vld [vmem:[#allocation19_spill] sm:$0xff]  ;;  %v34178_v16 = vld [vmem:[#allocation182_spill] sm:$0xff] }
 0x362   : > { %21547 = vmatprep.mubr.f32.mxu1 %v4667_v60  ;;  %v34167_v60 = vld [vmem:[#allocation192_spill] sm:$0xff] }
 0x363   : > { %23063 = vmatmul.mubr.f32.gmra.mrb[30].mxu0 %v34158_v29  ;;  %34159 = vst [vmem:[#allocation234_spill] sm:$0xff] %v29298_v34  ;;  %v34172_v29 = vld [vmem:[#allocation222_spill] sm:$0xff] }
 0x364   : > { %23073 = vmatprep.mubr.f32.mxu0 %v33981_v13 }
 0x365   : > { %21548 = vmatmul.mubr.f32.gmra.mrb[28].mxu1 %v4677_v30  ;;  %v34169_v30 = vld [vmem:[#allocation215_spill] sm:$0xff] }
 0x366   : > { %21550 = vmatprep.mubr.f32.mxu1 %v4687_v20  ;;  %v34171_v20 = vld [vmem:[#allocation209_spill] sm:$0xff] }
 0x367   : > { %23074 = vmatmul.mubr.f32.vlgmr.msra.gmra.mrb[0].mxu0 %v33984_v25 }
 0x368   : > { %23076 = vmatprep.mubr.f32.mxu0 %v33985_v37  ;;  %24180 = vmatpush3.bf16.msra.mxu0 %v34075_v1  ;;  %v34163_v1 = vld [vmem:[#allocation26_spill] sm:$0xff] }
 0x369   : > { %21551 = vmatmul.mubr.f32.gmra.mrb[30].mxu1 %v4697_v21  ;;  %24182 = vmatprep.subr.bf16.mxu0 %v28454_v36  ;;  %v34173_v21 = vld [vmem:[#allocation224_spill] sm:$0xff] }
 0x36a   : > { %21561 = vmatprep.mubr.f32.mxu1 %v28860_v61 }
 0x36b   : > { %23077 = vmatmul.mubr.f32.gmra.mrb[2].mxu0 %v33988_v51 }
 0x36c   : > { %23079 = vmatprep.mubr.f32.mxu0 %v33989_v52  ;;  %24184 = vmatpush3.bf16.msra.mxu0 %v28454_v36  ;;  %v34160_v36 = vld [vmem:[#allocation197_spill] sm:$0xff] }
 0x36d   : > { %21562 = vmatmul.mubr.f32.vlgmr.msra.gmra.mrb[0].mxu1 %v28869_v49  ;;  %24186 = vmatprep.subr.bf16.mxu0 %v29298_v34 }
 0x36e   : > { %23964 = vmatpush3.bf16.msra.mxu1 %v28793_v43  ;;  %21564 = vmatprep.mubr.f32.mxu1 %v28875_v28  ;;  %v34161_v43 = vld [vmem:[#allocation201_spill] sm:$0xff] }
 0x36f   : > { %23080 = vmatmul.mubr.f32.gmra.mrb[4].mxu0 %v33992_v41  ;;  %23966 = vmatprep.subr.bf16.mxu1 %v28843_v53 }
 0x370   : > { %23082 = vmatprep.mubr.f32.mxu0 %v33993_v35 }
 0x371   : > { %21565 = vmatmul.mubr.f32.gmra.mrb[2].mxu1 %v28886_v44  ;;  %v18773_v44 = vld [vmem:[%s26405_s17 + $0x79] sm:$0xff] }
 0x372   : > { %21567 = vmatprep.mubr.f32.mxu1 %v28894_v5  ;;  %23968 = vmatpush3.bf16.msra.mxu1 %v28843_v53  ;;  %v34162_v53 = vld [vmem:[#allocation167_spill] sm:$0xff] }
 0x373   : > { %23083 = vmatmul.mubr.f32.gmra.mrb[6].mxu0 %v33995_v3  ;;  %23970 = vmatprep.subr.bf16.mxu1 %v28700_v17 }
 0x374   : > { %23085 = vmatprep.mubr.f32.mxu0 %v33996_v26 }
 0x375   : > { %21568 = vmatmul.mubr.f32.gmra.mrb[4].mxu1 %v28908_v56  ;;  %v34230_v56 = vld [vmem:[#allocation189_spill] sm:$0xff] }
 0x376   : > { %21570 = vmatprep.mubr.f32.mxu1 %v28921_v54  ;;  %v34229_v54 = vld [vmem:[#allocation183_spill] sm:$0xff] }
 0x377   : > { %23086 = vmatmul.mubr.f32.gmra.mrb[8].mxu0 %v33997_v7 }
 0x378   : > { %23088 = vmatprep.mubr.f32.mxu0 %v33998_v19 }
 0x379   : > { %21571 = vmatmul.mubr.f32.gmra.mrb[6].mxu1 %v28941_v38 }
 0x37a   : > { %21573 = vmatprep.mubr.f32.mxu1 %v28956_v46 }
 0x37b   : > { %23089 = vmatmul.mubr.f32.gmra.mrb[10].mxu0 %v33999_v58 }
 0x37c   : > { %23091 = vmatprep.mubr.f32.mxu0 %v34000_v47 }
 0x37d   : > { %21574 = vmatmul.mubr.f32.gmra.mrb[8].mxu1 %v28973_v18  ;;  %v34194_v18 = vld [vmem:[#allocation149_spill] sm:$0xff] }
 0x37e   : > { %21576 = vmatprep.mubr.f32.mxu1 %v28975_v6 }
 0x37f   : > { %23092 = vmatmul.mubr.f32.gmra.mrb[12].mxu0 %v34001_v2 }
 0x380   : > { %23094 = vmatprep.mubr.f32.mxu0 %v34002_v31 }
 0x381   : > { %21577 = vmatmul.mubr.f32.gmra.mrb[10].mxu1 %v28994_v42 }
 0x382   : > { %21579 = vmatprep.mubr.f32.mxu1 %v29010_v48  ;;  %v34189_v48 = vld [vmem:[#allocation205_spill] sm:$0xff] }
 0x383   : > { %23095 = vmatmul.mubr.f32.gmra.mrb[14].mxu0 %v34160_v36 }
 0x384   : > { %23097 = vmatprep.mubr.f32.mxu0 %v34161_v43 }
 0x385   : > { %21580 = vmatmul.mubr.f32.gmra.mrb[12].mxu1 %v34162_v53  ;;  %v34186_v53 = vld [vmem:[#allocation194_spill] sm:$0xff] }
 0x386   : > { %21582 = vmatprep.mubr.f32.mxu1 %v34163_v1 }
 0x387   : > { %23098 = vmatmul.mubr.f32.gmra.mrb[16].mxu0 %v34164_v50 }
 0x388   : > { %23100 = vmatprep.mubr.f32.mxu0 %v34165_v24 }
 0x389   : > { %21583 = vmatmul.mubr.f32.gmra.mrb[14].mxu1 %v34166_v0  ;;  %v34182_v0 = vand.u32 4294901760, %v29278_v14 }
 0x38a   : > { %21585 = vmatprep.mubr.f32.mxu1 %v34167_v60  ;;  %v34179_v60 = vld [vmem:[#allocation237_spill] sm:$0xff] }
 0x38b   : > { %23101 = vmatmul.mubr.f32.gmra.mrb[18].mxu0 %v34168_v57 }
 0x38c   : > { %23103 = vmatprep.mubr.f32.mxu0 %v34169_v30 }
 0x38d   : > { %21586 = vmatmul.mubr.f32.gmra.mrb[16].mxu1 %v34170_v4  ;;  %v34180_v4 = vld [vmem:[#allocation240_spill] sm:$0xff] }
 0x38e   : > { %21588 = vmatprep.mubr.f32.mxu1 %v34171_v20  ;;  %v34181_v20 = vld [vmem:[#allocation190_spill] sm:$0xff] }
 0x38f   : > { %23104 = vmatmul.mubr.f32.gmra.mrb[20].mxu0 %v34172_v29 }
 0x390   : > { %23106 = vmatprep.mubr.f32.mxu0 %v34173_v21 }
 0x391   : > { %21589 = vmatmul.mubr.f32.gmra.mrb[18].mxu1 %v29099_v9  ;;  %v29357_v9 = vsub.f32 %v29278_v14, %v34182_v0  ;;  %v18801_v14 = vld [vmem:[%s32229_s1 + $0xf0] sm:$0xff]  ;;  %v34191_v0 = vld [vmem:[#allocation108_spill] sm:$0xff] }
 0x392   : > { %21591 = vmatprep.mubr.f32.mxu1 %v34174_v62  ;;  %v34184_v62 = vand.u32 4294901760, %v29283_v22 }
 0x393   : > { %23107 = vmatmul.mubr.f32.gmra.mrb[22].mxu0 %v34175_v23  ;;  %34183 = vst [vmem:[#allocation241_spill] sm:$0xff] %v29357_v9  ;;  %v34192_v42 = vand.u32 4294901760, %v29357_v9 }
 0x394   : > { %23109 = vmatprep.mubr.f32.mxu0 %v34176_v32  ;;  %v29362_v1 = vsub.f32 %v29283_v22, %v34184_v62  ;;  %v18802_v62 = vld [vmem:[%s32229_s1 + $0xf8] sm:$0xff]  ;;  %v34190_v22 = vld [vmem:[#allocation143_spill] sm:$0xff] }
 0x395   : > { %21592 = vmatmul.mubr.f32.gmra.mrb[20].mxu1 %v34177_v55  ;;  %v34187_v55 = vld [vmem:[#allocation244_spill] sm:$0xff] }
 0x396   : > { %21594 = vmatprep.mubr.f32.mxu1 %v34178_v16  ;;  %34185 = vst [vmem:[#allocation245_spill] sm:$0xff] %v29362_v1  ;;  %v34188_v16 = vld [vmem:[#allocation141_spill] sm:$0xff] }
 0x397   : > { %23110 = vmatmul.mubr.f32.gmra.mrb[24].mxu0 %v34179_v60 }
 0x398   : > { %23112 = vmatprep.mubr.f32.mxu0 %v34180_v4 }
 0x399   : > { %21595 = vmatmul.mubr.f32.gmra.mrb[22].mxu1 %v34181_v20  ;;  %v14241_v20 = vand.u32 4294901760, %v18802_v62 }
 0x39a   : > { %21597 = vmatprep.mubr.f32.mxu1 %v34186_v53  ;;  %v34193_v53 = vand.u32 4294901760, %v29362_v1 }
 0x39b   : > { %23113 = vmatmul.mubr.f32.gmra.mrb[26].mxu0 %v34187_v55 }
 0x39c   : > { %23115 = vmatprep.mubr.f32.mxu0 %v34188_v16  ;;  %v14631_v6 = vsub.f32 %v29362_v1, %v34193_v53  ;;  %v34202_v53 = vld [vmem:[#allocation154_spill] sm:$0xff] }
 0x39d   : > { %21598 = vmatmul.mubr.f32.gmra.mrb[24].mxu1 %v34189_v48  ;;  %v14238_v48 = vand.u32 4294901760, %v18801_v14 }
 0x39e   : > { %21600 = vmatprep.mubr.f32.mxu1 %v29177_v33  ;;  %v14624_v33 = vsub.f32 %v29357_v9, %v34192_v42  ;;  %v14632_v38 = vand.u32 4294901760, %v14631_v6  ;;  %v34200_v6 = vld [vmem:[#allocation153_spill] sm:$0xff] }
 0x39f   : > { %23116 = vmatmul.mubr.f32.gmra.mrb[28].mxu0 %v34190_v22  ;;  %v29390_v46 = vpack.c.bf16 %v14241_v20, %v14238_v48 }
 0x3a0   : > { %23118 = vmatprep.mubr.f32.mxu0 %v34191_v0 }
 0x3a1   : > { %21601 = vmatmul.mubr.f32.gmra.mrb[26].mxu1 %v29196_v27  ;;  %34195 = vst [vmem:[#allocation248_spill] sm:$0xff] %v29390_v46  ;;  %v14625_v27 = vand.u32 4294901760, %v14624_v33  ;;  %v29403_v33 = vpack.c.bf16 %v29362_v1, %v29357_v9  ;;  %v34205_v9 = vld [vmem:[#allocation174_spill] sm:$0xff] }
 0x3a2   : > { %21603 = vmatprep.mubr.f32.mxu1 %v29201_v45 }
 0x3a3   : > { %23119 = vmatmul.mubr.f32.gmra.mrb[30].mxu0 %v34194_v18  ;;  %v29398_v42 = vpack.c.bf16 %v14632_v38, %v14625_v27  ;;  %v34199_v38 = vld [vmem:[#allocation156_spill] sm:$0xff]  ;;  %v34201_v27 = vand.u32 4294901760, %v34200_v6  ;;  %v34207_v6 = vld [vmem:[#allocation177_spill] sm:$0xff] }
 0x3a4   : > { %23129 = vmatprep.mubr.f32.mxu0 %v33981_v13  ;;  %v34196_v13 = vld [vmem:[#allocation166_spill] sm:$0xff] }
 0x3a5   : > { %21604 = vmatmul.mubr.f32.gmra.mrb[28].mxu1 %v29218_v39 }
 0x3a6   : > { %21606 = vmatprep.mubr.f32.mxu1 %v29224_v40  ;;  %v34225_v40 = vld [vmem:[#allocation104_spill] sm:$0xff] }
 0x3a7   : > { %23130 = vmatmul.mubr.f32.vlgmr.msra.gmra.mrb[0].mxu0 %v33984_v25  ;;  %v34197_v25 = vld [vmem:[#allocation168_spill] sm:$0xff] }
 0x3a8   : > { %23132 = vmatprep.mubr.f32.mxu0 %v33985_v37  ;;  %24188 = vmatpush3.bf16.msra.mxu0 %v29298_v34  ;;  %v34198_v37 = vld [vmem:[#allocation170_spill] sm:$0xff] }
 0x3a9   : > { %21607 = vmatmul.mubr.f32.gmra.mrb[30].mxu1 %v29236_v59  ;;  %24190 = vmatprep.subr.bf16.mxu0 %v29390_v46  ;;  %v34224_v59 = vld [vmem:[#allocation100_spill] sm:$0xff] }
 0x3aa   : > { %21617 = vmatprep.mubr.f32.mxu1 %v34196_v13 }
 0x3ab   : > { %23133 = vmatmul.mubr.f32.gmra.mrb[2].mxu0 %v33988_v51  ;;  %v34203_v51 = vand.u32 4294901760, %v34202_v53  ;;  %v34218_v53 = vld [vmem:[#allocation196_spill] sm:$0xff] }
 0x3ac   : > { %23135 = vmatprep.mubr.f32.mxu0 %v33989_v52  ;;  %24192 = vmatpush3.bf16.msra.mxu0 %v29390_v46  ;;  %v34204_v52 = vld [vmem:[#allocation40_spill] sm:$0xff] }
 0x3ad   : > { %21618 = vmatmul.mubr.f32.vlgmr.msra.gmra.mrb[0].mxu1 %v34197_v25  ;;  %24194 = vmatprep.subr.bf16.mxu0 %v29398_v42  ;;  %v29418_v1 = vpack.c.bf16 %v34203_v51, %v34201_v27  ;;  %v34209_v27 = vld [vmem:[#allocation142_spill] sm:$0xff]  ;;  %v18767_v51 = vld [vmem:[%s26405_s17 + $0x31] sm:$0xff] }
 0x3ae   : > { %23972 = vmatpush3.bf16.msra.mxu1 %v28700_v17  ;;  %21620 = vmatprep.mubr.f32.mxu1 %v34198_v37 }
 0x3af   : > { %23136 = vmatmul.mubr.f32.gmra.mrb[4].mxu0 %v33992_v41  ;;  %23974 = vmatprep.subr.bf16.mxu1 %v34199_v38  ;;  %v34206_v41 = vld [vmem:[#allocation176_spill] sm:$0xff] }
 0x3b0   : > { %23138 = vmatprep.mubr.f32.mxu0 %v33993_v35  ;;  %v34208_v35 = vld [vmem:[#allocation178_spill] sm:$0xff] }
 0x3b1   : > { %21621 = vmatmul.mubr.f32.gmra.mrb[2].mxu1 %v34204_v52 }
 0x3b2   : > { %21623 = vmatprep.mubr.f32.mxu1 %v34205_v9  ;;  %23976 = vmatpush3.bf16.msra.mxu1 %v34199_v38  ;;  %v18774_v38 = vld [vmem:[%s26405_s17 + $0x81] sm:$0xff] }
 0x3b3   : > { %23139 = vmatmul.mubr.f32.gmra.mrb[6].mxu0 %v33995_v3  ;;  %23978 = vmatprep.subr.bf16.mxu1 %v29418_v1  ;;  %v34210_v3 = vld [vmem:[#allocation96_spill] sm:$0xff] }
 0x3b4   : > { %23141 = vmatprep.mubr.f32.mxu0 %v33996_v26  ;;  %v34211_v26 = vld [vmem:[#allocation85_spill] sm:$0xff] }
 0x3b5   : > { %21624 = vmatmul.mubr.f32.gmra.mrb[4].mxu1 %v34206_v41 }
 0x3b6   : > { %21626 = vmatprep.mubr.f32.mxu1 %v34207_v6 }
 0x3b7   : > { %23142 = vmatmul.mubr.f32.gmra.mrb[8].mxu0 %v33997_v7  ;;  %v34212_v7 = vld [vmem:[#allocation148_spill] sm:$0xff] }
 0x3b8   : > { %23144 = vmatprep.mubr.f32.mxu0 %v33998_v19  ;;  %v34213_v19 = vld [vmem:[#allocation44_spill] sm:$0xff] }
 0x3b9   : > { %21627 = vmatmul.mubr.f32.gmra.mrb[6].mxu1 %v34208_v35 }
 0x3ba   : > { %21629 = vmatprep.mubr.f32.mxu1 %v34209_v27 }
 0x3bb   : > { %23145 = vmatmul.mubr.f32.gmra.mrb[10].mxu0 %v33999_v58  ;;  %v34214_v58 = vld [vmem:[#allocation179_spill] sm:$0xff] }
 0x3bc   : > { %23147 = vmatprep.mubr.f32.mxu0 %v34000_v47  ;;  %v34215_v47 = vld [vmem:[#allocation180_spill] sm:$0xff] }
 0x3bd   : > { %21630 = vmatmul.mubr.f32.gmra.mrb[8].mxu1 %v34210_v3 }
 0x3be   : > { %21632 = vmatprep.mubr.f32.mxu1 %v34211_v26 }
 0x3bf   : > { %23148 = vmatmul.mubr.f32.gmra.mrb[12].mxu0 %v34001_v2  ;;  %v29447_v2 = vsub.f32 %v18801_v14, %v14238_v48  ;;  %v14136_v48 = vsel %vm352_vm0, %v18767_v51, 0  ;;  %v34222_v14 = vld [vmem:[#allocation169_spill] sm:$0xff] }
 0x3c0   : > { %23150 = vmatprep.mubr.f32.mxu0 %v34002_v31  ;;  %v29449_v31 = vsub.f32 %v18802_v62, %v14241_v20  ;;  %v18769_v20 = vld [vmem:[%s26405_s17 + $0x49] sm:$0xff]  ;;  %v29466_v62 = vand.u32 4294901760, %v14136_v48  ;;  %v18771_v51 = vld [vmem:[%s26405_s17 + $0x61] sm:$0xff] }
 0x3c1   : > { %21633 = vmatmul.mubr.f32.gmra.mrb[10].mxu1 %v34212_v7  ;;  %34216 = vst [vmem:[#allocation251_spill] sm:$0xff] %v29447_v2  ;;  %v34244_v34 = vand.u32 4294901760, %v29447_v2 }
 0x3c2   : > { %21635 = vmatprep.mubr.f32.mxu1 %v34213_v19  ;;  %34217 = vst [vmem:[#allocation253_spill] sm:$0xff] %v29449_v31  ;;  %34223 = vst [vmem:[#allocation256_spill] sm:$0xff] %v29466_v62 }
 0x3c3   : > { %23151 = vmatmul.mubr.f32.gmra.mrb[14].mxu0 %v34160_v36  ;;  %v34219_v36 = vld [vmem:[#allocation207_spill] sm:$0xff] }
 0x3c4   : > { %23153 = vmatprep.mubr.f32.mxu0 %v34161_v43  ;;  %v29456_v43 = vpack.c.bf16 %v29449_v31, %v29447_v2 }
 0x3c5   : > { %21636 = vmatmul.mubr.f32.gmra.mrb[12].mxu1 %v34214_v58 }
 0x3c6   : > { %21638 = vmatprep.mubr.f32.mxu1 %v34215_v47  ;;  %34220 = vst [vmem:[#allocation255_spill] sm:$0xff] %v29456_v43 }
 0x3c7   : > { %23154 = vmatmul.mubr.f32.gmra.mrb[16].mxu0 %v34164_v50  ;;  %v18768_v50 = vld [vmem:[%s26405_s17 + $0x39] sm:$0xff] }
 0x3c8   : > { %23156 = vmatprep.mubr.f32.mxu0 %v34165_v24  ;;  %v34221_v24 = vld [vmem:[#allocation210_spill] sm:$0xff]  ;;  %v14139_v46 = vsel %vm352_vm0, %v18768_v50, 0 }
 0x3c9   : > { %21639 = vmatmul.mubr.f32.gmra.mrb[14].mxu1 %v34218_v53  ;;  %v29475_v39 = vand.u32 4294901760, %v14139_v46  ;;  %v18772_v50 = vld [vmem:[%s26405_s17 + $0x69] sm:$0xff] }
 0x3ca   : > { %21641 = vmatprep.mubr.f32.mxu1 %v34219_v36 }
 0x3cb   : > { %23157 = vmatmul.mubr.f32.gmra.mrb[18].mxu0 %v34168_v57  ;;  %v14142_v57 = vsel %vm352_vm0, %v18769_v20, 0  ;;  %34226 = vst [vmem:[#allocation257_spill] sm:$0xff] %v29475_v39  ;;  %v14148_v20 = vsel %vm352_vm0, %v18771_v51, 0  ;;  %v29490_v5 = vsub.f32 %v14139_v46, %v29475_v39  ;;  %v34235_v46 = vld [vmem:[#allocation198_spill] sm:$0xff] }
 0x3cc   : > { %23159 = vmatprep.mubr.f32.mxu0 %v34169_v30  ;;  %v18770_v30 = vld [vmem:[%s26405_s17 + $0x51] sm:$0xff]  ;;  %v29481_v45 = vand.u32 4294901760, %v14142_v57  ;;  %v29501_v51 = vand.u32 4294901760, %v14148_v20 }
 0x3cd   : > { %21642 = vmatmul.mubr.f32.gmra.mrb[16].mxu1 %v34221_v24  ;;  %34231 = vst [vmem:[#allocation146_spill] sm:$0xff] %v29490_v5 }
 0x3ce   : > { %21644 = vmatprep.mubr.f32.mxu1 %v34222_v14  ;;  %34228 = vst [vmem:[#allocation145_spill] sm:$0xff] %v29481_v45  ;;  %34234 = vst [vmem:[#allocation152_spill] sm:$0xff] %v29501_v51  ;;  %v29523_v43 = vsub.f32 %v14148_v20, %v29501_v51  ;;  %v14638_v20 = vsub.f32 %v29447_v2, %v34244_v34  ;;  %v18778_v2 = vld [vmem:[%s26405_s17 + $0xb1] sm:$0xff] }
 0x3cf   : > { %23160 = vmatmul.mubr.f32.gmra.mrb[20].mxu0 %v34172_v29  ;;  %v29479_v29 = vsub.f32 %v14136_v48, %v29466_v62  ;;  %v14151_v48 = vsel %vm352_vm0, %v18772_v50, 0  ;;  %v14154_v50 = vsel %vm352_vm0, %v18773_v44, 0 }
 0x3d0   : > { %23162 = vmatprep.mubr.f32.mxu0 %v34173_v21  ;;  %v14145_v21 = vsel %vm352_vm0, %v18770_v30, 0  ;;  %v29506_v28 = vand.u32 4294901760, %v14151_v48  ;;  %v34237_v30 = vld [vmem:[#allocation202_spill] sm:$0xff]  ;;  %34240 = vst [vmem:[#allocation140_spill] sm:$0xff] %v29523_v43 }
 0x3d1   : > { %21645 = vmatmul.mubr.f32.gmra.mrb[18].mxu1 %v34224_v59  ;;  %34227 = vst [vmem:[#allocation80_spill] sm:$0xff] %v29479_v29  ;;  %v34239_v61 = vand.u32 4294901760, %v29479_v29 }
 0x3d2   : > { %21647 = vmatprep.mubr.f32.mxu1 %v34225_v40  ;;  %34236 = vst [vmem:[#allocation157_spill] sm:$0xff] %v29506_v28 }
 0x3d3   : > { %23163 = vmatmul.mubr.f32.gmra.mrb[22].mxu0 %v34175_v23  ;;  %v29492_v23 = vand.u32 4294901760, %v14145_v21  ;;  %v14303_v44 = vsub.f32 %v29479_v29, %v34239_v61  ;;  %v18777_v61 = vld [vmem:[%s26405_s17 + $0xa9] sm:$0xff] }
 0x3d4   : > { %23165 = vmatprep.mubr.f32.mxu0 %v34176_v32  ;;  %v29499_v32 = vsub.f32 %v14142_v57, %v29481_v45  ;;  %v29527_v57 = vand.u32 4294901760, %v14154_v50  ;;  %v18776_v45 = vld [vmem:[%s26405_s17 + $0x99] sm:$0xff] }
 0x3d5   : > { %21648 = vmatmul.mubr.f32.gmra.mrb[20].mxu1 %v34229_v54  ;;  %34232 = vst [vmem:[#allocation150_spill] sm:$0xff] %v29492_v23  ;;  %v29514_v49 = vsub.f32 %v14145_v21, %v29492_v23  ;;  %v34242_v21 = vld [vmem:[#allocation216_spill] sm:$0xff]  ;;  %v29531_v23 = vsub.f32 %v14151_v48, %v29506_v28  ;;  %v14304_v48 = vand.u32 4294901760, %v14303_v44  ;;  %v14166_v44 = vsel %vm352_vm0, %v18777_v61, 0 }
 0x3d6   : > { %21650 = vmatprep.mubr.f32.mxu1 %v34230_v56  ;;  %34233 = vst [vmem:[#allocation109_spill] sm:$0xff] %v29499_v32  ;;  %34241 = vst [vmem:[#allocation160_spill] sm:$0xff] %v29527_v57  ;;  %v34248_v39 = vand.u32 4294901760, %v29499_v32  ;;  %v29556_v29 = vsub.f32 %v14154_v50, %v29527_v57  ;;  %v34255_v57 = vand.u32 4294901760, %v29523_v43 }
 0x3d7   : > { %23166 = vmatmul.mubr.f32.gmra.mrb[24].mxu0 %v34179_v60  ;;  %34238 = vst [vmem:[#allocation118_spill] sm:$0xff] %v29514_v49  ;;  %v14157_v60 = vsel %vm352_vm0, %v18774_v38, 0  ;;  %34243 = vst [vmem:[#allocation163_spill] sm:$0xff] %v29531_v23  ;;  %v34245_v38 = vand.u32 4294901760, %v29449_v31 }
 0x3d8   : > { %23168 = vmatprep.mubr.f32.mxu0 %v34180_v4  ;;  %v18775_v4 = vld [vmem:[%s26405_s17 + $0x91] sm:$0xff]  ;;  %v29544_v51 = vand.u32 4294901760, %v14157_v60  ;;  %v14323_v34 = vsub.f32 %v29499_v32, %v34248_v39  ;;  %34249 = vst [vmem:[#allocation17_spill] sm:$0xff] %v29556_v29  ;;  %v14343_v62 = vsub.f32 %v29523_v43, %v34255_v57 }
 0x3d9   : > { %21651 = vmatmul.mubr.f32.gmra.mrb[22].mxu1 %v34235_v46 }
 0x3da   : > { %21653 = vmatprep.mubr.f32.mxu1 %v34237_v30  ;;  %34246 = vst [vmem:[#allocation134_spill] sm:$0xff] %v29544_v51 }
 0x3db   : > { %23169 = vmatmul.mubr.f32.gmra.mrb[26].mxu0 %v34187_v55  ;;  %v14160_v55 = vsel %vm352_vm0, %v18775_v4, 0  ;;  %v34247_v4 = vand.u32 4294901760, %v29490_v5 }
 0x3dc   : > { %23171 = vmatprep.mubr.f32.mxu0 %v34188_v16  ;;  %v14645_v16 = vsub.f32 %v29449_v31, %v34245_v38  ;;  %v29558_v31 = vand.u32 4294901760, %v14160_v55  ;;  %v29570_v38 = vsub.f32 %v14157_v60, %v29544_v51 }
 0x3dd   : > { %21654 = vmatmul.mubr.f32.gmra.mrb[24].mxu1 %v34242_v21  ;;  %v14313_v28 = vsub.f32 %v29490_v5, %v34247_v4  ;;  %v14639_v5 = vand.u32 4294901760, %v14638_v20  ;;  %v29576_v4 = vand.u32 4294901760, %v14166_v44  ;;  %v14169_v20 = vsel %vm352_vm0, %v18778_v2, 0 }
 0x3de   : > { %21656 = vmatprep.mubr.f32.mxu1 %v29199_v12  ;;  %34250 = vst [vmem:[#allocation172_spill] sm:$0xff] %v29558_v31  ;;  %v14646_v39 = vand.u32 4294901760, %v14645_v16  ;;  %34252 = vst [vmem:[#allocation50_spill] sm:$0xff] %v29570_v38  ;;  %v14324_v16 = vand.u32 4294901760, %v14323_v34  ;;  %v29584_v60 = vsub.f32 %v14160_v55, %v29558_v31  ;;  %v18782_v34 = vld [vmem:[%s26405_s17 + $0xe1] sm:$0xff] }
 0x3df   : > { %23172 = vmatmul.mubr.f32.gmra.mrb[28].mxu0 %v34190_v22  ;;  %v14163_v22 = vsel %vm352_vm0, %v18776_v45, 0  ;;  %v18779_v45 = vld [vmem:[%s26405_s17 + $0xc1] sm:$0xff]  ;;  %v14314_v61 = vand.u32 4294901760, %v14313_v28  ;;  %34254 = vst [vmem:[#allocation181_spill] sm:$0xff] %v29576_v4  ;;  %v34256_v28 = vand.u32 4294901760, %v29531_v23  ;;  %v29601_v43 = vsub.f32 %v14166_v44, %v29576_v4 }
 0x3e0   : > { %23174 = vmatprep.mubr.f32.mxu0 %v34191_v0  ;;  %v34251_v0 = vand.u32 4294901760, %v29514_v49  ;;  %v29574_v32 = vand.u32 4294901760, %v14163_v22  ;;  %v14172_v2 = vsel %vm352_vm0, %v18779_v45, 0  ;;  %v34266_v4 = vld [vmem:[#allocation161_spill] sm:$0xff] }
 0x3e1   : > { %21657 = vmatmul.mubr.f32.gmra.mrb[26].mxu1 %v29216_v15  ;;  %v14353_v51 = vsub.f32 %v29531_v23, %v34256_v28 }
 0x3e2   : > { %21659 = vmatprep.mubr.f32.mxu1 %v29222_v8  ;;  %v14333_v50 = vsub.f32 %v29514_v49, %v34251_v0  ;;  %34253 = vst [vmem:[#allocation53_spill] sm:$0xff] %v29574_v32  ;;  %v18780_v49 = vld [vmem:[%s26405_s17 + $0xc9] sm:$0xff]  ;;  %v29595_v0 = vand.u32 4294901760, %v14169_v20  ;;  %v29598_v55 = vsub.f32 %v14163_v22, %v29574_v32  ;;  %v29610_v22 = vand.u32 4294901760, %v14172_v2 }
 0x3e3   : > { %23175 = vmatmul.mubr.f32.gmra.mrb[30].mxu0 %v34194_v18  ;;  %v18781_v18 = vld [vmem:[%s26405_s17 + $0xd9] sm:$0xff]  ;;  %v14175_v28 = vsel %vm352_vm0, %v18780_v49, 0  ;;  %v14354_v44 = vand.u32 4294901760, %v14353_v51  ;;  %v34260_v49 = vand.u32 4294901760, %v34196_v13  ;;  %v14181_v13 = vsel %vm352_vm0, %v18782_v34, 0 }
 0x3e4   : > { %23185 = vmatprep.mubr.f32.mxu0 %v14304_v48  ;;  %v24197_v48 = vpack.c.bf16 %v14646_v39, %v14639_v5  ;;  %v14334_v57 = vand.u32 4294901760, %v14333_v50  ;;  %34257 = vst [vmem:[#allocation185_spill] sm:$0xff] %v29595_v0  ;;  %v14178_v45 = vsel %vm352_vm0, %v18781_v18, 0  ;;  %v14344_v5 = vand.u32 4294901760, %v14343_v62  ;;  %34259 = vst [vmem:[#allocation191_spill] sm:$0xff] %v29610_v22 }
 0x3e5   : > { %21660 = vmatmul.mubr.f32.gmra.mrb[28].mxu1 %v29234_v63  ;;  %v34258_v39 = vand.u32 4294901760, %v29556_v29  ;;  %v29620_v62 = vsub.f32 %v14169_v20, %v29595_v0  ;;  %v29622_v18 = vand.u32 4294901760, %v14175_v28  ;;  %v33008_v51 = vand.u32 4294901760, %v29598_v55 }
 0x3e6   : > { %21662 = vmatprep.mubr.f32.mxu1 %v29243_v11  ;;  %v34268_v0 = vand.u32 4294901760, %v29584_v60 }
 0x3e7   : > { %23186 = vmatmul.mubr.f32.vlgmr.msra.gmra.mrb[0].mxu0 %v14314_v61  ;;  %v14363_v50 = vsub.f32 %v29556_v29, %v34258_v39  ;;  %34262 = vst [vmem:[#allocation193_spill] sm:$0xff] %v29622_v18  ;;  %v29624_v39 = vand.u32 4294901760, %v14178_v45  ;;  %v18783_v61 = vld [vmem:[%s26405_s17 + $0xf1] sm:$0xff]  ;;  %v34270_v29 = vand.u32 4294901760, %v34197_v25  ;;  %v29655_v25 = vand.u32 4294901760, %v14181_v13 }
 0x3e8   : > { %23188 = vmatprep.mubr.f32.mxu0 %v14324_v16  ;;  %24196 = vmatpush3.bf16.msra.mxu0 %v29398_v42  ;;  %v34261_v16 = vand.u32 4294901760, %v29570_v38  ;;  %v14383_v32 = vsub.f32 %v29584_v60, %v34268_v0  ;;  %v14184_v34 = vsel %vm352_vm0, %v18783_v61, 0  ;;  %v29650_v0 = vsub.f32 %v14175_v28, %v29622_v18 }
 0x3e9   : > { %21663 = vmatmul.mubr.f32.gmra.mrb[30].mxu1 %v29252_v10  ;;  %24198 = vmatprep.subr.bf16.mxu0 %v24197_v48  ;;  %34263 = vst [vmem:[#allocation137_spill] sm:$0xff] %v29624_v39  ;;  %v14364_v20 = vand.u32 4294901760, %v14363_v50  ;;  %34274 = vst [vmem:[#allocation236_spill] sm:$0xff] %v29655_v25  ;;  %v29665_v50 = vand.u32 4294901760, %v14184_v34 }
 0x3ea   : > { %21673 = vmatprep.mubr.f32.mxu1 %v34260_v49  ;;  %v14373_v42 = vsub.f32 %v29570_v38, %v34261_v16  ;;  %v34264_v49 = vld [vmem:[#allocation159_spill] sm:$0xff]  ;;  %v34267_v16 = vand.u32 4294901760, %v34266_v4  ;;  %v33007_v4 = vand.u32 4294901760, %v29620_v62  ;;  %34272 = vst [vmem:[#allocation228_spill] sm:$0xff] %v29650_v0  ;;  %v14384_v28 = vand.u32 4294901760, %v14383_v32 }
 0x3eb   : > { %23189 = vmatmul.mubr.f32.gmra.mrb[2].mxu0 %v14334_v57  ;;  %v34265_v23 = vand.u32 4294901760, %v34264_v49  ;;  %v29638_v57 = vsub.f32 %v14172_v2, %v29610_v22  ;;  %v18784_v49 = vld [vmem:[%s26405_s17 + $0xf9] sm:$0xff]  ;;  %v29653_v2 = vsub.f32 %v14178_v45, %v29624_v39  ;;  %34276 = vst [vmem:[#allocation239_spill] sm:$0xff] %v29665_v50  ;;  %v33012_v32 = vand.u32 4294901760, %v29650_v0 }
 0x3ec   : > { %23191 = vmatprep.mubr.f32.mxu0 %v14344_v5  ;;  %24200 = vmatpush3.bf16.msra.mxu0 %v24197_v48  ;;  %v14374_v48 = vand.u32 4294901760, %v14373_v42  ;;  %v14187_v61 = vsel %vm352_vm0, %v18784_v49, 0  ;;  %v29680_v49 = vsub.f32 %v14181_v13, %v29655_v25  ;;  %v18788_v13 = vld [vmem:[%s26405_s17 + $0x129] sm:$0xff] }
 0x3ed   : > { %v23981_v38 = vpack.c.bf16 %v34267_v16, %v34265_v23  ;;  %34269 = vst [vmem:[#allocation221_spill] sm:$0xff] %v29638_v57  ;;  %21674 = vmatmul.mubr.f32.vlgmr.msra.gmra.mrb[0].mxu1 %v34270_v29  ;;  %24202 = vmatprep.subr.bf16.mxu0 %v29403_v33  ;;  %v34271_v23 = vand.u32 4294901760, %v34198_v37  ;;  %34273 = vst [vmem:[#allocation231_spill] sm:$0xff] %v29653_v2  ;;  %v18785_v29 = vld [vmem:[%s26405_s17 + $0x109] sm:$0xff]  ;;  %v34275_v37 = vand.u32 4294901760, %v29601_v43  ;;  %v33009_v45 = vand.u32 4294901760, %v29638_v57 }
 0x3ee   : > { %23980 = vmatpush3.bf16.msra.mxu1 %v29418_v1  ;;  %v14393_v1 = vsub.f32 %v29598_v55, %v33008_v51  ;;  %v14190_v42 = vsel %vm352_vm0, %v18785_v29, 0  ;;  %v18786_v16 = vld [vmem:[%s26405_s17 + $0x111] sm:$0xff]  ;;  %34279 = vst [vmem:[#allocation243_spill] sm:$0xff] %v29680_v49 }
 0x3ef   : > { %21676 = vmatprep.mubr.f32.mxu1 %v34271_v23  ;;  %23192 = vmatmul.mubr.f32.gmra.mrb[4].mxu0 %v14354_v44  ;;  %v14403_v5 = vsub.f32 %v29601_v43, %v34275_v37  ;;  %v34277_v44 = vand.u32 4294901760, %v34204_v52  ;;  %v34278_v23 = vand.u32 4294901760, %v34205_v9  ;;  %v18787_v52 = vld [vmem:[%s26405_s17 + $0x121] sm:$0xff]  ;;  %v29683_v9 = vand.u32 4294901760, %v14187_v61 }
 0x3f0   : > { %23982 = vmatprep.subr.bf16.mxu1 %v23981_v38  ;;  %23194 = vmatprep.mubr.f32.mxu0 %v14364_v20  ;;  %v14413_v20 = vsub.f32 %v29620_v62, %v33007_v4  ;;  %v14394_v29 = vand.u32 4294901760, %v14393_v1  ;;  %v29690_v4 = vsub.f32 %v14184_v34, %v29665_v50  ;;  %v29692_v51 = vand.u32 4294901760, %v14190_v42 }
 0x3f1   : > { %21677 = vmatmul.mubr.f32.gmra.mrb[2].mxu1 %v34277_v44  ;;  %v14404_v44 = vand.u32 4294901760, %v14403_v5  ;;  %34280 = vst [vmem:[#allocation247_spill] sm:$0xff] %v29683_v9  ;;  %v34283_v1 = vand.u32 4294901760, %v34206_v41  ;;  %v14196_v5 = vsel %vm352_vm0, %v18787_v52, 0  ;;  %v14433_v34 = vsub.f32 %v29650_v0, %v33012_v32 }
 0x3f2   : > { %21679 = vmatprep.mubr.f32.mxu1 %v34278_v23  ;;  %23984 = vmatpush3.bf16.msra.mxu1 %v23981_v38  ;;  %v14423_v23 = vsub.f32 %v29638_v57, %v33009_v45  ;;  %34281 = vst [vmem:[#allocation250_spill] sm:$0xff] %v29690_v4  ;;  %34282 = vst [vmem:[#allocation144_spill] sm:$0xff] %v29692_v51  ;;  %v14193_v38 = vsel %vm352_vm0, %v18786_v16, 0  ;;  %v14414_v37 = vand.u32 4294901760, %v14413_v20  ;;  %v34285_v45 = vand.u32 4294901760, %v29653_v2  ;;  %v18790_v57 = vld [vmem:[%s26405_s17 + $0x141] sm:$0xff] }
 0x3f3   : > { %23195 = vmatmul.mubr.f32.gmra.mrb[6].mxu0 %v14374_v48  ;;  %23986 = vmatprep.subr.bf16.mxu1 %v28700_v17  ;;  %v18789_v48 = vld [vmem:[%s26405_s17 + $0x139] sm:$0xff]  ;;  %v29710_v41 = vsub.f32 %v14187_v61, %v29683_v9  ;;  %v29712_v52 = vand.u32 4294901760, %v14193_v38  ;;  %v29718_v32 = vsub.f32 %v14190_v42, %v29692_v51  ;;  %v18791_v61 = vld [vmem:[%s26405_s17 + $0x151] sm:$0xff] }
 0x3f4   : > { %23197 = vmatprep.mubr.f32.mxu0 %v14384_v28  ;;  %v34284_v28 = vand.u32 4294901760, %v34207_v6  ;;  %v14443_v16 = vsub.f32 %v29653_v2, %v34285_v45  ;;  %v14199_v6 = vsel %vm352_vm0, %v18788_v13, 0  ;;  %v14202_v20 = vsel %vm352_vm0, %v18789_v48, 0 }
 0x3f5   : > { %21680 = vmatmul.mubr.f32.gmra.mrb[4].mxu1 %v34283_v1  ;;  %34286 = vst [vmem:[#allocation147_spill] sm:$0xff] %v29712_v52  ;;  %v14424_v1 = vand.u32 4294901760, %v14423_v23  ;;  %34287 = vst [vmem:[#allocation84_spill] sm:$0xff] %v29718_v32  ;;  %v29720_v45 = vand.u32 4294901760, %v14196_v5  ;;  %v34290_v2 = vand.u32 4294901760, %v34209_v27  ;;  %v14434_v13 = vand.u32 4294901760, %v14433_v34 }
 0x3f6   : > { %21682 = vmatprep.mubr.f32.mxu1 %v34284_v28  ;;  %v29731_v48 = vand.u32 4294901760, %v14199_v6  ;;  %v29733_v42 = vand.u32 4294901760, %v14202_v20  ;;  %v14444_v28 = vand.u32 4294901760, %v14443_v16  ;;  %v14205_v27 = vsel %vm352_vm0, %v18790_v57, 0 }
 0x3f7   : > { %23198 = vmatmul.mubr.f32.gmra.mrb[8].mxu0 %v14394_v29  ;;  %34288 = vst [vmem:[#allocation151_spill] sm:$0xff] %v29720_v45  ;;  %v34289_v29 = vand.u32 4294901760, %v34208_v35  ;;  %v34297_v16 = vand.u32 4294901760, %v34210_v3  ;;  %v18792_v35 = vld [vmem:[%s26405_s17 + $0x159] sm:$0xff] }
 0x3f8   : > { %23200 = vmatprep.mubr.f32.mxu0 %v14404_v44  ;;  %v34291_v44 = vand.u32 4294901760, %v29680_v49  ;;  %34292 = vst [vmem:[#allocation155_spill] sm:$0xff] %v29731_v48  ;;  %34293 = vst [vmem:[#allocation139_spill] sm:$0xff] %v29733_v42  ;;  %v29754_v57 = vsub.f32 %v14199_v6, %v29731_v48 }
 0x3f9   : > { %21683 = vmatmul.mubr.f32.gmra.mrb[6].mxu1 %v34289_v29  ;;  %v29737_v29 = vsub.f32 %v14193_v38, %v29712_v52  ;;  %v34298_v38 = vand.u32 4294901760, %v34211_v26  ;;  %v34306_v26 = vand.u32 4294901760, %v34213_v19 }
 0x3fa   : > { %21685 = vmatprep.mubr.f32.mxu1 %v34290_v2  ;;  %v14453_v23 = vsub.f32 %v29680_v49, %v34291_v44  ;;  %v34295_v2 = vand.u32 4294901760, %v29690_v4  ;;  %v29745_v49 = vsub.f32 %v14196_v5, %v29720_v45  ;;  %34299 = vst [vmem:[#allocation16_spill] sm:$0xff] %v29754_v57  ;;  %v18793_v5 = vld [vmem:[%s26405_s17 + $0x169] sm:$0xff] }
 0x3fb   : > { %23201 = vmatmul.mubr.f32.gmra.mrb[10].mxu0 %v14414_v37  ;;  %34294 = vst [vmem:[#allocation136_spill] sm:$0xff] %v29737_v29  ;;  %v14208_v37 = vsel %vm352_vm0, %v18791_v61, 0  ;;  %v34302_v61 = vand.u32 4294901760, %v29710_v41  ;;  %v14214_v0 = vsel %vm352_vm0, %v18793_v5, 0 }
 0x3fc   : > { %23203 = vmatprep.mubr.f32.mxu0 %v14424_v1  ;;  %v14463_v34 = vsub.f32 %v29690_v4, %v34295_v2  ;;  %34296 = vst [vmem:[#allocation158_spill] sm:$0xff] %v29745_v49  ;;  %v29757_v1 = vsub.f32 %v14202_v20, %v29733_v42  ;;  %v29759_v2 = vand.u32 4294901760, %v14205_v27  ;;  %v14454_v44 = vand.u32 4294901760, %v14453_v23  ;;  %v18795_v4 = vld [vmem:[%s26405_s17 + $0x181] sm:$0xff] }
 0x3fd   : > { %21686 = vmatmul.mubr.f32.gmra.mrb[8].mxu1 %v34297_v16  ;;  %v14473_v3 = vsub.f32 %v29710_v41, %v34302_v61  ;;  %v29766_v16 = vand.u32 4294901760, %v14208_v37  ;;  %v34305_v23 = vand.u32 4294901760, %v34212_v7  ;;  %v18794_v61 = vld [vmem:[%s26405_s17 + $0x171] sm:$0xff]  ;;  %v34307_v7 = vand.u32 4294901760, %v29737_v29 }
 0x3fe   : > { %21688 = vmatprep.mubr.f32.mxu1 %v34298_v38  ;;  %34300 = vst [vmem:[#allocation164_spill] sm:$0xff] %v29757_v1  ;;  %34301 = vst [vmem:[#allocation171_spill] sm:$0xff] %v29759_v2  ;;  %v14464_v6 = vand.u32 4294901760, %v14463_v34  ;;  %v34304_v38 = vand.u32 4294901760, %v29718_v32  ;;  %v34309_v34 = vand.u32 4294901760, %v29745_v49 }
 0x3ff   : > { %23204 = vmatmul.mubr.f32.gmra.mrb[12].mxu0 %v14434_v13  ;;  %34303 = vst [vmem:[#allocation7_spill] sm:$0xff] %v29766_v16  ;;  %v14211_v13 = vsel %vm352_vm0, %v18792_v35, 0  ;;  %v14474_v35 = vand.u32 4294901760, %v14473_v3  ;;  %v14493_v5 = vsub.f32 %v29737_v29, %v34307_v7  ;;  %v34311_v3 = vand.u32 4294901760, %v34214_v58  ;;  %v18796_v29 = vld [vmem:[%s26405_s17 + $0x189] sm:$0xff] }
 0x400   : > { %23206 = vmatprep.mubr.f32.mxu0 %v14444_v28  ;;  %v14483_v20 = vsub.f32 %v29718_v32, %v34304_v38  ;;  %v29782_v38 = vsub.f32 %v14205_v27, %v29759_v2  ;;  %v29791_v19 = vand.u32 4294901760, %v14211_v13  ;;  %v14503_v27 = vsub.f32 %v29745_v49, %v34309_v34  ;;  %v18797_v49 = vld [vmem:[%s26405_s17 + $0x199] sm:$0xff] }
 0x401   : > { %21689 = vmatmul.mubr.f32.gmra.mrb[10].mxu1 %v34305_v23  ;;  %v29789_v23 = vsub.f32 %v14208_v37, %v29766_v16  ;;  %v29796_v28 = vand.u32 4294901760, %v14214_v0  ;;  %v14220_v7 = vsel %vm352_vm0, %v18795_v4, 0  ;;  %v34312_v37 = vand.u32 4294901760, %v34215_v47 }
 0x402   : > { %21691 = vmatprep.mubr.f32.mxu1 %v34306_v26  ;;  %34308 = vst [vmem:[#allocation57_spill] sm:$0xff] %v29791_v19  ;;  %v14484_v26 = vand.u32 4294901760, %v14483_v20  ;;  %v34314_v32 = vand.u32 4294901760, %v29757_v1  ;;  %v14494_v58 = vand.u32 4294901760, %v14493_v5  ;;  %v18798_v5 = vld [vmem:[%s26405_s17 + $0x1a1] sm:$0xff] }
 0x403   : > { %23207 = vmatmul.mubr.f32.gmra.mrb[14].mxu0 %v14454_v44  ;;  %34310 = vst [vmem:[#allocation73_spill] sm:$0xff] %v29796_v28  ;;  %v14217_v44 = vsel %vm352_vm0, %v18794_v61, 0  ;;  %v34317_v61 = vand.u32 4294901760, %v34218_v53 }
 0x404   : > { %23209 = vmatprep.mubr.f32.mxu0 %v14464_v6  ;;  %v34313_v6 = vand.u32 4294901760, %v29754_v57  ;;  %v14523_v34 = vsub.f32 %v29757_v1, %v34314_v32  ;;  %v29817_v47 = vand.u32 4294901760, %v14217_v44  ;;  %v14223_v32 = vsel %vm352_vm0, %v18796_v29, 0 }
 0x405   : > { %21692 = vmatmul.mubr.f32.gmra.mrb[12].mxu1 %v34311_v3  ;;  %v29815_v3 = vsub.f32 %v14211_v13, %v29791_v19  ;;  %v34318_v13 = vand.u32 4294901760, %v34219_v36 }
 0x406   : > { %21694 = vmatprep.mubr.f32.mxu1 %v34312_v37  ;;  %v14513_v20 = vsub.f32 %v29754_v57, %v34313_v6  ;;  %34315 = vst [vmem:[#allocation9_spill] sm:$0xff] %v29817_v47  ;;  %v14504_v37 = vand.u32 4294901760, %v14503_v27  ;;  %v29820_v6 = vsub.f32 %v14214_v0, %v29796_v28  ;;  %v29822_v57 = vand.u32 4294901760, %v14220_v7 }
 0x407   : > { %23210 = vmatmul.mubr.f32.gmra.mrb[16].mxu0 %v14474_v35  ;;  %v14226_v35 = vsel %vm352_vm0, %v18797_v49, 0  ;;  %v14524_v1 = vand.u32 4294901760, %v14523_v34  ;;  %v34320_v27 = vand.u32 4294901760, %v29789_v23  ;;  %v33036_v53 = vand.u32 4294901760, %v29815_v3 }
 0x408   : > { %23212 = vmatprep.mubr.f32.mxu0 %v14484_v26  ;;  %34316 = vst [vmem:[#allocation184_spill] sm:$0xff] %v29822_v57  ;;  %v14514_v4 = vand.u32 4294901760, %v14513_v20  ;;  %v34319_v26 = vand.u32 4294901760, %v29782_v38  ;;  %v29841_v49 = vand.u32 4294901760, %v14223_v32  ;;  %v29845_v20 = vsub.f32 %v14220_v7, %v29822_v57 }
 0x409   : > { %21695 = vmatmul.mubr.f32.gmra.mrb[14].mxu1 %v34317_v61  ;;  %v14543_v29 = vsub.f32 %v29789_v23, %v34320_v27  ;;  %v29839_v61 = vsub.f32 %v14217_v44, %v29817_v47  ;;  %v29847_v34 = vand.u32 4294901760, %v14226_v35 }
 0x40a   : > { %21697 = vmatprep.mubr.f32.mxu1 %v34318_v13  ;;  %v14533_v0 = vsub.f32 %v29782_v38, %v34319_v26  ;;  %34321 = vst [vmem:[#allocation186_spill] sm:$0xff] %v29841_v49  ;;  %v34323_v13 = vand.u32 4294901760, %v34221_v24  ;;  %v34324_v26 = vand.u32 4294901760, %v34222_v14  ;;  %v29859_v7 = vsub.f32 %v14223_v32, %v29841_v49 }
 0x40b   : > { %23213 = vmatmul.mubr.f32.gmra.mrb[18].mxu0 %v14494_v58  ;;  %34322 = vst [vmem:[#allocation187_spill] sm:$0xff] %v29847_v34  ;;  %v14229_v58 = vsel %vm352_vm0, %v18798_v5, 0  ;;  %v33035_v27 = vand.u32 4294901760, %v29839_v61  ;;  %v14544_v5 = vand.u32 4294901760, %v14543_v29  ;;  %v34326_v24 = vand.u32 4294901760, %v29820_v6 }
 0x40c   : > { %23215 = vmatprep.mubr.f32.mxu0 %v14504_v37  ;;  %v14534_v44 = vand.u32 4294901760, %v14533_v0  ;;  %v14553_v37 = vsub.f32 %v29815_v3, %v33036_v53  ;;  %v29861_v36 = vand.u32 4294901760, %v14229_v58  ;;  %v33034_v0 = vand.u32 4294901760, %v29845_v20  ;;  %v34366_v53 = vld [vmem:[#allocation135_spill] sm:$0xff] }
 0x40d   : > { %21698 = vmatmul.mubr.f32.gmra.mrb[16].mxu1 %v34323_v13  ;;  %v14563_v14 = vsub.f32 %v29820_v6, %v34326_v24  ;;  %v34327_v13 = vand.u32 4294901760, %v34224_v59  ;;  %v33033_v29 = vand.u32 4294901760, %v29859_v7 }
 0x40e   : > { %21700 = vmatprep.mubr.f32.mxu1 %v34324_v26  ;;  %34325 = vst [vmem:[#allocation195_spill] sm:$0xff] %v29861_v36  ;;  %v34328_v26 = vand.u32 4294901760, %v34225_v40  ;;  %v14554_v32 = vand.u32 4294901760, %v14553_v37  ;;  %v29879_v24 = vsub.f32 %v14229_v58, %v29861_v36  ;;  %v14583_v59 = vsub.f32 %v29845_v20, %v33034_v0  ;;  %v34363_v0 = vld [vmem:[#allocation185_spill] sm:$0xff] }
 0x40f   : > { %23216 = vmatmul.mubr.f32.gmra.mrb[20].mxu0 %v14514_v4  ;;  %v29868_v4 = vsub.f32 %v14226_v35, %v29847_v34  ;;  %v14564_v35 = vand.u32 4294901760, %v14563_v14  ;;  %v34330_v37 = vand.u32 4294901760, %v34230_v56  ;;  %v14593_v58 = vsub.f32 %v29859_v7, %v33033_v29  ;;  %v34362_v29 = vld [vmem:[#allocation70_spill] sm:$0xff] }
 0x410   : > { %23218 = vmatprep.mubr.f32.mxu0 %v14524_v1  ;;  %v14573_v1 = vsub.f32 %v29839_v61, %v33035_v27  ;;  %v14584_v14 = vand.u32 4294901760, %v14583_v59  ;;  %v34332_v56 = vand.u32 4294901760, %v34237_v30  ;;  %v34334_v59 = vand.u32 4294901760, %v29199_v12  ;;  %v34340_v12 = vld [vmem:[#allocation257_spill] sm:$0xff]  ;;  %v34365_v27 = vld [vmem:[#allocation138_spill] sm:$0xff] }
 0x411   : > { %21701 = vmatmul.mubr.f32.gmra.mrb[18].mxu1 %v34327_v13  ;;  %v33032_v40 = vand.u32 4294901760, %v29868_v4  ;;  %v34335_v30 = vand.u32 4294901760, %v29216_v15  ;;  %v29922_v15 = vld [vmem:[%s32229_s1 + $0x60] sm:$0xff] }
 0x412   : > { %21703 = vmatprep.mubr.f32.mxu1 %v34328_v26  ;;  %v14574_v13 = vand.u32 4294901760, %v14573_v1 }
 0x413   : > { %23219 = vmatmul.mubr.f32.gmra.mrb[22].mxu0 %v14534_v44  ;;  %v34329_v44 = vand.u32 4294901760, %v34229_v54  ;;  %v14603_v26 = vsub.f32 %v29868_v4, %v33032_v40  ;;  %v34331_v54 = vand.u32 4294901760, %v34235_v46  ;;  %v34361_v40 = vld [vmem:[#allocation61_spill] sm:$0xff] }
 0x414   : > { %23221 = vmatprep.mubr.f32.mxu0 %v14544_v5  ;;  %v33031_v5 = vand.u32 4294901760, %v29879_v24 }
 0x415   : > { %21704 = vmatmul.mubr.f32.gmra.mrb[20].mxu1 %v34329_v44  ;;  %v14604_v44 = vand.u32 4294901760, %v14603_v26  ;;  %v34344_v26 = vld [vmem:[#allocation162_spill] sm:$0xff] }
 0x416   : > { %21706 = vmatprep.mubr.f32.mxu1 %v34330_v37  ;;  %v14613_v1 = vsub.f32 %v29879_v24, %v33031_v5  ;;  %v34336_v37 = vand.u32 4294901760, %v29222_v8  ;;  %v29927_v8 = vld [vmem:[%s32229_s1 + $0x68] sm:$0xff]  ;;  %v34360_v5 = vld [vmem:[#allocation181_spill] sm:$0xff] }
 0x417   : > { %23222 = vmatmul.mubr.f32.gmra.mrb[24].mxu0 %v14554_v32  ;;  %v14594_v32 = vand.u32 4294901760, %v14593_v58  ;;  %v34338_v58 = vand.u32 4294901760, %v29234_v63  ;;  %v34342_v63 = vand.u32 4294901760, %v29252_v10  ;;  %v34349_v10 = vld [vmem:[#allocation22_spill] sm:$0xff] }
 0x418   : > { %23224 = vmatprep.mubr.f32.mxu0 %v14564_v35  ;;  %v34333_v35 = vand.u32 4294901760, %v34242_v21  ;;  %v14614_v46 = vand.u32 4294901760, %v14613_v1  ;;  %v34339_v21 = vand.u32 4294901760, %v29243_v11  ;;  %v34343_v11 = vld [vmem:[#allocation255_spill] sm:$0xff]  ;;  %v34347_v1 = vld [vmem:[#allocation165_spill] sm:$0xff] }
 0x419   : > { %21707 = vmatmul.mubr.f32.gmra.mrb[22].mxu1 %v34331_v54  ;;  %v34345_v54 = vld [vmem:[#allocation150_spill] sm:$0xff] }
 0x41a   : > { %21709 = vmatprep.mubr.f32.mxu1 %v34332_v56  ;;  %v6302_v56 = vand.u32 4294901760, %v29927_v8 }
 0x41b   : > { %23225 = vmatmul.mubr.f32.gmra.mrb[26].mxu0 %v14574_v13  ;;  %v34337_v13 = vld [vmem:[#allocation256_spill] sm:$0xff] }
 0x41c   : > { %23227 = vmatprep.mubr.f32.mxu0 %v14584_v14  ;;  %v34341_v14 = vld [vmem:[#allocation145_spill] sm:$0xff] }
 0x41d   : > { %21710 = vmatmul.mubr.f32.gmra.mrb[24].mxu1 %v34333_v35  ;;  %v34350_v35 = vld [vmem:[#allocation157_spill] sm:$0xff] }
 0x41e   : > { %21712 = vmatprep.mubr.f32.mxu1 %v34334_v59  ;;  %v34351_v59 = vld [vmem:[#allocation156_spill] sm:$0xff] }
 0x41f   : > { %23228 = vmatmul.mubr.f32.gmra.mrb[28].mxu0 %v14594_v32  ;;  %v34346_v32 = vld [vmem:[#allocation152_spill] sm:$0xff] }
 0x420   : > { %23230 = vmatprep.mubr.f32.mxu0 %v14604_v44  ;;  %v34348_v44 = vld [vmem:[#allocation234_spill] sm:$0xff] }
 0x421   : > { %21713 = vmatmul.mubr.f32.gmra.mrb[26].mxu1 %v34335_v30  ;;  %v34353_v30 = vld [vmem:[#allocation160_spill] sm:$0xff] }
 0x422   : > { %21715 = vmatprep.mubr.f32.mxu1 %v34336_v37  ;;  %v34354_v37 = vld [vmem:[#allocation27_spill] sm:$0xff] }
 0x423   : > { %23231 = vmatmul.mubr.f32.gmra.mrb[30].mxu0 %v14614_v46 }
 0x424   : > { %23241 = vmatprep.mubr.f32.mxu0 %v34337_v13 }
 0x425   : > { %21716 = vmatmul.mubr.f32.gmra.mrb[28].mxu1 %v34338_v58  ;;  %v34355_v58 = vld [vmem:[#allocation30_spill] sm:$0xff] }
 0x426   : > { %21718 = vmatprep.mubr.f32.mxu1 %v34339_v21  ;;  %v34356_v21 = vld [vmem:[#allocation134_spill] sm:$0xff] }
 0x427   : > { %23242 = vmatmul.mubr.f32.vlgmr.msra.gmra.mrb[0].mxu0 %v34340_v12  ;;  %v34395_v12 = vld [vmem:[#allocation241_spill] sm:$0xff] }
 0x428   : > { %23244 = vmatprep.mubr.f32.mxu0 %v34341_v14  ;;  %24204 = vmatpush3.bf16.msra.mxu0 %v29403_v33  ;;  %v6299_v33 = vand.u32 4294901760, %v29922_v15  ;;  %v34394_v14 = vld [vmem:[#allocation248_spill] sm:$0xff]  ;;  %v34396_v13 = vand.u32 4294901760, %v34395_v12  ;;  %v34404_v12 = vld [vmem:[#allocation50_spill] sm:$0xff] }
 0x429   : > { %21719 = vmatmul.mubr.f32.gmra.mrb[30].mxu1 %v34342_v63  ;;  %24206 = vmatprep.subr.bf16.mxu0 %v34343_v11  ;;  %v34358_v63 = vld [vmem:[#allocation175_spill] sm:$0xff] }
 0x42a   : > { %21729 = vmatprep.mubr.f32.mxu1 %v34344_v26  ;;  %v29944_v46 = vpack.c.bf16 %v6302_v56, %v6299_v33 }
 0x42b   : > { %23245 = vmatmul.mubr.f32.gmra.mrb[2].mxu0 %v34345_v54  ;;  %v34393_v54 = vld [vmem:[#allocation233_spill] sm:$0xff] }
 0x42c   : > { %23247 = vmatprep.mubr.f32.mxu0 %v34346_v32  ;;  %24208 = vmatpush3.bf16.msra.mxu0 %v34343_v11  ;;  %34352 = vst [vmem:[#allocation199_spill] sm:$0xff] %v29944_v46  ;;  %v34359_v11 = vld [vmem:[#allocation53_spill] sm:$0xff] }
 0x42d   : > { %21730 = vmatmul.mubr.f32.vlgmr.msra.gmra.mrb[0].mxu1 %v34347_v1  ;;  %24210 = vmatprep.subr.bf16.mxu0 %v34348_v44  ;;  %v34392_v32 = vld [vmem:[#allocation109_spill] sm:$0xff] }
 0x42e   : > { %23988 = vmatpush3.bf16.msra.mxu1 %v28700_v17  ;;  %21732 = vmatprep.mubr.f32.mxu1 %v34349_v10  ;;  %v34357_v17 = vld [vmem:[#allocation173_spill] sm:$0xff] }
 0x42f   : > { %23248 = vmatmul.mubr.f32.gmra.mrb[4].mxu0 %v34350_v35  ;;  %23990 = vmatprep.subr.bf16.mxu1 %v34351_v59 }
 0x430   : > { %23250 = vmatprep.mubr.f32.mxu0 %v34353_v30 }
 0x431   : > { %21733 = vmatmul.mubr.f32.gmra.mrb[2].mxu1 %v34354_v37 }
 0x432   : > { %21735 = vmatprep.mubr.f32.mxu1 %v34355_v58  ;;  %23992 = vmatpush3.bf16.msra.mxu1 %v34351_v59  ;;  %v34364_v59 = vld [vmem:[#allocation76_spill] sm:$0xff] }
 0x433   : > { %23251 = vmatmul.mubr.f32.gmra.mrb[6].mxu0 %v34356_v21  ;;  %23994 = vmatprep.subr.bf16.mxu1 %v29944_v46  ;;  %v34386_v21 = vld [vmem:[#allocation80_spill] sm:$0xff] }
 0x434   : > { %23253 = vmatprep.mubr.f32.mxu0 %v29558_v31  ;;  %v34385_v31 = vld [vmem:[#allocation223_spill] sm:$0xff] }
 0x435   : > { %21736 = vmatmul.mubr.f32.gmra.mrb[4].mxu1 %v34357_v17 }
 0x436   : > { %21738 = vmatprep.mubr.f32.mxu1 %v34358_v63 }
 0x437   : > { %23254 = vmatmul.mubr.f32.gmra.mrb[8].mxu0 %v34359_v11  ;;  %v34367_v11 = vld [vmem:[#allocation92_spill] sm:$0xff] }
 0x438   : > { %23256 = vmatprep.mubr.f32.mxu0 %v34360_v5  ;;  %v34368_v5 = vld [vmem:[#allocation167_spill] sm:$0xff] }
 0x439   : > { %21739 = vmatmul.mubr.f32.gmra.mrb[6].mxu1 %v34361_v40 }
 0x43a   : > { %21741 = vmatprep.mubr.f32.mxu1 %v34362_v29 }
 0x43b   : > { %23257 = vmatmul.mubr.f32.gmra.mrb[10].mxu0 %v34363_v0  ;;  %v34369_v0 = vld [vmem:[#allocation26_spill] sm:$0xff] }
 0x43c   : > { %23259 = vmatprep.mubr.f32.mxu0 %v29610_v22  ;;  %v34370_v22 = vld [vmem:[#allocation188_spill] sm:$0xff] }
 0x43d   : > { %21742 = vmatmul.mubr.f32.gmra.mrb[8].mxu1 %v34364_v59 }
 0x43e   : > { %21744 = vmatprep.mubr.f32.mxu1 %v34365_v27 }
 0x43f   : > { %23260 = vmatmul.mubr.f32.gmra.mrb[12].mxu0 %v29622_v18  ;;  %v34371_v18 = vld [vmem:[#allocation192_spill] sm:$0xff] }
 0x440   : > { %23262 = vmatprep.mubr.f32.mxu0 %v29624_v39  ;;  %v34372_v39 = vld [vmem:[#allocation200_spill] sm:$0xff] }
 0x441   : > { %21745 = vmatmul.mubr.f32.gmra.mrb[10].mxu1 %v34366_v53 }
 0x442   : > { %21747 = vmatprep.mubr.f32.mxu1 %v34367_v11 }
 0x443   : > { %23263 = vmatmul.mubr.f32.gmra.mrb[14].mxu0 %v29655_v25  ;;  %v34373_v25 = vld [vmem:[#allocation209_spill] sm:$0xff] }
 0x444   : > { %23265 = vmatprep.mubr.f32.mxu0 %v29665_v50  ;;  %v34374_v50 = vld [vmem:[#allocation211_spill] sm:$0xff] }
 0x445   : > { %21748 = vmatmul.mubr.f32.gmra.mrb[12].mxu1 %v34368_v5 }
 0x446   : > { %21750 = vmatprep.mubr.f32.mxu1 %v34369_v0 }
 0x447   : > { %23266 = vmatmul.mubr.f32.gmra.mrb[16].mxu0 %v29683_v9  ;;  %v34375_v9 = vld [vmem:[#allocation43_spill] sm:$0xff] }
 0x448   : > { %23268 = vmatprep.mubr.f32.mxu0 %v29692_v51  ;;  %v34376_v51 = vld [vmem:[#allocation19_spill] sm:$0xff] }
 0x449   : > { %21751 = vmatmul.mubr.f32.gmra.mrb[14].mxu1 %v34370_v22 }
 0x44a   : > { %21753 = vmatprep.mubr.f32.mxu1 %v34371_v18 }
 0x44b   : > { %23269 = vmatmul.mubr.f32.gmra.mrb[18].mxu0 %v29712_v52  ;;  %v34377_v52 = vld [vmem:[#allocation182_spill] sm:$0xff] }
 0x44c   : > { %23271 = vmatprep.mubr.f32.mxu0 %v29720_v45  ;;  %v34378_v45 = vld [vmem:[#allocation190_spill] sm:$0xff] }
 0x44d   : > { %21754 = vmatmul.mubr.f32.gmra.mrb[16].mxu1 %v34372_v39 }
 0x44e   : > { %21756 = vmatprep.mubr.f32.mxu1 %v34373_v25 }
 0x44f   : > { %23272 = vmatmul.mubr.f32.gmra.mrb[20].mxu0 %v29731_v48  ;;  %v34379_v48 = vld [vmem:[#allocation194_spill] sm:$0xff] }
 0x450   : > { %23274 = vmatprep.mubr.f32.mxu0 %v29733_v42  ;;  %v34380_v42 = vld [vmem:[#allocation205_spill] sm:$0xff] }
 0x451   : > { %21757 = vmatmul.mubr.f32.gmra.mrb[18].mxu1 %v34374_v50 }
 0x452   : > { %21759 = vmatprep.mubr.f32.mxu1 %v34375_v9 }
 0x453   : > { %23275 = vmatmul.mubr.f32.gmra.mrb[22].mxu0 %v29759_v2  ;;  %v34381_v2 = vld [vmem:[#allocation213_spill] sm:$0xff] }
 0x454   : > { %23277 = vmatprep.mubr.f32.mxu0 %v29766_v16  ;;  %v29997_v16 = vsub.f32 %v29922_v15, %v6299_v33  ;;  %v18657_v15 = vld [vmem:[%s32229_s1 + $0x70] sm:$0xff]  ;;  %v34387_v33 = vld [vmem:[#allocation226_spill] sm:$0xff] }
 0x455   : > { %21760 = vmatmul.mubr.f32.gmra.mrb[20].mxu1 %v34376_v51 }
 0x456   : > { %21762 = vmatprep.mubr.f32.mxu1 %v34377_v52  ;;  %34382 = vst [vmem:[#allocation206_spill] sm:$0xff] %v29997_v16 }
 0x457   : > { %23278 = vmatmul.mubr.f32.gmra.mrb[24].mxu0 %v29791_v19  ;;  %v30000_v19 = vsub.f32 %v29927_v8, %v6302_v56  ;;  %v18658_v8 = vld [vmem:[%s32229_s1 + $0x78] sm:$0xff]  ;;  %v34388_v56 = vld [vmem:[#allocation230_spill] sm:$0xff] }
 0x458   : > { %23280 = vmatprep.mubr.f32.mxu0 %v29796_v28  ;;  %v34384_v28 = vld [vmem:[#allocation220_spill] sm:$0xff] }
 0x459   : > { %21763 = vmatmul.mubr.f32.gmra.mrb[22].mxu1 %v34378_v45  ;;  %34383 = vst [vmem:[#allocation208_spill] sm:$0xff] %v30000_v19  ;;  %v34391_v30 = vand.u32 4294901760, %v30000_v19 }
 0x45a   : > { %21765 = vmatprep.mubr.f32.mxu1 %v34379_v48 }
 0x45b   : > { %23281 = vmatmul.mubr.f32.gmra.mrb[26].mxu0 %v29817_v47  ;;  %v34390_v47 = vand.u32 4294901760, %v29997_v16  ;;  %v6698_v35 = vsub.f32 %v30000_v19, %v34391_v30  ;;  %v34399_v30 = vld [vmem:[#allocation118_spill] sm:$0xff] }
 0x45c   : > { %23283 = vmatprep.mubr.f32.mxu0 %v29822_v57  ;;  %v6308_v57 = vand.u32 4294901760, %v18658_v8 }
 0x45d   : > { %21766 = vmatmul.mubr.f32.gmra.mrb[24].mxu1 %v34380_v42 }
 0x45e   : > { %21768 = vmatprep.mubr.f32.mxu1 %v34381_v2 }
 0x45f   : > { %23284 = vmatmul.mubr.f32.gmra.mrb[28].mxu0 %v29841_v49  ;;  %v6691_v49 = vsub.f32 %v29997_v16, %v34390_v47  ;;  %v30037_v47 = vpack.c.bf16 %v30000_v19, %v29997_v16  ;;  %v18633_v19 = vld [vmem:[%s26405_s17 + $0x90] sm:$0xff] }
 0x460   : > { %23286 = vmatprep.mubr.f32.mxu0 %v29847_v34  ;;  %v34389_v34 = vld [vmem:[#allocation146_spill] sm:$0xff] }
 0x461   : > { %21769 = vmatmul.mubr.f32.gmra.mrb[26].mxu1 %v34384_v28 }
 0x462   : > { %21771 = vmatprep.mubr.f32.mxu1 %v34385_v31 }
 0x463   : > { %23287 = vmatmul.mubr.f32.gmra.mrb[30].mxu0 %v29861_v36  ;;  %v6305_v36 = vand.u32 4294901760, %v18657_v15 }
 0x464   : > { %23297 = vmatprep.mubr.f32.mxu0 %v34386_v21  ;;  %v34401_v21 = vld [vmem:[#allocation140_spill] sm:$0xff] }
 0x465   : > { %21772 = vmatmul.mubr.f32.gmra.mrb[28].mxu1 %v34387_v33 }
 0x466   : > { %21774 = vmatprep.mubr.f32.mxu1 %v34388_v56 }
 0x467   : > { %23298 = vmatmul.mubr.f32.vlgmr.msra.gmra.mrb[0].mxu0 %v34389_v34  ;;  %v34397_v34 = vld [vmem:[#allocation245_spill] sm:$0xff] }
 0x468   : > { %23300 = vmatprep.mubr.f32.mxu0 %v34392_v32  ;;  %24212 = vmatpush3.bf16.msra.mxu0 %v34348_v44  ;;  %v34398_v56 = vand.u32 4294901760, %v34397_v34  ;;  %v30040_v32 = vpack.c.bf16 %v6308_v57, %v6305_v36  ;;  %v6692_v44 = vand.u32 4294901760, %v6691_v49  ;;  %v34402_v34 = vld [vmem:[#allocation163_spill] sm:$0xff]  ;;  %v34403_v49 = vld [vmem:[#allocation17_spill] sm:$0xff] }
 0x469   : > { %21775 = vmatmul.mubr.f32.gmra.mrb[30].mxu1 %v34393_v54  ;;  %24214 = vmatprep.subr.bf16.mxu0 %v34394_v14  ;;  %v6699_v54 = vand.u32 4294901760, %v6698_v35  ;;  %v34417_v35 = vld [vmem:[#allocation164_spill] sm:$0xff] }
 0x46a   : > { %v30032_v33 = vpack.c.bf16 %v34398_v56, %v34396_v13  ;;  %21785 = vmatprep.mubr.f32.mxu1 %v34344_v26  ;;  %34400 = vst [vmem:[#allocation214_spill] sm:$0xff] %v30040_v32  ;;  %v34405_v26 = vld [vmem:[#allocation221_spill] sm:$0xff] }
 0x46b   : > { %23301 = vmatmul.mubr.f32.gmra.mrb[2].mxu0 %v34399_v30  ;;  %v30050_v13 = vpack.c.bf16 %v6699_v54, %v6692_v44  ;;  %v34406_v54 = vld [vmem:[#allocation228_spill] sm:$0xff]  ;;  %v34408_v44 = vld [vmem:[#allocation243_spill] sm:$0xff] }
 0x46c   : > { %23303 = vmatprep.mubr.f32.mxu0 %v34401_v21  ;;  %24216 = vmatpush3.bf16.msra.mxu0 %v34394_v14 }
 0x46d   : > { %21786 = vmatmul.mubr.f32.vlgmr.msra.gmra.mrb[0].mxu1 %v34347_v1  ;;  %24218 = vmatprep.subr.bf16.mxu0 %v30032_v33  ;;  %v34407_v1 = vld [vmem:[#allocation231_spill] sm:$0xff] }
 0x46e   : > { %23996 = vmatpush3.bf16.msra.mxu1 %v29944_v46  ;;  %21788 = vmatprep.mubr.f32.mxu1 %v34349_v10  ;;  %v30081_v10 = vsub.f32 %v18658_v8, %v6308_v57  ;;  %v18623_v57 = vld [vmem:[%s26405_s17 + $0x18] sm:$0xff]  ;;  %v18629_v8 = vld [vmem:[%s26405_s17 + $0x60] sm:$0xff] }
 0x46f   : > { %23304 = vmatmul.mubr.f32.gmra.mrb[4].mxu0 %v34402_v34  ;;  %23998 = vmatprep.subr.bf16.mxu1 %v30040_v32 }
 0x470   : > { %23306 = vmatprep.mubr.f32.mxu0 %v34403_v49  ;;  %34412 = vst [vmem:[#allocation218_spill] sm:$0xff] %v30081_v10 }
 0x471   : > { %21789 = vmatmul.mubr.f32.gmra.mrb[2].mxu1 %v34354_v37  ;;  %v18625_v37 = vld [vmem:[%s26405_s17 + $0x30] sm:$0xff] }
 0x472   : > { %21791 = vmatprep.mubr.f32.mxu1 %v34355_v58  ;;  %24000 = vmatpush3.bf16.msra.mxu1 %v30040_v32  ;;  %v18627_v58 = vld [vmem:[%s26405_s17 + $0x48] sm:$0xff]  ;;  %v34431_v32 = vld [vmem:[#allocation80_spill] sm:$0xff] }
 0x473   : > { %23307 = vmatmul.mubr.f32.gmra.mrb[6].mxu0 %v34404_v12  ;;  %24002 = vmatprep.subr.bf16.mxu1 %v30050_v13 }
 0x474   : > { %23309 = vmatprep.mubr.f32.mxu0 %v29584_v60 }
 0x475   : > { %21792 = vmatmul.mubr.f32.gmra.mrb[4].mxu1 %v34357_v17 }
 0x476   : > { %21794 = vmatprep.mubr.f32.mxu1 %v34358_v63 }
 0x477   : > { %23310 = vmatmul.mubr.f32.gmra.mrb[8].mxu0 %v29598_v55 }
 0x478   : > { %23312 = vmatprep.mubr.f32.mxu0 %v29601_v43 }
 0x479   : > { %21795 = vmatmul.mubr.f32.gmra.mrb[6].mxu1 %v34361_v40  ;;  %v34409_v40 = vld [vmem:[#allocation250_spill] sm:$0xff] }
 0x47a   : > { %21797 = vmatprep.mubr.f32.mxu1 %v34362_v29  ;;  %v30079_v29 = vsub.f32 %v18657_v15, %v6305_v36  ;;  %v34416_v36 = vld [vmem:[#allocation16_spill] sm:$0xff] }
 0x47b   : > { %23313 = vmatmul.mubr.f32.gmra.mrb[10].mxu0 %v29620_v62 }
 0x47c   : > { %23315 = vmatprep.mubr.f32.mxu0 %v34405_v26  ;;  %34411 = vst [vmem:[#allocation217_spill] sm:$0xff] %v30079_v29  ;;  %v34429_v16 = vand.u32 4294901760, %v30079_v29 }
 0x47d   : > { %21798 = vmatmul.mubr.f32.gmra.mrb[8].mxu1 %v34364_v59  ;;  %v18628_v59 = vld [vmem:[%s26405_s17 + $0x50] sm:$0xff] }
 0x47e   : > { %21800 = vmatprep.mubr.f32.mxu1 %v34365_v27  ;;  %v34410_v27 = vld [vmem:[#allocation84_spill] sm:$0xff] }
 0x47f   : > { %23316 = vmatmul.mubr.f32.gmra.mrb[12].mxu0 %v34406_v54 }
 0x480   : > { %23318 = vmatprep.mubr.f32.mxu0 %v34407_v1 }
 0x481   : > { %21801 = vmatmul.mubr.f32.gmra.mrb[10].mxu1 %v34366_v53  ;;  %v30087_v53 = vpack.c.bf16 %v30081_v10, %v30079_v29 }
 0x482   : > { %21803 = vmatprep.mubr.f32.mxu1 %v34367_v11  ;;  %v6215_v11 = vsel %vm352_vm0, %v18627_v58, 0 }
 0x483   : > { %23319 = vmatmul.mubr.f32.gmra.mrb[14].mxu0 %v34408_v44  ;;  %34413 = vst [vmem:[#allocation219_spill] sm:$0xff] %v30087_v53  ;;  %v34439_v53 = vld [vmem:[#allocation253_spill] sm:$0xff] }
 0x484   : > { %23321 = vmatprep.mubr.f32.mxu0 %v34409_v40 }
 0x485   : > { %21804 = vmatmul.mubr.f32.gmra.mrb[12].mxu1 %v34368_v5  ;;  %v34414_v5 = vld [vmem:[#allocation136_spill] sm:$0xff] }
 0x486   : > { %21806 = vmatprep.mubr.f32.mxu1 %v34369_v0  ;;  %v34415_v0 = vld [vmem:[#allocation158_spill] sm:$0xff] }
 0x487   : > { %23322 = vmatmul.mubr.f32.gmra.mrb[16].mxu0 %v29710_v41 }
 0x488   : > { %23324 = vmatprep.mubr.f32.mxu0 %v34410_v27 }
 0x489   : > { %21807 = vmatmul.mubr.f32.gmra.mrb[14].mxu1 %v34370_v22  ;;  %v6203_v22 = vsel %vm352_vm0, %v18623_v57, 0  ;;  %v30138_v57 = vand.u32 4294901760, %v6215_v11 }
 0x48a   : > { %21809 = vmatprep.mubr.f32.mxu1 %v34371_v18  ;;  %v18624_v18 = vld [vmem:[%s26405_s17 + $0x20] sm:$0xff] }
 0x48b   : > { %23325 = vmatmul.mubr.f32.gmra.mrb[18].mxu0 %v34414_v5  ;;  %34425 = vst [vmem:[#allocation252_spill] sm:$0xff] %v30138_v57 }
 0x48c   : > { %23327 = vmatprep.mubr.f32.mxu0 %v34415_v0 }
 0x48d   : > { %21810 = vmatmul.mubr.f32.gmra.mrb[16].mxu1 %v34372_v39  ;;  %v30104_v39 = vand.u32 4294901760, %v6203_v22 }
 0x48e   : > { %21812 = vmatprep.mubr.f32.mxu1 %v34373_v25  ;;  %v6206_v25 = vsel %vm352_vm0, %v18624_v18, 0  ;;  %v18630_v18 = vld [vmem:[%s26405_s17 + $0x68] sm:$0xff] }
 0x48f   : > { %23328 = vmatmul.mubr.f32.gmra.mrb[20].mxu0 %v34416_v36  ;;  %34418 = vst [vmem:[#allocation225_spill] sm:$0xff] %v30104_v39  ;;  %v30113_v17 = vand.u32 4294901760, %v6206_v25 }
 0x490   : > { %23330 = vmatprep.mubr.f32.mxu0 %v34417_v35 }
 0x491   : > { %21813 = vmatmul.mubr.f32.gmra.mrb[18].mxu1 %v34374_v50  ;;  %v6209_v50 = vsel %vm352_vm0, %v18625_v37, 0  ;;  %34419 = vst [vmem:[#allocation227_spill] sm:$0xff] %v30113_v17  ;;  %v30128_v15 = vsub.f32 %v6206_v25, %v30113_v17  ;;  %v6221_v37 = vsel %vm352_vm0, %v18629_v8, 0  ;;  %v6224_v25 = vsel %vm352_vm0, %v18630_v18, 0 }
 0x492   : > { %21815 = vmatprep.mubr.f32.mxu1 %v34375_v9  ;;  %v18626_v9 = vld [vmem:[%s26405_s17 + $0x38] sm:$0xff]  ;;  %v30119_v63 = vand.u32 4294901760, %v6209_v50  ;;  %v34430_v8 = vand.u32 4294901760, %v30081_v10  ;;  %v34432_v18 = vand.u32 4294901760, %v34431_v32 }
 0x493   : > { %23331 = vmatmul.mubr.f32.gmra.mrb[22].mxu0 %v29782_v38  ;;  %34422 = vst [vmem:[#allocation242_spill] sm:$0xff] %v30128_v15 }
 0x494   : > { %23333 = vmatprep.mubr.f32.mxu0 %v29789_v23  ;;  %34421 = vst [vmem:[#allocation238_spill] sm:$0xff] %v30119_v63 }
 0x495   : > { %21816 = vmatmul.mubr.f32.gmra.mrb[20].mxu1 %v34376_v51  ;;  %v30117_v51 = vsub.f32 %v6203_v22, %v30104_v39  ;;  %v6218_v22 = vsel %vm352_vm0, %v18628_v59, 0 }
 0x496   : > { %21818 = vmatprep.mubr.f32.mxu1 %v34377_v52  ;;  %v6212_v52 = vsel %vm352_vm0, %v18626_v9, 0  ;;  %v30152_v58 = vand.u32 4294901760, %v6218_v22 }
 0x497   : > { %23334 = vmatmul.mubr.f32.gmra.mrb[24].mxu0 %v29815_v3  ;;  %34420 = vst [vmem:[#allocation235_spill] sm:$0xff] %v30117_v51  ;;  %v33082_v56 = vand.u32 4294901760, %v30117_v51 }
 0x498   : > { %23336 = vmatprep.mubr.f32.mxu0 %v29820_v6  ;;  %34427 = vst [vmem:[#allocation197_spill] sm:$0xff] %v30152_v58  ;;  %v30184_v46 = vsub.f32 %v6218_v22, %v30152_v58 }
 0x499   : > { %21819 = vmatmul.mubr.f32.gmra.mrb[22].mxu1 %v34378_v45  ;;  %v30130_v45 = vand.u32 4294901760, %v6212_v52  ;;  %v6370_v59 = vsub.f32 %v30117_v51, %v33082_v56  ;;  %v6705_v56 = vsub.f32 %v30079_v29, %v34429_v16  ;;  %v34435_v16 = vld [vmem:[#allocation226_spill] sm:$0xff] }
 0x49a   : > { %21821 = vmatprep.mubr.f32.mxu1 %v34379_v48  ;;  %v30136_v48 = vsub.f32 %v6209_v50, %v30119_v63 }
 0x49b   : > { %23337 = vmatmul.mubr.f32.gmra.mrb[26].mxu0 %v29839_v61  ;;  %34423 = vst [vmem:[#allocation246_spill] sm:$0xff] %v30130_v45  ;;  %v30150_v9 = vsub.f32 %v6212_v52, %v30130_v45  ;;  %v30165_v52 = vand.u32 4294901760, %v6221_v37  ;;  %v6371_v29 = vand.u32 4294901760, %v6370_v59 }
 0x49c   : > { %23339 = vmatprep.mubr.f32.mxu0 %v29845_v20  ;;  %34424 = vst [vmem:[#allocation249_spill] sm:$0xff] %v30136_v48 }
 0x49d   : > { %21822 = vmatmul.mubr.f32.gmra.mrb[24].mxu1 %v34380_v42  ;;  %34426 = vst [vmem:[#allocation254_spill] sm:$0xff] %v30150_v9  ;;  %v30161_v42 = vsub.f32 %v6215_v11, %v30138_v57  ;;  %34428 = vst [vmem:[#allocation201_spill] sm:$0xff] %v30165_v52  ;;  %v6712_v11 = vsub.f32 %v30081_v10, %v34430_v8  ;;  %v30186_v57 = vand.u32 4294901760, %v6224_v25  ;;  %v34436_v8 = vand.u32 4294901760, %v30136_v48  ;;  %v34437_v10 = vld [vmem:[#allocation251_spill] sm:$0xff] }
 0x49e   : > { %21824 = vmatprep.mubr.f32.mxu1 %v34381_v2  ;;  %v18631_v2 = vld [vmem:[%s26405_s17 + $0x78] sm:$0xff]  ;;  %v34438_v45 = vand.u32 4294901760, %v34437_v10  ;;  %v30199_v22 = vsub.f32 %v6221_v37, %v30165_v52  ;;  %v6706_v10 = vand.u32 4294901760, %v6705_v56  ;;  %v34453_v37 = vand.u32 4294901760, %v34399_v30 }
 0x49f   : > { %23340 = vmatmul.mubr.f32.gmra.mrb[28].mxu0 %v29859_v7  ;;  %v6227_v50 = vsel %vm352_vm0, %v18631_v2, 0  ;;  %34434 = vst [vmem:[#allocation203_spill] sm:$0xff] %v30186_v57  ;;  %v6390_v32 = vsub.f32 %v30136_v48, %v34436_v8  ;;  %v18634_v8 = vld [vmem:[%s26405_s17 + $0x98] sm:$0xff]  ;;  %v34443_v48 = vld [vmem:[#allocation146_spill] sm:$0xff]  ;;  %v6713_v63 = vand.u32 4294901760, %v6712_v11 }
 0x4a0   : > { %23342 = vmatprep.mubr.f32.mxu0 %v29868_v4  ;;  %v30201_v58 = vand.u32 4294901760, %v6227_v50 }
 0x4a1   : > { %21825 = vmatmul.mubr.f32.gmra.mrb[26].mxu1 %v34384_v28  ;;  %v18632_v28 = vld [vmem:[%s26405_s17 + $0x80] sm:$0xff] }
 0x4a2   : > { %21827 = vmatprep.mubr.f32.mxu1 %v34385_v31  ;;  %v34433_v31 = vand.u32 4294901760, %v30128_v15  ;;  %34442 = vst [vmem:[#allocation204_spill] sm:$0xff] %v30201_v58  ;;  %v6230_v59 = vsel %vm352_vm0, %v18632_v28, 0  ;;  %v34448_v28 = vld [vmem:[#allocation233_spill] sm:$0xff] }
 0x4a3   : > { %23343 = vmatmul.mubr.f32.gmra.mrb[30].mxu0 %v29879_v24  ;;  %v30220_v11 = vand.u32 4294901760, %v6230_v59 }
 0x4a4   : > { %23353 = vmatprep.mubr.f32.mxu0 %v34432_v18  ;;  %v6380_v51 = vsub.f32 %v30128_v15, %v34433_v31  ;;  %v34440_v31 = vand.u32 4294901760, %v34439_v53  ;;  %v34441_v15 = vld [vmem:[#allocation230_spill] sm:$0xff]  ;;  %v34444_v18 = vand.u32 4294901760, %v34443_v48  ;;  %v34445_v53 = vld [vmem:[#allocation109_spill] sm:$0xff] }
 0x4a5   : > { %21828 = vmatmul.mubr.f32.gmra.mrb[28].mxu1 %v34435_v16  ;;  %v6233_v16 = vsel %vm352_vm0, %v18633_v19, 0  ;;  %v34446_v17 = vand.u32 4294901760, %v34445_v53  ;;  %v30216_v19 = vsub.f32 %v6224_v25, %v30186_v57  ;;  %v18635_v48 = vld [vmem:[%s26405_s17 + $0xa8] sm:$0xff]  ;;  %34449 = vst [vmem:[#allocation212_spill] sm:$0xff] %v30220_v11  ;;  %v34455_v57 = vand.u32 4294901760, %v30184_v46 }
 0x4a6   : > { %v24221_v2 = vpack.c.bf16 %v34440_v31, %v34438_v45  ;;  %21830 = vmatprep.mubr.f32.mxu1 %v34441_v15  ;;  %v34447_v15 = vand.u32 4294901760, %v30150_v9  ;;  %v6381_v56 = vand.u32 4294901760, %v6380_v51  ;;  %v34451_v31 = vand.u32 4294901760, %v30161_v42  ;;  %v18637_v51 = vld [vmem:[%s26405_s17 + $0xc0] sm:$0xff] }
 0x4a7   : > { %23354 = vmatmul.mubr.f32.vlgmr.msra.gmra.mrb[0].mxu0 %v34444_v18  ;;  %v6391_v18 = vand.u32 4294901760, %v6390_v32  ;;  %v30246_v30 = vsub.f32 %v6230_v59, %v30220_v11 }
 0x4a8   : > { %23356 = vmatprep.mubr.f32.mxu0 %v34446_v17  ;;  %24220 = vmatpush3.bf16.msra.mxu0 %v30032_v33  ;;  %v6400_v45 = vsub.f32 %v30150_v9, %v34447_v15  ;;  %v30222_v17 = vand.u32 4294901760, %v6233_v16  ;;  %v6236_v33 = vsel %vm352_vm0, %v18634_v8, 0  ;;  %v6410_v53 = vsub.f32 %v30161_v42, %v34451_v31 }
 0x4a9   : > { %21831 = vmatmul.mubr.f32.gmra.mrb[30].mxu1 %v34448_v28  ;;  %24222 = vmatprep.subr.bf16.mxu0 %v24221_v2  ;;  %v30230_v15 = vsub.f32 %v6227_v50, %v30201_v58  ;;  %v18636_v28 = vld [vmem:[%s26405_s17 + $0xb0] sm:$0xff]  ;;  %v6239_v9 = vsel %vm352_vm0, %v18635_v48, 0  ;;  %v24005_v8 = vpack.c.bf16 %v6713_v63, %v6706_v10  ;;  %v6420_v31 = vsub.f32 %v30184_v46, %v34455_v57 }
 0x4aa   : > { %34450 = vst [vmem:[#allocation215_spill] sm:$0xff] %v30222_v17  ;;  %21841 = vmatprep.mubr.f32.mxu1 %v6371_v29  ;;  %v34454_v29 = vand.u32 4294901760, %v34401_v21  ;;  %v6401_v32 = vand.u32 4294901760, %v6400_v45  ;;  %v33110_v50 = vand.u32 4294901760, %v30216_v19  ;;  %v30243_v25 = vand.u32 4294901760, %v6236_v33  ;;  %34457 = vst [vmem:[#allocation229_spill] sm:$0xff] %v30246_v30 }
 0x4ab   : > { %34452 = vst [vmem:[#allocation222_spill] sm:$0xff] %v30230_v15  ;;  %23357 = vmatmul.mubr.f32.gmra.mrb[2].mxu0 %v34453_v37  ;;  %v30249_v63 = vsub.f32 %v6233_v16, %v30222_v17  ;;  %v6242_v21 = vsel %vm352_vm0, %v18636_v28, 0  ;;  %v6245_v10 = vsel %vm352_vm0, %v18637_v51, 0  ;;  %v34459_v45 = vld [vmem:[#allocation234_spill] sm:$0xff]  ;;  %v6411_v57 = vand.u32 4294901760, %v6410_v53 }
 0x4ac   : > { %23359 = vmatprep.mubr.f32.mxu0 %v34454_v29  ;;  %34456 = vst [vmem:[#allocation224_spill] sm:$0xff] %v30243_v25  ;;  %24224 = vmatpush3.bf16.msra.mxu0 %v24221_v2  ;;  %v34460_v2 = vand.u32 4294901760, %v30199_v22  ;;  %v33111_v59 = vand.u32 4294901760, %v30230_v15  ;;  %v30259_v48 = vand.u32 4294901760, %v6239_v9  ;;  %v18638_v16 = vld [vmem:[%s26405_s17 + $0xc8] sm:$0xff]  ;;  %v34463_v28 = vand.u32 4294901760, %v34403_v49 }
 0x4ad   : > { %21842 = vmatmul.mubr.f32.vlgmr.msra.gmra.mrb[0].mxu1 %v6381_v56  ;;  %34458 = vst [vmem:[#allocation232_spill] sm:$0xff] %v30249_v63  ;;  %24226 = vmatprep.subr.bf16.mxu0 %v34459_v45  ;;  %v34462_v56 = vand.u32 4294901760, %v34402_v34  ;;  %v6421_v51 = vand.u32 4294901760, %v6420_v31  ;;  %v30271_v53 = vand.u32 4294901760, %v6245_v10  ;;  %v18639_v29 = vld [vmem:[%s26405_s17 + $0xd8] sm:$0xff]  ;;  %v6440_v34 = vsub.f32 %v30216_v19, %v33110_v50 }
 0x4ae   : > { %24004 = vmatpush3.bf16.msra.mxu1 %v30050_v13  ;;  %21844 = vmatprep.mubr.f32.mxu1 %v6391_v18  ;;  %v6430_v37 = vsub.f32 %v30199_v22, %v34460_v2  ;;  %34461 = vst [vmem:[#allocation237_spill] sm:$0xff] %v30259_v48  ;;  %v30267_v13 = vsub.f32 %v6236_v33, %v30243_v25  ;;  %v30269_v18 = vand.u32 4294901760, %v6242_v21  ;;  %v33114_v49 = vand.u32 4294901760, %v30249_v63  ;;  %v18640_v2 = vld [vmem:[%s26405_s17 + $0xe0] sm:$0xff] }
 0x4af   : > { %23360 = vmatmul.mubr.f32.gmra.mrb[4].mxu0 %v34462_v56  ;;  %24006 = vmatprep.subr.bf16.mxu1 %v24005_v8  ;;  %34466 = vst [vmem:[#allocation141_spill] sm:$0xff] %v30271_v53  ;;  %v6248_v31 = vsel %vm352_vm0, %v18638_v16, 0  ;;  %v6450_v56 = vsub.f32 %v30230_v15, %v33111_v59  ;;  %v6251_v50 = vsel %vm352_vm0, %v18639_v29, 0  ;;  %v34469_v16 = vand.u32 4294901760, %v29584_v60  ;;  %v18642_v15 = vld [vmem:[%s26405_s17 + $0xf8] sm:$0xff] }
 0x4b0   : > { %23362 = vmatprep.mubr.f32.mxu0 %v34463_v28  ;;  %34464 = vst [vmem:[#allocation240_spill] sm:$0xff] %v30267_v13  ;;  %34465 = vst [vmem:[#allocation244_spill] sm:$0xff] %v30269_v18  ;;  %v6431_v33 = vand.u32 4294901760, %v6430_v37  ;;  %v30284_v28 = vsub.f32 %v6239_v9, %v30259_v48  ;;  %v30295_v37 = vsub.f32 %v6242_v21, %v30269_v18  ;;  %v6441_v29 = vand.u32 4294901760, %v6440_v34 }
 0x4b1   : > { %21845 = vmatmul.mubr.f32.gmra.mrb[2].mxu1 %v6401_v32  ;;  %v34468_v32 = vand.u32 4294901760, %v34404_v12  ;;  %v30298_v9 = vsub.f32 %v6245_v10, %v30271_v53  ;;  %v18641_v12 = vld [vmem:[%s26405_s17 + $0xf0] sm:$0xff]  ;;  %v6451_v21 = vand.u32 4294901760, %v6450_v56  ;;  %v30310_v10 = vand.u32 4294901760, %v6251_v50 }
 0x4b2   : > { %21847 = vmatprep.mubr.f32.mxu1 %v6411_v57  ;;  %34467 = vst [vmem:[#allocation143_spill] sm:$0xff] %v30284_v28  ;;  %24008 = vmatpush3.bf16.msra.mxu1 %v24005_v8  ;;  %34470 = vst [vmem:[#allocation108_spill] sm:$0xff] %v30295_v37  ;;  %v30300_v8 = vand.u32 4294901760, %v6248_v31  ;;  %v6254_v57 = vsel %vm352_vm0, %v18640_v2, 0  ;;  %v6257_v34 = vsel %vm352_vm0, %v18641_v12, 0  ;;  %v6260_v59 = vsel %vm352_vm0, %v18642_v15, 0 }
 0x4b3   : > { %23363 = vmatmul.mubr.f32.gmra.mrb[6].mxu0 %v34468_v32  ;;  %24010 = vmatprep.subr.bf16.mxu1 %v30037_v47  ;;  %34471 = vst [vmem:[#allocation149_spill] sm:$0xff] %v30298_v9  ;;  %v34473_v32 = vand.u32 4294901760, %v30246_v30  ;;  %34474 = vst [vmem:[#allocation168_spill] sm:$0xff] %v30310_v10  ;;  %v30336_v56 = vand.u32 4294901760, %v6257_v34 }
 0x4b4   : > { %23365 = vmatprep.mubr.f32.mxu0 %v34469_v16  ;;  %34472 = vst [vmem:[#allocation166_spill] sm:$0xff] %v30300_v8  ;;  %v6470_v16 = vsub.f32 %v30249_v63, %v33114_v49  ;;  %v34477_v49 = vand.u32 4294901760, %v30267_v13  ;;  %v30325_v2 = vsub.f32 %v6248_v31, %v30300_v8  ;;  %v30328_v63 = vand.u32 4294901760, %v6254_v57  ;;  %v18644_v31 = vld [vmem:[%s26405_s17 + $0x110] sm:$0xff] }
 0x4b5   : > { %21848 = vmatmul.mubr.f32.gmra.mrb[4].mxu1 %v6421_v51  ;;  %v6460_v60 = vsub.f32 %v30246_v30, %v34473_v32  ;;  %v34475_v51 = vand.u32 4294901760, %v29598_v55  ;;  %v34476_v32 = vand.u32 4294901760, %v29601_v43  ;;  %v18643_v55 = vld [vmem:[%s26405_s17 + $0x108] sm:$0xff]  ;;  %v34480_v43 = vand.u32 4294901760, %v30284_v28  ;;  %34482 = vst [vmem:[#allocation40_spill] sm:$0xff] %v30336_v56 }
 0x4b6   : > { %21850 = vmatprep.mubr.f32.mxu1 %v6431_v33  ;;  %v6480_v33 = vsub.f32 %v30267_v13, %v34477_v49  ;;  %34478 = vst [vmem:[#allocation170_spill] sm:$0xff] %v30325_v2  ;;  %34479 = vst [vmem:[#allocation153_spill] sm:$0xff] %v30328_v63  ;;  %v30334_v49 = vsub.f32 %v6251_v50, %v30310_v10  ;;  %v18645_v13 = vld [vmem:[%s26405_s17 + $0x120] sm:$0xff]  ;;  %v18646_v30 = vld [vmem:[%s26405_s17 + $0x128] sm:$0xff] }
 0x4b7   : > { %23366 = vmatmul.mubr.f32.gmra.mrb[8].mxu0 %v34475_v51  ;;  %v6461_v12 = vand.u32 4294901760, %v6460_v60  ;;  %v6471_v51 = vand.u32 4294901760, %v6470_v16  ;;  %v6263_v60 = vsel %vm352_vm0, %v18643_v55, 0  ;;  %v34484_v16 = vand.u32 4294901760, %v34405_v26 }
 0x4b8   : > { %23368 = vmatprep.mubr.f32.mxu0 %v34476_v32  ;;  %v6490_v32 = vsub.f32 %v30284_v28, %v34480_v43  ;;  %34481 = vst [vmem:[#allocation154_spill] sm:$0xff] %v30334_v49  ;;  %v34485_v43 = vand.u32 4294901760, %v30295_v37  ;;  %v34486_v28 = vand.u32 4294901760, %v30298_v9  ;;  %v30356_v55 = vand.u32 4294901760, %v6260_v59 }
 0x4b9   : > { %21851 = vmatmul.mubr.f32.gmra.mrb[6].mxu1 %v6441_v29  ;;  %v34483_v29 = vand.u32 4294901760, %v29620_v62  ;;  %v30354_v62 = vsub.f32 %v6254_v57, %v30328_v63  ;;  %v6266_v26 = vsel %vm352_vm0, %v18644_v31, 0  ;;  %v18647_v57 = vld [vmem:[%s26405_s17 + $0x138] sm:$0xff] }
 0x4ba   : > { %21853 = vmatprep.mubr.f32.mxu1 %v6451_v21  ;;  %v6481_v21 = vand.u32 4294901760, %v6480_v33  ;;  %v6500_v50 = vsub.f32 %v30295_v37, %v34485_v43  ;;  %v6510_v15 = vsub.f32 %v30298_v9, %v34486_v28  ;;  %34487 = vst [vmem:[#allocation174_spill] sm:$0xff] %v30356_v55  ;;  %v6269_v33 = vsel %vm352_vm0, %v18645_v13, 0 }
 0x4bb   : > { %23369 = vmatmul.mubr.f32.gmra.mrb[10].mxu0 %v34483_v29  ;;  %v6491_v29 = vand.u32 4294901760, %v6490_v32  ;;  %v30362_v43 = vsub.f32 %v6257_v34, %v30336_v56  ;;  %v30364_v28 = vand.u32 4294901760, %v6263_v60  ;;  %v34491_v9 = vand.u32 4294901760, %v34407_v1 }
 0x4bc   : > { %23371 = vmatprep.mubr.f32.mxu0 %v34484_v16  ;;  %v6501_v31 = vand.u32 4294901760, %v6500_v50  ;;  %v34492_v13 = vand.u32 4294901760, %v30325_v2  ;;  %v30375_v32 = vand.u32 4294901760, %v6266_v26  ;;  %v30377_v34 = vand.u32 4294901760, %v6269_v33 }
 0x4bd   : > { %21854 = vmatmul.mubr.f32.gmra.mrb[8].mxu1 %v6461_v12  ;;  %34488 = vst [vmem:[#allocation176_spill] sm:$0xff] %v30362_v43  ;;  %34489 = vst [vmem:[#allocation177_spill] sm:$0xff] %v30364_v28  ;;  %v34490_v12 = vand.u32 4294901760, %v34406_v54  ;;  %v6511_v16 = vand.u32 4294901760, %v6510_v15  ;;  %v6272_v1 = vsel %vm352_vm0, %v18646_v30, 0  ;;  %v34498_v15 = vand.u32 4294901760, %v34408_v44 }
 0x4be   : > { %21856 = vmatprep.mubr.f32.mxu1 %v6471_v51  ;;  %v6520_v51 = vsub.f32 %v30325_v2, %v34492_v13  ;;  %34493 = vst [vmem:[#allocation178_spill] sm:$0xff] %v30375_v32  ;;  %34494 = vst [vmem:[#allocation142_spill] sm:$0xff] %v30377_v34  ;;  %v30389_v2 = vsub.f32 %v6263_v60, %v30364_v28  ;;  %v18648_v54 = vld [vmem:[%s26405_s17 + $0x140] sm:$0xff]  ;;  %v30398_v30 = vsub.f32 %v6266_v26, %v30375_v32  ;;  %v18649_v60 = vld [vmem:[%s26405_s17 + $0x150] sm:$0xff] }
 0x4bf   : > { %23372 = vmatmul.mubr.f32.gmra.mrb[12].mxu0 %v34490_v12  ;;  %v30381_v12 = vsub.f32 %v6260_v59, %v30356_v55  ;;  %v34499_v59 = vand.u32 4294901760, %v34409_v40  ;;  %v6281_v37 = vsel %vm352_vm0, %v18649_v60, 0  ;;  %v34507_v40 = vand.u32 4294901760, %v34410_v27 }
 0x4c0   : > { %23374 = vmatprep.mubr.f32.mxu0 %v34491_v9  ;;  %v34496_v9 = vand.u32 4294901760, %v30334_v49  ;;  %34497 = vst [vmem:[#allocation85_spill] sm:$0xff] %v30389_v2  ;;  %34500 = vst [vmem:[#allocation148_spill] sm:$0xff] %v30398_v30  ;;  %v6521_v13 = vand.u32 4294901760, %v6520_v51  ;;  %v34506_v51 = vand.u32 4294901760, %v29710_v41 }
 0x4c1   : > { %21857 = vmatmul.mubr.f32.gmra.mrb[10].mxu1 %v6481_v21  ;;  %34495 = vst [vmem:[#allocation96_spill] sm:$0xff] %v30381_v12  ;;  %v6275_v21 = vsel %vm352_vm0, %v18647_v57, 0  ;;  %v34503_v57 = vand.u32 4294901760, %v30354_v62  ;;  %v34508_v41 = vand.u32 4294901760, %v30381_v12 }
 0x4c2   : > { %21859 = vmatprep.mubr.f32.mxu1 %v6491_v29  ;;  %v6530_v50 = vsub.f32 %v30334_v49, %v34496_v9  ;;  %v30401_v29 = vsub.f32 %v6269_v33, %v30377_v34  ;;  %v30403_v9 = vand.u32 4294901760, %v6272_v1  ;;  %v18651_v49 = vld [vmem:[%s26405_s17 + $0x168] sm:$0xff] }
 0x4c3   : > { %23375 = vmatmul.mubr.f32.gmra.mrb[14].mxu0 %v34498_v15  ;;  %v6540_v44 = vsub.f32 %v30354_v62, %v34503_v57  ;;  %v30410_v15 = vand.u32 4294901760, %v6275_v21  ;;  %v18650_v57 = vld [vmem:[%s26405_s17 + $0x158] sm:$0xff]  ;;  %v6560_v60 = vsub.f32 %v30381_v12, %v34508_v41  ;;  %v6287_v41 = vsel %vm352_vm0, %v18651_v49, 0  ;;  %v18652_v12 = vld [vmem:[%s26405_s17 + $0x170] sm:$0xff] }
 0x4c4   : > { %23377 = vmatprep.mubr.f32.mxu0 %v34499_v59  ;;  %34501 = vst [vmem:[#allocation44_spill] sm:$0xff] %v30401_v29  ;;  %34502 = vst [vmem:[#allocation179_spill] sm:$0xff] %v30403_v9  ;;  %v6531_v26 = vand.u32 4294901760, %v6530_v50  ;;  %v34505_v59 = vand.u32 4294901760, %v30362_v43  ;;  %v34510_v50 = vand.u32 4294901760, %v30389_v2 }
 0x4c5   : > { %21860 = vmatmul.mubr.f32.gmra.mrb[12].mxu1 %v6501_v31  ;;  %34504 = vst [vmem:[#allocation180_spill] sm:$0xff] %v30410_v15  ;;  %v6278_v31 = vsel %vm352_vm0, %v18648_v54, 0  ;;  %v6541_v54 = vand.u32 4294901760, %v6540_v44  ;;  %v34512_v44 = vand.u32 4294901760, %v34414_v5  ;;  %v6561_v5 = vand.u32 4294901760, %v6560_v60  ;;  %v18654_v60 = vld [vmem:[%s26405_s17 + $0x188] sm:$0xff] }
 0x4c6   : > { %21862 = vmatprep.mubr.f32.mxu1 %v6511_v16  ;;  %v6550_v33 = vsub.f32 %v30362_v43, %v34505_v59  ;;  %v30426_v59 = vsub.f32 %v6272_v1, %v30403_v9  ;;  %v30435_v27 = vand.u32 4294901760, %v6278_v31  ;;  %v6570_v1 = vsub.f32 %v30389_v2, %v34510_v50  ;;  %v18653_v2 = vld [vmem:[%s26405_s17 + $0x180] sm:$0xff] }
 0x4c7   : > { %23378 = vmatmul.mubr.f32.gmra.mrb[16].mxu0 %v34506_v51  ;;  %v30433_v51 = vsub.f32 %v6275_v21, %v30410_v15  ;;  %v30440_v16 = vand.u32 4294901760, %v6281_v37  ;;  %v34513_v21 = vand.u32 4294901760, %v34415_v0  ;;  %v34515_v43 = vand.u32 4294901760, %v30401_v29 }
 0x4c8   : > { %23380 = vmatprep.mubr.f32.mxu0 %v34507_v40  ;;  %34509 = vst [vmem:[#allocation196_spill] sm:$0xff] %v30435_v27  ;;  %v6551_v40 = vand.u32 4294901760, %v6550_v33 }
 0x4c9   : > { %21863 = vmatmul.mubr.f32.gmra.mrb[14].mxu1 %v6521_v13  ;;  %34511 = vst [vmem:[#allocation207_spill] sm:$0xff] %v30440_v16  ;;  %v6284_v13 = vsel %vm352_vm0, %v18650_v57, 0  ;;  %v6590_v50 = vsub.f32 %v30401_v29, %v34515_v43  ;;  %v6290_v43 = vsel %vm352_vm0, %v18652_v12, 0  ;;  %v34518_v57 = vand.u32 4294901760, %v34416_v36 }
 0x4ca   : > { %21865 = vmatprep.mubr.f32.mxu1 %v6531_v26  ;;  %v34514_v26 = vand.u32 4294901760, %v30398_v30  ;;  %v30461_v0 = vand.u32 4294901760, %v6284_v13 }
 0x4cb   : > { %23381 = vmatmul.mubr.f32.gmra.mrb[18].mxu0 %v34512_v44  ;;  %v30459_v44 = vsub.f32 %v6278_v31, %v30435_v27  ;;  %v34519_v31 = vand.u32 4294901760, %v34417_v35  ;;  %v6591_v29 = vand.u32 4294901760, %v6590_v50 }
 0x4cc   : > { %23383 = vmatprep.mubr.f32.mxu0 %v34513_v21  ;;  %v6580_v33 = vsub.f32 %v30398_v30, %v34514_v26  ;;  %34516 = vst [vmem:[#allocation210_spill] sm:$0xff] %v30461_v0  ;;  %v6571_v21 = vand.u32 4294901760, %v6570_v1  ;;  %v30464_v26 = vsub.f32 %v6281_v37, %v30440_v16  ;;  %v30466_v30 = vand.u32 4294901760, %v6287_v41 }
 0x4cd   : > { %21866 = vmatmul.mubr.f32.gmra.mrb[16].mxu1 %v6541_v54  ;;  %v6293_v54 = vsel %vm352_vm0, %v18653_v2, 0  ;;  %v34521_v1 = vand.u32 4294901760, %v30433_v51  ;;  %v33146_v36 = vand.u32 4294901760, %v30459_v44  ;;  %v30485_v2 = vand.u32 4294901760, %v6290_v43 }
 0x4ce   : > { %21868 = vmatprep.mubr.f32.mxu1 %v6551_v40  ;;  %34517 = vst [vmem:[#allocation169_spill] sm:$0xff] %v30466_v30  ;;  %v6581_v49 = vand.u32 4294901760, %v6580_v33  ;;  %v34520_v40 = vand.u32 4294901760, %v30426_v59  ;;  %v30489_v33 = vsub.f32 %v6287_v41, %v30466_v30  ;;  %v30491_v50 = vand.u32 4294901760, %v6293_v54 }
 0x4cf   : > { %23384 = vmatmul.mubr.f32.gmra.mrb[20].mxu0 %v34518_v57  ;;  %v6610_v12 = vsub.f32 %v30433_v51, %v34521_v1  ;;  %v30483_v57 = vsub.f32 %v6284_v13, %v30461_v0  ;;  %34522 = vst [vmem:[#allocation100_spill] sm:$0xff] %v30485_v2  ;;  %v30503_v41 = vsub.f32 %v6290_v43, %v30485_v2 }
 0x4d0   : > { %23386 = vmatprep.mubr.f32.mxu0 %v34519_v31  ;;  %v6600_v37 = vsub.f32 %v30426_v59, %v34520_v40  ;;  %34523 = vst [vmem:[#allocation104_spill] sm:$0xff] %v30491_v50  ;;  %v34524_v31 = vand.u32 4294901760, %v29782_v38  ;;  %v34525_v40 = vand.u32 4294901760, %v29789_v23  ;;  %v34527_v38 = vand.u32 4294901760, %v30464_v26 }
 0x4d1   : > { %21869 = vmatmul.mubr.f32.gmra.mrb[18].mxu1 %v6561_v5  ;;  %v6296_v5 = vsel %vm352_vm0, %v18654_v60, 0  ;;  %v33145_v1 = vand.u32 4294901760, %v30483_v57  ;;  %v6611_v60 = vand.u32 4294901760, %v6610_v12  ;;  %v33143_v12 = vand.u32 4294901760, %v30503_v41 }
 0x4d2   : > { %21871 = vmatprep.mubr.f32.mxu1 %v6571_v21  ;;  %v6601_v13 = vand.u32 4294901760, %v6600_v37  ;;  %v6620_v21 = vsub.f32 %v30459_v44, %v33146_v36  ;;  %v30505_v35 = vand.u32 4294901760, %v6296_v5  ;;  %v6630_v23 = vsub.f32 %v30464_v26, %v34527_v38  ;;  %v34555_v36 = vld [vmem:[#allocation203_spill] sm:$0xff] }
 0x4d3   : > { %23387 = vmatmul.mubr.f32.gmra.mrb[22].mxu0 %v34524_v31  ;;  %v33144_v37 = vand.u32 4294901760, %v30489_v33  ;;  %v34528_v31 = vand.u32 4294901760, %v29815_v3 }
 0x4d4   : > { %23389 = vmatprep.mubr.f32.mxu0 %v34525_v40  ;;  %34526 = vst [vmem:[#allocation183_spill] sm:$0xff] %v30505_v35  ;;  %v34529_v40 = vand.u32 4294901760, %v29820_v6  ;;  %v6621_v43 = vand.u32 4294901760, %v6620_v21  ;;  %v30523_v38 = vsub.f32 %v6296_v5, %v30505_v35  ;;  %v34532_v21 = vand.u32 4294901760, %v29845_v20 }
 0x4d5   : > { %21872 = vmatmul.mubr.f32.gmra.mrb[20].mxu1 %v6581_v49  ;;  %v30512_v49 = vsub.f32 %v6293_v54, %v30491_v50  ;;  %v6631_v54 = vand.u32 4294901760, %v6630_v23  ;;  %v6650_v3 = vsub.f32 %v30489_v33, %v33144_v37  ;;  %v6660_v5 = vsub.f32 %v30503_v41, %v33143_v12  ;;  %v34551_v12 = vld [vmem:[#allocation172_spill] sm:$0xff]  ;;  %v34553_v37 = vld [vmem:[#allocation53_spill] sm:$0xff] }
 0x4d6   : > { %21874 = vmatprep.mubr.f32.mxu1 %v6591_v29  ;;  %v6640_v29 = vsub.f32 %v30483_v57, %v33145_v1  ;;  %34530 = vst [vmem:[#allocation189_spill] sm:$0xff] %v30523_v38  ;;  %v34534_v20 = vand.u32 4294901760, %v29868_v4  ;;  %v34535_v4 = vand.u32 4294901760, %v29879_v24  ;;  %v34554_v1 = vld [vmem:[#allocation181_spill] sm:$0xff] }
 0x4d7   : > { %23390 = vmatmul.mubr.f32.gmra.mrb[24].mxu0 %v34528_v31  ;;  %v33142_v6 = vand.u32 4294901760, %v30512_v49  ;;  %v6651_v23 = vand.u32 4294901760, %v6650_v3  ;;  %v34536_v3 = vld [vmem:[#allocation256_spill] sm:$0xff] }
 0x4d8   : > { %23392 = vmatprep.mubr.f32.mxu0 %v34529_v40  ;;  %v6641_v31 = vand.u32 4294901760, %v6640_v29 }
 0x4d9   : > { %21875 = vmatmul.mubr.f32.gmra.mrb[22].mxu1 %v6601_v13  ;;  %v34531_v13 = vand.u32 4294901760, %v29839_v61  ;;  %v6670_v40 = vsub.f32 %v30512_v49, %v33142_v6  ;;  %v34533_v61 = vand.u32 4294901760, %v29859_v7  ;;  %v30555_v7 = vld [vmem:[%s32229_s1 + $0x108] sm:$0xff]  ;;  %v34550_v6 = vld [vmem:[#allocation199_spill] sm:$0xff] }
 0x4da   : > { %21877 = vmatprep.mubr.f32.mxu1 %v6611_v60  ;;  %v33141_v60 = vand.u32 4294901760, %v30523_v38 }
 0x4db   : > { %23393 = vmatmul.mubr.f32.gmra.mrb[26].mxu0 %v34531_v13  ;;  %v6671_v13 = vand.u32 4294901760, %v6670_v40  ;;  %v34538_v40 = vld [vmem:[#allocation145_spill] sm:$0xff] }
 0x4dc   : > { %23395 = vmatprep.mubr.f32.mxu0 %v34532_v21  ;;  %v6680_v29 = vsub.f32 %v30523_v38, %v33141_v60  ;;  %v34548_v60 = vld [vmem:[#allocation252_spill] sm:$0xff] }
 0x4dd   : > { %21878 = vmatmul.mubr.f32.gmra.mrb[24].mxu1 %v6621_v43  ;;  %v6661_v43 = vand.u32 4294901760, %v6660_v5  ;;  %v33147_v5 = vand.u32 4294901760, %v30555_v7 }
 0x4de   : > { %21880 = vmatprep.mubr.f32.mxu1 %v6631_v54  ;;  %v30550_v54 = vld [vmem:[%s32229_s1 + $0x100] sm:$0xff]  ;;  %v6681_v21 = vand.u32 4294901760, %v6680_v29 }
 0x4df   : > { %23396 = vmatmul.mubr.f32.gmra.mrb[28].mxu0 %v34533_v61  ;;  %v34540_v61 = vld [vmem:[#allocation150_spill] sm:$0xff]  ;;  %v34544_v29 = vld [vmem:[#allocation157_spill] sm:$0xff] }
 0x4e0   : > { %23398 = vmatprep.mubr.f32.mxu0 %v34534_v20  ;;  %v34541_v20 = vld [vmem:[#allocation152_spill] sm:$0xff] }
 0x4e1   : > { %21881 = vmatmul.mubr.f32.gmra.mrb[26].mxu1 %v6641_v31  ;;  %v33148_v31 = vand.u32 4294901760, %v30550_v54 }
 0x4e2   : > { %21883 = vmatprep.mubr.f32.mxu1 %v6651_v23  ;;  %v34537_v23 = vld [vmem:[#allocation257_spill] sm:$0xff] }
 0x4e3   : > { %23399 = vmatmul.mubr.f32.gmra.mrb[30].mxu0 %v34535_v4  ;;  %v30570_v24 = vpack.c.bf16 %v33147_v5, %v33148_v31  ;;  %v34546_v4 = vld [vmem:[#allocation160_spill] sm:$0xff]  ;;  %v34556_v5 = vld [vmem:[#allocation185_spill] sm:$0xff] }
 0x4e4   : > { %23409 = vmatprep.mubr.f32.mxu0 %v34536_v3  ;;  %v34558_v31 = vld [vmem:[#allocation193_spill] sm:$0xff] }
 0x4e5   : > { %21884 = vmatmul.mubr.f32.gmra.mrb[28].mxu1 %v6661_v43  ;;  %34539 = vst [vmem:[#allocation198_spill] sm:$0xff] %v30570_v24  ;;  %v34542_v43 = vld [vmem:[#allocation227_spill] sm:$0xff] }
 0x4e6   : > { %21886 = vmatprep.mubr.f32.mxu1 %v6671_v13  ;;  %v34545_v13 = vld [vmem:[#allocation219_spill] sm:$0xff] }
 0x4e7   : > { %23410 = vmatmul.mubr.f32.vlgmr.msra.gmra.mrb[0].mxu0 %v34537_v23 }
 0x4e8   : > { %23412 = vmatprep.mubr.f32.mxu0 %v34538_v40  ;;  %24228 = vmatpush3.bf16.msra.mxu0 %v34459_v45  ;;  %v34543_v45 = vld [vmem:[#allocation238_spill] sm:$0xff] }
 0x4e9   : > { %21887 = vmatmul.mubr.f32.gmra.mrb[30].mxu1 %v6681_v21  ;;  %24230 = vmatprep.subr.bf16.mxu0 %v34394_v14  ;;  %v34547_v21 = vld [vmem:[#allocation246_spill] sm:$0xff] }
 0x4ea   : > { %21897 = vmatprep.mubr.f32.mxu1 %v30104_v39 }
 0x4eb   : > { %23413 = vmatmul.mubr.f32.gmra.mrb[2].mxu0 %v34540_v61 }
 0x4ec   : > { %23415 = vmatprep.mubr.f32.mxu0 %v34541_v20  ;;  %24232 = vmatpush3.bf16.msra.mxu0 %v34394_v14  ;;  %v34549_v14 = vld [vmem:[#allocation134_spill] sm:$0xff] }
 0x4ed   : > { %21898 = vmatmul.mubr.f32.vlgmr.msra.gmra.mrb[0].mxu1 %v34542_v43  ;;  %24234 = vmatprep.subr.bf16.mxu0 %v30570_v24  ;;  %v34582_v43 = vld [vmem:[#allocation195_spill] sm:$0xff] }
 0x4ee   : > { %24012 = vmatpush3.bf16.msra.mxu1 %v30037_v47  ;;  %21900 = vmatprep.mubr.f32.mxu1 %v34543_v45  ;;  %v34552_v47 = vld [vmem:[#allocation197_spill] sm:$0xff] }
 0x4ef   : > { %23416 = vmatmul.mubr.f32.gmra.mrb[4].mxu0 %v34544_v29  ;;  %24014 = vmatprep.subr.bf16.mxu1 %v34545_v13 }
 0x4f0   : > { %23418 = vmatprep.mubr.f32.mxu0 %v34546_v4 }
 0x4f1   : > { %21901 = vmatmul.mubr.f32.gmra.mrb[2].mxu1 %v34547_v21 }
 0x4f2   : > { %21903 = vmatprep.mubr.f32.mxu1 %v34548_v60  ;;  %24016 = vmatpush3.bf16.msra.mxu1 %v34545_v13  ;;  %v34557_v13 = vld [vmem:[#allocation191_spill] sm:$0xff] }
 0x4f3   : > { %23419 = vmatmul.mubr.f32.gmra.mrb[6].mxu0 %v34549_v14  ;;  %24018 = vmatprep.subr.bf16.mxu1 %v34550_v6 }
 0x4f4   : > { %23421 = vmatprep.mubr.f32.mxu0 %v34551_v12 }
 0x4f5   : > { %21904 = vmatmul.mubr.f32.gmra.mrb[4].mxu1 %v34552_v47  ;;  %v34559_v47 = vld [vmem:[#allocation137_spill] sm:$0xff] }
 0x4f6   : > { %21906 = vmatprep.mubr.f32.mxu1 %v30165_v52  ;;  %v34560_v52 = vld [vmem:[#allocation236_spill] sm:$0xff] }
 0x4f7   : > { %23422 = vmatmul.mubr.f32.gmra.mrb[8].mxu0 %v34553_v37 }
 0x4f8   : > { %23424 = vmatprep.mubr.f32.mxu0 %v34554_v1 }
 0x4f9   : > { %21907 = vmatmul.mubr.f32.gmra.mrb[6].mxu1 %v34555_v36  ;;  %v34561_v36 = vld [vmem:[#allocation239_spill] sm:$0xff] }
 0x4fa   : > { %21909 = vmatprep.mubr.f32.mxu1 %v30201_v58  ;;  %v34562_v58 = vld [vmem:[#allocation247_spill] sm:$0xff] }
 0x4fb   : > { %23425 = vmatmul.mubr.f32.gmra.mrb[10].mxu0 %v34556_v5 }
 0x4fc   : > { %23427 = vmatprep.mubr.f32.mxu0 %v34557_v13 }
 0x4fd   : > { %21910 = vmatmul.mubr.f32.gmra.mrb[8].mxu1 %v30220_v11  ;;  %v34563_v11 = vld [vmem:[#allocation144_spill] sm:$0xff] }
 0x4fe   : > { %21912 = vmatprep.mubr.f32.mxu1 %v30222_v17  ;;  %v34564_v17 = vld [vmem:[#allocation147_spill] sm:$0xff] }
 0x4ff   : > { %23428 = vmatmul.mubr.f32.gmra.mrb[12].mxu0 %v34558_v31 }
 0x500   : > { %23430 = vmatprep.mubr.f32.mxu0 %v34559_v47 }
 0x501   : > { %21913 = vmatmul.mubr.f32.gmra.mrb[10].mxu1 %v30243_v25  ;;  %v34565_v25 = vld [vmem:[#allocation151_spill] sm:$0xff] }
 0x502   : > { %21915 = vmatprep.mubr.f32.mxu1 %v30259_v48  ;;  %v34566_v48 = vld [vmem:[#allocation155_spill] sm:$0xff] }
 0x503   : > { %23431 = vmatmul.mubr.f32.gmra.mrb[14].mxu0 %v34560_v52 }
 0x504   : > { %23433 = vmatprep.mubr.f32.mxu0 %v34561_v36 }
 0x505   : > { %21916 = vmatmul.mubr.f32.gmra.mrb[12].mxu1 %v30269_v18  ;;  %v34567_v18 = vld [vmem:[#allocation139_spill] sm:$0xff] }
 0x506   : > { %21918 = vmatprep.mubr.f32.mxu1 %v30271_v53  ;;  %v34568_v53 = vld [vmem:[#allocation171_spill] sm:$0xff] }
 0x507   : > { %23434 = vmatmul.mubr.f32.gmra.mrb[16].mxu0 %v34562_v58 }
 0x508   : > { %23436 = vmatprep.mubr.f32.mxu0 %v34563_v11 }
 0x509   : > { %21919 = vmatmul.mubr.f32.gmra.mrb[14].mxu1 %v30300_v8  ;;  %v34569_v8 = vld [vmem:[#allocation7_spill] sm:$0xff] }
 0x50a   : > { %21921 = vmatprep.mubr.f32.mxu1 %v30310_v10  ;;  %v34570_v10 = vld [vmem:[#allocation57_spill] sm:$0xff] }
 0x50b   : > { %23437 = vmatmul.mubr.f32.gmra.mrb[18].mxu0 %v34564_v17 }
 0x50c   : > { %23439 = vmatprep.mubr.f32.mxu0 %v34565_v25 }
 0x50d   : > { %21922 = vmatmul.mubr.f32.gmra.mrb[16].mxu1 %v30328_v63  ;;  %v34571_v63 = vld [vmem:[#allocation73_spill] sm:$0xff] }
 0x50e   : > { %21924 = vmatprep.mubr.f32.mxu1 %v30336_v56  ;;  %v34572_v56 = vand.u32 4294901760, %v30550_v54 }
 0x50f   : > { %23440 = vmatmul.mubr.f32.gmra.mrb[20].mxu0 %v34566_v48 }
 0x510   : > { %23442 = vmatprep.mubr.f32.mxu0 %v34567_v18 }
 0x511   : > { %21925 = vmatmul.mubr.f32.gmra.mrb[18].mxu1 %v30356_v55  ;;  %v30629_v55 = vsub.f32 %v30550_v54, %v34572_v56  ;;  %v18837_v56 = vld [vmem:[%s32229_s1 + $0x110] sm:$0xff]  ;;  %v34578_v54 = vld [vmem:[#allocation186_spill] sm:$0xff] }
 0x512   : > { %21927 = vmatprep.mubr.f32.mxu1 %v30364_v28  ;;  %v34574_v28 = vand.u32 4294901760, %v30555_v7 }
 0x513   : > { %23443 = vmatmul.mubr.f32.gmra.mrb[22].mxu0 %v34568_v53  ;;  %34573 = vst [vmem:[#allocation202_spill] sm:$0xff] %v30629_v55  ;;  %v34580_v21 = vand.u32 4294901760, %v30629_v55 }
 0x514   : > { %23445 = vmatprep.mubr.f32.mxu0 %v34569_v8  ;;  %v30634_v60 = vsub.f32 %v30555_v7, %v34574_v28  ;;  %v18838_v28 = vld [vmem:[%s32229_s1 + $0x118] sm:$0xff]  ;;  %v34579_v7 = vld [vmem:[#allocation187_spill] sm:$0xff] }
 0x515   : > { %21928 = vmatmul.mubr.f32.gmra.mrb[20].mxu1 %v30375_v32  ;;  %v34576_v32 = vld [vmem:[#allocation9_spill] sm:$0xff] }
 0x516   : > { %21930 = vmatprep.mubr.f32.mxu1 %v30377_v34  ;;  %34575 = vst [vmem:[#allocation216_spill] sm:$0xff] %v30634_v60  ;;  %v34577_v34 = vld [vmem:[#allocation184_spill] sm:$0xff] }
 0x517   : > { %23446 = vmatmul.mubr.f32.gmra.mrb[24].mxu0 %v34570_v10 }
 0x518   : > { %23448 = vmatprep.mubr.f32.mxu0 %v34571_v63 }
 0x519   : > { %21931 = vmatmul.mubr.f32.gmra.mrb[22].mxu1 %v30403_v9  ;;  %v16224_v9 = vand.u32 4294901760, %v18838_v28 }
 0x51a   : > { %21933 = vmatprep.mubr.f32.mxu1 %v30410_v15  ;;  %v34581_v15 = vand.u32 4294901760, %v30634_v60 }
 0x51b   : > { %23449 = vmatmul.mubr.f32.gmra.mrb[26].mxu0 %v34576_v32 }
 0x51c   : > { %23451 = vmatprep.mubr.f32.mxu0 %v34577_v34  ;;  %v16614_v45 = vsub.f32 %v30634_v60, %v34581_v15 }
 0x51d   : > { %21934 = vmatmul.mubr.f32.gmra.mrb[24].mxu1 %v30435_v27  ;;  %v16221_v27 = vand.u32 4294901760, %v18837_v56 }
 0x51e   : > { %21936 = vmatprep.mubr.f32.mxu1 %v30440_v16  ;;  %v16607_v16 = vsub.f32 %v30629_v55, %v34580_v21  ;;  %v16615_v38 = vand.u32 4294901760, %v16614_v45  ;;  %v34590_v21 = vld [vmem:[#allocation208_spill] sm:$0xff] }
 0x51f   : > { %23452 = vmatmul.mubr.f32.gmra.mrb[28].mxu0 %v34578_v54  ;;  %v30662_v39 = vpack.c.bf16 %v16224_v9, %v16221_v27 }
 0x520   : > { %23454 = vmatprep.mubr.f32.mxu0 %v34579_v7 }
 0x521   : > { %21937 = vmatmul.mubr.f32.gmra.mrb[26].mxu1 %v30461_v0  ;;  %34583 = vst [vmem:[#allocation159_spill] sm:$0xff] %v30662_v39  ;;  %v16608_v0 = vand.u32 4294901760, %v16607_v16  ;;  %v30675_v16 = vpack.c.bf16 %v30634_v60, %v30629_v55 }
 0x522   : > { %21939 = vmatprep.mubr.f32.mxu1 %v30466_v30  ;;  %v18810_v30 = vld [vmem:[%s26405_s17 + $0x82] sm:$0xff] }
 0x523   : > { %23455 = vmatmul.mubr.f32.gmra.mrb[30].mxu0 %v34582_v43  ;;  %v30670_v15 = vpack.c.bf16 %v16615_v38, %v16608_v0  ;;  %v34586_v0 = vld [vmem:[#allocation249_spill] sm:$0xff]  ;;  %v34587_v38 = vld [vmem:[#allocation214_spill] sm:$0xff] }
 0x524   : > { %23465 = vmatprep.mubr.f32.mxu0 %v34536_v3  ;;  %v34584_v3 = vld [vmem:[#allocation235_spill] sm:$0xff] }
 0x525   : > { %21940 = vmatmul.mubr.f32.gmra.mrb[28].mxu1 %v30485_v2  ;;  %v18809_v2 = vld [vmem:[%s26405_s17 + $0x7a] sm:$0xff] }
 0x526   : > { %21942 = vmatprep.mubr.f32.mxu1 %v30491_v50 }
 0x527   : > { %23466 = vmatmul.mubr.f32.vlgmr.msra.gmra.mrb[0].mxu0 %v34537_v23  ;;  %v34585_v23 = vld [vmem:[#allocation242_spill] sm:$0xff] }
 0x528   : > { %23468 = vmatprep.mubr.f32.mxu0 %v34538_v40  ;;  %24236 = vmatpush3.bf16.msra.mxu0 %v30570_v24  ;;  %v34588_v40 = vld [vmem:[#allocation206_spill] sm:$0xff] }
 0x529   : > { %21943 = vmatmul.mubr.f32.gmra.mrb[30].mxu1 %v30505_v35  ;;  %24238 = vmatprep.subr.bf16.mxu0 %v30662_v39  ;;  %v34589_v45 = vand.u32 4294901760, %v34588_v40  ;;  %v18803_v40 = vld [vmem:[%s26405_s17 + $0x32] sm:$0xff] }
 0x52a   : > { %21953 = vmatprep.mubr.f32.mxu1 %v34584_v3  ;;  %v34613_v35 = vld [vmem:[#allocation44_spill] sm:$0xff] }
 0x52b   : > { %23469 = vmatmul.mubr.f32.gmra.mrb[2].mxu0 %v34540_v61  ;;  %v34591_v61 = vand.u32 4294901760, %v34590_v21  ;;  %v18807_v21 = vld [vmem:[%s26405_s17 + $0x62] sm:$0xff] }
 0x52c   : > { %23471 = vmatprep.mubr.f32.mxu0 %v34541_v20  ;;  %24240 = vmatpush3.bf16.msra.mxu0 %v30662_v39  ;;  %v34592_v20 = vld [vmem:[#allocation254_spill] sm:$0xff]  ;;  %v34612_v39 = vld [vmem:[#allocation148_spill] sm:$0xff] }
 0x52d   : > { %21954 = vmatmul.mubr.f32.vlgmr.msra.gmra.mrb[0].mxu1 %v34585_v23  ;;  %24242 = vmatprep.subr.bf16.mxu0 %v30670_v15  ;;  %v30690_v60 = vpack.c.bf16 %v34591_v61, %v34589_v45  ;;  %v34607_v45 = vld [vmem:[#allocation96_spill] sm:$0xff]  ;;  %v34608_v61 = vld [vmem:[#allocation85_spill] sm:$0xff] }
 0x52e   : > { %24020 = vmatpush3.bf16.msra.mxu1 %v34550_v6  ;;  %21956 = vmatprep.mubr.f32.mxu1 %v34586_v0 }
 0x52f   : > { %23472 = vmatmul.mubr.f32.gmra.mrb[4].mxu0 %v34544_v29  ;;  %24022 = vmatprep.subr.bf16.mxu1 %v34587_v38  ;;  %v34593_v29 = vld [vmem:[#allocation222_spill] sm:$0xff] }
 0x530   : > { %23474 = vmatprep.mubr.f32.mxu0 %v34546_v4  ;;  %v34594_v4 = vld [vmem:[#allocation229_spill] sm:$0xff] }
 0x531   : > { %21957 = vmatmul.mubr.f32.gmra.mrb[2].mxu1 %v34592_v20 }
 0x532   : > { %21959 = vmatprep.mubr.f32.mxu1 %v30161_v42  ;;  %24024 = vmatpush3.bf16.msra.mxu1 %v34587_v38 }
 0x533   : > { %23475 = vmatmul.mubr.f32.gmra.mrb[6].mxu0 %v34549_v14  ;;  %24026 = vmatprep.subr.bf16.mxu1 %v30690_v60  ;;  %v34599_v14 = vld [vmem:[#allocation149_spill] sm:$0xff] }
 0x534   : > { %23477 = vmatprep.mubr.f32.mxu0 %v34551_v12  ;;  %v34595_v12 = vld [vmem:[#allocation232_spill] sm:$0xff] }
 0x535   : > { %21960 = vmatmul.mubr.f32.gmra.mrb[4].mxu1 %v30184_v46 }
 0x536   : > { %21962 = vmatprep.mubr.f32.mxu1 %v30199_v22 }
 0x537   : > { %23478 = vmatmul.mubr.f32.gmra.mrb[8].mxu0 %v34553_v37  ;;  %v34596_v37 = vld [vmem:[#allocation240_spill] sm:$0xff] }
 0x538   : > { %23480 = vmatprep.mubr.f32.mxu0 %v34554_v1  ;;  %v34597_v1 = vld [vmem:[#allocation143_spill] sm:$0xff] }
 0x539   : > { %21963 = vmatmul.mubr.f32.gmra.mrb[6].mxu1 %v30216_v19 }
 0x53a   : > { %21965 = vmatprep.mubr.f32.mxu1 %v34593_v29 }
 0x53b   : > { %23481 = vmatmul.mubr.f32.gmra.mrb[10].mxu0 %v34556_v5  ;;  %v34598_v5 = vld [vmem:[#allocation108_spill] sm:$0xff] }
 0x53c   : > { %23483 = vmatprep.mubr.f32.mxu0 %v34557_v13  ;;  %v34602_v13 = vld [vmem:[#allocation170_spill] sm:$0xff] }
 0x53d   : > { %21966 = vmatmul.mubr.f32.gmra.mrb[8].mxu1 %v34594_v4 }
 0x53e   : > { %21968 = vmatprep.mubr.f32.mxu1 %v34595_v12 }
 0x53f   : > { %23484 = vmatmul.mubr.f32.gmra.mrb[12].mxu0 %v34558_v31  ;;  %v30719_v31 = vsub.f32 %v18837_v56, %v16221_v27  ;;  %v34605_v27 = vld [vmem:[#allocation176_spill] sm:$0xff] }
 0x540   : > { %23486 = vmatprep.mubr.f32.mxu0 %v34559_v47  ;;  %v30721_v47 = vsub.f32 %v18838_v28, %v16224_v9  ;;  %v18805_v9 = vld [vmem:[%s26405_s17 + $0x4a] sm:$0xff] }
 0x541   : > { %21969 = vmatmul.mubr.f32.gmra.mrb[10].mxu1 %v34596_v37  ;;  %34600 = vst [vmem:[#allocation161_spill] sm:$0xff] %v30719_v31  ;;  %v34624_v38 = vand.u32 4294901760, %v30719_v31 }
 0x542   : > { %21971 = vmatprep.mubr.f32.mxu1 %v34597_v1  ;;  %34601 = vst [vmem:[#allocation255_spill] sm:$0xff] %v30721_v47 }
 0x543   : > { %23487 = vmatmul.mubr.f32.gmra.mrb[14].mxu0 %v34560_v52  ;;  %v34603_v52 = vld [vmem:[#allocation154_spill] sm:$0xff] }
 0x544   : > { %23489 = vmatprep.mubr.f32.mxu0 %v34561_v36  ;;  %v30728_v36 = vpack.c.bf16 %v30721_v47, %v30719_v31 }
 0x545   : > { %21972 = vmatmul.mubr.f32.gmra.mrb[12].mxu1 %v34598_v5 }
 0x546   : > { %21974 = vmatprep.mubr.f32.mxu1 %v34599_v14  ;;  %34604 = vst [vmem:[#allocation162_spill] sm:$0xff] %v30728_v36 }
 0x547   : > { %23490 = vmatmul.mubr.f32.gmra.mrb[16].mxu0 %v34562_v58  ;;  %v16119_v58 = vsel %vm352_vm0, %v18803_v40, 0 }
 0x548   : > { %23492 = vmatprep.mubr.f32.mxu0 %v34563_v11  ;;  %v18804_v11 = vld [vmem:[%s26405_s17 + $0x3a] sm:$0xff]  ;;  %v30738_v56 = vand.u32 4294901760, %v16119_v58 }
 0x549   : > { %21975 = vmatmul.mubr.f32.gmra.mrb[14].mxu1 %v34602_v13  ;;  %v16122_v28 = vsel %vm352_vm0, %v18804_v11, 0  ;;  %v18808_v11 = vld [vmem:[%s26405_s17 + $0x6a] sm:$0xff] }
 0x54a   : > { %21977 = vmatprep.mubr.f32.mxu1 %v34603_v52  ;;  %34606 = vst [vmem:[#allocation165_spill] sm:$0xff] %v30738_v56  ;;  %v30747_v40 = vand.u32 4294901760, %v16122_v28 }
 0x54b   : > { %23493 = vmatmul.mubr.f32.gmra.mrb[18].mxu0 %v34564_v17  ;;  %v16125_v17 = vsel %vm352_vm0, %v18805_v9, 0  ;;  %v16131_v9 = vsel %vm352_vm0, %v18807_v21, 0 }
 0x54c   : > { %23495 = vmatprep.mubr.f32.mxu0 %v34565_v25  ;;  %v18806_v25 = vld [vmem:[%s26405_s17 + $0x52] sm:$0xff]  ;;  %34609 = vst [vmem:[#allocation22_spill] sm:$0xff] %v30747_v40  ;;  %v30753_v55 = vand.u32 4294901760, %v16125_v17  ;;  %v30762_v50 = vsub.f32 %v16122_v28, %v30747_v40  ;;  %v30773_v21 = vand.u32 4294901760, %v16131_v9 }
 0x54d   : > { %21978 = vmatmul.mubr.f32.gmra.mrb[16].mxu1 %v30354_v62 }
 0x54e   : > { %21980 = vmatprep.mubr.f32.mxu1 %v34605_v27  ;;  %34611 = vst [vmem:[#allocation27_spill] sm:$0xff] %v30753_v55  ;;  %34614 = vst [vmem:[#allocation30_spill] sm:$0xff] %v30762_v50  ;;  %v30795_v36 = vsub.f32 %v16131_v9, %v30773_v21  ;;  %v16621_v9 = vsub.f32 %v30719_v31, %v34624_v38  ;;  %v18814_v31 = vld [vmem:[%s26405_s17 + $0xb2] sm:$0xff] }
 0x54f   : > { %23496 = vmatmul.mubr.f32.gmra.mrb[20].mxu0 %v34566_v48  ;;  %v30751_v48 = vsub.f32 %v16119_v58, %v30738_v56  ;;  %v16134_v58 = vsel %vm352_vm0, %v18808_v11, 0  ;;  %34617 = vst [vmem:[#allocation61_spill] sm:$0xff] %v30773_v21  ;;  %v16137_v11 = vsel %vm352_vm0, %v18809_v2, 0 }
 0x550   : > { %23498 = vmatprep.mubr.f32.mxu0 %v34567_v18  ;;  %v16128_v18 = vsel %vm352_vm0, %v18806_v25, 0  ;;  %v30778_v28 = vand.u32 4294901760, %v16134_v58  ;;  %34621 = vst [vmem:[#allocation138_spill] sm:$0xff] %v30795_v36 }
 0x551   : > { %21981 = vmatmul.mubr.f32.gmra.mrb[18].mxu1 %v34607_v45  ;;  %34610 = vst [vmem:[#allocation156_spill] sm:$0xff] %v30751_v48  ;;  %v34620_v24 = vand.u32 4294901760, %v30751_v48 }
 0x552   : > { %21983 = vmatprep.mubr.f32.mxu1 %v34608_v61  ;;  %34618 = vst [vmem:[#allocation70_spill] sm:$0xff] %v30778_v28 }
 0x553   : > { %23499 = vmatmul.mubr.f32.gmra.mrb[22].mxu0 %v34568_v53  ;;  %v30764_v53 = vand.u32 4294901760, %v16128_v18  ;;  %v16286_v2 = vsub.f32 %v30751_v48, %v34620_v24  ;;  %v18813_v24 = vld [vmem:[%s26405_s17 + $0xaa] sm:$0xff] }
 0x554   : > { %23501 = vmatprep.mubr.f32.mxu0 %v34569_v8  ;;  %v30771_v8 = vsub.f32 %v16125_v17, %v30753_v55  ;;  %v30799_v17 = vand.u32 4294901760, %v16137_v11 }
 0x555   : > { %21984 = vmatmul.mubr.f32.gmra.mrb[20].mxu1 %v34612_v39  ;;  %34615 = vst [vmem:[#allocation173_spill] sm:$0xff] %v30764_v53  ;;  %v30786_v25 = vsub.f32 %v16128_v18, %v30764_v53  ;;  %v30803_v18 = vsub.f32 %v16134_v58, %v30778_v28  ;;  %v18812_v53 = vld [vmem:[%s26405_s17 + $0x9a] sm:$0xff]  ;;  %v16287_v58 = vand.u32 4294901760, %v16286_v2  ;;  %v16149_v2 = vsel %vm352_vm0, %v18813_v24, 0 }
 0x556   : > { %21986 = vmatprep.mubr.f32.mxu1 %v34613_v35  ;;  %34616 = vst [vmem:[#allocation175_spill] sm:$0xff] %v30771_v8  ;;  %34622 = vst [vmem:[#allocation135_spill] sm:$0xff] %v30799_v17  ;;  %v34628_v55 = vand.u32 4294901760, %v30771_v8  ;;  %v30828_v48 = vsub.f32 %v16137_v11, %v30799_v17  ;;  %v34635_v17 = vand.u32 4294901760, %v30795_v36 }
 0x557   : > { %23502 = vmatmul.mubr.f32.gmra.mrb[24].mxu0 %v34570_v10  ;;  %34619 = vst [vmem:[#allocation76_spill] sm:$0xff] %v30786_v25  ;;  %v16140_v10 = vsel %vm352_vm0, %v18810_v30, 0  ;;  %34623 = vst [vmem:[#allocation92_spill] sm:$0xff] %v30803_v18  ;;  %v34625_v30 = vand.u32 4294901760, %v30721_v47 }
 0x558   : > { %23504 = vmatprep.mubr.f32.mxu0 %v34571_v63  ;;  %v18811_v63 = vld [vmem:[%s26405_s17 + $0x92] sm:$0xff]  ;;  %v30816_v21 = vand.u32 4294901760, %v16140_v10  ;;  %v16306_v38 = vsub.f32 %v30771_v8, %v34628_v55  ;;  %34629 = vst [vmem:[#allocation26_spill] sm:$0xff] %v30828_v48  ;;  %v16326_v40 = vsub.f32 %v30795_v36, %v34635_v17 }
 0x559   : > { %21987 = vmatmul.mubr.f32.gmra.mrb[22].mxu1 %v30426_v59 }
 0x55a   : > { %21989 = vmatprep.mubr.f32.mxu1 %v30433_v51  ;;  %34626 = vst [vmem:[#allocation167_spill] sm:$0xff] %v30816_v21 }
 0x55b   : > { %23505 = vmatmul.mubr.f32.gmra.mrb[26].mxu0 %v34576_v32  ;;  %v16143_v32 = vsel %vm352_vm0, %v18811_v63, 0  ;;  %v34627_v63 = vand.u32 4294901760, %v30762_v50 }
 0x55c   : > { %23507 = vmatprep.mubr.f32.mxu0 %v34577_v34  ;;  %v16628_v34 = vsub.f32 %v30721_v47, %v34625_v30  ;;  %v30830_v47 = vand.u32 4294901760, %v16143_v32  ;;  %v30842_v30 = vsub.f32 %v16140_v10, %v30816_v21 }
 0x55d   : > { %21990 = vmatmul.mubr.f32.gmra.mrb[24].mxu1 %v30459_v44  ;;  %v16296_v28 = vsub.f32 %v30762_v50, %v34627_v63  ;;  %v16622_v50 = vand.u32 4294901760, %v16621_v9  ;;  %v30848_v63 = vand.u32 4294901760, %v16149_v2  ;;  %v16152_v9 = vsel %vm352_vm0, %v18814_v31, 0 }
 0x55e   : > { %21992 = vmatprep.mubr.f32.mxu1 %v30464_v26  ;;  %34630 = vst [vmem:[#allocation188_spill] sm:$0xff] %v30830_v47  ;;  %v16629_v55 = vand.u32 4294901760, %v16628_v34  ;;  %34632 = vst [vmem:[#allocation192_spill] sm:$0xff] %v30842_v30  ;;  %v16307_v34 = vand.u32 4294901760, %v16306_v38  ;;  %v30856_v10 = vsub.f32 %v16143_v32, %v30830_v47  ;;  %v18818_v38 = vld [vmem:[%s26405_s17 + $0xe2] sm:$0xff] }
 0x55f   : > { %23508 = vmatmul.mubr.f32.gmra.mrb[28].mxu0 %v34578_v54  ;;  %v16146_v54 = vsel %vm352_vm0, %v18812_v53, 0  ;;  %v18815_v53 = vld [vmem:[%s26405_s17 + $0xc2] sm:$0xff]  ;;  %v16297_v24 = vand.u32 4294901760, %v16296_v28  ;;  %34634 = vst [vmem:[#allocation209_spill] sm:$0xff] %v30848_v63  ;;  %v34636_v28 = vand.u32 4294901760, %v30803_v18  ;;  %v30873_v36 = vsub.f32 %v16149_v2, %v30848_v63 }
 0x560   : > { %23510 = vmatprep.mubr.f32.mxu0 %v34579_v7  ;;  %v34631_v7 = vand.u32 4294901760, %v30786_v25  ;;  %v30846_v8 = vand.u32 4294901760, %v16146_v54  ;;  %v16155_v31 = vsel %vm352_vm0, %v18815_v53, 0  ;;  %v34640_v2 = vld [vmem:[#allocation189_spill] sm:$0xff] }
 0x561   : > { %21993 = vmatmul.mubr.f32.gmra.mrb[26].mxu1 %v30483_v57  ;;  %v16336_v21 = vsub.f32 %v30803_v18, %v34636_v28 }
 0x562   : > { %21995 = vmatprep.mubr.f32.mxu1 %v30489_v33  ;;  %v16316_v11 = vsub.f32 %v30786_v25, %v34631_v7  ;;  %34633 = vst [vmem:[#allocation200_spill] sm:$0xff] %v30846_v8  ;;  %v18816_v25 = vld [vmem:[%s26405_s17 + $0xca] sm:$0xff]  ;;  %v30867_v7 = vand.u32 4294901760, %v16152_v9  ;;  %v30870_v32 = vsub.f32 %v16146_v54, %v30846_v8  ;;  %v30882_v54 = vand.u32 4294901760, %v16155_v31 }
 0x563   : > { %23511 = vmatmul.mubr.f32.gmra.mrb[30].mxu0 %v34582_v43  ;;  %v18817_v43 = vld [vmem:[%s26405_s17 + $0xda] sm:$0xff]  ;;  %v16158_v28 = vsel %vm352_vm0, %v18816_v25, 0  ;;  %v16337_v18 = vand.u32 4294901760, %v16336_v21  ;;  %v34641_v25 = vand.u32 4294901760, %v34584_v3  ;;  %v16164_v3 = vsel %vm352_vm0, %v18818_v38, 0  ;;  %v34647_v8 = vld [vmem:[#allocation218_spill] sm:$0xff] }
 0x564   : > { %23521 = vmatprep.mubr.f32.mxu0 %v16287_v58  ;;  %v24245_v58 = vpack.c.bf16 %v16629_v55, %v16622_v50  ;;  %v16317_v17 = vand.u32 4294901760, %v16316_v11  ;;  %34637 = vst [vmem:[#allocation211_spill] sm:$0xff] %v30867_v7  ;;  %v16161_v53 = vsel %vm352_vm0, %v18817_v43, 0  ;;  %v16327_v50 = vand.u32 4294901760, %v16326_v40  ;;  %34639 = vst [vmem:[#allocation43_spill] sm:$0xff] %v30882_v54 }
 0x565   : > { %21996 = vmatmul.mubr.f32.gmra.mrb[28].mxu1 %v30503_v41  ;;  %v34638_v55 = vand.u32 4294901760, %v30828_v48  ;;  %v30892_v40 = vsub.f32 %v16152_v9, %v30867_v7  ;;  %v30894_v43 = vand.u32 4294901760, %v16158_v28  ;;  %v33252_v21 = vand.u32 4294901760, %v30870_v32 }
 0x566   : > { %21998 = vmatprep.mubr.f32.mxu1 %v30512_v49  ;;  %v34649_v7 = vand.u32 4294901760, %v30856_v10 }
 0x567   : > { %23522 = vmatmul.mubr.f32.vlgmr.msra.gmra.mrb[0].mxu0 %v16297_v24  ;;  %v16346_v11 = vsub.f32 %v30828_v48, %v34638_v55  ;;  %34643 = vst [vmem:[#allocation19_spill] sm:$0xff] %v30894_v43  ;;  %v30896_v55 = vand.u32 4294901760, %v16161_v53  ;;  %v18819_v24 = vld [vmem:[%s26405_s17 + $0xf2] sm:$0xff]  ;;  %v34651_v48 = vand.u32 4294901760, %v34585_v23  ;;  %v30927_v23 = vand.u32 4294901760, %v16164_v3 }
 0x568   : > { %23524 = vmatprep.mubr.f32.mxu0 %v16307_v34  ;;  %24244 = vmatpush3.bf16.msra.mxu0 %v30670_v15  ;;  %v34642_v34 = vand.u32 4294901760, %v30842_v30  ;;  %v16366_v47 = vsub.f32 %v30856_v10, %v34649_v7  ;;  %v16167_v38 = vsel %vm352_vm0, %v18819_v24, 0  ;;  %v30922_v7 = vsub.f32 %v16158_v28, %v30894_v43 }
 0x569   : > { %21999 = vmatmul.mubr.f32.gmra.mrb[30].mxu1 %v34640_v2  ;;  %24246 = vmatprep.subr.bf16.mxu0 %v24245_v58  ;;  %34644 = vst [vmem:[#allocation182_spill] sm:$0xff] %v30896_v55  ;;  %v16347_v9 = vand.u32 4294901760, %v16346_v11  ;;  %34655 = vst [vmem:[#allocation213_spill] sm:$0xff] %v30927_v23  ;;  %v30937_v11 = vand.u32 4294901760, %v16167_v38 }
 0x56a   : > { %22009 = vmatprep.mubr.f32.mxu1 %v34641_v25  ;;  %v16356_v15 = vsub.f32 %v30842_v30, %v34642_v34  ;;  %v34645_v25 = vld [vmem:[#allocation217_spill] sm:$0xff]  ;;  %v34648_v34 = vand.u32 4294901760, %v34647_v8  ;;  %v34652_v8 = vand.u32 4294901760, %v34586_v0  ;;  %34653 = vst [vmem:[#allocation194_spill] sm:$0xff] %v30922_v7  ;;  %v34656_v0 = vand.u32 4294901760, %v30873_v36 }
 0x56b   : > { %23525 = vmatmul.mubr.f32.gmra.mrb[2].mxu0 %v16317_v17  ;;  %v34646_v63 = vand.u32 4294901760, %v34645_v25  ;;  %v30910_v17 = vsub.f32 %v16155_v31, %v30882_v54  ;;  %v18820_v25 = vld [vmem:[%s26405_s17 + $0xfa] sm:$0xff]  ;;  %v30925_v31 = vsub.f32 %v16161_v53, %v30896_v55  ;;  %v16367_v28 = vand.u32 4294901760, %v16366_v47  ;;  %34657 = vst [vmem:[#allocation220_spill] sm:$0xff] %v30937_v11 }
 0x56c   : > { %23527 = vmatprep.mubr.f32.mxu0 %v16327_v50  ;;  %24248 = vmatpush3.bf16.msra.mxu0 %v24245_v58  ;;  %v16357_v58 = vand.u32 4294901760, %v16356_v15  ;;  %v16386_v50 = vsub.f32 %v30873_v36, %v34656_v0  ;;  %v16170_v24 = vsel %vm352_vm0, %v18820_v25, 0  ;;  %v33256_v47 = vand.u32 4294901760, %v30922_v7 }
 0x56d   : > { %v24029_v30 = vpack.c.bf16 %v34648_v34, %v34646_v63  ;;  %34650 = vst [vmem:[#allocation190_spill] sm:$0xff] %v30910_v17  ;;  %22010 = vmatmul.mubr.f32.vlgmr.msra.gmra.mrb[0].mxu1 %v34651_v48  ;;  %24250 = vmatprep.subr.bf16.mxu0 %v30675_v16  ;;  %v33251_v63 = vand.u32 4294901760, %v30892_v40  ;;  %34654 = vst [vmem:[#allocation205_spill] sm:$0xff] %v30925_v31  ;;  %v18821_v48 = vld [vmem:[%s26405_s17 + $0x10a] sm:$0xff]  ;;  %v33253_v53 = vand.u32 4294901760, %v30910_v17  ;;  %v18822_v34 = vld [vmem:[%s26405_s17 + $0x112] sm:$0xff] }
 0x56e   : > { %24028 = vmatpush3.bf16.msra.mxu1 %v30690_v60  ;;  %22012 = vmatprep.mubr.f32.mxu1 %v34652_v8  ;;  %v16376_v60 = vsub.f32 %v30870_v32, %v33252_v21  ;;  %v16173_v15 = vsel %vm352_vm0, %v18821_v48, 0  ;;  %v34659_v8 = vand.u32 4294901760, %v30161_v42  ;;  %v30952_v25 = vsub.f32 %v16164_v3, %v30927_v23  ;;  %v18824_v3 = vld [vmem:[%s26405_s17 + $0x12a] sm:$0xff] }
 0x56f   : > { %23528 = vmatmul.mubr.f32.gmra.mrb[4].mxu0 %v16337_v18  ;;  %24030 = vmatprep.subr.bf16.mxu1 %v24029_v30  ;;  %v34658_v18 = vand.u32 4294901760, %v34592_v20  ;;  %v18823_v20 = vld [vmem:[%s26405_s17 + $0x122] sm:$0xff]  ;;  %v30955_v42 = vand.u32 4294901760, %v16170_v24  ;;  %v30964_v21 = vand.u32 4294901760, %v16173_v15 }
 0x570   : > { %23530 = vmatprep.mubr.f32.mxu0 %v16347_v9  ;;  %v16396_v9 = vsub.f32 %v30892_v40, %v33251_v63  ;;  %34660 = vst [vmem:[#allocation223_spill] sm:$0xff] %v30952_v25  ;;  %v16377_v48 = vand.u32 4294901760, %v16376_v60  ;;  %v30962_v63 = vsub.f32 %v16167_v38, %v30937_v11  ;;  %v34664_v60 = vand.u32 4294901760, %v30184_v46 }
 0x571   : > { %22013 = vmatmul.mubr.f32.gmra.mrb[2].mxu1 %v34658_v18  ;;  %v16387_v18 = vand.u32 4294901760, %v16386_v50  ;;  %34661 = vst [vmem:[#allocation248_spill] sm:$0xff] %v30955_v42  ;;  %34663 = vst [vmem:[#allocation245_spill] sm:$0xff] %v30964_v21  ;;  %v16179_v50 = vsel %vm352_vm0, %v18823_v20, 0  ;;  %v16416_v38 = vsub.f32 %v30922_v7, %v33256_v47  ;;  %v30982_v46 = vsub.f32 %v16170_v24, %v30955_v42  ;;  %v18827_v24 = vld [vmem:[%s26405_s17 + $0x152] sm:$0xff] }
 0x572   : > { %22015 = vmatprep.mubr.f32.mxu1 %v34659_v8  ;;  %24032 = vmatpush3.bf16.msra.mxu1 %v24029_v30  ;;  %v16406_v8 = vsub.f32 %v30910_v17, %v33253_v53  ;;  %34662 = vst [vmem:[#allocation241_spill] sm:$0xff] %v30962_v63  ;;  %v16176_v30 = vsel %vm352_vm0, %v18822_v34, 0  ;;  %v16397_v0 = vand.u32 4294901760, %v16396_v9  ;;  %v34666_v53 = vand.u32 4294901760, %v30925_v31  ;;  %v18826_v17 = vld [vmem:[%s26405_s17 + $0x142] sm:$0xff] }
 0x573   : > { %23531 = vmatmul.mubr.f32.gmra.mrb[6].mxu0 %v16357_v58  ;;  %24034 = vmatprep.subr.bf16.mxu1 %v34550_v6  ;;  %v18825_v58 = vld [vmem:[%s26405_s17 + $0x13a] sm:$0xff]  ;;  %v30984_v20 = vand.u32 4294901760, %v16176_v30  ;;  %v30990_v47 = vsub.f32 %v16173_v15, %v30964_v21 }
 0x574   : > { %23533 = vmatprep.mubr.f32.mxu0 %v16367_v28  ;;  %v34665_v28 = vand.u32 4294901760, %v30199_v22  ;;  %v16426_v34 = vsub.f32 %v30925_v31, %v34666_v53  ;;  %v16182_v22 = vsel %vm352_vm0, %v18824_v3, 0  ;;  %v16185_v9 = vsel %vm352_vm0, %v18825_v58, 0 }
 0x575   : > { %22016 = vmatmul.mubr.f32.gmra.mrb[4].mxu1 %v34664_v60  ;;  %34667 = vst [vmem:[#allocation118_spill] sm:$0xff] %v30984_v20  ;;  %v16407_v60 = vand.u32 4294901760, %v16406_v8  ;;  %34668 = vst [vmem:[#allocation140_spill] sm:$0xff] %v30990_v47  ;;  %v30992_v53 = vand.u32 4294901760, %v16179_v50  ;;  %v34671_v31 = vand.u32 4294901760, %v34593_v29  ;;  %v16417_v3 = vand.u32 4294901760, %v16416_v38 }
 0x576   : > { %22018 = vmatprep.mubr.f32.mxu1 %v34665_v28  ;;  %v31003_v58 = vand.u32 4294901760, %v16182_v22  ;;  %v31005_v15 = vand.u32 4294901760, %v16185_v9  ;;  %v16427_v28 = vand.u32 4294901760, %v16426_v34  ;;  %v16188_v29 = vsel %vm352_vm0, %v18826_v17, 0 }
 0x577   : > { %23534 = vmatmul.mubr.f32.gmra.mrb[8].mxu0 %v16377_v48  ;;  %34669 = vst [vmem:[#allocation163_spill] sm:$0xff] %v30992_v53  ;;  %v34670_v48 = vand.u32 4294901760, %v30216_v19  ;;  %v34678_v34 = vand.u32 4294901760, %v34594_v4  ;;  %v18828_v19 = vld [vmem:[%s26405_s17 + $0x15a] sm:$0xff] }
 0x578   : > { %23536 = vmatprep.mubr.f32.mxu0 %v16387_v18  ;;  %v34672_v18 = vand.u32 4294901760, %v30952_v25  ;;  %34673 = vst [vmem:[#allocation17_spill] sm:$0xff] %v31003_v58  ;;  %34674 = vst [vmem:[#allocation50_spill] sm:$0xff] %v31005_v15  ;;  %v31026_v17 = vsub.f32 %v16182_v22, %v31003_v58 }
 0x579   : > { %22019 = vmatmul.mubr.f32.gmra.mrb[6].mxu1 %v34670_v48  ;;  %v31009_v48 = vsub.f32 %v16176_v30, %v30984_v20  ;;  %v34679_v30 = vand.u32 4294901760, %v34595_v12  ;;  %v34687_v12 = vand.u32 4294901760, %v34597_v1 }
 0x57a   : > { %22021 = vmatprep.mubr.f32.mxu1 %v34671_v31  ;;  %v16436_v8 = vsub.f32 %v30952_v25, %v34672_v18  ;;  %v34676_v31 = vand.u32 4294901760, %v30962_v63  ;;  %v31017_v25 = vsub.f32 %v16179_v50, %v30992_v53  ;;  %34680 = vst [vmem:[#allocation231_spill] sm:$0xff] %v31026_v17  ;;  %v18829_v50 = vld [vmem:[%s26405_s17 + $0x16a] sm:$0xff] }
 0x57b   : > { %23537 = vmatmul.mubr.f32.gmra.mrb[10].mxu0 %v16397_v0  ;;  %34675 = vst [vmem:[#allocation221_spill] sm:$0xff] %v31009_v48  ;;  %v16191_v0 = vsel %vm352_vm0, %v18827_v24, 0  ;;  %v34683_v24 = vand.u32 4294901760, %v30982_v46  ;;  %v16197_v7 = vsel %vm352_vm0, %v18829_v50, 0 }
 0x57c   : > { %23539 = vmatprep.mubr.f32.mxu0 %v16407_v60  ;;  %v16446_v38 = vsub.f32 %v30962_v63, %v34676_v31  ;;  %34677 = vst [vmem:[#allocation228_spill] sm:$0xff] %v31017_v25  ;;  %v31029_v60 = vsub.f32 %v16185_v9, %v31005_v15  ;;  %v31031_v31 = vand.u32 4294901760, %v16188_v29  ;;  %v16437_v18 = vand.u32 4294901760, %v16436_v8  ;;  %v18831_v63 = vld [vmem:[%s26405_s17 + $0x182] sm:$0xff] }
 0x57d   : > { %22022 = vmatmul.mubr.f32.gmra.mrb[8].mxu1 %v34678_v34  ;;  %v16456_v4 = vsub.f32 %v30982_v46, %v34683_v24  ;;  %v31038_v34 = vand.u32 4294901760, %v16191_v0  ;;  %v34686_v8 = vand.u32 4294901760, %v34596_v37  ;;  %v18830_v24 = vld [vmem:[%s26405_s17 + $0x172] sm:$0xff]  ;;  %v34688_v37 = vand.u32 4294901760, %v31009_v48 }
 0x57e   : > { %22024 = vmatprep.mubr.f32.mxu1 %v34679_v30  ;;  %34681 = vst [vmem:[#allocation243_spill] sm:$0xff] %v31029_v60  ;;  %34682 = vst [vmem:[#allocation250_spill] sm:$0xff] %v31031_v31  ;;  %v16447_v22 = vand.u32 4294901760, %v16446_v38  ;;  %v34685_v30 = vand.u32 4294901760, %v30990_v47  ;;  %v34690_v38 = vand.u32 4294901760, %v31017_v25 }
 0x57f   : > { %23540 = vmatmul.mubr.f32.gmra.mrb[12].mxu0 %v16417_v3  ;;  %34684 = vst [vmem:[#allocation84_spill] sm:$0xff] %v31038_v34  ;;  %v16194_v3 = vsel %vm352_vm0, %v18828_v19, 0  ;;  %v16457_v19 = vand.u32 4294901760, %v16456_v4  ;;  %v16476_v50 = vsub.f32 %v31009_v48, %v34688_v37  ;;  %v34692_v4 = vand.u32 4294901760, %v34598_v5  ;;  %v18832_v48 = vld [vmem:[%s26405_s17 + $0x18a] sm:$0xff] }
 0x580   : > { %23542 = vmatprep.mubr.f32.mxu0 %v16427_v28  ;;  %v16466_v9 = vsub.f32 %v30990_v47, %v34685_v30  ;;  %v31054_v30 = vsub.f32 %v16188_v29, %v31031_v31  ;;  %v31063_v1 = vand.u32 4294901760, %v16194_v3  ;;  %v16486_v29 = vsub.f32 %v31017_v25, %v34690_v38  ;;  %v18833_v25 = vld [vmem:[%s26405_s17 + $0x19a] sm:$0xff] }
 0x581   : > { %22025 = vmatmul.mubr.f32.gmra.mrb[10].mxu1 %v34686_v8  ;;  %v31061_v8 = vsub.f32 %v16191_v0, %v31038_v34  ;;  %v31068_v28 = vand.u32 4294901760, %v16197_v7  ;;  %v16203_v37 = vsel %vm352_vm0, %v18831_v63, 0  ;;  %v34693_v0 = vand.u32 4294901760, %v34599_v14 }
 0x582   : > { %22027 = vmatprep.mubr.f32.mxu1 %v34687_v12  ;;  %34689 = vst [vmem:[#allocation136_spill] sm:$0xff] %v31063_v1  ;;  %v16467_v12 = vand.u32 4294901760, %v16466_v9  ;;  %v34695_v47 = vand.u32 4294901760, %v31029_v60  ;;  %v16477_v5 = vand.u32 4294901760, %v16476_v50  ;;  %v18834_v50 = vld [vmem:[%s26405_s17 + $0x1a2] sm:$0xff] }
 0x583   : > { %23543 = vmatmul.mubr.f32.gmra.mrb[14].mxu0 %v16437_v18  ;;  %34691 = vst [vmem:[#allocation158_spill] sm:$0xff] %v31068_v28  ;;  %v16200_v18 = vsel %vm352_vm0, %v18830_v24, 0  ;;  %v34698_v24 = vand.u32 4294901760, %v34602_v13 }
 0x584   : > { %23545 = vmatprep.mubr.f32.mxu0 %v16447_v22  ;;  %v34694_v22 = vand.u32 4294901760, %v31026_v17  ;;  %v16506_v38 = vsub.f32 %v31029_v60, %v34695_v47  ;;  %v31089_v14 = vand.u32 4294901760, %v16200_v18  ;;  %v16206_v47 = vsel %vm352_vm0, %v18832_v48, 0 }
 0x585   : > { %22028 = vmatmul.mubr.f32.gmra.mrb[12].mxu1 %v34692_v4  ;;  %v31087_v4 = vsub.f32 %v16194_v3, %v31063_v1  ;;  %v34699_v3 = vand.u32 4294901760, %v34603_v52 }
 0x586   : > { %22030 = vmatprep.mubr.f32.mxu1 %v34693_v0  ;;  %v16496_v9 = vsub.f32 %v31026_v17, %v34694_v22  ;;  %34696 = vst [vmem:[#allocation16_spill] sm:$0xff] %v31089_v14  ;;  %v16487_v0 = vand.u32 4294901760, %v16486_v29  ;;  %v31092_v22 = vsub.f32 %v16197_v7, %v31068_v28  ;;  %v31094_v17 = vand.u32 4294901760, %v16203_v37 }
 0x587   : > { %23546 = vmatmul.mubr.f32.gmra.mrb[16].mxu0 %v16457_v19  ;;  %v16209_v19 = vsel %vm352_vm0, %v18833_v25, 0  ;;  %v16507_v60 = vand.u32 4294901760, %v16506_v38  ;;  %v34701_v29 = vand.u32 4294901760, %v31061_v8  ;;  %v33280_v13 = vand.u32 4294901760, %v31087_v4 }
 0x588   : > { %23548 = vmatprep.mubr.f32.mxu0 %v16467_v12  ;;  %34697 = vst [vmem:[#allocation164_spill] sm:$0xff] %v31094_v17  ;;  %v16497_v63 = vand.u32 4294901760, %v16496_v9  ;;  %v34700_v12 = vand.u32 4294901760, %v31054_v30  ;;  %v31113_v25 = vand.u32 4294901760, %v16206_v47  ;;  %v31117_v9 = vsub.f32 %v16203_v37, %v31094_v17 }
 0x589   : > { %22031 = vmatmul.mubr.f32.gmra.mrb[14].mxu1 %v34698_v24  ;;  %v16526_v48 = vsub.f32 %v31061_v8, %v34701_v29  ;;  %v31111_v24 = vsub.f32 %v16200_v18, %v31089_v14  ;;  %v31119_v38 = vand.u32 4294901760, %v16209_v19 }
 0x58a   : > { %22033 = vmatprep.mubr.f32.mxu1 %v34699_v3  ;;  %v16516_v7 = vsub.f32 %v31054_v30, %v34700_v12  ;;  %34702 = vst [vmem:[#allocation80_spill] sm:$0xff] %v31113_v25  ;;  %v34704_v3 = vand.u32 4294901760, %v30354_v62  ;;  %v34705_v12 = vand.u32 4294901760, %v34605_v27  ;;  %v31131_v37 = vsub.f32 %v16206_v47, %v31113_v25 }
 0x58b   : > { %23549 = vmatmul.mubr.f32.gmra.mrb[18].mxu0 %v16477_v5  ;;  %34703 = vst [vmem:[#allocation226_spill] sm:$0xff] %v31119_v38  ;;  %v16212_v5 = vsel %vm352_vm0, %v18834_v50, 0  ;;  %v33279_v29 = vand.u32 4294901760, %v31111_v24  ;;  %v16527_v50 = vand.u32 4294901760, %v16526_v48  ;;  %v34707_v62 = vand.u32 4294901760, %v31092_v22 }
 0x58c   : > { %23551 = vmatprep.mubr.f32.mxu0 %v16487_v0  ;;  %v16517_v18 = vand.u32 4294901760, %v16516_v7  ;;  %v16536_v0 = vsub.f32 %v31087_v4, %v33280_v13  ;;  %v31133_v52 = vand.u32 4294901760, %v16212_v5  ;;  %v33278_v7 = vand.u32 4294901760, %v31117_v9  ;;  %v34751_v13 = vld [vmem:[#allocation166_spill] sm:$0xff] }
 0x58d   : > { %22034 = vmatmul.mubr.f32.gmra.mrb[16].mxu1 %v34704_v3  ;;  %v16546_v27 = vsub.f32 %v31092_v22, %v34707_v62  ;;  %v34708_v3 = vand.u32 4294901760, %v34607_v45  ;;  %v33277_v48 = vand.u32 4294901760, %v31131_v37 }
 0x58e   : > { %22036 = vmatprep.mubr.f32.mxu1 %v34705_v12  ;;  %34706 = vst [vmem:[#allocation251_spill] sm:$0xff] %v31133_v52  ;;  %v34709_v12 = vand.u32 4294901760, %v34608_v61  ;;  %v16537_v47 = vand.u32 4294901760, %v16536_v0  ;;  %v31151_v62 = vsub.f32 %v16212_v5, %v31133_v52  ;;  %v16566_v45 = vsub.f32 %v31117_v9, %v33278_v7  ;;  %v34749_v7 = vld [vmem:[#allocation244_spill] sm:$0xff] }
 0x58f   : > { %23552 = vmatmul.mubr.f32.gmra.mrb[20].mxu0 %v16497_v63  ;;  %v31140_v63 = vsub.f32 %v16209_v19, %v31119_v38  ;;  %v16547_v19 = vand.u32 4294901760, %v16546_v27  ;;  %v34711_v0 = vand.u32 4294901760, %v34613_v35  ;;  %v16576_v5 = vsub.f32 %v31131_v37, %v33277_v48  ;;  %v34748_v48 = vld [vmem:[#allocation237_spill] sm:$0xff] }
 0x590   : > { %23554 = vmatprep.mubr.f32.mxu0 %v16507_v60  ;;  %v16556_v60 = vsub.f32 %v31111_v24, %v33279_v29  ;;  %v16567_v27 = vand.u32 4294901760, %v16566_v45  ;;  %v34713_v35 = vand.u32 4294901760, %v30433_v51  ;;  %v34715_v45 = vand.u32 4294901760, %v30464_v26  ;;  %v34720_v26 = vld [vmem:[#allocation22_spill] sm:$0xff]  ;;  %v34750_v29 = vld [vmem:[#allocation141_spill] sm:$0xff] }
 0x591   : > { %22037 = vmatmul.mubr.f32.gmra.mrb[18].mxu1 %v34708_v3  ;;  %v33276_v61 = vand.u32 4294901760, %v31140_v63  ;;  %v34716_v51 = vand.u32 4294901760, %v30483_v57  ;;  %v34722_v57 = vand.u32 4294901760, %v34640_v2  ;;  %v34730_v2 = vld [vmem:[#allocation70_spill] sm:$0xff] }
 0x592   : > { %22039 = vmatprep.mubr.f32.mxu1 %v34709_v12  ;;  %v16557_v3 = vand.u32 4294901760, %v16556_v60 }
 0x593   : > { %23555 = vmatmul.mubr.f32.gmra.mrb[22].mxu0 %v16517_v18  ;;  %v34710_v18 = vand.u32 4294901760, %v34612_v39  ;;  %v16586_v12 = vsub.f32 %v31140_v63, %v33276_v61  ;;  %v34712_v39 = vand.u32 4294901760, %v30426_v59  ;;  %v34747_v61 = vld [vmem:[#allocation224_spill] sm:$0xff] }
 0x594   : > { %23557 = vmatprep.mubr.f32.mxu0 %v16527_v50  ;;  %v33275_v50 = vand.u32 4294901760, %v31151_v62 }
 0x595   : > { %22040 = vmatmul.mubr.f32.gmra.mrb[20].mxu1 %v34710_v18  ;;  %v16587_v18 = vand.u32 4294901760, %v16586_v12  ;;  %v34725_v12 = vld [vmem:[#allocation173_spill] sm:$0xff] }
 0x596   : > { %22042 = vmatprep.mubr.f32.mxu1 %v34711_v0  ;;  %v16596_v60 = vsub.f32 %v31151_v62, %v33275_v50  ;;  %v34717_v0 = vand.u32 4294901760, %v30489_v33  ;;  %v34723_v33 = vld [vmem:[#allocation162_spill] sm:$0xff]  ;;  %v34746_v50 = vld [vmem:[#allocation215_spill] sm:$0xff] }
 0x597   : > { %23558 = vmatmul.mubr.f32.gmra.mrb[24].mxu0 %v16537_v47  ;;  %v16577_v47 = vand.u32 4294901760, %v16576_v5  ;;  %v34721_v5 = vld [vmem:[#allocation27_spill] sm:$0xff] }
 0x598   : > { %23560 = vmatprep.mubr.f32.mxu0 %v16547_v19  ;;  %v34714_v19 = vand.u32 4294901760, %v30459_v44  ;;  %v16597_v59 = vand.u32 4294901760, %v16596_v60  ;;  %v34719_v44 = vand.u32 4294901760, %v30512_v49  ;;  %v34727_v49 = vld [vmem:[#allocation227_spill] sm:$0xff]  ;;  %v34733_v60 = vld [vmem:[#allocation246_spill] sm:$0xff] }
 0x599   : > { %22043 = vmatmul.mubr.f32.gmra.mrb[22].mxu1 %v34712_v39  ;;  %v34728_v39 = vld [vmem:[#allocation198_spill] sm:$0xff] }
 0x59a   : > { %22045 = vmatprep.mubr.f32.mxu1 %v34713_v35  ;;  %v34731_v35 = vld [vmem:[#allocation214_spill] sm:$0xff] }
 0x59b   : > { %23561 = vmatmul.mubr.f32.gmra.mrb[26].mxu0 %v16557_v3  ;;  %v34718_v3 = vand.u32 4294901760, %v30503_v41  ;;  %v34726_v41 = vld [vmem:[#allocation61_spill] sm:$0xff] }
 0x59c   : > { %23563 = vmatprep.mubr.f32.mxu0 %v16567_v27  ;;  %v34724_v27 = vld [vmem:[#allocation225_spill] sm:$0xff] }
 0x59d   : > { %22046 = vmatmul.mubr.f32.gmra.mrb[24].mxu1 %v34714_v19  ;;  %v34735_v19 = vld [vmem:[#allocation167_spill] sm:$0xff] }
 0x59e   : > { %22048 = vmatprep.mubr.f32.mxu1 %v34715_v45  ;;  %v34736_v45 = vld [vmem:[#allocation5_spill] sm:$0xff] }
 0x59f   : > { %23564 = vmatmul.mubr.f32.gmra.mrb[28].mxu0 %v16577_v47  ;;  %v34732_v47 = vld [vmem:[#allocation135_spill] sm:$0xff] }
 0x5a0   : > { %23566 = vmatprep.mubr.f32.mxu0 %v16587_v18  ;;  %v34734_v18 = vld [vmem:[#allocation252_spill] sm:$0xff] }
 0x5a1   : > { %22049 = vmatmul.mubr.f32.gmra.mrb[26].mxu1 %v34716_v51  ;;  %v34739_v51 = vld [vmem:[#allocation201_spill] sm:$0xff] }
 0x5a2   : > { %22051 = vmatprep.mubr.f32.mxu1 %v34717_v0  ;;  %v34740_v0 = vld [vmem:[#allocation200_spill] sm:$0xff] }
 0x5a3   : > { %23567 = vmatmul.mubr.f32.gmra.mrb[30].mxu0 %v16597_v59  ;;  %v34737_v59 = vld [vmem:[#allocation188_spill] sm:$0xff] }
 0x5a4   : > { %23577 = vmatprep.mubr.f32.mxu0 %v30738_v56 }
 0x5a5   : > { %22052 = vmatmul.mubr.f32.gmra.mrb[28].mxu1 %v34718_v3  ;;  %v34741_v3 = vld [vmem:[#allocation209_spill] sm:$0xff] }
 0x5a6   : > { %22054 = vmatprep.mubr.f32.mxu1 %v34719_v44  ;;  %v34742_v44 = vld [vmem:[#allocation203_spill] sm:$0xff] }
 0x5a7   : > { %23578 = vmatmul.mubr.f32.vlgmr.msra.gmra.mrb[0].mxu0 %v34720_v26 }
 0x5a8   : > { %23580 = vmatprep.mubr.f32.mxu0 %v34721_v5  ;;  %24252 = vmatpush3.bf16.msra.mxu0 %v30675_v16  ;;  %v34729_v16 = vld [vmem:[#allocation238_spill] sm:$0xff] }
 0x5a9   : > { %22055 = vmatmul.mubr.f32.gmra.mrb[30].mxu1 %v34722_v57  ;;  %24254 = vmatprep.subr.bf16.mxu0 %v34723_v33  ;;  %v34743_v57 = vld [vmem:[#allocation204_spill] sm:$0xff] }
 0x5aa   : > { %22065 = vmatprep.mubr.f32.mxu1 %v34724_v27 }
 0x5ab   : > { %23581 = vmatmul.mubr.f32.gmra.mrb[2].mxu0 %v34725_v12  ;;  %v34778_v12 = vld [vmem:[#allocation216_spill] sm:$0xff] }
 0x5ac   : > { %23583 = vmatprep.mubr.f32.mxu0 %v34726_v41  ;;  %24256 = vmatpush3.bf16.msra.mxu0 %v34723_v33  ;;  %v34744_v33 = vld [vmem:[#allocation211_spill] sm:$0xff]  ;;  %v34779_v5 = vand.u32 4294901760, %v34778_v12  ;;  %v34783_v12 = vld [vmem:[#allocation6_spill] sm:$0xff] }
 0x5ad   : > { %22066 = vmatmul.mubr.f32.vlgmr.msra.gmra.mrb[0].mxu1 %v34727_v49  ;;  %24258 = vmatprep.subr.bf16.mxu0 %v34728_v39 }
 0x5ae   : > { %24036 = vmatpush3.bf16.msra.mxu1 %v34550_v6  ;;  %22068 = vmatprep.mubr.f32.mxu1 %v34729_v16  ;;  %v34738_v6 = vld [vmem:[#allocation197_spill] sm:$0xff] }
 0x5af   : > { %23584 = vmatmul.mubr.f32.gmra.mrb[4].mxu0 %v34730_v2  ;;  %24038 = vmatprep.subr.bf16.mxu1 %v34731_v35  ;;  %v34776_v2 = vld [vmem:[#allocation202_spill] sm:$0xff] }
 0x5b0   : > { %23586 = vmatprep.mubr.f32.mxu0 %v34732_v47  ;;  %v34775_v47 = vld [vmem:[#allocation159_spill] sm:$0xff]  ;;  %v34777_v41 = vand.u32 4294901760, %v34776_v2 }
 0x5b1   : > { %22069 = vmatmul.mubr.f32.gmra.mrb[2].mxu1 %v34733_v60  ;;  %v34789_v2 = vld [vmem:[#allocation223_spill] sm:$0xff] }
 0x5b2   : > { %22071 = vmatprep.mubr.f32.mxu1 %v34734_v18  ;;  %24040 = vmatpush3.bf16.msra.mxu1 %v34731_v35  ;;  %v34745_v35 = vld [vmem:[#allocation212_spill] sm:$0xff]  ;;  %v31276_v26 = vpack.c.bf16 %v34779_v5, %v34777_v41 }
 0x5b3   : > { %23587 = vmatmul.mubr.f32.gmra.mrb[6].mxu0 %v34735_v19  ;;  %24042 = vmatprep.subr.bf16.mxu1 %v34736_v45  ;;  %v34773_v19 = vld [vmem:[#allocation175_spill] sm:$0xff]  ;;  %v34782_v5 = vld [vmem:[#allocation92_spill] sm:$0xff] }
 0x5b4   : > { %23589 = vmatprep.mubr.f32.mxu0 %v34737_v59  ;;  %v34785_v41 = vld [vmem:[#allocation192_spill] sm:$0xff] }
 0x5b5   : > { %22072 = vmatmul.mubr.f32.gmra.mrb[4].mxu1 %v34738_v6 }
 0x5b6   : > { %22074 = vmatprep.mubr.f32.mxu1 %v34739_v51 }
 0x5b7   : > { %23590 = vmatmul.mubr.f32.gmra.mrb[8].mxu0 %v34740_v0  ;;  %v34771_v0 = vld [vmem:[#allocation10_spill] sm:$0xff] }
 0x5b8   : > { %23592 = vmatprep.mubr.f32.mxu0 %v34741_v3 }
 0x5b9   : > { %22075 = vmatmul.mubr.f32.gmra.mrb[6].mxu1 %v34742_v44 }
 0x5ba   : > { %22077 = vmatprep.mubr.f32.mxu1 %v34743_v57 }
 0x5bb   : > { %23593 = vmatmul.mubr.f32.gmra.mrb[10].mxu0 %v34744_v33  ;;  %v34769_v33 = vld [vmem:[#allocation8_spill] sm:$0xff] }
 0x5bc   : > { %23595 = vmatprep.mubr.f32.mxu0 %v30882_v54  ;;  %v34766_v54 = vld [vmem:[#allocation100_spill] sm:$0xff]  ;;  %v34770_v3 = vand.u32 4294901760, %v34769_v33 }
 0x5bd   : > { %22078 = vmatmul.mubr.f32.gmra.mrb[8].mxu1 %v34745_v35 }
 0x5be   : > { %22080 = vmatprep.mubr.f32.mxu1 %v34746_v50 }
 0x5bf   : > { %23596 = vmatmul.mubr.f32.gmra.mrb[12].mxu0 %v30894_v43  ;;  %v34752_v43 = vld [vmem:[#allocation168_spill] sm:$0xff] }
 0x5c0   : > { %23598 = vmatprep.mubr.f32.mxu0 %v30896_v55  ;;  %v34753_v55 = vld [vmem:[#allocation153_spill] sm:$0xff] }
 0x5c1   : > { %22081 = vmatmul.mubr.f32.gmra.mrb[10].mxu1 %v34747_v61 }
 0x5c2   : > { %22083 = vmatprep.mubr.f32.mxu1 %v34748_v48 }
 0x5c3   : > { %23599 = vmatmul.mubr.f32.gmra.mrb[14].mxu0 %v30927_v23  ;;  %v34754_v23 = vld [vmem:[#allocation40_spill] sm:$0xff] }
 0x5c4   : > { %23601 = vmatprep.mubr.f32.mxu0 %v30937_v11  ;;  %v34755_v11 = vld [vmem:[#allocation174_spill] sm:$0xff] }
 0x5c5   : > { %22084 = vmatmul.mubr.f32.gmra.mrb[12].mxu1 %v34749_v7 }
 0x5c6   : > { %22086 = vmatprep.mubr.f32.mxu1 %v34750_v29 }
 0x5c7   : > { %23602 = vmatmul.mubr.f32.gmra.mrb[16].mxu0 %v30955_v42  ;;  %v34756_v42 = vld [vmem:[#allocation177_spill] sm:$0xff] }
 0x5c8   : > { %23604 = vmatprep.mubr.f32.mxu0 %v30964_v21  ;;  %v34757_v21 = vld [vmem:[#allocation178_spill] sm:$0xff] }
 0x5c9   : > { %22087 = vmatmul.mubr.f32.gmra.mrb[14].mxu1 %v34751_v13 }
 0x5ca   : > { %22089 = vmatprep.mubr.f32.mxu1 %v34752_v43 }
 0x5cb   : > { %23605 = vmatmul.mubr.f32.gmra.mrb[18].mxu0 %v30984_v20  ;;  %v34758_v20 = vld [vmem:[#allocation142_spill] sm:$0xff] }
 0x5cc   : > { %23607 = vmatprep.mubr.f32.mxu0 %v30992_v53  ;;  %v34759_v53 = vld [vmem:[#allocation179_spill] sm:$0xff] }
 0x5cd   : > { %22090 = vmatmul.mubr.f32.gmra.mrb[16].mxu1 %v34753_v55 }
 0x5ce   : > { %22092 = vmatprep.mubr.f32.mxu1 %v34754_v23 }
 0x5cf   : > { %23608 = vmatmul.mubr.f32.gmra.mrb[20].mxu0 %v31003_v58  ;;  %v34760_v58 = vld [vmem:[#allocation180_spill] sm:$0xff] }
 0x5d0   : > { %23610 = vmatprep.mubr.f32.mxu0 %v31005_v15  ;;  %v34761_v15 = vld [vmem:[#allocation196_spill] sm:$0xff] }
 0x5d1   : > { %22093 = vmatmul.mubr.f32.gmra.mrb[18].mxu1 %v34755_v11 }
 0x5d2   : > { %22095 = vmatprep.mubr.f32.mxu1 %v34756_v42 }
 0x5d3   : > { %23611 = vmatmul.mubr.f32.gmra.mrb[22].mxu0 %v31031_v31  ;;  %v34762_v31 = vld [vmem:[#allocation207_spill] sm:$0xff] }
 0x5d4   : > { %23613 = vmatprep.mubr.f32.mxu0 %v31038_v34  ;;  %v34763_v34 = vld [vmem:[#allocation210_spill] sm:$0xff] }
 0x5d5   : > { %22096 = vmatmul.mubr.f32.gmra.mrb[20].mxu1 %v34757_v21 }
 0x5d6   : > { %22098 = vmatprep.mubr.f32.mxu1 %v34758_v20 }
 0x5d7   : > { %23614 = vmatmul.mubr.f32.gmra.mrb[24].mxu0 %v31063_v1  ;;  %v34764_v1 = vld [vmem:[#allocation169_spill] sm:$0xff] }
 0x5d8   : > { %23616 = vmatprep.mubr.f32.mxu0 %v31068_v28  ;;  %v34765_v28 = vld [vmem:[#allocation156_spill] sm:$0xff] }
 0x5d9   : > { %22099 = vmatmul.mubr.f32.gmra.mrb[22].mxu1 %v34759_v53 }
 0x5da   : > { %22101 = vmatprep.mubr.f32.mxu1 %v34760_v58 }
 0x5db   : > { %23617 = vmatmul.mubr.f32.gmra.mrb[26].mxu0 %v31089_v14  ;;  %v34767_v14 = vld [vmem:[#allocation104_spill] sm:$0xff] }
 0x5dc   : > { %23619 = vmatprep.mubr.f32.mxu0 %v31094_v17  ;;  %v34768_v17 = vld [vmem:[#allocation30_spill] sm:$0xff] }
 0x5dd   : > { %22102 = vmatmul.mubr.f32.gmra.mrb[24].mxu1 %v34761_v15 }
 0x5de   : > { %22104 = vmatprep.mubr.f32.mxu1 %v34762_v31 }
 0x5df   : > { %23620 = vmatmul.mubr.f32.gmra.mrb[28].mxu0 %v31113_v25  ;;  %v8674_v25 = vsub.f32 %v34769_v33, %v34770_v3  ;;  %v34780_v3 = vld [vmem:[#allocation76_spill] sm:$0xff] }
 0x5e0   : > { %23622 = vmatprep.mubr.f32.mxu0 %v31119_v38  ;;  %v34772_v38 = vand.u32 4294901760, %v34771_v0 }
 0x5e1   : > { %22105 = vmatmul.mubr.f32.gmra.mrb[26].mxu1 %v34763_v34  ;;  %v8675_v56 = vand.u32 4294901760, %v8674_v25  ;;  %v34784_v25 = vld [vmem:[#allocation26_spill] sm:$0xff] }
 0x5e2   : > { %22107 = vmatprep.mubr.f32.mxu1 %v34764_v1  ;;  %v8681_v59 = vsub.f32 %v34771_v0, %v34772_v38  ;;  %v34781_v0 = vld [vmem:[#allocation138_spill] sm:$0xff] }
 0x5e3   : > { %23623 = vmatmul.mubr.f32.gmra.mrb[30].mxu0 %v31133_v52  ;;  %v34774_v52 = vld [vmem:[#allocation183_spill] sm:$0xff] }
 0x5e4   : > { %23633 = vmatprep.mubr.f32.mxu0 %v34765_v28  ;;  %v8682_v38 = vand.u32 4294901760, %v8681_v59 }
 0x5e5   : > { %22108 = vmatmul.mubr.f32.gmra.mrb[28].mxu1 %v34766_v54 }
 0x5e6   : > { %22110 = vmatprep.mubr.f32.mxu1 %v34767_v14 }
 0x5e7   : > { %23634 = vmatmul.mubr.f32.vlgmr.msra.gmra.mrb[0].mxu0 %v34768_v17 }
 0x5e8   : > { %23636 = vmatprep.mubr.f32.mxu0 %v34773_v19  ;;  %24260 = vmatpush3.bf16.msra.mxu0 %v34728_v39 }
 0x5e9   : > { %22111 = vmatmul.mubr.f32.gmra.mrb[30].mxu1 %v34774_v52  ;;  %24262 = vmatprep.subr.bf16.mxu0 %v34775_v47 }
 0x5ea   : > { %22121 = vmatprep.mubr.f32.mxu1 %v34724_v27  ;;  %v31288_v27 = vpack.c.bf16 %v8682_v38, %v8675_v56  ;;  %v34786_v56 = vld [vmem:[#allocation190_spill] sm:$0xff]  ;;  %v34821_v38 = vand.u32 4294901760, %v30870_v32 }
 0x5eb   : > { %23637 = vmatmul.mubr.f32.gmra.mrb[2].mxu0 %v34780_v3 }
 0x5ec   : > { %23639 = vmatprep.mubr.f32.mxu0 %v34781_v0  ;;  %24264 = vmatpush3.bf16.msra.mxu0 %v34775_v47 }
 0x5ed   : > { %22122 = vmatmul.mubr.f32.vlgmr.msra.gmra.mrb[0].mxu1 %v34727_v49  ;;  %24266 = vmatprep.subr.bf16.mxu0 %v31276_v26  ;;  %v34787_v49 = vld [vmem:[#allocation194_spill] sm:$0xff] }
 0x5ee   : > { %24044 = vmatpush3.bf16.msra.mxu1 %v34736_v45  ;;  %22124 = vmatprep.mubr.f32.mxu1 %v34729_v16  ;;  %v34788_v16 = vld [vmem:[#allocation205_spill] sm:$0xff]  ;;  %v34806_v45 = vand.u32 4294901760, %v34773_v19  ;;  %v34813_v19 = vld [vmem:[#allocation10_spill] sm:$0xff] }
 0x5ef   : > { %23640 = vmatmul.mubr.f32.gmra.mrb[4].mxu0 %v34782_v5  ;;  %24046 = vmatprep.subr.bf16.mxu1 %v34783_v12 }
 0x5f0   : > { %23642 = vmatprep.mubr.f32.mxu0 %v34784_v25 }
 0x5f1   : > { %22125 = vmatmul.mubr.f32.gmra.mrb[2].mxu1 %v34733_v60  ;;  %v34790_v60 = vld [vmem:[#allocation241_spill] sm:$0xff] }
 0x5f2   : > { %22127 = vmatprep.mubr.f32.mxu1 %v34734_v18  ;;  %24048 = vmatpush3.bf16.msra.mxu1 %v34783_v12  ;;  %v34791_v18 = vld [vmem:[#allocation140_spill] sm:$0xff] }
 0x5f3   : > { %23643 = vmatmul.mubr.f32.gmra.mrb[6].mxu0 %v34785_v41  ;;  %24050 = vmatprep.subr.bf16.mxu1 %v31288_v27  ;;  %v34823_v12 = vld [vmem:[#allocation64_spill] sm:$0xff] }
 0x5f4   : > { %23645 = vmatprep.mubr.f32.mxu0 %v30856_v10 }
 0x5f5   : > { %22128 = vmatmul.mubr.f32.gmra.mrb[4].mxu1 %v34738_v6  ;;  %v31377_v6 = vpack.c.bf16 %v34813_v19, %v34769_v33  ;;  %v34820_v33 = vld [vmem:[#allocation56_spill] sm:$0xff] }
 0x5f6   : > { %22130 = vmatprep.mubr.f32.mxu1 %v34739_v51  ;;  %v34814_v51 = vand.u32 4294901760, %v34784_v25  ;;  %v34825_v25 = vand.u32 4294901760, %v30892_v40 }
 0x5f7   : > { %23646 = vmatmul.mubr.f32.gmra.mrb[8].mxu0 %v30870_v32  ;;  %v34829_v32 = vand.u32 4294901760, %v34787_v49 }
 0x5f8   : > { %23648 = vmatprep.mubr.f32.mxu0 %v30873_v36 }
 0x5f9   : > { %22131 = vmatmul.mubr.f32.gmra.mrb[6].mxu1 %v34742_v44  ;;  %v34816_v44 = vld [vmem:[#allocation48_spill] sm:$0xff] }
 0x5fa   : > { %22133 = vmatprep.mubr.f32.mxu1 %v34743_v57  ;;  %v34817_v57 = vand.u32 4294901760, %v34785_v41  ;;  %v34827_v41 = vld [vmem:[#allocation67_spill] sm:$0xff] }
 0x5fb   : > { %23649 = vmatmul.mubr.f32.gmra.mrb[10].mxu0 %v30892_v40  ;;  %v34833_v40 = vand.u32 4294901760, %v34789_v2 }
 0x5fc   : > { %23651 = vmatprep.mubr.f32.mxu0 %v34786_v56 }
 0x5fd   : > { %22134 = vmatmul.mubr.f32.gmra.mrb[8].mxu1 %v34745_v35  ;;  %v34818_v35 = vand.u32 4294901760, %v30856_v10  ;;  %v34826_v10 = vand.u32 4294901760, %v34786_v56  ;;  %v34834_v56 = vand.u32 4294901760, %v34790_v60 }
 0x5fe   : > { %22136 = vmatprep.mubr.f32.mxu1 %v34746_v50  ;;  %v34792_v50 = vld [vmem:[#allocation221_spill] sm:$0xff] }
 0x5ff   : > { %23652 = vmatmul.mubr.f32.gmra.mrb[12].mxu0 %v34787_v49  ;;  %v34837_v49 = vand.u32 4294901760, %v30982_v46 }
 0x600   : > { %23654 = vmatprep.mubr.f32.mxu0 %v34788_v16 }
 0x601   : > { %22137 = vmatmul.mubr.f32.gmra.mrb[10].mxu1 %v34747_v61  ;;  %v34793_v61 = vld [vmem:[#allocation228_spill] sm:$0xff] }
 0x602   : > { %22139 = vmatprep.mubr.f32.mxu1 %v34748_v48  ;;  %v34794_v48 = vld [vmem:[#allocation231_spill] sm:$0xff] }
 0x603   : > { %23655 = vmatmul.mubr.f32.gmra.mrb[14].mxu0 %v34789_v2  ;;  %v34841_v2 = vand.u32 4294901760, %v34792_v50 }
 0x604   : > { %23657 = vmatprep.mubr.f32.mxu0 %v34790_v60  ;;  %v34842_v60 = vand.u32 4294901760, %v34793_v61 }
 0x605   : > { %22140 = vmatmul.mubr.f32.gmra.mrb[12].mxu1 %v34749_v7  ;;  %v34795_v7 = vld [vmem:[#allocation243_spill] sm:$0xff] }
 0x606   : > { %22142 = vmatprep.mubr.f32.mxu1 %v34750_v29 }
 0x607   : > { %23658 = vmatmul.mubr.f32.gmra.mrb[16].mxu0 %v30982_v46  ;;  %v34845_v46 = vand.u32 4294901760, %v34794_v48 }
 0x608   : > { %23660 = vmatprep.mubr.f32.mxu0 %v34791_v18 }
 0x609   : > { %22143 = vmatmul.mubr.f32.gmra.mrb[14].mxu1 %v34751_v13 }
 0x60a   : > { %22145 = vmatprep.mubr.f32.mxu1 %v34752_v43  ;;  %v34796_v43 = vld [vmem:[#allocation65_spill] sm:$0xff] }
 0x60b   : > { %23661 = vmatmul.mubr.f32.gmra.mrb[18].mxu0 %v34792_v50  ;;  %v34849_v50 = vand.u32 4294901760, %v31054_v30 }
 0x60c   : > { %23663 = vmatprep.mubr.f32.mxu0 %v34793_v61  ;;  %v34850_v61 = vand.u32 4294901760, %v31061_v8 }
 0x60d   : > { %22146 = vmatmul.mubr.f32.gmra.mrb[16].mxu1 %v34753_v55  ;;  %v34797_v55 = vand.u32 4294901760, %v34796_v43 }
 0x60e   : > { %22148 = vmatprep.mubr.f32.mxu1 %v34754_v23  ;;  %v34798_v23 = vld [vmem:[#allocation69_spill] sm:$0xff] }
 0x60f   : > { %23664 = vmatmul.mubr.f32.gmra.mrb[20].mxu0 %v34794_v48  ;;  %v34853_v48 = vand.u32 4294901760, %v31087_v4 }
 0x610   : > { %23666 = vmatprep.mubr.f32.mxu0 %v34795_v7 }
 0x611   : > { %22149 = vmatmul.mubr.f32.gmra.mrb[18].mxu1 %v34755_v11  ;;  %v34799_v11 = vand.u32 4294901760, %v34798_v23 }
 0x612   : > { %22151 = vmatprep.mubr.f32.mxu1 %v34756_v42 }
 0x613   : > { %23667 = vmatmul.mubr.f32.gmra.mrb[22].mxu0 %v31054_v30  ;;  %v8695_v42 = vsub.f32 %v34798_v23, %v34799_v11  ;;  %v34832_v11 = vld [vmem:[#allocation83_spill] sm:$0xff]  ;;  %v34857_v30 = vand.u32 4294901760, %v31111_v24 }
 0x614   : > { %23669 = vmatprep.mubr.f32.mxu0 %v31061_v8  ;;  %v34858_v8 = vand.u32 4294901760, %v31117_v9 }
 0x615   : > { %22152 = vmatmul.mubr.f32.gmra.mrb[20].mxu1 %v34757_v21  ;;  %v8688_v21 = vsub.f32 %v34796_v43, %v34797_v55  ;;  %v8696_v29 = vand.u32 4294901760, %v8695_v42  ;;  %v34828_v55 = vld [vmem:[#allocation71_spill] sm:$0xff]  ;;  %v34835_v42 = vld [vmem:[#allocation90_spill] sm:$0xff] }
 0x616   : > { %22154 = vmatprep.mubr.f32.mxu1 %v34758_v20  ;;  %v34800_v20 = vand.u32 4294901760, %v34765_v28  ;;  %v34808_v28 = vand.u32 4294901760, %v34780_v3  ;;  %v34819_v3 = vld [vmem:[#allocation52_spill] sm:$0xff] }
 0x617   : > { %23670 = vmatmul.mubr.f32.gmra.mrb[24].mxu0 %v31087_v4  ;;  %v8689_v13 = vand.u32 4294901760, %v8688_v21  ;;  %v34831_v21 = vld [vmem:[#allocation81_spill] sm:$0xff] }
 0x618   : > { %23672 = vmatprep.mubr.f32.mxu0 %v31092_v22 }
 0x619   : > { %22155 = vmatmul.mubr.f32.gmra.mrb[22].mxu1 %v34759_v53  ;;  %v34801_v53 = vld [vmem:[#allocation161_spill] sm:$0xff]  ;;  %v24053_v59 = vpack.c.bf16 %v8696_v29, %v8689_v13  ;;  %v34852_v29 = vld [vmem:[#allocation122_spill] sm:$0xff] }
 0x61a   : > { %22157 = vmatprep.mubr.f32.mxu1 %v34760_v58  ;;  %v34802_v58 = vand.u32 4294901760, %v34801_v53  ;;  %v34839_v53 = vld [vmem:[#allocation98_spill] sm:$0xff]  ;;  %v34851_v13 = vld [vmem:[#allocation121_spill] sm:$0xff] }
 0x61b   : > { %23673 = vmatmul.mubr.f32.gmra.mrb[26].mxu0 %v31111_v24  ;;  %v34866_v24 = vld [vmem:[#allocation128_spill] sm:$0xff] }
 0x61c   : > { %23675 = vmatprep.mubr.f32.mxu0 %v31117_v9  ;;  %v34867_v19 = vand.u32 4294901760, %v34866_v24 }
 0x61d   : > { %22158 = vmatmul.mubr.f32.gmra.mrb[24].mxu1 %v34761_v15  ;;  %v34803_v15 = vld [vmem:[#allocation255_spill] sm:$0xff] }
 0x61e   : > { %22160 = vmatprep.mubr.f32.mxu1 %v34762_v31  ;;  %v34804_v31 = vand.u32 4294901760, %v34803_v15  ;;  %v34843_v15 = vld [vmem:[#allocation106_spill] sm:$0xff]  ;;  %v8663_v9 = vsub.f32 %v34866_v24, %v34867_v19  ;;  %v34925_v19 = vld [vmem:[#allocation103_spill] sm:$0xff] }
 0x61f   : > { %23676 = vmatmul.mubr.f32.gmra.mrb[28].mxu0 %v31131_v37 }
 0x620   : > { %23678 = vmatprep.mubr.f32.mxu0 %v31140_v63 }
 0x621   : > { %22161 = vmatmul.mubr.f32.gmra.mrb[26].mxu1 %v34763_v34  ;;  %v24269_v34 = vpack.c.bf16 %v34804_v31, %v34802_v58  ;;  %v34840_v58 = vld [vmem:[#allocation99_spill] sm:$0xff] }
 0x622   : > { %22163 = vmatprep.mubr.f32.mxu1 %v34764_v1  ;;  %v34805_v1 = vand.u32 4294901760, %v34768_v17  ;;  %v34810_v17 = vld [vmem:[#allocation32_spill] sm:$0xff]  ;;  %v34844_v31 = vld [vmem:[#allocation107_spill] sm:$0xff] }
 0x623   : > { %23679 = vmatmul.mubr.f32.gmra.mrb[30].mxu0 %v31151_v62 }
 0x624   : > { %23689 = vmatprep.mubr.f32.mxu0 %v34800_v20  ;;  %v34836_v20 = vld [vmem:[#allocation91_spill] sm:$0xff] }
 0x625   : > { %22164 = vmatmul.mubr.f32.gmra.mrb[28].mxu1 %v34766_v54  ;;  %v34807_v54 = vld [vmem:[#allocation29_spill] sm:$0xff] }
 0x626   : > { %22166 = vmatprep.mubr.f32.mxu1 %v34767_v14  ;;  %v34809_v14 = vand.u32 4294901760, %v34781_v0  ;;  %v34815_v0 = vld [vmem:[#allocation45_spill] sm:$0xff] }
 0x627   : > { %23690 = vmatmul.mubr.f32.vlgmr.msra.gmra.mrb[0].mxu0 %v34805_v1  ;;  %v34848_v1 = vld [vmem:[#allocation115_spill] sm:$0xff] }
 0x628   : > { %23692 = vmatprep.mubr.f32.mxu0 %v34806_v45  ;;  %24268 = vmatpush3.bf16.msra.mxu0 %v31276_v26  ;;  %v34811_v26 = vld [vmem:[#allocation35_spill] sm:$0xff]  ;;  %v34855_v45 = vld [vmem:[#allocation126_spill] sm:$0xff] }
 0x629   : > { %22167 = vmatmul.mubr.f32.gmra.mrb[30].mxu1 %v34774_v52  ;;  %24270 = vmatprep.subr.bf16.mxu0 %v24269_v34  ;;  %v34812_v52 = vand.u32 4294901760, %v34782_v5  ;;  %v34822_v5 = vand.u32 4294901760, %v30873_v36  ;;  %v34830_v36 = vand.u32 4294901760, %v34788_v16  ;;  %v34838_v16 = vand.u32 4294901760, %v34791_v18 }
 0x62a   : > { %22177 = vmatprep.mubr.f32.mxu1 %v34807_v54  ;;  %v34846_v18 = vand.u32 4294901760, %v34795_v7  ;;  %v34854_v7 = vand.u32 4294901760, %v31092_v22  ;;  %v34856_v54 = vld [vmem:[#allocation127_spill] sm:$0xff]  ;;  %v34863_v22 = vand.u32 4294901760, %v31131_v37  ;;  %v8664_v37 = vand.u32 4294901760, %v8663_v9  ;;  %v34926_v9 = vld [vmem:[#allocation105_spill] sm:$0xff] }
 0x62b   : > { %23693 = vmatmul.mubr.f32.gmra.mrb[2].mxu0 %v34808_v28  ;;  %v34859_v28 = vld [vmem:[#allocation129_spill] sm:$0xff] }
 0x62c   : > { %23695 = vmatprep.mubr.f32.mxu0 %v34809_v14  ;;  %24272 = vmatpush3.bf16.msra.mxu0 %v24269_v34  ;;  %v34847_v34 = vld [vmem:[#allocation114_spill] sm:$0xff]  ;;  %v34861_v14 = vld [vmem:[#allocation125_spill] sm:$0xff] }
 0x62d   : > { %22178 = vmatmul.mubr.f32.vlgmr.msra.gmra.mrb[0].mxu1 %v34810_v17  ;;  %24274 = vmatprep.subr.bf16.mxu0 %v34728_v39  ;;  %v34862_v4 = vand.u32 4294901760, %v34861_v14 }
 0x62e   : > { %24052 = vmatpush3.bf16.msra.mxu1 %v31288_v27  ;;  %22180 = vmatprep.mubr.f32.mxu1 %v34811_v26  ;;  %v34824_v27 = vld [vmem:[#allocation66_spill] sm:$0xff]  ;;  %v34864_v26 = vand.u32 4294901760, %v31140_v63 }
 0x62f   : > { %23696 = vmatmul.mubr.f32.gmra.mrb[4].mxu0 %v34812_v52  ;;  %24054 = vmatprep.subr.bf16.mxu1 %v24053_v59  ;;  %v8653_v17 = vsub.f32 %v34861_v14, %v34862_v4  ;;  %v34865_v52 = vld [vmem:[#allocation131_spill] sm:$0xff]  ;;  %v34872_v63 = vld [vmem:[#allocation22_spill] sm:$0xff] }
 0x630   : > { %23698 = vmatprep.mubr.f32.mxu0 %v34814_v51  ;;  %v34868_v51 = vld [vmem:[#allocation132_spill] sm:$0xff]  ;;  %v34920_v4 = vld [vmem:[#allocation158_spill] sm:$0xff] }
 0x631   : > { %22181 = vmatmul.mubr.f32.gmra.mrb[2].mxu1 %v34815_v0  ;;  %v8654_v0 = vand.u32 4294901760, %v8653_v17  ;;  %v34921_v17 = vld [vmem:[#allocation94_spill] sm:$0xff] }
 0x632   : > { %22183 = vmatprep.mubr.f32.mxu1 %v34816_v44  ;;  %24056 = vmatpush3.bf16.msra.mxu1 %v24053_v59  ;;  %v34860_v59 = vld [vmem:[#allocation130_spill] sm:$0xff]  ;;  %v34869_v44 = vand.u32 4294901760, %v31151_v62  ;;  %v24061_v62 = vpack.c.bf16 %v34798_v23, %v34796_v43  ;;  %v34883_v43 = vld [vmem:[#allocation167_spill] sm:$0xff]  ;;  %v34884_v23 = vld [vmem:[#allocation188_spill] sm:$0xff] }
 0x633   : > { %23699 = vmatmul.mubr.f32.gmra.mrb[6].mxu0 %v34817_v57  ;;  %24058 = vmatprep.subr.bf16.mxu1 %v31377_v6  ;;  %v34870_v57 = vld [vmem:[#allocation165_spill] sm:$0xff] }
 0x634   : > { %23701 = vmatprep.mubr.f32.mxu0 %v34818_v35  ;;  %v34871_v35 = vld [vmem:[#allocation133_spill] sm:$0xff] }
 0x635   : > { %22184 = vmatmul.mubr.f32.gmra.mrb[4].mxu1 %v34819_v3  ;;  %v34873_v3 = vld [vmem:[#allocation27_spill] sm:$0xff] }
 0x636   : > { %22186 = vmatprep.mubr.f32.mxu1 %v34820_v33  ;;  %v34874_v33 = vld [vmem:[#allocation11_spill] sm:$0xff] }
 0x637   : > { %23702 = vmatmul.mubr.f32.gmra.mrb[8].mxu0 %v34821_v38  ;;  %v34875_v38 = vld [vmem:[#allocation173_spill] sm:$0xff] }
 0x638   : > { %23704 = vmatprep.mubr.f32.mxu0 %v34822_v5  ;;  %v34876_v5 = vld [vmem:[#allocation61_spill] sm:$0xff] }
 0x639   : > { %22187 = vmatmul.mubr.f32.gmra.mrb[6].mxu1 %v34823_v12  ;;  %v34877_v12 = vld [vmem:[#allocation12_spill] sm:$0xff] }
 0x63a   : > { %22189 = vmatprep.mubr.f32.mxu1 %v34824_v27  ;;  %v34878_v27 = vld [vmem:[#allocation15_spill] sm:$0xff] }
 0x63b   : > { %23705 = vmatmul.mubr.f32.gmra.mrb[10].mxu0 %v34825_v25  ;;  %v34880_v25 = vld [vmem:[#allocation135_spill] sm:$0xff] }
 0x63c   : > { %23707 = vmatprep.mubr.f32.mxu0 %v34826_v10  ;;  %v34881_v10 = vld [vmem:[#allocation20_spill] sm:$0xff] }
 0x63d   : > { %22190 = vmatmul.mubr.f32.gmra.mrb[8].mxu1 %v34827_v41  ;;  %v34882_v41 = vld [vmem:[#allocation21_spill] sm:$0xff] }
 0x63e   : > { %22192 = vmatprep.mubr.f32.mxu1 %v34828_v55  ;;  %v34886_v55 = vld [vmem:[#allocation31_spill] sm:$0xff] }
 0x63f   : > { %23708 = vmatmul.mubr.f32.gmra.mrb[12].mxu0 %v34829_v32  ;;  %v34888_v32 = vld [vmem:[#allocation209_spill] sm:$0xff] }
 0x640   : > { %23710 = vmatprep.mubr.f32.mxu0 %v34830_v36  ;;  %v34889_v36 = vld [vmem:[#allocation33_spill] sm:$0xff] }
 0x641   : > { %22193 = vmatmul.mubr.f32.gmra.mrb[10].mxu1 %v34831_v21  ;;  %v34890_v21 = vld [vmem:[#allocation34_spill] sm:$0xff] }
 0x642   : > { %22195 = vmatprep.mubr.f32.mxu1 %v34832_v11  ;;  %v34891_v11 = vld [vmem:[#allocation211_spill] sm:$0xff] }
 0x643   : > { %23711 = vmatmul.mubr.f32.gmra.mrb[14].mxu0 %v34833_v40  ;;  %v34892_v40 = vld [vmem:[#allocation43_spill] sm:$0xff] }
 0x644   : > { %23713 = vmatprep.mubr.f32.mxu0 %v34834_v56  ;;  %v34893_v56 = vld [vmem:[#allocation37_spill] sm:$0xff] }
 0x645   : > { %22196 = vmatmul.mubr.f32.gmra.mrb[12].mxu1 %v34835_v42  ;;  %v34894_v42 = vld [vmem:[#allocation42_spill] sm:$0xff] }
 0x646   : > { %22198 = vmatprep.mubr.f32.mxu1 %v34836_v20  ;;  %v34895_v20 = vld [vmem:[#allocation19_spill] sm:$0xff] }
 0x647   : > { %23714 = vmatmul.mubr.f32.gmra.mrb[16].mxu0 %v34837_v49  ;;  %v34896_v49 = vld [vmem:[#allocation182_spill] sm:$0xff] }
 0x648   : > { %23716 = vmatprep.mubr.f32.mxu0 %v34838_v16  ;;  %v34897_v16 = vld [vmem:[#allocation47_spill] sm:$0xff] }
 0x649   : > { %22199 = vmatmul.mubr.f32.gmra.mrb[14].mxu1 %v34839_v53  ;;  %v34898_v53 = vld [vmem:[#allocation49_spill] sm:$0xff] }
 0x64a   : > { %22201 = vmatprep.mubr.f32.mxu1 %v34840_v58  ;;  %v34899_v58 = vld [vmem:[#allocation213_spill] sm:$0xff] }
 0x64b   : > { %23717 = vmatmul.mubr.f32.gmra.mrb[18].mxu0 %v34841_v2  ;;  %v34900_v2 = vld [vmem:[#allocation220_spill] sm:$0xff] }
 0x64c   : > { %23719 = vmatprep.mubr.f32.mxu0 %v34842_v60  ;;  %v34901_v60 = vld [vmem:[#allocation55_spill] sm:$0xff] }
 0x64d   : > { %22202 = vmatmul.mubr.f32.gmra.mrb[16].mxu1 %v34843_v15  ;;  %v34902_v15 = vld [vmem:[#allocation58_spill] sm:$0xff] }
 0x64e   : > { %22204 = vmatprep.mubr.f32.mxu1 %v34844_v31  ;;  %v34903_v31 = vld [vmem:[#allocation248_spill] sm:$0xff] }
 0x64f   : > { %23720 = vmatmul.mubr.f32.gmra.mrb[20].mxu0 %v34845_v46  ;;  %v34904_v46 = vld [vmem:[#allocation245_spill] sm:$0xff] }
 0x650   : > { %23722 = vmatprep.mubr.f32.mxu0 %v34846_v18  ;;  %v34905_v18 = vld [vmem:[#allocation60_spill] sm:$0xff] }
 0x651   : > { %22205 = vmatmul.mubr.f32.gmra.mrb[18].mxu1 %v34847_v34  ;;  %v34906_v34 = vld [vmem:[#allocation63_spill] sm:$0xff] }
 0x652   : > { %22207 = vmatprep.mubr.f32.mxu1 %v34848_v1  ;;  %v34907_v1 = vld [vmem:[#allocation118_spill] sm:$0xff] }
 0x653   : > { %23723 = vmatmul.mubr.f32.gmra.mrb[22].mxu0 %v34849_v50  ;;  %v34908_v50 = vld [vmem:[#allocation163_spill] sm:$0xff] }
 0x654   : > { %23725 = vmatprep.mubr.f32.mxu0 %v34850_v61  ;;  %v34909_v61 = vld [vmem:[#allocation72_spill] sm:$0xff] }
 0x655   : > { %22208 = vmatmul.mubr.f32.gmra.mrb[20].mxu1 %v34851_v13  ;;  %v34910_v13 = vld [vmem:[#allocation75_spill] sm:$0xff] }
 0x656   : > { %22210 = vmatprep.mubr.f32.mxu1 %v34852_v29  ;;  %v34911_v29 = vld [vmem:[#allocation17_spill] sm:$0xff] }
 0x657   : > { %23726 = vmatmul.mubr.f32.gmra.mrb[24].mxu0 %v34853_v48  ;;  %v34912_v48 = vld [vmem:[#allocation50_spill] sm:$0xff] }
 0x658   : > { %23728 = vmatprep.mubr.f32.mxu0 %v34854_v7  ;;  %v34913_v7 = vld [vmem:[#allocation79_spill] sm:$0xff] }
 0x659   : > { %22211 = vmatmul.mubr.f32.gmra.mrb[22].mxu1 %v34855_v45  ;;  %v34914_v45 = vld [vmem:[#allocation82_spill] sm:$0xff] }
 0x65a   : > { %22213 = vmatprep.mubr.f32.mxu1 %v34856_v54  ;;  %v34915_v54 = vld [vmem:[#allocation250_spill] sm:$0xff] }
 0x65b   : > { %23729 = vmatmul.mubr.f32.gmra.mrb[26].mxu0 %v34857_v30  ;;  %v34916_v30 = vld [vmem:[#allocation84_spill] sm:$0xff] }
 0x65c   : > { %23731 = vmatprep.mubr.f32.mxu0 %v34858_v8  ;;  %v34917_v8 = vld [vmem:[#allocation87_spill] sm:$0xff] }
 0x65d   : > { %22214 = vmatmul.mubr.f32.gmra.mrb[24].mxu1 %v34859_v28  ;;  %v34918_v28 = vld [vmem:[#allocation89_spill] sm:$0xff] }
 0x65e   : > { %22216 = vmatprep.mubr.f32.mxu1 %v34860_v59  ;;  %v34919_v59 = vld [vmem:[#allocation136_spill] sm:$0xff] }
 0x65f   : > { %23732 = vmatmul.mubr.f32.gmra.mrb[28].mxu0 %v34863_v22  ;;  %v34922_v22 = vld [vmem:[#allocation95_spill] sm:$0xff] }
 0x660   : > { %23734 = vmatprep.mubr.f32.mxu0 %v34864_v26  ;;  %v34923_v26 = vld [vmem:[#allocation16_spill] sm:$0xff] }
 0x661   : > { %22217 = vmatmul.mubr.f32.gmra.mrb[26].mxu1 %v34865_v52  ;;  %v34924_v52 = vld [vmem:[#allocation164_spill] sm:$0xff] }
 0x662   : > { %22219 = vmatprep.mubr.f32.mxu1 %v34868_v51  ;;  %v34927_v51 = vld [vmem:[#allocation80_spill] sm:$0xff] }
 0x663   : > { %23735 = vmatmul.mubr.f32.gmra.mrb[30].mxu0 %v34869_v44  ;;  %v34929_v44 = vld [vmem:[#allocation111_spill] sm:$0xff] }
 0x664   : > { %23745 = vmatprep.mubr.f32.mxu0 %v34870_v57 }
 0x665   : > { %22220 = vmatmul.mubr.f32.gmra.mrb[28].mxu1 %v34871_v35  ;;  %v34930_v35 = vld [vmem:[#allocation113_spill] sm:$0xff] }
 0x666   : > { %22222 = vmatprep.mubr.f32.mxu1 %v8654_v0  ;;  %v34928_v0 = vld [vmem:[#allocation226_spill] sm:$0xff] }
 0x667   : > { %23746 = vmatmul.mubr.f32.vlgmr.msra.gmra.mrb[0].mxu0 %v34872_v63 }
 0x668   : > { %23748 = vmatprep.mubr.f32.mxu0 %v34873_v3  ;;  %24276 = vmatpush3.bf16.msra.mxu0 %v34728_v39  ;;  %v34879_v39 = vld [vmem:[#allocation70_spill] sm:$0xff] }
 0x669   : > { %22223 = vmatmul.mubr.f32.gmra.mrb[30].mxu1 %v8664_v37  ;;  %24278 = vmatprep.subr.bf16.mxu0 %v34775_v47  ;;  %v34931_v37 = vld [vmem:[#allocation251_spill] sm:$0xff] }
 0x66a   : > { %22233 = vmatprep.mubr.f32.mxu1 %v34874_v33  ;;  %v34932_v33 = vld [vmem:[#allocation117_spill] sm:$0xff] }
 0x66b   : > { %23749 = vmatmul.mubr.f32.gmra.mrb[2].mxu0 %v34875_v38 }
 0x66c   : > { %23751 = vmatprep.mubr.f32.mxu0 %v34876_v5  ;;  %24280 = vmatpush3.bf16.msra.mxu0 %v34775_v47  ;;  %v34885_v47 = vld [vmem:[#allocation25_spill] sm:$0xff] }
 0x66d   : > { %22234 = vmatmul.mubr.f32.vlgmr.msra.gmra.mrb[0].mxu1 %v34877_v12  ;;  %v34934_v12 = vld [vmem:[#allocation124_spill] sm:$0xff] }
 0x66e   : > { %24060 = vmatpush3.bf16.msra.mxu1 %v31377_v6  ;;  %22236 = vmatprep.mubr.f32.mxu1 %v34878_v27  ;;  %v34887_v6 = vld [vmem:[#allocation200_spill] sm:$0xff]  ;;  %v34935_v27 = vld [vmem:[#allocation13_spill] sm:$0xff] }
 0x66f   : > { %23752 = vmatmul.mubr.f32.gmra.mrb[4].mxu0 %v34879_v39  ;;  %24062 = vmatprep.subr.bf16.mxu1 %v24061_v62 }
 0x670   : > { %23754 = vmatprep.mubr.f32.mxu0 %v34880_v25 }
 0x671   : > { %22237 = vmatmul.mubr.f32.gmra.mrb[2].mxu1 %v34881_v10  ;;  %v34936_v10 = vld [vmem:[#allocation14_spill] sm:$0xff] }
 0x672   : > { %22239 = vmatprep.mubr.f32.mxu1 %v34882_v41  ;;  %24064 = vmatpush3.bf16.msra.mxu1 %v24061_v62  ;;  %v34933_v62 = vld [vmem:[#allocation120_spill] sm:$0xff]  ;;  %v34937_v41 = vld [vmem:[#allocation18_spill] sm:$0xff] }
 0x673   : > { %23755 = vmatmul.mubr.f32.gmra.mrb[6].mxu0 %v34883_v43 }
 0x674   : > { %23757 = vmatprep.mubr.f32.mxu0 %v34884_v23 }
 0x675   : > { %22240 = vmatmul.mubr.f32.gmra.mrb[4].mxu1 %v34885_v47  ;;  %v34947_v47 = vld [vmem:[#allocation54_spill] sm:$0xff] }
 0x676   : > { %22242 = vmatprep.mubr.f32.mxu1 %v34886_v55  ;;  %v34948_v55 = vld [vmem:[#allocation59_spill] sm:$0xff] }
 0x677   : > { %23758 = vmatmul.mubr.f32.gmra.mrb[8].mxu0 %v34887_v6 }
 0x678   : > { %23760 = vmatprep.mubr.f32.mxu0 %v34888_v32 }
 0x679   : > { %22243 = vmatmul.mubr.f32.gmra.mrb[6].mxu1 %v34889_v36  ;;  %v34951_v36 = vld [vmem:[#allocation74_spill] sm:$0xff] }
 0x67a   : > { %22245 = vmatprep.mubr.f32.mxu1 %v34890_v21  ;;  %v34952_v21 = vld [vmem:[#allocation77_spill] sm:$0xff] }
 0x67b   : > { %23761 = vmatmul.mubr.f32.gmra.mrb[10].mxu0 %v34891_v11 }
 0x67c   : > { %23763 = vmatprep.mubr.f32.mxu0 %v34892_v40 }
 0x67d   : > { %22246 = vmatmul.mubr.f32.gmra.mrb[8].mxu1 %v34893_v56  ;;  %v34955_v56 = vld [vmem:[#allocation88_spill] sm:$0xff] }
 0x67e   : > { %22248 = vmatprep.mubr.f32.mxu1 %v34894_v42  ;;  %v34956_v42 = vld [vmem:[#allocation93_spill] sm:$0xff] }
 0x67f   : > { %23764 = vmatmul.mubr.f32.gmra.mrb[12].mxu0 %v34895_v20 }
 0x680   : > { %23766 = vmatprep.mubr.f32.mxu0 %v34896_v49 }
 0x681   : > { %22249 = vmatmul.mubr.f32.gmra.mrb[10].mxu1 %v34897_v16  ;;  %v34959_v16 = vld [vmem:[#allocation102_spill] sm:$0xff] }
 0x682   : > { %22251 = vmatprep.mubr.f32.mxu1 %v34898_v53  ;;  %v34960_v53 = vld [vmem:[#allocation110_spill] sm:$0xff] }
 0x683   : > { %23767 = vmatmul.mubr.f32.gmra.mrb[14].mxu0 %v34899_v58 }
 0x684   : > { %23769 = vmatprep.mubr.f32.mxu0 %v34900_v2 }
 0x685   : > { %22252 = vmatmul.mubr.f32.gmra.mrb[12].mxu1 %v34901_v60  ;;  %v34963_v60 = vld [vmem:[#allocation119_spill] sm:$0xff] }
 0x686   : > { %22254 = vmatprep.mubr.f32.mxu1 %v34902_v15  ;;  %v34964_v15 = vld [vmem:[#allocation123_spill] sm:$0xff] }
 0x687   : > { %23770 = vmatmul.mubr.f32.gmra.mrb[16].mxu0 %v34903_v31 }
 0x688   : > { %23772 = vmatprep.mubr.f32.mxu0 %v34904_v46 }
 0x689   : > { %22255 = vmatmul.mubr.f32.gmra.mrb[14].mxu1 %v34905_v18 }
 0x68a   : > { %22257 = vmatprep.mubr.f32.mxu1 %v34906_v34 }
 0x68b   : > { %23773 = vmatmul.mubr.f32.gmra.mrb[18].mxu0 %v34907_v1 }
 0x68c   : > { %23775 = vmatprep.mubr.f32.mxu0 %v34908_v50 }
 0x68d   : > { %22258 = vmatmul.mubr.f32.gmra.mrb[16].mxu1 %v34909_v61 }
 0x68e   : > { %22260 = vmatprep.mubr.f32.mxu1 %v34910_v13 }
 0x68f   : > { %23776 = vmatmul.mubr.f32.gmra.mrb[20].mxu0 %v34911_v29 }
 0x690   : > { %23778 = vmatprep.mubr.f32.mxu0 %v34912_v48 }
 0x691   : > { %22261 = vmatmul.mubr.f32.gmra.mrb[18].mxu1 %v34913_v7 }
 0x692   : > { %22263 = vmatprep.mubr.f32.mxu1 %v34914_v45  ;;  %v31615_v45 = vld [vmem:[%s32233_s5] ss:$0 sm:$0xff] }
 0x693   : > { %23779 = vmatmul.mubr.f32.gmra.mrb[22].mxu0 %v34915_v54 }
 0x694   : > { %23781 = vmatprep.mubr.f32.mxu0 %v34916_v30 }
 0x695   : > { %22264 = vmatmul.mubr.f32.gmra.mrb[20].mxu1 %v34917_v8 }
 0x696   : > { %22266 = vmatprep.mubr.f32.mxu1 %v34918_v28 }
 0x697   : > { %23782 = vmatmul.mubr.f32.gmra.mrb[24].mxu0 %v34919_v59 }
 0x698   : > { %23784 = vmatprep.mubr.f32.mxu0 %v34920_v4 }
 0x699   : > { %22267 = vmatmul.mubr.f32.gmra.mrb[22].mxu1 %v34921_v17 }
 0x69a   : > { %22269 = vmatprep.mubr.f32.mxu1 %v34922_v22 }
 0x69b   : > { %23785 = vmatmul.mubr.f32.gmra.mrb[26].mxu0 %v34923_v26 }
 0x69c   : > { %23787 = vmatprep.mubr.f32.mxu0 %v34924_v52 }
 0x69d   : > { %22270 = vmatmul.mubr.f32.gmra.mrb[24].mxu1 %v34925_v19 }
 0x69e   : > { %22272 = vmatprep.mubr.f32.mxu1 %v34926_v9 }
 0x69f   : > { %23788 = vmatmul.mubr.f32.gmra.mrb[28].mxu0 %v34927_v51 }
 0x6a0   : > { %23790 = vmatprep.mubr.f32.mxu0 %v34928_v0 }
 0x6a1   : > { %22273 = vmatmul.mubr.f32.gmra.mrb[26].mxu1 %v34929_v44 }
 0x6a2   : > { %22275 = vmatprep.mubr.f32.mxu1 %v34930_v35 }
 0x6a3   : > { %23791 = vmatmul.mubr.f32.gmra.mrb[30].mxu0 %v34931_v37 }
 0x6a4   : > { %23801 = vmatprep.mubr.f32.mxu0 %v34870_v57  ;;  %v34938_v57 = vld [vmem:[#allocation23_spill] sm:$0xff] }
 0x6a5   : > { %22276 = vmatmul.mubr.f32.gmra.mrb[28].mxu1 %v34932_v33 }
 0x6a6   : > { %22278 = vmatprep.mubr.f32.mxu1 %v34933_v62 }
 0x6a7   : > { %23802 = vmatmul.mubr.f32.vlgmr.msra.gmra.mrb[0].mxu0 %v34872_v63  ;;  %v34939_v63 = vld [vmem:[#allocation24_spill] sm:$0xff] }
 0x6a8   : > { %23804 = vmatprep.mubr.f32.mxu0 %v34873_v3  ;;  %v34940_v3 = vld [vmem:[#allocation28_spill] sm:$0xff] }
 0x6a9   : > { %22279 = vmatmul.mubr.f32.gmra.mrb[30].mxu1 %v34934_v12 }
 0x6aa   : > { %22289 = vmatprep.mubr.f32.mxu1 %v34935_v27 }
 0x6ab   : > { %23805 = vmatmul.mubr.f32.gmra.mrb[2].mxu0 %v34875_v38  ;;  %v34941_v38 = vld [vmem:[#allocation36_spill] sm:$0xff] }
 0x6ac   : > { %23807 = vmatprep.mubr.f32.mxu0 %v34876_v5  ;;  %v34942_v5 = vld [vmem:[#allocation38_spill] sm:$0xff] }
 0x6ad   : > { %22290 = vmatmul.mubr.f32.vlgmr.msra.gmra.mrb[0].mxu1 %v34936_v10 }
 0x6ae   : > { %22292 = vmatprep.mubr.f32.mxu1 %v34937_v41 }
 0x6af   : > { %23808 = vmatmul.mubr.f32.gmra.mrb[4].mxu0 %v34879_v39  ;;  %v34943_v39 = vld [vmem:[#allocation39_spill] sm:$0xff] }
 0x6b0   : > { %23810 = vmatprep.mubr.f32.mxu0 %v34880_v25  ;;  %v34944_v25 = vld [vmem:[#allocation41_spill] sm:$0xff] }
 0x6b1   : > { %22293 = vmatmul.mubr.f32.gmra.mrb[2].mxu1 %v34938_v57 }
 0x6b2   : > { %22295 = vmatprep.mubr.f32.mxu1 %v34939_v63 }
 0x6b3   : > { %23811 = vmatmul.mubr.f32.gmra.mrb[6].mxu0 %v34883_v43  ;;  %v34945_v43 = vld [vmem:[#allocation46_spill] sm:$0xff] }
 0x6b4   : > { %23813 = vmatprep.mubr.f32.mxu0 %v34884_v23  ;;  %v34946_v23 = vld [vmem:[#allocation51_spill] sm:$0xff] }
 0x6b5   : > { %22296 = vmatmul.mubr.f32.gmra.mrb[4].mxu1 %v34940_v3 }
 0x6b6   : > { %22298 = vmatprep.mubr.f32.mxu1 %v34941_v38 }
 0x6b7   : > { %23814 = vmatmul.mubr.f32.gmra.mrb[8].mxu0 %v34887_v6  ;;  %v34949_v6 = vld [vmem:[#allocation62_spill] sm:$0xff] }
 0x6b8   : > { %23816 = vmatprep.mubr.f32.mxu0 %v34888_v32  ;;  %v34950_v32 = vld [vmem:[#allocation68_spill] sm:$0xff] }
 0x6b9   : > { %22299 = vmatmul.mubr.f32.gmra.mrb[6].mxu1 %v34942_v5 }
 0x6ba   : > { %22301 = vmatprep.mubr.f32.mxu1 %v34943_v39 }
 0x6bb   : > { %23817 = vmatmul.mubr.f32.gmra.mrb[10].mxu0 %v34891_v11  ;;  %v34953_v11 = vld [vmem:[#allocation78_spill] sm:$0xff] }
 0x6bc   : > { %23819 = vmatprep.mubr.f32.mxu0 %v34892_v40  ;;  %v34954_v40 = vld [vmem:[#allocation86_spill] sm:$0xff] }
 0x6bd   : > { %22302 = vmatmul.mubr.f32.gmra.mrb[8].mxu1 %v34944_v25 }
 0x6be   : > { %22304 = vmatprep.mubr.f32.mxu1 %v34945_v43 }
 0x6bf   : > { %23820 = vmatmul.mubr.f32.gmra.mrb[12].mxu0 %v34895_v20  ;;  %v34957_v20 = vld [vmem:[#allocation97_spill] sm:$0xff] }
 0x6c0   : > { %23822 = vmatprep.mubr.f32.mxu0 %v34896_v49  ;;  %v34958_v49 = vld [vmem:[#allocation101_spill] sm:$0xff] }
 0x6c1   : > { %22305 = vmatmul.mubr.f32.gmra.mrb[10].mxu1 %v34946_v23 }
 0x6c2   : > { %22307 = vmatprep.mubr.f32.mxu1 %v34947_v47 }
 0x6c3   : > { %23823 = vmatmul.mubr.f32.gmra.mrb[14].mxu0 %v34899_v58  ;;  %v34961_v58 = vld [vmem:[#allocation112_spill] sm:$0xff] }
 0x6c4   : > { %23825 = vmatprep.mubr.f32.mxu0 %v34900_v2  ;;  %v34962_v2 = vld [vmem:[#allocation116_spill] sm:$0xff] }
 0x6c5   : > { %22308 = vmatmul.mubr.f32.gmra.mrb[12].mxu1 %v34948_v55 }
 0x6c6   : > { %22310 = vmatprep.mubr.f32.mxu1 %v34949_v6 }
 0x6c7   : > { %23826 = vmatmul.mubr.f32.gmra.mrb[16].mxu0 %v34903_v31 }
 0x6c8   : > { %23828 = vmatprep.mubr.f32.mxu0 %v34904_v46 }
 0x6c9   : > { %22311 = vmatmul.mubr.f32.gmra.mrb[14].mxu1 %v34950_v32 }
 0x6ca   : > { %22313 = vmatprep.mubr.f32.mxu1 %v34951_v36 }
 0x6cb   : > { %23829 = vmatmul.mubr.f32.gmra.mrb[18].mxu0 %v34907_v1 }
 0x6cc   : > { %23831 = vmatprep.mubr.f32.mxu0 %v34908_v50  ;;  %v31602_v50 = vld [vmem:[%s32230_s2] ss:$0 sm:$0xff] }
 0x6cd   : > { %22314 = vmatmul.mubr.f32.gmra.mrb[16].mxu1 %v34952_v21 }
 0x6ce   : > { %22316 = vmatprep.mubr.f32.mxu1 %v34953_v11 }
 0x6cf   : > { %23832 = vmatmul.mubr.f32.gmra.mrb[20].mxu0 %v34911_v29  ;;  %v31607_v29 = vld [vmem:[%s32231_s3] ss:$0 sm:$0xff] }
 0x6d0   : > { %23834 = vmatprep.mubr.f32.mxu0 %v34912_v48 }
 0x6d1   : > { %22317 = vmatmul.mubr.f32.gmra.mrb[18].mxu1 %v34954_v40 }
 0x6d2   : > { %22319 = vmatprep.mubr.f32.mxu1 %v34955_v56 }
 0x6d3   : > { %23835 = vmatmul.mubr.f32.gmra.mrb[22].mxu0 %v34915_v54 }
 0x6d4   : > { %23837 = vmatprep.mubr.f32.mxu0 %v34916_v30 }
 0x6d5   : > { %22320 = vmatmul.mubr.f32.gmra.mrb[20].mxu1 %v34956_v42 }
 0x6d6   : > { %22322 = vmatprep.mubr.f32.mxu1 %v34957_v20 }
 0x6d7   : > { %23838 = vmatmul.mubr.f32.gmra.mrb[24].mxu0 %v34919_v59 }
 0x6d8   : > { %23840 = vmatprep.mubr.f32.mxu0 %v34920_v4 }
 0x6d9   : > { %22323 = vmatmul.mubr.f32.gmra.mrb[22].mxu1 %v34958_v49 }
 0x6da   : > { %22325 = vmatprep.mubr.f32.mxu1 %v34959_v16 }
 0x6db   : > { %23841 = vmatmul.mubr.f32.gmra.mrb[26].mxu0 %v34923_v26 }
 0x6dc   : > { %23843 = vmatprep.mubr.f32.mxu0 %v34924_v52 }
 0x6dd   : > { %22326 = vmatmul.mubr.f32.gmra.mrb[24].mxu1 %v34960_v53 }
 0x6de   : > { %22328 = vmatprep.mubr.f32.mxu1 %v34961_v58 }
 0x6df   : > { %23844 = vmatmul.mubr.f32.gmra.mrb[28].mxu0 %v34927_v51 }
 0x6e0   : > { %23846 = vmatprep.mubr.f32.mxu0 %v34928_v0 }
 0x6e1   : > { %22329 = vmatmul.mubr.f32.gmra.mrb[26].mxu1 %v34962_v2 }
 0x6e2   : > { %22331 = vmatprep.mubr.f32.mxu1 %v34963_v60 }
 0x6e3   : > { %23847 = vmatmul.mubr.f32.gmra.mrb[30].mxu0 %v34931_v37 }
 0x6e5   : > { %22332 = vmatmul.mubr.f32.gmra.mrb[28].mxu1 %v34964_v15 }
 0x6e6   : > { %22334 = vmatprep.mubr.f32.mxu1 %v34861_v14 }
 0x6e9   : > { %22335 = vmatmul.mubr.f32.gmra.mrb[30].mxu1 %v34866_v24 }
 0x77a   : > { %v23803_v31 = vpop.f32.mrb[0].mxu0 }
 0x77b   : > { %v17842_v46 = vpop.f32.mrb[1].mxu0 }
 0x77e   : > { %v23806_v18 = vpop.f32.mrb[2].mxu0 }
 0x77f   : > { %v17854_v34 = vpop.f32.mrb[3].mxu0 }
 0x780   : > { %v22291_v1 = vpop.f32.mrb[0].mxu1 }
 0x781   : > { %v24281_v61 = vadd.f32 %v23803_v31, %v22291_v1  ;;  %v9023_v13 = vpop.f32.mrb[1].mxu1 }
 0x782   : > { %v24282_v14 = vadd.f32 %v17842_v46, %v9023_v13  ;;  %v23809_v48 = vpop.f32.mrb[4].mxu0 }
 0x783   : > { %v31610_v24 = vadd.f32 %v24281_v61, %v31602_v50  ;;  %v17866_v7 = vpop.f32.mrb[5].mxu0 }
 0x784   : > { %v31618_v54 = vadd.f32 %v24282_v14, %v31602_v50  ;;  %v22294_v30 = vpop.f32.mrb[2].mxu1  ;;  %v31695_v14 = vld [vmem:[%s32232_s4] ss:$0 sm:$0xff] }
 0x785   : > { %v31622_v8 = vmul.f32 %v31607_v29, %v31610_v24  ;;  %v24283_v28 = vadd.f32 %v23806_v18, %v22294_v30  ;;  %v9037_v59 = vpop.f32.mrb[3].mxu1 }
 0x786   : > { %v31626_v4 = vmul.f32 %v31607_v29, %v31618_v54  ;;  %v24284_v17 = vadd.f32 %v17854_v34, %v9037_v59  ;;  %v23812_v22 = vpop.f32.mrb[6].mxu0 }
 0x787   : > { %v18150_v26 = vmul.f32 %v31615_v45, %v31622_v8  ;;  %v31631_v52 = vadd.f32 %v24283_v28, %v31602_v50  ;;  %v17878_v19 = vpop.f32.mrb[7].mxu0 }
 0x788   : > { %v18149_v9 = vmul.f32 %v31615_v45, %v31626_v4  ;;  %v31636_v51 = vadd.f32 %v24284_v17, %v31602_v50  ;;  %v22297_v0 = vpop.f32.mrb[4].mxu1 }
 0x789   : > { %v18843_v44 = vmul.f32 -1.442695, %v18150_v26  ;;  %v31640_v35 = vmul.f32 %v31607_v29, %v31631_v52  ;;  %v24285_v37 = vadd.f32 %v23809_v48, %v22297_v0  ;;  %v9051_v33 = vpop.f32.mrb[5].mxu1 }
 0x78a   : > { %v18842_v62 = vmul.f32 -1.442695, %v18149_v9  ;;  %v31644_v12 = vmul.f32 %v31607_v29, %v31636_v51  ;;  %v24286_v27 = vadd.f32 %v17866_v7, %v9051_v33  ;;  %v23815_v10 = vpop.f32.mrb[8].mxu0  ;;  %v31712_v33 = vmul.f32 %v31695_v14, %v31610_v24 }
 0x78b   : > { %26035 = vpow2.f32 %v18843_v44  ;;  %v18152_v41 = vmul.f32 %v31615_v45, %v31640_v35  ;;  %v31649_v57 = vadd.f32 %v24285_v37, %v31602_v50  ;;  %v17890_v63 = vpop.f32.mrb[9].mxu0 }
 0x78c   : > { %26037 = vpow2.f32 %v18842_v62  ;;  %v18151_v3 = vmul.f32 %v31615_v45, %v31644_v12  ;;  %v31654_v38 = vadd.f32 %v24286_v27, %v31602_v50  ;;  %v22300_v5 = vpop.f32.mrb[6].mxu1 }
 0x78d   : > { %v18845_v39 = vmul.f32 -1.442695, %v18152_v41  ;;  %v31658_v25 = vmul.f32 %v31607_v29, %v31649_v57  ;;  %v24287_v43 = vadd.f32 %v23812_v22, %v22300_v5  ;;  %v9065_v23 = vpop.f32.mrb[7].mxu1 }
 0x78e   : > { %v18844_v47 = vmul.f32 -1.442695, %v18151_v3  ;;  %v31662_v55 = vmul.f32 %v31607_v29, %v31654_v38  ;;  %v24288_v6 = vadd.f32 %v17878_v19, %v9065_v23  ;;  %v23818_v32 = vpop.f32.mrb[10].mxu0 }
 0x78f   : > { %26039 = vpow2.f32 %v18845_v39  ;;  %v18154_v36 = vmul.f32 %v31615_v45, %v31658_v25  ;;  %v31667_v21 = vadd.f32 %v24287_v43, %v31602_v50  ;;  %v17902_v11 = vpop.f32.mrb[11].mxu0 }
 0x790   : > { %26041 = vpow2.f32 %v18844_v47  ;;  %v18153_v40 = vmul.f32 %v31615_v45, %v31662_v55  ;;  %v31672_v56 = vadd.f32 %v24288_v6, %v31602_v50  ;;  %v22303_v42 = vpop.f32.mrb[8].mxu1 }
 0x791   : > { %v18847_v20 = vmul.f32 -1.442695, %v18154_v36  ;;  %v31676_v49 = vmul.f32 %v31607_v29, %v31667_v21  ;;  %v24289_v16 = vadd.f32 %v23815_v10, %v22303_v42  ;;  %v9079_v53 = vpop.f32.mrb[9].mxu1 }
 0x792   : > { %v18846_v58 = vmul.f32 -1.442695, %v18153_v40  ;;  %v31680_v2 = vmul.f32 %v31607_v29, %v31672_v56  ;;  %v24290_v60 = vadd.f32 %v17890_v63, %v9079_v53  ;;  %v23821_v15 = vpop.f32.mrb[12].mxu0  ;;  %v31718_v63 = vmul.f32 %v31695_v14, %v31618_v54 }
 0x793   : > { %26043 = vpow2.f32 %v18847_v20  ;;  %v18156_v31 = vmul.f32 %v31615_v45, %v31676_v49  ;;  %v31685_v46 = vadd.f32 %v24289_v16, %v31602_v50  ;;  %v17914_v18 = vpop.f32.mrb[13].mxu0  ;;  %v31733_v40 = vmul.f32 %v31695_v14, %v31631_v52 }
 0x794   : > { %26045 = vpow2.f32 %v18846_v58  ;;  %v18155_v34 = vmul.f32 %v31615_v45, %v31680_v2  ;;  %v31690_v1 = vadd.f32 %v24290_v60, %v31602_v50  ;;  %v22306_v61 = vpop.f32.mrb[10].mxu1 }
 0x795   : > { %v26036_v13 = vpop.eup %26035  ;;  %v18849_v48 = vmul.f32 -1.442695, %v18156_v31  ;;  %v31699_v7 = vmul.f32 %v31607_v29, %v31685_v46  ;;  %v24291_v30 = vadd.f32 %v23818_v32, %v22306_v61  ;;  %v9093_v28 = vpop.f32.mrb[11].mxu1 }
 0x796   : > { %v26038_v59 = vpop.eup %26037  ;;  %v18278_v17 = vadd.f32 1.0, %v26036_v13  ;;  %v18848_v22 = vmul.f32 -1.442695, %v18155_v34  ;;  %v31703_v26 = vmul.f32 %v31607_v29, %v31690_v1  ;;  %v23824_v19 = vpop.f32.mrb[14].mxu0  ;;  %v24292_v27 = vadd.f32 %v17902_v11, %v9093_v28 }
 0x797   : > { %v18277_v9 = vadd.f32 1.0, %v26038_v59  ;;  %26047 = vpow2.f32 %v18849_v48  ;;  %v18158_v0 = vmul.f32 %v31615_v45, %v31699_v7  ;;  %v31708_v44 = vadd.f32 %v24291_v30, %v31602_v50  ;;  %v17926_v37 = vpop.f32.mrb[15].mxu0 }
 0x798   : > { %26049 = vrcp.f32 %v18278_v17  ;;  %v18157_v62 = vmul.f32 %v31615_v45, %v31703_v26  ;;  %v22309_v10 = vpop.f32.mrb[12].mxu1  ;;  %v31725_v47 = vadd.f32 %v24292_v27, %v31602_v50  ;;  %v31752_v48 = vmul.f32 %v31695_v14, %v31636_v51 }
 0x799   : > { %v26040_v41 = vpop.eup %26039  ;;  %26051 = vrcp.f32 %v18277_v9  ;;  %v18851_v3 = vmul.f32 -1.442695, %v18158_v0  ;;  %v31722_v5 = vmul.f32 %v31607_v29, %v31708_v44  ;;  %v9107_v39 = vpop.f32.mrb[13].mxu1  ;;  %v24293_v36 = vadd.f32 %v23821_v15, %v22309_v10 }
 0x79a   : > { %v26042_v43 = vpop.eup %26041  ;;  %v18280_v24 = vadd.f32 1.0, %v26040_v41  ;;  %26053 = vpow2.f32 %v18848_v22  ;;  %v18850_v23 = vmul.f32 -1.442695, %v18157_v62  ;;  %v23827_v6 = vpop.f32.mrb[16].mxu0  ;;  %v31737_v42 = vmul.f32 %v31607_v29, %v31725_v47 }
 0x79b   : > { %v18279_v32 = vadd.f32 1.0, %v26042_v43  ;;  %26055 = vpow2.f32 %v18851_v3  ;;  %v18160_v54 = vmul.f32 %v31615_v45, %v31722_v5  ;;  %v31729_v11 = vpop.f32.mrb[17].mxu0  ;;  %v24294_v20 = vadd.f32 %v17914_v18, %v9107_v39 }
 0x79c   : > { %26057 = vrcp.f32 %v18280_v24  ;;  %v22312_v16 = vpop.f32.mrb[14].mxu1  ;;  %v31740_v60 = vadd.f32 %v24293_v36, %v31602_v50  ;;  %v18159_v52 = vmul.f32 %v31615_v45, %v31737_v42  ;;  %v31762_v17 = vmul.f32 %v31695_v14, %v31649_v57 }
 0x79d   : > { %v26044_v53 = vpop.eup %26043  ;;  %26059 = vrcp.f32 %v18279_v32  ;;  %v18853_v58 = vmul.f32 -1.442695, %v18160_v54  ;;  %v24295_v15 = vadd.f32 %v23824_v19, %v22312_v16  ;;  %v9121_v31 = vpop.f32.mrb[15].mxu1  ;;  %v31746_v13 = vadd.f32 %v24294_v20, %v31602_v50 }
 0x79e   : > { %v26046_v34 = vpop.eup %26045  ;;  %v18282_v61 = vadd.f32 1.0, %v26044_v53  ;;  %26061 = vpow2.f32 %v18850_v23  ;;  %v31748_v18 = vpop.f32.mrb[18].mxu0  ;;  %v31756_v28 = vmul.f32 %v31607_v29, %v31740_v60  ;;  %v18852_v22 = vmul.f32 -1.442695, %v18159_v52 }
 0x79f   : > { %v18281_v30 = vadd.f32 1.0, %v26046_v34  ;;  %26063 = vpow2.f32 %v18853_v58  ;;  %v31758_v59 = vpop.f32.mrb[19].mxu0  ;;  %v31766_v19 = vmul.f32 %v31607_v29, %v31746_v13  ;;  %v31775_v62 = vadd.f32 %v24295_v15, %v31602_v50 }
 0x7a0   : > { %26065 = vrcp.f32 %v18282_v61  ;;  %v22315_v51 = vpop.f32.mrb[16].mxu1  ;;  %v18162_v0 = vmul.f32 %v31615_v45, %v31756_v28  ;;  %v24296_v27 = vadd.f32 %v17926_v37, %v9121_v31  ;;  %v31784_v32 = vmul.f32 %v31695_v14, %v31654_v38 }
 0x7a1   : > { %v26048_v9 = vpop.eup %26047  ;;  %26067 = vrcp.f32 %v18281_v30  ;;  %v9135_v57 = vpop.f32.mrb[17].mxu1  ;;  %v18161_v3 = vmul.f32 %v31615_v45, %v31766_v19  ;;  %v24297_v39 = vadd.f32 %v23827_v6, %v22315_v51  ;;  %v31788_v37 = vmul.f32 %v31607_v29, %v31775_v62 }
 0x7a2   : > { %v26050_v10 = vpop.eup %26049  ;;  %v18284_v41 = vadd.f32 1.0, %v26048_v9  ;;  %26069 = vpow2.f32 %v18852_v22  ;;  %v31779_v43 = vpop.f32.mrb[20].mxu0  ;;  %v18855_v54 = vmul.f32 -1.442695, %v18162_v0  ;;  %v31794_v53 = vadd.f32 %v24296_v27, %v31602_v50 }
 0x7a3   : > { %v26052_v24 = vpop.eup %26051  ;;  %v18374_v23 = vmul.f32 %v26050_v10, %v31622_v8  ;;  %v31790_v36 = vpop.f32.mrb[21].mxu0  ;;  %v18854_v6 = vmul.f32 -1.442695, %v18161_v3  ;;  %v18164_v31 = vmul.f32 %v31615_v45, %v31788_v37 }
 0x7a4   : > { %v26054_v20 = vpop.eup %26053  ;;  %v18373_v16 = vmul.f32 %v26052_v24, %v31626_v4  ;;  %26071 = vrcp.f32 %v18284_v41  ;;  %v22318_v8 = vpop.f32.mrb[18].mxu1  ;;  %v31804_v30 = vmul.f32 %v31607_v29, %v31794_v53 }
 0x7a5   : > { %v26056_v58 = vpop.eup %26055  ;;  %v18445_v38 = vadd.f32 %v31712_v33, %v18374_v23  ;;  %v18283_v15 = vadd.f32 1.0, %v26054_v20  ;;  %26073 = vpow2.f32 %v18855_v54  ;;  %v31799_v34 = vpop.f32.mrb[19].mxu1  ;;  %v18857_v9 = vmul.f32 -1.442695, %v18164_v31 }
 0x7a6   : > { %v26058_v61 = vpop.eup %26057  ;;  %v18444_v4 = vadd.f32 %v31718_v63, %v18373_v16  ;;  %v18286_v52 = vadd.f32 1.0, %v26056_v58  ;;  %26075 = vpow2.f32 %v18854_v6  ;;  %v31806_v22 = vpop.f32.mrb[22].mxu0  ;;  %v31816_v63 = vmul.f32 %v31695_v14, %v31667_v21 }
 0x7a7   : > { %v26060_v51 = vpop.eup %26059  ;;  %18478 = vst.msk [vmem:[%s31809_s18 + $0x8] sm:$0xff] %vm18476_vm1, %v18445_v38  ;;  %v18376_v33 = vmul.f32 %v26058_v61, %v31640_v35  ;;  %26077 = vrcp.f32 %v18283_v15  ;;  %v31818_v0 = vpop.f32.mrb[23].mxu0  ;;  %v18163_v41 = vmul.f32 %v31615_v45, %v31804_v30  ;;  %v31826_v35 = vadd.f32 %v24297_v39, %v31602_v50 }
 0x7a8   : > { %v26062_v27 = vpop.eup %26061  ;;  %18477 = vst.msk [vmem:[%s31809_s18] sm:$0xff] %vm18476_vm1, %v18444_v4  ;;  %v18375_v10 = vmul.f32 %v26060_v51, %v31644_v12  ;;  %26079 = vrcp.f32 %v18286_v52  ;;  %v22321_v3 = vpop.f32.mrb[20].mxu1  ;;  %v24298_v54 = vadd.f32 %v31729_v11, %v9135_v57  ;;  %v18418_v11 = vmul.f32 %v31695_v14, %v31672_v56 }
 0x7a9   : > { %v26064_v21 = vpop.eup %26063  ;;  %v18447_v24 = vadd.f32 %v31733_v40, %v18376_v33  ;;  %v18285_v23 = vadd.f32 1.0, %v26062_v27  ;;  %26081 = vpow2.f32 %v18857_v9  ;;  %v31830_v20 = vpop.f32.mrb[21].mxu1  ;;  %v18856_v58 = vmul.f32 -1.442695, %v18163_v41 }
 0x7aa   : > { %v26066_v12 = vpop.eup %26065  ;;  %v18446_v16 = vadd.f32 %v31752_v48, %v18375_v10  ;;  %v18288_v6 = vadd.f32 1.0, %v26064_v21  ;;  %v31835_v39 = vmul.f32 %v31607_v29, %v31826_v35  ;;  %v31837_v38 = vpop.f32.mrb[24].mxu0  ;;  %v31845_v57 = vadd.f32 %v24298_v54, %v31602_v50 }
 0x7ab   : > { %v26068_v15 = vpop.eup %26067  ;;  %18480 = vst.msk [vmem:[%s31809_s18 + $0x18] sm:$0xff] %vm18476_vm1, %v18447_v24  ;;  %v18378_v40 = vmul.f32 %v26066_v12, %v31658_v25  ;;  %26083 = vrcp.f32 %v18285_v23  ;;  %v31847_v48 = vpop.f32.mrb[25].mxu0  ;;  %v24299_v25 = vadd.f32 %v31748_v18, %v22318_v8  ;;  %v18421_v10 = vmul.f32 %v31695_v14, %v31685_v46 }
 0x7ac   : > { %v26070_v31 = vpop.eup %26069  ;;  %18479 = vst.msk [vmem:[%s31809_s18 + $0x10] sm:$0xff] %vm18476_vm1, %v18446_v16  ;;  %v18377_v61 = vmul.f32 %v26068_v15, %v31662_v55  ;;  %26085 = vrcp.f32 %v18288_v6  ;;  %v18166_v4 = vmul.f32 %v31615_v45, %v31835_v39  ;;  %v22324_v52 = vpop.f32.mrb[22].mxu1  ;;  %v31858_v33 = vmul.f32 %v31607_v29, %v31845_v57 }
 0x7ad   : > { %v18449_v56 = vadd.f32 %v31762_v17, %v18378_v40  ;;  %v18287_v51 = vadd.f32 1.0, %v26070_v31  ;;  %26087 = vpow2.f32 %v18856_v58  ;;  %v9177_v9 = vpop.f32.mrb[23].mxu1  ;;  %v31864_v18 = vadd.f32 %v24299_v25, %v31602_v50 }
 0x7ae   : > { %v26072_v27 = vpop.eup %26071  ;;  %v18448_v55 = vadd.f32 %v31784_v32, %v18377_v61  ;;  %v18859_v41 = vmul.f32 -1.442695, %v18166_v4  ;;  %v31866_v8 = vpop.f32.mrb[26].mxu0  ;;  %v18165_v24 = vmul.f32 %v31615_v45, %v31858_v33  ;;  %v24300_v32 = vadd.f32 %v31758_v59, %v31799_v34 }
 0x7af   : > { %v26074_v17 = vpop.eup %26073  ;;  %18482 = vst.msk [vmem:[%s31809_s18 + $0x28] sm:$0xff] %vm18476_vm1, %v18449_v56  ;;  %v18380_v21 = vmul.f32 %v26072_v27, %v31676_v49  ;;  %26089 = vrcp.f32 %v18287_v51  ;;  %v31875_v23 = vpop.f32.mrb[27].mxu0  ;;  %v18420_v54 = vmul.f32 %v31695_v14, %v31690_v1  ;;  %v31883_v49 = vmul.f32 %v31607_v29, %v31864_v18 }
 0x7b0   : > { %v26076_v46 = vpop.eup %26075  ;;  %18481 = vst.msk [vmem:[%s31809_s18 + $0x20] sm:$0xff] %vm18476_vm1, %v18448_v55  ;;  %v18290_v12 = vadd.f32 1.0, %v26074_v17  ;;  %26091 = vpow2.f32 %v18859_v41  ;;  %v31885_v16 = vpop.f32.mrb[24].mxu1  ;;  %v18858_v58 = vmul.f32 -1.442695, %v18165_v24  ;;  %v31889_v15 = vadd.f32 %v24300_v32, %v31602_v50 }
 0x7b1   : > { %v26078_v6 = vpop.eup %26077  ;;  %v18451_v59 = vadd.f32 %v31816_v63, %v18380_v21  ;;  %v18289_v34 = vadd.f32 1.0, %v26076_v46  ;;  %v31891_v40 = vpop.f32.mrb[25].mxu1  ;;  %v18168_v61 = vmul.f32 %v31615_v45, %v31883_v49  ;;  %v24301_v4 = vadd.f32 %v31779_v43, %v22321_v3 }
 0x7b2   : > { %v26080_v1 = vpop.eup %26079  ;;  %v18379_v31 = vmul.f32 %v26078_v6, %v31680_v2  ;;  %26093 = vrcp.f32 %v18290_v12  ;;  %v31897_v25 = vpop.f32.mrb[28].mxu0  ;;  %v18423_v51 = vmul.f32 %v31695_v14, %v31708_v44  ;;  %v31906_v2 = vmul.f32 %v31607_v29, %v31889_v15 }
 0x7b3   : > { %v26082_v56 = vpop.eup %26081  ;;  %18484 = vst.msk [vmem:[%s31809_s18 + $0x38] sm:$0xff] %vm18476_vm1, %v18451_v59  ;;  %v18382_v63 = vmul.f32 %v26080_v1, %v31699_v7  ;;  %26095 = vrcp.f32 %v18289_v34  ;;  %v31908_v27 = vpop.f32.mrb[29].mxu0  ;;  %v18861_v3 = vmul.f32 -1.442695, %v18168_v61  ;;  %v31915_v21 = vadd.f32 %v24301_v4, %v31602_v50 }
 0x7b4   : > { %v18450_v55 = vadd.f32 %v18418_v11, %v18379_v31  ;;  %v18292_v43 = vadd.f32 1.0, %v26082_v56  ;;  %26097 = vpow2.f32 %v18858_v58  ;;  %v31910_v41 = vpop.f32.mrb[26].mxu1  ;;  %v18167_v44 = vmul.f32 %v31615_v45, %v31906_v2 }
 0x7b5   : > { %v26084_v17 = vpop.eup %26083  ;;  %v18453_v7 = vadd.f32 %v18421_v10, %v18382_v63  ;;  %v24302_v24 = vadd.f32 %v31790_v36, %v31830_v20  ;;  %v31919_v32 = vpop.f32.mrb[27].mxu1  ;;  %v24303_v12 = vadd.f32 %v31806_v22, %v22324_v52  ;;  %v24304_v10 = vadd.f32 %v31818_v0, %v9177_v9 }
 0x7b6   : > { %v26086_v11 = vpop.eup %26085  ;;  %18483 = vst.msk [vmem:[%s31809_s18 + $0x30] sm:$0xff] %vm18476_vm1, %v18450_v55  ;;  %v18381_v46 = vmul.f32 %v26084_v17, %v31703_v26  ;;  %26099 = vrcp.f32 %v18292_v43  ;;  %v31926_v6 = vpop.f32.mrb[30].mxu0  ;;  %v18860_v36 = vmul.f32 -1.442695, %v18167_v44  ;;  %v31933_v20 = vmul.f32 %v31607_v29, %v31915_v21 }
 0x7b7   : > { %v26088_v59 = vpop.eup %26087  ;;  %18486 = vst.msk [vmem:[%s31809_s18 + $0x48] sm:$0xff] %vm18476_vm1, %v18453_v7  ;;  %v18384_v34 = vmul.f32 %v26086_v11, %v31722_v5  ;;  %26101 = vpow2.f32 %v18861_v3  ;;  %v31935_v26 = vpop.f32.mrb[31].mxu0  ;;  %v18422_v22 = vmul.f32 %v31695_v14, %v31725_v47  ;;  %v31940_v52 = vadd.f32 %v24302_v24, %v31602_v50 }
 0x7b8   : > { %v18452_v58 = vadd.f32 %v18420_v54, %v18381_v46  ;;  %v18291_v0 = vadd.f32 1.0, %v26088_v59  ;;  %v31942_v9 = vpop.f32.mrb[28].mxu1  ;;  %26103 = vpow2.f32 %v18860_v36  ;;  %v18170_v31 = vmul.f32 %v31615_v45, %v31933_v20 }
 0x7b9   : > { %v26090_v5 = vpop.eup %26089  ;;  %v18455_v1 = vadd.f32 %v18423_v51, %v18384_v34  ;;  %v31947_v61 = vadd.f32 %v24303_v12, %v31602_v50  ;;  %v31949_v54 = vpop.f32.mrb[29].mxu1  ;;  %v18425_v56 = vmul.f32 %v31695_v14, %v31740_v60  ;;  %v31958_v63 = vmul.f32 %v31607_v29, %v31940_v52 }
 0x7ba   : > { %v26092_v4 = vpop.eup %26091  ;;  %18485 = vst.msk [vmem:[%s31809_s18 + $0x40] sm:$0xff] %vm18476_vm1, %v18452_v58  ;;  %v18383_v47 = vmul.f32 %v26090_v5, %v31737_v42  ;;  %26105 = vrcp.f32 %v18291_v0  ;;  %v18424_v51 = vmul.f32 %v31695_v14, %v31746_v13  ;;  %v18863_v43 = vmul.f32 -1.442695, %v18170_v31 }
 0x7bb   : > { %18488 = vst.msk [vmem:[%s31809_s18 + $0x58] sm:$0xff] %vm18476_vm1, %v18455_v1  ;;  %v18294_v55 = vadd.f32 1.0, %v26092_v4  ;;  %v31966_v3 = vmul.f32 %v31607_v29, %v31947_v61  ;;  %v18169_v60 = vmul.f32 %v31615_v45, %v31958_v63  ;;  %v31971_v7 = vadd.f32 %v24304_v10, %v31602_v50 }
 0x7bc   : > { %v26094_v42 = vpop.eup %26093  ;;  %v18454_v17 = vadd.f32 %v18422_v22, %v18383_v47  ;;  %v24305_v44 = vadd.f32 %v31837_v38, %v31885_v16  ;;  %v31975_v24 = vpop.f32.mrb[30].mxu1  ;;  %v24306_v12 = vadd.f32 %v31847_v48, %v31891_v40  ;;  %v18427_v36 = vmul.f32 %v31695_v14, %v31775_v62 }
 0x7bd   : > { %v26096_v13 = vpop.eup %26095  ;;  %v18386_v11 = vmul.f32 %v26094_v42, %v31756_v28  ;;  %26107 = vrcp.f32 %v18294_v55  ;;  %v18172_v46 = vmul.f32 %v31615_v45, %v31966_v3  ;;  %v31982_v59 = vpop.f32.mrb[31].mxu1  ;;  %v18862_v16 = vmul.f32 -1.442695, %v18169_v60 }
 0x7be   : > { %v26098_v34 = vpop.eup %26097  ;;  %18487 = vst.msk [vmem:[%s31809_s18 + $0x50] sm:$0xff] %vm18476_vm1, %v18454_v17  ;;  %v18385_v38 = vmul.f32 %v26096_v13, %v31766_v19  ;;  %26109 = vpow2.f32 %v18863_v43  ;;  %v31989_v28 = vmul.f32 %v31607_v29, %v31971_v7  ;;  %v31996_v19 = vadd.f32 %v24305_v44, %v31602_v50 }
 0x7bf   : > { %v18457_v10 = vadd.f32 %v18425_v56, %v18386_v11  ;;  %v18293_v48 = vadd.f32 1.0, %v26098_v34  ;;  %v18865_v40 = vmul.f32 -1.442695, %v18172_v46  ;;  %26111 = vpow2.f32 %v18862_v16 }
 0x7c0   : > { %v26100_v58 = vpop.eup %26099  ;;  %v18456_v22 = vadd.f32 %v18424_v51, %v18385_v38  ;;  %v18171_v0 = vmul.f32 %v31615_v45, %v31989_v28  ;;  %v32002_v31 = vadd.f32 %v24306_v12, %v31602_v50  ;;  %v24307_v62 = vadd.f32 %v31866_v8, %v31910_v41 }
 0x7c1   : > { %v26102_v5 = vpop.eup %26101  ;;  %18490 = vst.msk [vmem:[%s31809_s18 + $0x68] sm:$0xff] %vm18476_vm1, %v18457_v10  ;;  %v18388_v1 = vmul.f32 %v26100_v58, %v31788_v37  ;;  %26113 = vrcp.f32 %v18293_v48  ;;  %v32010_v56 = vmul.f32 %v31607_v29, %v31996_v19  ;;  %v18426_v37 = vmul.f32 %v31695_v14, %v31794_v53 }
 0x7c2   : > { %18489 = vst.msk [vmem:[%s31809_s18 + $0x60] sm:$0xff] %vm18476_vm1, %v18456_v22  ;;  %v18296_v4 = vadd.f32 1.0, %v26102_v5  ;;  %26115 = vpow2.f32 %v18865_v40  ;;  %v18864_v47 = vmul.f32 -1.442695, %v18171_v0  ;;  %v26104_v51 = vpop.eup %26103  ;;  %v32016_v43 = vmul.f32 %v31607_v29, %v32002_v31 }
 0x7c3   : > { %v18459_v55 = vadd.f32 %v18427_v36, %v18388_v1  ;;  %v18295_v8 = vadd.f32 1.0, %v26104_v51  ;;  %v18174_v41 = vmul.f32 %v31615_v45, %v32010_v56  ;;  %v32021_v17 = vadd.f32 %v24307_v62, %v31602_v50 }
 0x7c4   : > { %v26106_v42 = vpop.eup %26105  ;;  %26117 = vrcp.f32 %v18296_v4  ;;  %v18173_v53 = vmul.f32 %v31615_v45, %v32016_v43  ;;  %v24308_v44 = vadd.f32 %v31875_v23, %v31919_v32  ;;  %v18429_v13 = vmul.f32 %v31695_v14, %v31826_v35 }
 0x7c5   : > { %18492 = vst.msk [vmem:[%s31809_s18 + $0x78] sm:$0xff] %vm18476_vm1, %v18459_v55  ;;  %v18387_v60 = vmul.f32 %v26106_v42, %v31804_v30  ;;  %26119 = vpow2.f32 %v18864_v47  ;;  %v18867_v11 = vmul.f32 -1.442695, %v18174_v41  ;;  %v32034_v46 = vmul.f32 %v31607_v29, %v32021_v17 }
 0x7c6   : > { %26121 = vrcp.f32 %v18295_v8  ;;  %v18866_v30 = vmul.f32 -1.442695, %v18173_v53  ;;  %v32037_v38 = vadd.f32 %v24308_v44, %v31602_v50  ;;  %v24309_v16 = vadd.f32 %v31897_v25, %v31942_v9 }
 0x7c7   : > { %v26108_v12 = vpop.eup %26107  ;;  %v18458_v34 = vadd.f32 %v18426_v37, %v18387_v60  ;;  %26123 = vpow2.f32 %v18867_v11  ;;  %v18176_v35 = vmul.f32 %v31615_v45, %v32034_v46  ;;  %v24310_v32 = vadd.f32 %v31908_v27, %v31949_v54 }
 0x7c8   : > { %v26110_v10 = vpop.eup %26109  ;;  %v18390_v23 = vmul.f32 %v26108_v12, %v31835_v39  ;;  %26125 = vpow2.f32 %v18866_v30  ;;  %v32050_v48 = vmul.f32 %v31607_v29, %v32037_v38  ;;  %v32053_v39 = vadd.f32 %v24309_v16, %v31602_v50 }
 0x7c9   : > { %18491 = vst.msk [vmem:[%s31809_s18 + $0x70] sm:$0xff] %vm18476_vm1, %v18458_v34  ;;  %v18298_v36 = vadd.f32 1.0, %v26110_v10  ;;  %v26112_v25 = vpop.eup %26111  ;;  %v18869_v40 = vmul.f32 -1.442695, %v18176_v35  ;;  %v32056_v58 = vadd.f32 %v24310_v32, %v31602_v50  ;;  %v24311_v0 = vadd.f32 %v31926_v6, %v31975_v24 }
 0x7ca   : > { %v18461_v9 = vadd.f32 %v18429_v13, %v18390_v23  ;;  %v18297_v27 = vadd.f32 1.0, %v26112_v25  ;;  %v18175_v54 = vmul.f32 %v31615_v45, %v32050_v48  ;;  %v18428_v62 = vmul.f32 %v31695_v14, %v31845_v57 }
 0x7cb   : > { %v26114_v22 = vpop.eup %26113  ;;  %26127 = vrcp.f32 %v18298_v36  ;;  %v32069_v4 = vmul.f32 %v31607_v29, %v32053_v39  ;;  %v32073_v6 = vmul.f32 %v31607_v29, %v32056_v58  ;;  %v32080_v37 = vadd.f32 %v24311_v0, %v31602_v50 }
 0x7cc   : > { %v26116_v5 = vpop.eup %26115  ;;  %18494 = vst.msk [vmem:[%s31809_s18 + $0x88] sm:$0xff] %vm18476_vm1, %v18461_v9  ;;  %v18389_v1 = vmul.f32 %v26114_v22, %v31858_v33  ;;  %26129 = vpow2.f32 %v18869_v40  ;;  %v18868_v51 = vmul.f32 -1.442695, %v18175_v54  ;;  %v18431_v33 = vmul.f32 %v31695_v14, %v31864_v18 }
 0x7cd   : > { %26131 = vrcp.f32 %v18297_v27  ;;  %v18300_v47 = vadd.f32 1.0, %v26116_v5  ;;  %v18178_v57 = vmul.f32 %v31615_v45, %v32069_v4  ;;  %v18177_v41 = vmul.f32 %v31615_v45, %v32073_v6 }
 0x7ce   : > { %v26118_v24 = vpop.eup %26117  ;;  %v18460_v55 = vadd.f32 %v18428_v62, %v18389_v1  ;;  %v24312_v60 = vadd.f32 %v31935_v26, %v31982_v59  ;;  %v32091_v13 = vmul.f32 %v31607_v29, %v32080_v37  ;;  %v18430_v12 = vmul.f32 %v31695_v14, %v31889_v15 }
 0x7cf   : > { %v26120_v42 = vpop.eup %26119  ;;  %v18392_v8 = vmul.f32 %v26118_v24, %v31883_v49  ;;  %26133 = vrcp.f32 %v18300_v47  ;;  %v18871_v44 = vmul.f32 -1.442695, %v18178_v57  ;;  %v18870_v34 = vmul.f32 -1.442695, %v18177_v41 }
 0x7d0   : > { %v26122_v53 = vpop.eup %26121  ;;  %18493 = vst.msk [vmem:[%s31809_s18 + $0x80] sm:$0xff] %vm18476_vm1, %v18460_v55  ;;  %v18299_v18 = vadd.f32 1.0, %v26120_v42  ;;  %26135 = vpow2.f32 %v18868_v51  ;;  %v18180_v59 = vmul.f32 %v31615_v45, %v32091_v13  ;;  %v32099_v30 = vadd.f32 %v24312_v60, %v31602_v50 }
 0x7d1   : > { %v18463_v11 = vadd.f32 %v18431_v33, %v18392_v8  ;;  %v18391_v49 = vmul.f32 %v26122_v53, %v31906_v2  ;;  %v26124_v26 = vpop.eup %26123  ;;  %v18433_v25 = vmul.f32 %v31695_v14, %v31915_v21  ;;  %v18432_v54 = vmul.f32 %v31695_v14, %v31940_v52 }
 0x7d2   : > { %26137 = vrcp.f32 %v18299_v18  ;;  %v26126_v16 = vpop.eup %26125  ;;  %v18302_v23 = vadd.f32 1.0, %v26124_v26  ;;  %v18873_v35 = vmul.f32 -1.442695, %v18180_v59  ;;  %v32105_v15 = vmul.f32 %v31607_v29, %v32099_v30 }
 0x7d3   : > { %18496 = vst.msk [vmem:[%s31809_s18 + $0x98] sm:$0xff] %vm18476_vm1, %v18463_v11  ;;  %v18462_v10 = vadd.f32 %v18430_v12, %v18391_v49  ;;  %26139 = vpow2.f32 %v18871_v44  ;;  %v18301_v2 = vadd.f32 1.0, %v26126_v16  ;;  %v18435_v1 = vmul.f32 %v31695_v14, %v31947_v61 }
 0x7d4   : > { %26141 = vpow2.f32 %v18870_v34  ;;  %v18179_v9 = vmul.f32 %v31615_v45, %v32105_v15  ;;  %v18434_v24 = vmul.f32 %v31695_v14, %v31971_v7  ;;  %v18437_v41 = vmul.f32 %v31695_v14, %v31996_v19 }
 0x7d5   : > { %v26128_v32 = vpop.eup %26127  ;;  %18495 = vst.msk [vmem:[%s31809_s18 + $0x90] sm:$0xff] %vm18476_vm1, %v18462_v10  ;;  %26143 = vrcp.f32 %v18302_v23  ;;  %v18436_v60 = vmul.f32 %v31695_v14, %v32002_v31  ;;  %v18439_v49 = vmul.f32 %v31695_v14, %v32021_v17  ;;  %v18441_v10 = vmul.f32 %v31695_v14, %v32053_v39 }
 0x7d6   : > { %v26130_v50 = vpop.eup %26129  ;;  %v18394_v36 = vmul.f32 %v26128_v32, %v31933_v20  ;;  %26145 = vrcp.f32 %v18301_v2  ;;  %v18872_v0 = vmul.f32 -1.442695, %v18179_v9  ;;  %v18443_v39 = vmul.f32 %v31695_v14, %v32080_v37 }
 0x7d7   : > { %v26132_v40 = vpop.eup %26131  ;;  %v18304_v22 = vadd.f32 1.0, %v26130_v50  ;;  %26147 = vpow2.f32 %v18873_v35  ;;  %v18442_v50 = vmul.f32 %v31695_v14, %v32099_v30 }
 0x7d8   : > { %v18465_v29 = vadd.f32 %v18433_v25, %v18394_v36  ;;  %v18393_v27 = vmul.f32 %v26132_v40, %v31958_v63 }
 0x7d9   : > { %v26134_v5 = vpop.eup %26133  ;;  %26149 = vrcp.f32 %v18304_v22 }
 0x7da   : > { %v26136_v20 = vpop.eup %26135  ;;  %18498 = vst.msk [vmem:[%s31809_s18 + $0xa8] sm:$0xff] %vm18476_vm1, %v18465_v29  ;;  %v18464_v21 = vadd.f32 %v18432_v54, %v18393_v27  ;;  %v18396_v45 = vmul.f32 %v26134_v5, %v31966_v3  ;;  %26151 = vpow2.f32 %v18872_v0 }
 0x7db   : > { %v18303_v62 = vadd.f32 1.0, %v26136_v20 }
 0x7dc   : > { %v26138_v47 = vpop.eup %26137  ;;  %18497 = vst.msk [vmem:[%s31809_s18 + $0xa0] sm:$0xff] %vm18476_vm1, %v18464_v21  ;;  %v18467_v63 = vadd.f32 %v18435_v1, %v18396_v45 }
 0x7dd   : > { %v26140_v52 = vpop.eup %26139  ;;  %v18395_v51 = vmul.f32 %v26138_v47, %v31989_v28  ;;  %26153 = vrcp.f32 %v18303_v62 }
 0x7de   : > { %v26142_v55 = vpop.eup %26141  ;;  %18500 = vst.msk [vmem:[%s31809_s18 + $0xb8] sm:$0xff] %vm18476_vm1, %v18467_v63  ;;  %v18306_v3 = vadd.f32 1.0, %v26140_v52 }
 0x7df   : > { %v26144_v33 = vpop.eup %26143  ;;  %v18466_v61 = vadd.f32 %v18434_v24, %v18395_v51  ;;  %v18305_v57 = vadd.f32 1.0, %v26142_v55 }
 0x7e0   : > { %v26146_v42 = vpop.eup %26145  ;;  %v18398_v8 = vmul.f32 %v26144_v33, %v32010_v56  ;;  %26155 = vrcp.f32 %v18306_v3 }
 0x7e1   : > { %v26148_v28 = vpop.eup %26147  ;;  %18499 = vst.msk [vmem:[%s31809_s18 + $0xb0] sm:$0xff] %vm18476_vm1, %v18466_v61  ;;  %v18397_v7 = vmul.f32 %v26146_v42, %v32016_v43  ;;  %26157 = vrcp.f32 %v18305_v57 }
 0x7e2   : > { %v18469_v53 = vadd.f32 %v18437_v41, %v18398_v8  ;;  %v18308_v18 = vadd.f32 1.0, %v26148_v28 }
 0x7e3   : > { %v26150_v44 = vpop.eup %26149  ;;  %v18468_v11 = vadd.f32 %v18436_v60, %v18397_v7 }
 0x7e4   : > { %v26152_v56 = vpop.eup %26151  ;;  %18502 = vst.msk [vmem:[%s31809_s18 + $0xc8] sm:$0xff] %vm18476_vm1, %v18469_v53  ;;  %v18400_v19 = vmul.f32 %v26150_v44, %v32034_v46  ;;  %26159 = vrcp.f32 %v18308_v18  ;;  %v18438_v46 = vmul.f32 %v31695_v14, %v32037_v38 }
 0x7e5   : > { %18501 = vst.msk [vmem:[%s31809_s18 + $0xc0] sm:$0xff] %vm18476_vm1, %v18468_v11  ;;  %v18307_v43 = vadd.f32 1.0, %v26152_v56 }
 0x7e6   : > { %v18471_v31 = vadd.f32 %v18439_v49, %v18400_v19 }
 0x7e7   : > { %v26154_v12 = vpop.eup %26153  ;;  %26161 = vrcp.f32 %v18307_v43 }
 0x7e8   : > { %18504 = vst.msk [vmem:[%s31809_s18 + $0xd8] sm:$0xff] %vm18476_vm1, %v18471_v31  ;;  %v18399_v34 = vmul.f32 %v26154_v12, %v32050_v48  ;;  %v18440_v48 = vmul.f32 %v31695_v14, %v32056_v58 }
 0x7ea   : > { %v26156_v26 = vpop.eup %26155  ;;  %v18470_v17 = vadd.f32 %v18438_v46, %v18399_v34 }
 0x7eb   : > { %v26158_v59 = vpop.eup %26157  ;;  %v18402_v16 = vmul.f32 %v26156_v26, %v32069_v4 }
 0x7ec   : > { %18503 = vst.msk [vmem:[%s31809_s18 + $0xd0] sm:$0xff] %vm18476_vm1, %v18470_v17  ;;  %v18401_v23 = vmul.f32 %v26158_v59, %v32073_v6 }
 0x7ed   : > { %v18473_v2 = vadd.f32 %v18441_v10, %v18402_v16 }
 0x7ee   : > { %v26160_v38 = vpop.eup %26159  ;;  %v18472_v35 = vadd.f32 %v18440_v48, %v18401_v23 }
 0x7ef   : > { %18506 = vst.msk [vmem:[%s31809_s18 + $0xe8] sm:$0xff] %vm18476_vm1, %v18473_v2  ;;  %v18404_v4 = vmul.f32 %v26160_v38, %v32091_v13 }
 0x7f0   : > { %18505 = vst.msk [vmem:[%s31809_s18 + $0xe0] sm:$0xff] %vm18476_vm1, %v18472_v35 }
 0x7f1   : > { %v26162_v6 = vpop.eup %26161  ;;  %v18475_v32 = vadd.f32 %v18443_v39, %v18404_v4 }
 0x7f2   : > { %v18403_v58 = vmul.f32 %v26162_v6, %v32105_v15 }
 0x7f3   : > { %18508 = vst.msk [vmem:[%s31809_s18 + $0xf8] sm:$0xff] %vm18476_vm1, %v18475_v32 }
 0x7f4   : > { %v18474_v37 = vadd.f32 %v18442_v50, %v18403_v58 }
 0x7f6   : > { %18507 = vst.msk [vmem:[%s31809_s18 + $0xf0] sm:$0xff] %vm18476_vm1, %v18474_v37 }
 0x7f7   : > { %26176 = shalt.err (!%p26173_p5)
}
 0x7f8   : > { %s26177_s13 = scalar_lea.hbm %s32174_s28, 4096  ;;  %s26181_s16 = scalar_lea.hbm %s32234_s6, 8192 }
 0x7f9   : > { %p26178_p6 = scmp.ne.s32.totalorder %s32174_s28, %s26177_s13  ;;  %p26182_p10 = scmp.lt.u32.totalorder %s32174_s28, %s32234_s6 }
 0x7fa   : > { %p26183_p11 = scmp.lt.u32.totalorder %s26181_s16, %s26177_s13  ;;  %p26185_p13 = scmp.lt.u32.totalorder %s26177_s13, %s32174_s28 }
 0x7fb   : > { %p26179_p7 = pnand %p26178_p6, %p26321_p4 }
 0x7fc   : > { %p26184_p12 = por %p26183_p11, %p26182_p10 }
 0x7fd   : > { %p26180_p9 = pneg %p26179_p7 }
 0x7fe   : > { %p26186_p0 = por %p26185_p13, %p26184_p12 }
 0x800   : > { %p26187_p1 = pnand %p26186_p0, %p26180_p9 }
 0x802   : > { %26190 = shalt.err (!%p26187_p1)
}
 0x803   : > { %s26244_s27 = smov 128   ;;  %s26245_s17 = smov 8  }
 0x804   : > { %25978 = dma.vmem_to_hbm [thread:$0]  (%p26321_p4), %s32176_s20, 4096, %s32174_s28, %s32182_s24, %s26244_s27, %s26244_s27, %s26245_s17  }
 0x805 PF: > { %p25984_p2 = scmp.ge.s32.totalorder %s26241_s26, 2  ;;  %s18541_s30 = sand.u32 1, %s26221_s21  }
 0x806   : > { %s18542_s8 = scalar_lea.sflag [#allocation3], %s18541_s30 }
 0x807   : > { %p25981_p3 = pnand %p25984_p2, %p26328_p8 }
 0x809   : > { %26216 = dma.done.wait (!%p25981_p3), %s18542_s8, 4096  }
 0x80a   : > { %26218 = vsyncadd (!%p25981_p3), %s18542_s8, 4294963200  ;;  %s19_s26 = sadd.s32 1, %s26241_s26   ;;  %s34965_s21 = smov %s26225_s22 }
 0x80b   : > { %p16_p5 = scmp.ge.s32.totalorder %s19_s26, 4   ;;  %s34966_s22 = smov %s26229_s23 }
 0x80c   : > { %s34967_s23 = smov %s26334_s10  ;;  %s34968_s24 = smov %s26237_s25 }
 0x80d   : > { %s34969_s25 = smov %s34971_s29  ;;  %18 = sbr.rel (!%p16_p5) target bundleno = 4 (0x4), region = 89 }
 0x814   :  { %18547 = vsyncpa [#allocation3], 1 }
 0x815   :  { %18549 = vsyncpa [#allocation3 + $0x1], 1 }

</bundles_post_ra>
